<compile_context>
chip_gen: v6e
topology: v6e:2x2x1
jax: 0.10.0
libtpu: 0.0.40
codegen_flags: <defaults>
</compile_context>

<pallas_src>
import functools

import jax
import jax.numpy as jnp
from jax.experimental import pallas as pl
from jax.experimental.pallas import tpu as pltpu

EPS = 1e-5
ACT_DTYPE = jnp.bfloat16  # bf16 weights/activations, f32 accumulation


# ---------------------------------------------------------------------------
# Per-generation tiling / VMEM budget
# ---------------------------------------------------------------------------
def _vmem_capacity_bytes():
    try:
        return int(pltpu.get_tpu_info().vmem_capacity_bytes)
    except Exception:
        return 64 * 1024 * 1024  # conservative fallback (v7x-sized)


_VMEM_CAP_BYTES = _vmem_capacity_bytes()
_BIG_VMEM = _VMEM_CAP_BYTES >= 100 * 1024 * 1024      # v5e / v6e (128 MiB)
_TILE_N_CAP = 2048 if _BIG_VMEM else 1024             # v7x (64 MiB) stays at 1024
_VMEM_LIMIT = (96 if _BIG_VMEM else 44) * 1024 * 1024


def _tile_n_for(n):
    """Pick an N (points) tile: large, multiple of 16 (bf16 sublane packing)."""
    t = min(((n + 15) // 16) * 16, _TILE_N_CAP)
    return max(16, t)


# ---------------------------------------------------------------------------
# Fused kernel: per-point MLP chain + global max pool (+ optional FC head
# epilogue on the pooled vector, + optional per-point feature emission).
#   grid = (B, ceil(N / tile_n))
# ---------------------------------------------------------------------------
def _fused_mlp_pool_kernel(*refs, num_layers, relu_flags, emit_after, num_fc,
                           n_total, tile_n, c_pool):
    n_inputs = 1 + 2 * num_layers + 2 * num_fc
    x_ref = refs[0]
    layer_refs = refs[1:1 + 2 * num_layers]
    fc_refs = refs[1 + 2 * num_layers:n_inputs]
    out_ref = refs[n_inputs]
    ridx = n_inputs + 1
    emit_ref = None
    if emit_after is not None:
        emit_ref = refs[ridx]
        ridx += 1
    pool_ref = refs[ridx]  # (8, c_pool) f32 running-max scratch

    n = pl.program_id(1)
    n_last = pl.num_programs(1) - 1

    @pl.when(n == 0)
    def _init():
        pool_ref[...] = jnp.full(pool_ref.shape, -jnp.inf, dtype=pool_ref.dtype)

    # ---- per-point MLP chain (bias/ReLU of the LAST layer hoisted) ----
    h = x_ref[0]  # (tile_n, Cin)
    for li in range(num_layers):
        w_ref = layer_refs[2 * li]
        b_ref = layer_refs[2 * li + 1]
        w = w_ref[0] if len(w_ref.shape) == 3 else w_ref[...]
        h = jnp.dot(h.astype(w.dtype), w, preferred_element_type=jnp.float32)
        if li < num_layers - 1:
            h = h + b_ref[...]
            if relu_flags[li]:
                h = jnp.maximum(h, 0.0)
            if emit_after == li:
                emit_ref[0] = h.astype(emit_ref.dtype)
        # last layer: bias/ReLU applied to the pooled vector in the epilogue.

    # ---- running max into (8, c_pool) scratch: vreg-aligned slices, pure VPU
    def _accumulate(hv):
        part = hv[0:8]
        for i in range(1, tile_n // 8):
            part = jnp.maximum(part, hv[8 * i:8 * (i + 1)])
        pool_ref[...] = jnp.maximum(pool_ref[...], part)

    if n_total % tile_n != 0:
        # Interior tiles: no masking work at all.
        @pl.when(n != n_last)
        def _interior():
            _accumulate(h)

        # Ragged last tile: mask padded rows with a cheap (tile_n, 1) compare.
        @pl.when(n == n_last)
        def _ragged():
            rows = (jax.lax.broadcasted_iota(jnp.int32, (tile_n, 1), 0)
                    + n * tile_n)
            _accumulate(jnp.where(rows < n_total, h, -jnp.inf))
    else:
        _accumulate(h)

    # ---- epilogue: single cross-sublane reduce, hoisted bias/ReLU, FC head.
    @pl.when(n == n_last)
    def _epilogue():
        pooled = jnp.max(pool_ref[...], axis=0, keepdims=True)  # (1, c_pool)
        b_last = layer_refs[2 * num_layers - 1]
        pooled = pooled + b_last[...]
        if relu_flags[num_layers - 1]:
            pooled = jnp.maximum(pooled, 0.0)
        for fj in range(num_fc):
            fw = fc_refs[2 * fj][...]
            fb = fc_refs[2 * fj + 1][...]
            pooled = jnp.dot(pooled.astype(fw.dtype), fw,
                             preferred_element_type=jnp.float32) + fb
            if fj < num_fc - 1:
                pooled = jnp.maximum(pooled, 0.0)
        out_ref[0] = pooled.astype(out_ref.dtype)


def fused_mlp_maxpool(x, layers, relu_flags, fc_layers=(), emit_after=None,
                      emit_dtype=ACT_DTYPE):
    """x: (B, N, Cin) bf16.

    layers:    [(W, b), ...]  W (Cin,Cout) shared or (B,Cin,Cout) per-batch
               (bf16), b (Cout,) f32.  relu_flags aligned with layers.
    fc_layers: [(W, b), ...] applied to the pooled vector in the epilogue;
               ReLU after every fc layer except the last.
    emit_after: index of a (non-last) layer whose per-point output is also
               written to HBM as a second output (B, N, Cout) bf16.

    Returns (B, out_dim) f32  [, (B, N, C_emit) bf16].
    """
    B, N, _ = x.shape
    assert len(layers) == len(relu_flags)
    assert emit_after is None or emit_after < len(layers) - 1
    tile_n = _tile_n_for(N)
    grid = (B, pl.cdiv(N, tile_n))
    c_pool = layers[-1][0].shape[-1]
    out_dim = fc_layers[-1][0].shape[-1] if fc_layers else c_pool

    in_specs = [pl.BlockSpec((1, tile_n, x.shape[2]), lambda b, n: (b, n, 0))]
    args = [x]
    for (w, bias) in layers:
        if w.ndim == 3:  # per-batch (learned transform folded in)
            in_specs.append(pl.BlockSpec((1, w.shape[1], w.shape[2]),
                                         lambda b, n: (b, 0, 0)))
        else:            # shared
            in_specs.append(pl.BlockSpec(w.shape, lambda b, n: (0, 0)))
        args.append(w)
        in_specs.append(pl.BlockSpec((1, bias.shape[0]), lambda b, n: (0, 0)))
        args.append(bias.reshape(1, -1))
    for (w, bias) in fc_layers:
        in_specs.append(pl.BlockSpec(w.shape, lambda b, n: (0, 0)))
        args.append(w)
        in_specs.append(pl.BlockSpec((1, bias.shape[0]), lambda b, n: (0, 0)))
        args.append(bias.reshape(1, -1))

    out_shapes = [jax.ShapeDtypeStruct((B, 1, out_dim), jnp.float32)]
    out_specs = [pl.BlockSpec((1, 1, out_dim), lambda b, n: (b, 0, 0))]
    if emit_after is not None:
        c_emit = layers[emit_after][0].shape[-1]
        out_shapes.append(jax.ShapeDtypeStruct((B, N, c_emit), emit_dtype))
        out_specs.append(
            pl.BlockSpec((1, tile_n, c_emit), lambda b, n: (b, n, 0)))

    kernel = functools.partial(
        _fused_mlp_pool_kernel,
        num_layers=len(layers),
        relu_flags=tuple(relu_flags),
        emit_after=emit_after,
        num_fc=len(fc_layers),
        n_total=N,
        tile_n=tile_n,
        c_pool=c_pool,
    )
    outs = pl.pallas_call(
        kernel,
        out_shape=out_shapes,
        grid_spec=pltpu.PrefetchScalarGridSpec(
            num_scalar_prefetch=0,
            grid=grid,
            in_specs=in_specs,
            out_specs=out_specs,
            scratch_shapes=[pltpu.VMEM((8, c_pool), jnp.float32)],
        ),
        compiler_params=pltpu.CompilerParams(
            dimension_semantics=("parallel", "arbitrary"),
            vmem_limit_bytes=_VMEM_LIMIT),
    )(*args)
    pooled = outs[0].reshape(B, out_dim)
    if emit_after is not None:
        return pooled, outs[1]
    return pooled


# ---------------------------------------------------------------------------
# Parameter init (deterministic, PyTorch-like uniform fan-in init)
# ---------------------------------------------------------------------------
def init_linear(key, in_f, out_f):
    kw, kb = jax.random.split(key)
    bound = 1.0 / jnp.sqrt(jnp.float32(in_f))
    w = jax.random.uniform(kw, (in_f, out_f), jnp.float32, -bound, bound)
    b = jax.random.uniform(kb, (out_f,), jnp.float32, -bound, bound)
    return {"w": w, "b": b}


def init_bn(c):
    return {
        "gamma": jnp.ones((c,), jnp.float32),
        "beta": jnp.zeros((c,), jnp.float32),
        "mean": jnp.zeros((c,), jnp.float32),
        "var": jnp.ones((c,), jnp.float32),
    }


def fold_bn(lin, bn):
    """Fold inference-mode BatchNorm into the preceding 1x1-conv / linear."""
    scale = bn["gamma"] / jnp.sqrt(bn["var"] + EPS)
    w = lin["w"] * scale[None, :]
    b = (lin["b"] - bn["mean"]) * scale + bn["beta"]
    return w, b


def init_tnet(key, k):
    keys = jax.random.split(key, 6)
    return {
        "conv1": init_linear(keys[0], k, 64),
        "conv2": init_linear(keys[1], 64, 128),
        "conv3": init_linear(keys[2], 128, 1024),
        "fc1": init_linear(keys[3], 1024, 512),
        "fc2": init_linear(keys[4], 512, 256),
        "fc3": init_linear(keys[5], 256, k * k),
        "bn1": init_bn(64),
        "bn2": init_bn(128),
        "bn3": init_bn(1024),
        "bn4": init_bn(512),
        "bn5": init_bn(256),
    }


def init_transform(key):
    keys = jax.random.split(key, 5)
    return {
        "input_transform": init_tnet(keys[0], 3),
        "feature_transform": init_tnet(keys[1], 64),
        "conv1": init_linear(keys[2], 3, 64),
        "conv2": init_linear(keys[3], 64, 128),
        "conv3": init_linear(keys[4], 128, 1024),
        "bn1": init_bn(64),
        "bn2": init_bn(128),
        "bn3": init_bn(1024),
    }


# ---------------------------------------------------------------------------
# Forward passes (hot path entirely inside the fused Pallas kernel)
# ---------------------------------------------------------------------------
def _tnet_fc_head(p):
    fw1, fb1 = fold_bn(p["fc1"], p["bn4"])
    fw2, fb2 = fold_bn(p["fc2"], p["bn5"])
    return [(fw1.astype(ACT_DTYPE), fb1),
            (fw2.astype(ACT_DTYPE), fb2),
            (p["fc3"]["w"].astype(ACT_DTYPE), p["fc3"]["b"])]


def tnet_forward(p, x_bnc, k):
    """Full T-Net (conv chain + max pool + FC head) in ONE kernel launch."""
    B = x_bnc.shape[0]
    w1, b1 = fold_bn(p["conv1"], p["bn1"])
    w2, b2 = fold_bn(p["conv2"], p["bn2"])
    w3, b3 = fold_bn(p["conv3"], p["bn3"])
    mat = fused_mlp_maxpool(
        x_bnc,
        layers=[(w1.astype(ACT_DTYPE), b1),
                (w2.astype(ACT_DTYPE), b2),
                (w3.astype(ACT_DTYPE), b3)],
        relu_flags=(True, True, True),
        fc_layers=_tnet_fc_head(p),
    )  # (B, k*k) f32
    return mat.reshape(B, k, k) + jnp.eye(k, dtype=mat.dtype)[None]


def transform_forward(p, x_bnc):  # x: (B, N, 3), channels-last
    B, N, _ = x_bnc.shape
    x_bf = x_bnc.astype(ACT_DTYPE)

    # --- input transform (3x3): one fused kernel launch ---
    matrix3x3 = tnet_forward(p["input_transform"], x_bf, 3)          # (B,3,3) f32

    # bmm(x, M3) then conv1  ==  conv1 with per-batch weight M3 @ W1.
    w1, b1 = fold_bn(p["conv1"], p["bn1"])                            # (3,64),(64,)
    w1b = jnp.einsum("bij,jk->bik", matrix3x3, w1).astype(ACT_DTYPE)  # (B,3,64)

    # --- conv1 + feature T-Net (64x64) fused: the (B,N,64) features are
    # computed in-register, fed to the T-Net chain + FC head, and emitted as a
    # second output so the final chain can reuse them without recompute. ---
    ft = p["feature_transform"]
    t1, tb1 = fold_bn(ft["conv1"], ft["bn1"])                         # 64->64
    t2, tb2 = fold_bn(ft["conv2"], ft["bn2"])                         # 64->128
    t3, tb3 = fold_bn(ft["conv3"], ft["bn3"])                         # 128->1024
    mat64_flat, h64 = fused_mlp_maxpool(
        x_bf,
        layers=[(w1b, b1),
                (t1.astype(ACT_DTYPE), tb1),
                (t2.astype(ACT_DTYPE), tb2),
                (t3.astype(ACT_DTYPE), tb3)],
        relu_flags=(True, True, True, True),
        fc_layers=_tnet_fc_head(ft),
        emit_after=0,
    )                                                                 # (B,4096), (B,N,64)
    matrix64x64 = (mat64_flat.reshape(B, 64, 64)
                   + jnp.eye(64, dtype=mat64_flat.dtype)[None])

    # --- final chain: bmm(h, M64) + conv2 folded; conv3 (BN, no ReLU); pool ---
    w2, b2 = fold_bn(p["conv2"], p["bn2"])
    w2b = jnp.einsum("bij,jk->bik", matrix64x64, w2).astype(ACT_DTYPE)  # (B,64,128)
    w3, b3 = fold_bn(p["conv3"], p["bn3"])
    out = fused_mlp_maxpool(
        h64,
        layers=[(w2b, b2), (w3.astype(ACT_DTYPE), b3)],
        relu_flags=(True, False),
    )                                                                  # (B,1024) f32
    return out, matrix3x3, matrix64x64


# ---------------------------------------------------------------------------
if __name__ == "__main__":
    key = jax.random.PRNGKey(0)
    k_param, k_data = jax.random.split(key)

    params = init_transform(k_param)

    B, C_in, N = 2, 3, 64
    # PyTorch-style input layout (B, C, N); convert to kernel layout (B, N, C).
    x_torch_layout = jax.random.normal(k_data, (B, C_in, N), jnp.float32)
    x = jnp.transpose(x_torch_layout, (0, 2, 1))  # (B, N, 3)

    fwd = jax.jit(transform_forward)
    out, m3, m64 = fwd(params, x)
    jax.block_until_ready((out, m3, m64))

    assert out.shape == (B, 1024)
    assert m3.shape == (B, 3, 3)
    assert m64.shape == (B, 64, 64)
    assert bool(jnp.all(jnp.isfinite(out)))
    assert bool(jnp.all(jnp.isfinite(m3)))
    assert bool(jnp.all(jnp.isfinite(m64)))
    print("KERNEL_OK")
</pallas_src>

<mosaic_0001>
module attributes {stable_mosaic.version = 11 : i64} {
  func.func @_fused_mlp_pool_kernel(%arg0: i32, %arg1: i32, %arg2: memref<1x64x3xbf16, #tpu.memory_space<vmem>>, %arg3: memref<3x64xbf16, #tpu.memory_space<vmem>>, %arg4: memref<1x64xf32, #tpu.memory_space<vmem>>, %arg5: memref<64x128xbf16, #tpu.memory_space<vmem>>, %arg6: memref<1x128xf32, #tpu.memory_space<vmem>>, %arg7: memref<128x1024xbf16, #tpu.memory_space<vmem>>, %arg8: memref<1x1024xf32, #tpu.memory_space<vmem>>, %arg9: memref<1024x512xbf16, #tpu.memory_space<vmem>>, %arg10: memref<1x512xf32, #tpu.memory_space<vmem>>, %arg11: memref<512x256xbf16, #tpu.memory_space<vmem>>, %arg12: memref<1x256xf32, #tpu.memory_space<vmem>>, %arg13: memref<256x9xbf16, #tpu.memory_space<vmem>>, %arg14: memref<1x9xf32, #tpu.memory_space<vmem>>, %arg15: memref<1x1x9xf32, #tpu.memory_space<vmem>>, %arg16: memref<8x1024xf32, #tpu.memory_space<vmem>>) attributes {dimension_semantics = [#tpu.dimension_semantics<parallel>, #tpu.dimension_semantics<arbitrary>], iteration_bounds = array<i64: 2, 1>, scalar_prefetch = 0 : i64, scratch_operands = 1 : i64, tpu.core_type = #tpu.core_type<tc>, window_params = [{transform_indices = @transform_0, window_bounds = array<i64: 1, 64, 3>}, {pipeline_mode = #tpu.pipeline_mode<synchronous>, transform_indices = @transform_1, window_bounds = array<i64: 3, 64>}, {pipeline_mode = #tpu.pipeline_mode<synchronous>, transform_indices = @transform_2, window_bounds = array<i64: 1, 64>}, {pipeline_mode = #tpu.pipeline_mode<synchronous>, transform_indices = @transform_3, window_bounds = array<i64: 64, 128>}, {pipeline_mode = #tpu.pipeline_mode<synchronous>, transform_indices = @transform_4, window_bounds = array<i64: 1, 128>}, {pipeline_mode = #tpu.pipeline_mode<synchronous>, transform_indices = @transform_5, window_bounds = array<i64: 128, 1024>}, {pipeline_mode = #tpu.pipeline_mode<synchronous>, transform_indices = @transform_6, window_bounds = array<i64: 1, 1024>}, {pipeline_mode = #tpu.pipeline_mode<synchronous>, transform_indices = @transform_7, window_bounds = array<i64: 1024, 512>}, {pipeline_mode = #tpu.pipeline_mode<synchronous>, transform_indices = @transform_8, window_bounds = array<i64: 1, 512>}, {pipeline_mode = #tpu.pipeline_mode<synchronous>, transform_indices = @transform_9, window_bounds = array<i64: 512, 256>}, {pipeline_mode = #tpu.pipeline_mode<synchronous>, transform_indices = @transform_10, window_bounds = array<i64: 1, 256>}, {pipeline_mode = #tpu.pipeline_mode<synchronous>, transform_indices = @transform_11, window_bounds = array<i64: 256, 9>}, {pipeline_mode = #tpu.pipeline_mode<synchronous>, transform_indices = @transform_12, window_bounds = array<i64: 1, 9>}, {transform_indices = @transform_13, window_bounds = array<i64: 1, 1, 9>}]} {
    %c0_i32 = arith.constant 0 : i32
    %0 = arith.cmpi eq, %arg1, %c0_i32 : i32
    %1 = arith.extui %0 : i1 to i32
    %c0_i32_0 = arith.constant 0 : i32
    %2 = arith.cmpi ne, %1, %c0_i32_0 : i32
    scf.if %2 {
      %cst_23 = arith.constant 0xFF800000 : f32
      %44 = vector.broadcast %cst_23 : f32 to vector<8x1024xf32>
      %c0_24 = arith.constant 0 : index
      %c0_25 = arith.constant 0 : index
      %45 = vector.load %arg16[%c0_24, %c0_25] : memref<8x1024xf32, #tpu.memory_space<vmem>>, vector<8x1024xf32>
      tpu.vector_store %arg16[%c0_24, %c0_25], %44 {strides = array<i32>} : memref<8x1024xf32, #tpu.memory_space<vmem>>, vector<8x1024xf32>,
    } else {
    }
    %c0 = arith.constant 0 : index
    %c0_1 = arith.constant 0 : index
    %c0_2 = arith.constant 0 : index
    %3 = vector.load %arg2[%c0, %c0_1, %c0_2] : memref<1x64x3xbf16, #tpu.memory_space<vmem>>, vector<1x64x3xbf16>
    %4 = vector.shape_cast %3 : vector<1x64x3xbf16> to vector<64x3xbf16>
    %c0_3 = arith.constant 0 : index
    %c0_4 = arith.constant 0 : index
    %5 = vector.load %arg3[%c0_3, %c0_4] : memref<3x64xbf16, #tpu.memory_space<vmem>>, vector<3x64xbf16>
    %cst = arith.constant dense<0.000000e+00> : vector<64x64xf32>
    %6 = tpu.matmul %4, %5, %cst {dimension_numbers = #tpu.dot_dimension_numbers<[1], [0], [0], [1], [0, 0, 1, 1], [], []>} : vector<64x3xbf16>, vector<3x64xbf16>, vector<64x64xf32> -> vector<64x64xf32>
    %c0_5 = arith.constant 0 : index
    %c0_6 = arith.constant 0 : index
    %7 = vector.load %arg4[%c0_5, %c0_6] : memref<1x64xf32, #tpu.memory_space<vmem>>, vector<1x64xf32>
    %8 = vector.broadcast %7 : vector<1x64xf32> to vector<64x64xf32>
    %9 = arith.addf %6, %8 : vector<64x64xf32>
    %cst_7 = arith.constant 0.000000e+00 : f32
    %10 = vector.broadcast %cst_7 : f32 to vector<64x64xf32>
    %11 = arith.maximumf %9, %10 : vector<64x64xf32>
    %c0_8 = arith.constant 0 : index
    %c0_9 = arith.constant 0 : index
    %12 = vector.load %arg5[%c0_8, %c0_9] : memref<64x128xbf16, #tpu.memory_space<vmem>>, vector<64x128xbf16>
    %13 = arith.truncf %11 : vector<64x64xf32> to vector<64x64xbf16>
    %cst_10 = arith.constant dense<0.000000e+00> : vector<64x128xf32>
    %14 = tpu.matmul %13, %12, %cst_10 {dimension_numbers = #tpu.dot_dimension_numbers<[1], [0], [0], [1], [0, 0, 1, 1], [], []>} : vector<64x64xbf16>, vector<64x128xbf16>, vector<64x128xf32> -> vector<64x128xf32>
    %c0_11 = arith.constant 0 : index
    %c0_12 = arith.constant 0 : index
    %15 = vector.load %arg6[%c0_11, %c0_12] : memref<1x128xf32, #tpu.memory_space<vmem>>, vector<1x128xf32>
    %16 = vector.broadcast %15 : vector<1x128xf32> to vector<64x128xf32>
    %17 = arith.addf %14, %16 : vector<64x128xf32>
    %cst_13 = arith.constant 0.000000e+00 : f32
    %18 = vector.broadcast %cst_13 : f32 to vector<64x128xf32>
    %19 = arith.maximumf %17, %18 : vector<64x128xf32>
    %c0_14 = arith.constant 0 : index
    %c0_15 = arith.constant 0 : index
    %20 = vector.load %arg7[%c0_14, %c0_15] : memref<128x1024xbf16, #tpu.memory_space<vmem>>, vector<128x1024xbf16>
    %21 = arith.truncf %19 : vector<64x128xf32> to vector<64x128xbf16>
    %cst_16 = arith.constant dense<0.000000e+00> : vector<64x1024xf32>
    %22 = tpu.matmul %21, %20, %cst_16 {dimension_numbers = #tpu.dot_dimension_numbers<[1], [0], [0], [1], [0, 0, 1, 1], [], []>} : vector<64x128xbf16>, vector<128x1024xbf16>, vector<64x1024xf32> -> vector<64x1024xf32>
    %23 = vector.extract_strided_slice %22 {offsets = [0, 0], sizes = [8, 1024], strides = [1, 1]} : vector<64x1024xf32> to vector<8x1024xf32>
    %24 = vector.extract_strided_slice %22 {offsets = [8, 0], sizes = [8, 1024], strides = [1, 1]} : vector<64x1024xf32> to vector<8x1024xf32>
    %25 = arith.maximumf %23, %24 : vector<8x1024xf32>
    %26 = vector.extract_strided_slice %22 {offsets = [16, 0], sizes = [8, 1024], strides = [1, 1]} : vector<64x1024xf32> to vector<8x1024xf32>
    %27 = arith.maximumf %25, %26 : vector<8x1024xf32>
    %28 = vector.extract_strided_slice %22 {offsets = [24, 0], sizes = [8, 1024], strides = [1, 1]} : vector<64x1024xf32> to vector<8x1024xf32>
    %29 = arith.maximumf %27, %28 : vector<8x1024xf32>
    %30 = vector.extract_strided_slice %22 {offsets = [32, 0], sizes = [8, 1024], strides = [1, 1]} : vector<64x1024xf32> to vector<8x1024xf32>
    %31 = arith.maximumf %29, %30 : vector<8x1024xf32>
    %32 = vector.extract_strided_slice %22 {offsets = [40, 0], sizes = [8, 1024], strides = [1, 1]} : vector<64x1024xf32> to vector<8x1024xf32>
    %33 = arith.maximumf %31, %32 : vector<8x1024xf32>
    %34 = vector.extract_strided_slice %22 {offsets = [48, 0], sizes = [8, 1024], strides = [1, 1]} : vector<64x1024xf32> to vector<8x1024xf32>
    %35 = arith.maximumf %33, %34 : vector<8x1024xf32>
    %36 = vector.extract_strided_slice %22 {offsets = [56, 0], sizes = [8, 1024], strides = [1, 1]} : vector<64x1024xf32> to vector<8x1024xf32>
    %37 = arith.maximumf %35, %36 : vector<8x1024xf32>
    %c0_17 = arith.constant 0 : index
    %c0_18 = arith.constant 0 : index
    %38 = vector.load %arg16[%c0_17, %c0_18] : memref<8x1024xf32, #tpu.memory_space<vmem>>, vector<8x1024xf32>
    %39 = arith.maximumf %38, %37 : vector<8x1024xf32>
    %c0_19 = arith.constant 0 : index
    %c0_20 = arith.constant 0 : index
    %40 = vector.load %arg16[%c0_19, %c0_20] : memref<8x1024xf32, #tpu.memory_space<vmem>>, vector<8x1024xf32>
    tpu.vector_store %arg16[%c0_19, %c0_20], %39 {strides = array<i32>} : memref<8x1024xf32, #tpu.memory_space<vmem>>, vector<8x1024xf32>,
    %c0_i32_21 = arith.constant 0 : i32
    %41 = arith.cmpi eq, %arg1, %c0_i32_21 : i32
    %42 = arith.extui %41 : i1 to i32
    %c0_i32_22 = arith.constant 0 : i32
    %43 = arith.cmpi ne, %42, %c0_i32_22 : i32
    scf.if %43 {
      %c0_23 = arith.constant 0 : index
      %c0_24 = arith.constant 0 : index
      %44 = vector.load %arg16[%c0_23, %c0_24] : memref<8x1024xf32, #tpu.memory_space<vmem>>, vector<8x1024xf32>
      %cst_25 = arith.constant dense<0xFF800000> : vector<1024xf32>
      %45 = vector.multi_reduction <maximumf>, %44, %cst_25 [0] : vector<8x1024xf32> to vector<1024xf32>
      %46 = vector.shape_cast %45 : vector<1024xf32> to vector<1x1024xf32>
      %c0_26 = arith.constant 0 : index
      %c0_27 = arith.constant 0 : index
      %47 = vector.load %arg8[%c0_26, %c0_27] : memref<1x1024xf32, #tpu.memory_space<vmem>>, vector<1x1024xf32>
      %48 = arith.addf %46, %47 : vector<1x1024xf32>
      %cst_28 = arith.constant 0.000000e+00 : f32
      %49 = vector.broadcast %cst_28 : f32 to vector<1x1024xf32>
      %50 = arith.maximumf %48, %49 : vector<1x1024xf32>
      %c0_29 = arith.constant 0 : index
      %c0_30 = arith.constant 0 : index
      %51 = vector.load %arg9[%c0_29, %c0_30] : memref<1024x512xbf16, #tpu.memory_space<vmem>>, vector<1024x512xbf16>
      %c0_31 = arith.constant 0 : index
      %c0_32 = arith.constant 0 : index
      %52 = vector.load %arg10[%c0_31, %c0_32] : memref<1x512xf32, #tpu.memory_space<vmem>>, vector<1x512xf32>
      %53 = arith.truncf %50 : vector<1x1024xf32> to vector<1x1024xbf16>
      %cst_33 = arith.constant dense<0.000000e+00> : vector<1x512xf32>
      %54 = tpu.matmul %53, %51, %cst_33 {dimension_numbers = #tpu.dot_dimension_numbers<[1], [0], [0], [1], [0, 0, 1, 1], [], []>} : vector<1x1024xbf16>, vector<1024x512xbf16>, vector<1x512xf32> -> vector<1x512xf32>
      %55 = arith.addf %54, %52 : vector<1x512xf32>
      %cst_34 = arith.constant 0.000000e+00 : f32
      %56 = vector.broadcast %cst_34 : f32 to vector<1x512xf32>
      %57 = arith.maximumf %55, %56 : vector<1x512xf32>
      %c0_35 = arith.constant 0 : index
      %c0_36 = arith.constant 0 : index
      %58 = vector.load %arg11[%c0_35, %c0_36] : memref<512x256xbf16, #tpu.memory_space<vmem>>, vector<512x256xbf16>
      %c0_37 = arith.constant 0 : index
      %c0_38 = arith.constant 0 : index
      %59 = vector.load %arg12[%c0_37, %c0_38] : memref<1x256xf32, #tpu.memory_space<vmem>>, vector<1x256xf32>
      %60 = arith.truncf %57 : vector<1x512xf32> to vector<1x512xbf16>
      %cst_39 = arith.constant dense<0.000000e+00> : vector<1x256xf32>
      %61 = tpu.matmul %60, %58, %cst_39 {dimension_numbers = #tpu.dot_dimension_numbers<[1], [0], [0], [1], [0, 0, 1, 1], [], []>} : vector<1x512xbf16>, vector<512x256xbf16>, vector<1x256xf32> -> vector<1x256xf32>
      %62 = arith.addf %61, %59 : vector<1x256xf32>
      %cst_40 = arith.constant 0.000000e+00 : f32
      %63 = vector.broadcast %cst_40 : f32 to vector<1x256xf32>
      %64 = arith.maximumf %62, %63 : vector<1x256xf32>
      %c0_41 = arith.constant 0 : index
      %c0_42 = arith.constant 0 : index
      %65 = vector.load %arg13[%c0_41, %c0_42] : memref<256x9xbf16, #tpu.memory_space<vmem>>, vector<256x9xbf16>
      %c0_43 = arith.constant 0 : index
      %c0_44 = arith.constant 0 : index
      %66 = vector.load %arg14[%c0_43, %c0_44] : memref<1x9xf32, #tpu.memory_space<vmem>>, vector<1x9xf32>
      %67 = arith.truncf %64 : vector<1x256xf32> to vector<1x256xbf16>
      %cst_45 = arith.constant dense<0.000000e+00> : vector<1x9xf32>
      %68 = tpu.matmul %67, %65, %cst_45 {dimension_numbers = #tpu.dot_dimension_numbers<[1], [0], [0], [1], [0, 0, 1, 1], [], []>} : vector<1x256xbf16>, vector<256x9xbf16>, vector<1x9xf32> -> vector<1x9xf32>
      %69 = arith.addf %68, %66 : vector<1x9xf32>
      %c0_46 = arith.constant 0 : index
      %c0_47 = arith.constant 0 : index
      %c0_48 = arith.constant 0 : index
      %70 = vector.load %arg15[%c0_46, %c0_47, %c0_48] : memref<1x1x9xf32, #tpu.memory_space<vmem>>, vector<1x1x9xf32>
      %71 = vector.shape_cast %70 : vector<1x1x9xf32> to vector<1x9xf32>
      %72 = vector.shape_cast %69 : vector<1x9xf32> to vector<1x1x9xf32>
      tpu.vector_store %arg15[%c0_46, %c0_47, %c0_48], %72 {strides = array<i32>} : memref<1x1x9xf32, #tpu.memory_space<vmem>>, vector<1x1x9xf32>,
    } else {
    }
    return
  }
  func.func @transform_0(%arg0: i32, %arg1: i32) -> (i32, i32, i32) {
    %c0_i32 = arith.constant 0 : i32
    %c0_i32_0 = arith.constant 0 : i32
    return %arg0, %arg1, %c0_i32 : i32, i32, i32
  }
  func.func @transform_1(%arg0: i32, %arg1: i32) -> (i32, i32) {
    %c0_i32 = arith.constant 0 : i32
    %c0_i32_0 = arith.constant 0 : i32
    %c0_i32_1 = arith.constant 0 : i32
    return %c0_i32, %c0_i32_0 : i32, i32
  }
  func.func @transform_2(%arg0: i32, %arg1: i32) -> (i32, i32) {
    %c0_i32 = arith.constant 0 : i32
    %c0_i32_0 = arith.constant 0 : i32
    %c0_i32_1 = arith.constant 0 : i32
    return %c0_i32, %c0_i32_0 : i32, i32
  }
  func.func @transform_3(%arg0: i32, %arg1: i32) -> (i32, i32) {
    %c0_i32 = arith.constant 0 : i32
    %c0_i32_0 = arith.constant 0 : i32
    %c0_i32_1 = arith.constant 0 : i32
    return %c0_i32, %c0_i32_0 : i32, i32
  }
  func.func @transform_4(%arg0: i32, %arg1: i32) -> (i32, i32) {
    %c0_i32 = arith.constant 0 : i32
    %c0_i32_0 = arith.constant 0 : i32
    %c0_i32_1 = arith.constant 0 : i32
    return %c0_i32, %c0_i32_0 : i32, i32
  }
  func.func @transform_5(%arg0: i32, %arg1: i32) -> (i32, i32) {
    %c0_i32 = arith.constant 0 : i32
    %c0_i32_0 = arith.constant 0 : i32
    %c0_i32_1 = arith.constant 0 : i32
    return %c0_i32, %c0_i32_0 : i32, i32
  }
  func.func @transform_6(%arg0: i32, %arg1: i32) -> (i32, i32) {
    %c0_i32 = arith.constant 0 : i32
    %c0_i32_0 = arith.constant 0 : i32
    %c0_i32_1 = arith.constant 0 : i32
    return %c0_i32, %c0_i32_0 : i32, i32
  }
  func.func @transform_7(%arg0: i32, %arg1: i32) -> (i32, i32) {
    %c0_i32 = arith.constant 0 : i32
    %c0_i32_0 = arith.constant 0 : i32
    %c0_i32_1 = arith.constant 0 : i32
    return %c0_i32, %c0_i32_0 : i32, i32
  }
  func.func @transform_8(%arg0: i32, %arg1: i32) -> (i32, i32) {
    %c0_i32 = arith.constant 0 : i32
    %c0_i32_0 = arith.constant 0 : i32
    %c0_i32_1 = arith.constant 0 : i32
    return %c0_i32, %c0_i32_0 : i32, i32
  }
  func.func @transform_9(%arg0: i32, %arg1: i32) -> (i32, i32) {
    %c0_i32 = arith.constant 0 : i32
    %c0_i32_0 = arith.constant 0 : i32
    %c0_i32_1 = arith.constant 0 : i32
    return %c0_i32, %c0_i32_0 : i32, i32
  }
  func.func @transform_10(%arg0: i32, %arg1: i32) -> (i32, i32) {
    %c0_i32 = arith.constant 0 : i32
    %c0_i32_0 = arith.constant 0 : i32
    %c0_i32_1 = arith.constant 0 : i32
    return %c0_i32, %c0_i32_0 : i32, i32
  }
  func.func @transform_11(%arg0: i32, %arg1: i32) -> (i32, i32) {
    %c0_i32 = arith.constant 0 : i32
    %c0_i32_0 = arith.constant 0 : i32
    %c0_i32_1 = arith.constant 0 : i32
    return %c0_i32, %c0_i32_0 : i32, i32
  }
  func.func @transform_12(%arg0: i32, %arg1: i32) -> (i32, i32) {
    %c0_i32 = arith.constant 0 : i32
    %c0_i32_0 = arith.constant 0 : i32
    %c0_i32_1 = arith.constant 0 : i32
    return %c0_i32, %c0_i32_0 : i32, i32
  }
  func.func @transform_13(%arg0: i32, %arg1: i32) -> (i32, i32, i32) {
    %c0_i32 = arith.constant 0 : i32
    %c0_i32_0 = arith.constant 0 : i32
    %c0_i32_1 = arith.constant 0 : i32
    return %arg0, %c0_i32, %c0_i32_0 : i32, i32, i32
  }
}

module attributes {stable_mosaic.version = 11 : i64} {
  func.func @_fused_mlp_pool_kernel(%arg0: i32, %arg1: i32, %arg2: memref<1x64x3xbf16, #tpu.memory_space<vmem>>, %arg3: memref<1x3x64xbf16, #tpu.memory_space<vmem>>, %arg4: memref<1x64xf32, #tpu.memory_space<vmem>>, %arg5: memref<64x64xbf16, #tpu.memory_space<vmem>>, %arg6: memref<1x64xf32, #tpu.memory_space<vmem>>, %arg7: memref<64x128xbf16, #tpu.memory_space<vmem>>, %arg8: memref<1x128xf32, #tpu.memory_space<vmem>>, %arg9: memref<128x1024xbf16, #tpu.memory_space<vmem>>, %arg10: memref<1x1024xf32, #tpu.memory_space<vmem>>, %arg11: memref<1024x512xbf16, #tpu.memory_space<vmem>>, %arg12: memref<1x512xf32, #tpu.memory_space<vmem>>, %arg13: memref<512x256xbf16, #tpu.memory_space<vmem>>, %arg14: memref<1x256xf32, #tpu.memory_space<vmem>>, %arg15: memref<256x4096xbf16, #tpu.memory_space<vmem>>, %arg16: memref<1x4096xf32, #tpu.memory_space<vmem>>, %arg17: memref<1x1x4096xf32, #tpu.memory_space<vmem>>, %arg18: memref<1x64x64xbf16, #tpu.memory_space<vmem>>, %arg19: memref<8x1024xf32, #tpu.memory_space<vmem>>) attributes {dimension_semantics = [#tpu.dimension_semantics<parallel>, #tpu.dimension_semantics<arbitrary>], iteration_bounds = array<i64: 2, 1>, scalar_prefetch = 0 : i64, scratch_operands = 1 : i64, tpu.core_type = #tpu.core_type<tc>, window_params = [{transform_indices = @transform_0, window_bounds = array<i64: 1, 64, 3>}, {transform_indices = @transform_1, window_bounds = array<i64: 1, 3, 64>}, {pipeline_mode = #tpu.pipeline_mode<synchronous>, transform_indices = @transform_2, window_bounds = array<i64: 1, 64>}, {pipeline_mode = #tpu.pipeline_mode<synchronous>, transform_indices = @transform_3, window_bounds = array<i64: 64, 64>}, {pipeline_mode = #tpu.pipeline_mode<synchronous>, transform_indices = @transform_4, window_bounds = array<i64: 1, 64>}, {pipeline_mode = #tpu.pipeline_mode<synchronous>, transform_indices = @transform_5, window_bounds = array<i64: 64, 128>}, {pipeline_mode = #tpu.pipeline_mode<synchronous>, transform_indices = @transform_6, window_bounds = array<i64: 1, 128>}, {pipeline_mode = #tpu.pipeline_mode<synchronous>, transform_indices = @transform_7, window_bounds = array<i64: 128, 1024>}, {pipeline_mode = #tpu.pipeline_mode<synchronous>, transform_indices = @transform_8, window_bounds = array<i64: 1, 1024>}, {pipeline_mode = #tpu.pipeline_mode<synchronous>, transform_indices = @transform_9, window_bounds = array<i64: 1024, 512>}, {pipeline_mode = #tpu.pipeline_mode<synchronous>, transform_indices = @transform_10, window_bounds = array<i64: 1, 512>}, {pipeline_mode = #tpu.pipeline_mode<synchronous>, transform_indices = @transform_11, window_bounds = array<i64: 512, 256>}, {pipeline_mode = #tpu.pipeline_mode<synchronous>, transform_indices = @transform_12, window_bounds = array<i64: 1, 256>}, {pipeline_mode = #tpu.pipeline_mode<synchronous>, transform_indices = @transform_13, window_bounds = array<i64: 256, 4096>}, {pipeline_mode = #tpu.pipeline_mode<synchronous>, transform_indices = @transform_14, window_bounds = array<i64: 1, 4096>}, {transform_indices = @transform_15, window_bounds = array<i64: 1, 1, 4096>}, {transform_indices = @transform_16, window_bounds = array<i64: 1, 64, 64>}]} {
    %c0_i32 = arith.constant 0 : i32
    %0 = arith.cmpi eq, %arg1, %c0_i32 : i32
    %1 = arith.extui %0 : i1 to i32
    %c0_i32_0 = arith.constant 0 : i32
    %2 = arith.cmpi ne, %1, %c0_i32_0 : i32
    scf.if %2 {
      %cst_33 = arith.constant 0xFF800000 : f32
      %57 = vector.broadcast %cst_33 : f32 to vector<8x1024xf32>
      %c0_34 = arith.constant 0 : index
      %c0_35 = arith.constant 0 : index
      %58 = vector.load %arg19[%c0_34, %c0_35] : memref<8x1024xf32, #tpu.memory_space<vmem>>, vector<8x1024xf32>
      tpu.vector_store %arg19[%c0_34, %c0_35], %57 {strides = array<i32>} : memref<8x1024xf32, #tpu.memory_space<vmem>>, vector<8x1024xf32>,
    } else {
    }
    %c0 = arith.constant 0 : index
    %c0_1 = arith.constant 0 : index
    %c0_2 = arith.constant 0 : index
    %3 = vector.load %arg2[%c0, %c0_1, %c0_2] : memref<1x64x3xbf16, #tpu.memory_space<vmem>>, vector<1x64x3xbf16>
    %4 = vector.shape_cast %3 : vector<1x64x3xbf16> to vector<64x3xbf16>
    %c0_3 = arith.constant 0 : index
    %c0_4 = arith.constant 0 : index
    %c0_5 = arith.constant 0 : index
    %5 = vector.load %arg3[%c0_3, %c0_4, %c0_5] : memref<1x3x64xbf16, #tpu.memory_space<vmem>>, vector<1x3x64xbf16>
    %6 = vector.shape_cast %5 : vector<1x3x64xbf16> to vector<3x64xbf16>
    %cst = arith.constant dense<0.000000e+00> : vector<64x64xf32>
    %7 = tpu.matmul %4, %6, %cst {dimension_numbers = #tpu.dot_dimension_numbers<[1], [0], [0], [1], [0, 0, 1, 1], [], []>} : vector<64x3xbf16>, vector<3x64xbf16>, vector<64x64xf32> -> vector<64x64xf32>
    %c0_6 = arith.constant 0 : index
    %c0_7 = arith.constant 0 : index
    %8 = vector.load %arg4[%c0_6, %c0_7] : memref<1x64xf32, #tpu.memory_space<vmem>>, vector<1x64xf32>
    %9 = vector.broadcast %8 : vector<1x64xf32> to vector<64x64xf32>
    %10 = arith.addf %7, %9 : vector<64x64xf32>
    %cst_8 = arith.constant 0.000000e+00 : f32
    %11 = vector.broadcast %cst_8 : f32 to vector<64x64xf32>
    %12 = arith.maximumf %10, %11 : vector<64x64xf32>
    %13 = arith.truncf %12 : vector<64x64xf32> to vector<64x64xbf16>
    %c0_9 = arith.constant 0 : index
    %c0_10 = arith.constant 0 : index
    %c0_11 = arith.constant 0 : index
    %14 = vector.load %arg18[%c0_9, %c0_10, %c0_11] : memref<1x64x64xbf16, #tpu.memory_space<vmem>>, vector<1x64x64xbf16>
    %15 = vector.shape_cast %14 : vector<1x64x64xbf16> to vector<64x64xbf16>
    %16 = vector.shape_cast %13 : vector<64x64xbf16> to vector<1x64x64xbf16>
    tpu.vector_store %arg18[%c0_9, %c0_10, %c0_11], %16 {strides = array<i32>} : memref<1x64x64xbf16, #tpu.memory_space<vmem>>, vector<1x64x64xbf16>,
    %c0_12 = arith.constant 0 : index
    %c0_13 = arith.constant 0 : index
    %17 = vector.load %arg5[%c0_12, %c0_13] : memref<64x64xbf16, #tpu.memory_space<vmem>>, vector<64x64xbf16>
    %18 = arith.truncf %12 : vector<64x64xf32> to vector<64x64xbf16>
    %cst_14 = arith.constant dense<0.000000e+00> : vector<64x64xf32>
    %19 = tpu.matmul %18, %17, %cst_14 {dimension_numbers = #tpu.dot_dimension_numbers<[1], [0], [0], [1], [0, 0, 1, 1], [], []>} : vector<64x64xbf16>, vector<64x64xbf16>, vector<64x64xf32> -> vector<64x64xf32>
    %c0_15 = arith.constant 0 : index
    %c0_16 = arith.constant 0 : index
    %20 = vector.load %arg6[%c0_15, %c0_16] : memref<1x64xf32, #tpu.memory_space<vmem>>, vector<1x64xf32>
    %21 = vector.broadcast %20 : vector<1x64xf32> to vector<64x64xf32>
    %22 = arith.addf %19, %21 : vector<64x64xf32>
    %cst_17 = arith.constant 0.000000e+00 : f32
    %23 = vector.broadcast %cst_17 : f32 to vector<64x64xf32>
    %24 = arith.maximumf %22, %23 : vector<64x64xf32>
    %c0_18 = arith.constant 0 : index
    %c0_19 = arith.constant 0 : index
    %25 = vector.load %arg7[%c0_18, %c0_19] : memref<64x128xbf16, #tpu.memory_space<vmem>>, vector<64x128xbf16>
    %26 = arith.truncf %24 : vector<64x64xf32> to vector<64x64xbf16>
    %cst_20 = arith.constant dense<0.000000e+00> : vector<64x128xf32>
    %27 = tpu.matmul %26, %25, %cst_20 {dimension_numbers = #tpu.dot_dimension_numbers<[1], [0], [0], [1], [0, 0, 1, 1], [], []>} : vector<64x64xbf16>, vector<64x128xbf16>, vector<64x128xf32> -> vector<64x128xf32>
    %c0_21 = arith.constant 0 : index
    %c0_22 = arith.constant 0 : index
    %28 = vector.load %arg8[%c0_21, %c0_22] : memref<1x128xf32, #tpu.memory_space<vmem>>, vector<1x128xf32>
    %29 = vector.broadcast %28 : vector<1x128xf32> to vector<64x128xf32>
    %30 = arith.addf %27, %29 : vector<64x128xf32>
    %cst_23 = arith.constant 0.000000e+00 : f32
    %31 = vector.broadcast %cst_23 : f32 to vector<64x128xf32>
    %32 = arith.maximumf %30, %31 : vector<64x128xf32>
    %c0_24 = arith.constant 0 : index
    %c0_25 = arith.constant 0 : index
    %33 = vector.load %arg9[%c0_24, %c0_25] : memref<128x1024xbf16, #tpu.memory_space<vmem>>, vector<128x1024xbf16>
    %34 = arith.truncf %32 : vector<64x128xf32> to vector<64x128xbf16>
    %cst_26 = arith.constant dense<0.000000e+00> : vector<64x1024xf32>
    %35 = tpu.matmul %34, %33, %cst_26 {dimension_numbers = #tpu.dot_dimension_numbers<[1], [0], [0], [1], [0, 0, 1, 1], [], []>} : vector<64x128xbf16>, vector<128x1024xbf16>, vector<64x1024xf32> -> vector<64x1024xf32>
    %36 = vector.extract_strided_slice %35 {offsets = [0, 0], sizes = [8, 1024], strides = [1, 1]} : vector<64x1024xf32> to vector<8x1024xf32>
    %37 = vector.extract_strided_slice %35 {offsets = [8, 0], sizes = [8, 1024], strides = [1, 1]} : vector<64x1024xf32> to vector<8x1024xf32>
    %38 = arith.maximumf %36, %37 : vector<8x1024xf32>
    %39 = vector.extract_strided_slice %35 {offsets = [16, 0], sizes = [8, 1024], strides = [1, 1]} : vector<64x1024xf32> to vector<8x1024xf32>
    %40 = arith.maximumf %38, %39 : vector<8x1024xf32>
    %41 = vector.extract_strided_slice %35 {offsets = [24, 0], sizes = [8, 1024], strides = [1, 1]} : vector<64x1024xf32> to vector<8x1024xf32>
    %42 = arith.maximumf %40, %41 : vector<8x1024xf32>
    %43 = vector.extract_strided_slice %35 {offsets = [32, 0], sizes = [8, 1024], strides = [1, 1]} : vector<64x1024xf32> to vector<8x1024xf32>
    %44 = arith.maximumf %42, %43 : vector<8x1024xf32>
    %45 = vector.extract_strided_slice %35 {offsets = [40, 0], sizes = [8, 1024], strides = [1, 1]} : vector<64x1024xf32> to vector<8x1024xf32>
    %46 = arith.maximumf %44, %45 : vector<8x1024xf32>
    %47 = vector.extract_strided_slice %35 {offsets = [48, 0], sizes = [8, 1024], strides = [1, 1]} : vector<64x1024xf32> to vector<8x1024xf32>
    %48 = arith.maximumf %46, %47 : vector<8x1024xf32>
    %49 = vector.extract_strided_slice %35 {offsets = [56, 0], sizes = [8, 1024], strides = [1, 1]} : vector<64x1024xf32> to vector<8x1024xf32>
    %50 = arith.maximumf %48, %49 : vector<8x1024xf32>
    %c0_27 = arith.constant 0 : index
    %c0_28 = arith.constant 0 : index
    %51 = vector.load %arg19[%c0_27, %c0_28] : memref<8x1024xf32, #tpu.memory_space<vmem>>, vector<8x1024xf32>
    %52 = arith.maximumf %51, %50 : vector<8x1024xf32>
    %c0_29 = arith.constant 0 : index
    %c0_30 = arith.constant 0 : index
    %53 = vector.load %arg19[%c0_29, %c0_30] : memref<8x1024xf32, #tpu.memory_space<vmem>>, vector<8x1024xf32>
    tpu.vector_store %arg19[%c0_29, %c0_30], %52 {strides = array<i32>} : memref<8x1024xf32, #tpu.memory_space<vmem>>, vector<8x1024xf32>,
    %c0_i32_31 = arith.constant 0 : i32
    %54 = arith.cmpi eq, %arg1, %c0_i32_31 : i32
    %55 = arith.extui %54 : i1 to i32
    %c0_i32_32 = arith.constant 0 : i32
    %56 = arith.cmpi ne, %55, %c0_i32_32 : i32
    scf.if %56 {
      %c0_33 = arith.constant 0 : index
      %c0_34 = arith.constant 0 : index
      %57 = vector.load %arg19[%c0_33, %c0_34] : memref<8x1024xf32, #tpu.memory_space<vmem>>, vector<8x1024xf32>
      %cst_35 = arith.constant dense<0xFF800000> : vector<1024xf32>
      %58 = vector.multi_reduction <maximumf>, %57, %cst_35 [0] : vector<8x1024xf32> to vector<1024xf32>
      %59 = vector.shape_cast %58 : vector<1024xf32> to vector<1x1024xf32>
      %c0_36 = arith.constant 0 : index
      %c0_37 = arith.constant 0 : index
      %60 = vector.load %arg10[%c0_36, %c0_37] : memref<1x1024xf32, #tpu.memory_space<vmem>>, vector<1x1024xf32>
      %61 = arith.addf %59, %60 : vector<1x1024xf32>
      %cst_38 = arith.constant 0.000000e+00 : f32
      %62 = vector.broadcast %cst_38 : f32 to vector<1x1024xf32>
      %63 = arith.maximumf %61, %62 : vector<1x1024xf32>
      %c0_39 = arith.constant 0 : index
      %c0_40 = arith.constant 0 : index
      %64 = vector.load %arg11[%c0_39, %c0_40] : memref<1024x512xbf16, #tpu.memory_space<vmem>>, vector<1024x512xbf16>
      %c0_41 = arith.constant 0 : index
      %c0_42 = arith.constant 0 : index
      %65 = vector.load %arg12[%c0_41, %c0_42] : memref<1x512xf32, #tpu.memory_space<vmem>>, vector<1x512xf32>
      %66 = arith.truncf %63 : vector<1x1024xf32> to vector<1x1024xbf16>
      %cst_43 = arith.constant dense<0.000000e+00> : vector<1x512xf32>
      %67 = tpu.matmul %66, %64, %cst_43 {dimension_numbers = #tpu.dot_dimension_numbers<[1], [0], [0], [1], [0, 0, 1, 1], [], []>} : vector<1x1024xbf16>, vector<1024x512xbf16>, vector<1x512xf32> -> vector<1x512xf32>
      %68 = arith.addf %67, %65 : vector<1x512xf32>
      %cst_44 = arith.constant 0.000000e+00 : f32
      %69 = vector.broadcast %cst_44 : f32 to vector<1x512xf32>
      %70 = arith.maximumf %68, %69 : vector<1x512xf32>
      %c0_45 = arith.constant 0 : index
      %c0_46 = arith.constant 0 : index
      %71 = vector.load %arg13[%c0_45, %c0_46] : memref<512x256xbf16, #tpu.memory_space<vmem>>, vector<512x256xbf16>
      %c0_47 = arith.constant 0 : index
      %c0_48 = arith.constant 0 : index
      %72 = vector.load %arg14[%c0_47, %c0_48] : memref<1x256xf32, #tpu.memory_space<vmem>>, vector<1x256xf32>
      %73 = arith.truncf %70 : vector<1x512xf32> to vector<1x512xbf16>
      %cst_49 = arith.constant dense<0.000000e+00> : vector<1x256xf32>
      %74 = tpu.matmul %73, %71, %cst_49 {dimension_numbers = #tpu.dot_dimension_numbers<[1], [0], [0], [1], [0, 0, 1, 1], [], []>} : vector<1x512xbf16>, vector<512x256xbf16>, vector<1x256xf32> -> vector<1x256xf32>
      %75 = arith.addf %74, %72 : vector<1x256xf32>
      %cst_50 = arith.constant 0.000000e+00 : f32
      %76 = vector.broadcast %cst_50 : f32 to vector<1x256xf32>
      %77 = arith.maximumf %75, %76 : vector<1x256xf32>
      %c0_51 = arith.constant 0 : index
      %c0_52 = arith.constant 0 : index
      %78 = vector.load %arg15[%c0_51, %c0_52] : memref<256x4096xbf16, #tpu.memory_space<vmem>>, vector<256x4096xbf16>
      %c0_53 = arith.constant 0 : index
      %c0_54 = arith.constant 0 : index
      %79 = vector.load %arg16[%c0_53, %c0_54] : memref<1x4096xf32, #tpu.memory_space<vmem>>, vector<1x4096xf32>
      %80 = arith.truncf %77 : vector<1x256xf32> to vector<1x256xbf16>
      %cst_55 = arith.constant dense<0.000000e+00> : vector<1x4096xf32>
      %81 = tpu.matmul %80, %78, %cst_55 {dimension_numbers = #tpu.dot_dimension_numbers<[1], [0], [0], [1], [0, 0, 1, 1], [], []>} : vector<1x256xbf16>, vector<256x4096xbf16>, vector<1x4096xf32> -> vector<1x4096xf32>
      %82 = arith.addf %81, %79 : vector<1x4096xf32>
      %c0_56 = arith.constant 0 : index
      %c0_57 = arith.constant 0 : index
      %c0_58 = arith.constant 0 : index
      %83 = vector.load %arg17[%c0_56, %c0_57, %c0_58] : memref<1x1x4096xf32, #tpu.memory_space<vmem>>, vector<1x1x4096xf32>
      %84 = vector.shape_cast %83 : vector<1x1x4096xf32> to vector<1x4096xf32>
      %85 = vector.shape_cast %82 : vector<1x4096xf32> to vector<1x1x4096xf32>
      tpu.vector_store %arg17[%c0_56, %c0_57, %c0_58], %85 {strides = array<i32>} : memref<1x1x4096xf32, #tpu.memory_space<vmem>>, vector<1x1x4096xf32>,
    } else {
    }
    return
  }
  func.func @transform_0(%arg0: i32, %arg1: i32) -> (i32, i32, i32) {
    %c0_i32 = arith.constant 0 : i32
    %c0_i32_0 = arith.constant 0 : i32
    return %arg0, %arg1, %c0_i32 : i32, i32, i32
  }
  func.func @transform_1(%arg0: i32, %arg1: i32) -> (i32, i32, i32) {
    %c0_i32 = arith.constant 0 : i32
    %c0_i32_0 = arith.constant 0 : i32
    %c0_i32_1 = arith.constant 0 : i32
    return %arg0, %c0_i32, %c0_i32_0 : i32, i32, i32
  }
  func.func @transform_2(%arg0: i32, %arg1: i32) -> (i32, i32) {
    %c0_i32 = arith.constant 0 : i32
    %c0_i32_0 = arith.constant 0 : i32
    %c0_i32_1 = arith.constant 0 : i32
    return %c0_i32, %c0_i32_0 : i32, i32
  }
  func.func @transform_3(%arg0: i32, %arg1: i32) -> (i32, i32) {
    %c0_i32 = arith.constant 0 : i32
    %c0_i32_0 = arith.constant 0 : i32
    %c0_i32_1 = arith.constant 0 : i32
    return %c0_i32, %c0_i32_0 : i32, i32
  }
  func.func @transform_4(%arg0: i32, %arg1: i32) -> (i32, i32) {
    %c0_i32 = arith.constant 0 : i32
    %c0_i32_0 = arith.constant 0 : i32
    %c0_i32_1 = arith.constant 0 : i32
    return %c0_i32, %c0_i32_0 : i32, i32
  }
  func.func @transform_5(%arg0: i32, %arg1: i32) -> (i32, i32) {
    %c0_i32 = arith.constant 0 : i32
    %c0_i32_0 = arith.constant 0 : i32
    %c0_i32_1 = arith.constant 0 : i32
    return %c0_i32, %c0_i32_0 : i32, i32
  }
  func.func @transform_6(%arg0: i32, %arg1: i32) -> (i32, i32) {
    %c0_i32 = arith.constant 0 : i32
    %c0_i32_0 = arith.constant 0 : i32
    %c0_i32_1 = arith.constant 0 : i32
    return %c0_i32, %c0_i32_0 : i32, i32
  }
  func.func @transform_7(%arg0: i32, %arg1: i32) -> (i32, i32) {
    %c0_i32 = arith.constant 0 : i32
    %c0_i32_0 = arith.constant 0 : i32
    %c0_i32_1 = arith.constant 0 : i32
    return %c0_i32, %c0_i32_0 : i32, i32
  }
  func.func @transform_8(%arg0: i32, %arg1: i32) -> (i32, i32) {
    %c0_i32 = arith.constant 0 : i32
    %c0_i32_0 = arith.constant 0 : i32
    %c0_i32_1 = arith.constant 0 : i32
    return %c0_i32, %c0_i32_0 : i32, i32
  }
  func.func @transform_9(%arg0: i32, %arg1: i32) -> (i32, i32) {
    %c0_i32 = arith.constant 0 : i32
    %c0_i32_0 = arith.constant 0 : i32
    %c0_i32_1 = arith.constant 0 : i32
    return %c0_i32, %c0_i32_0 : i32, i32
  }
  func.func @transform_10(%arg0: i32, %arg1: i32) -> (i32, i32) {
    %c0_i32 = arith.constant 0 : i32
    %c0_i32_0 = arith.constant 0 : i32
    %c0_i32_1 = arith.constant 0 : i32
    return %c0_i32, %c0_i32_0 : i32, i32
  }
  func.func @transform_11(%arg0: i32, %arg1: i32) -> (i32, i32) {
    %c0_i32 = arith.constant 0 : i32
    %c0_i32_0 = arith.constant 0 : i32
    %c0_i32_1 = arith.constant 0 : i32
    return %c0_i32, %c0_i32_0 : i32, i32
  }
  func.func @transform_12(%arg0: i32, %arg1: i32) -> (i32, i32) {
    %c0_i32 = arith.constant 0 : i32
    %c0_i32_0 = arith.constant 0 : i32
    %c0_i32_1 = arith.constant 0 : i32
    return %c0_i32, %c0_i32_0 : i32, i32
  }
  func.func @transform_13(%arg0: i32, %arg1: i32) -> (i32, i32) {
    %c0_i32 = arith.constant 0 : i32
    %c0_i32_0 = arith.constant 0 : i32
    %c0_i32_1 = arith.constant 0 : i32
    return %c0_i32, %c0_i32_0 : i32, i32
  }
  func.func @transform_14(%arg0: i32, %arg1: i32) -> (i32, i32) {
    %c0_i32 = arith.constant 0 : i32
    %c0_i32_0 = arith.constant 0 : i32
    %c0_i32_1 = arith.constant 0 : i32
    return %c0_i32, %c0_i32_0 : i32, i32
  }
  func.func @transform_15(%arg0: i32, %arg1: i32) -> (i32, i32, i32) {
    %c0_i32 = arith.constant 0 : i32
    %c0_i32_0 = arith.constant 0 : i32
    %c0_i32_1 = arith.constant 0 : i32
    return %arg0, %c0_i32, %c0_i32_0 : i32, i32, i32
  }
  func.func @transform_16(%arg0: i32, %arg1: i32) -> (i32, i32, i32) {
    %c0_i32 = arith.constant 0 : i32
    %c0_i32_0 = arith.constant 0 : i32
    return %arg0, %arg1, %c0_i32 : i32, i32, i32
  }
}

module attributes {stable_mosaic.version = 11 : i64} {
  func.func @_fused_mlp_pool_kernel(%arg0: i32, %arg1: i32, %arg2: memref<1x64x64xbf16, #tpu.memory_space<vmem>>, %arg3: memref<1x64x128xbf16, #tpu.memory_space<vmem>>, %arg4: memref<1x128xf32, #tpu.memory_space<vmem>>, %arg5: memref<128x1024xbf16, #tpu.memory_space<vmem>>, %arg6: memref<1x1024xf32, #tpu.memory_space<vmem>>, %arg7: memref<1x1x1024xf32, #tpu.memory_space<vmem>>, %arg8: memref<8x1024xf32, #tpu.memory_space<vmem>>) attributes {dimension_semantics = [#tpu.dimension_semantics<parallel>, #tpu.dimension_semantics<arbitrary>], iteration_bounds = array<i64: 2, 1>, scalar_prefetch = 0 : i64, scratch_operands = 1 : i64, tpu.core_type = #tpu.core_type<tc>, window_params = [{transform_indices = @transform_0, window_bounds = array<i64: 1, 64, 64>}, {transform_indices = @transform_1, window_bounds = array<i64: 1, 64, 128>}, {pipeline_mode = #tpu.pipeline_mode<synchronous>, transform_indices = @transform_2, window_bounds = array<i64: 1, 128>}, {pipeline_mode = #tpu.pipeline_mode<synchronous>, transform_indices = @transform_3, window_bounds = array<i64: 128, 1024>}, {pipeline_mode = #tpu.pipeline_mode<synchronous>, transform_indices = @transform_4, window_bounds = array<i64: 1, 1024>}, {transform_indices = @transform_5, window_bounds = array<i64: 1, 1, 1024>}]} {
    %c0_i32 = arith.constant 0 : i32
    %0 = arith.cmpi eq, %arg1, %c0_i32 : i32
    %1 = arith.extui %0 : i1 to i32
    %c0_i32_0 = arith.constant 0 : i32
    %2 = arith.cmpi ne, %1, %c0_i32_0 : i32
    scf.if %2 {
      %cst_18 = arith.constant 0xFF800000 : f32
      %37 = vector.broadcast %cst_18 : f32 to vector<8x1024xf32>
      %c0_19 = arith.constant 0 : index
      %c0_20 = arith.constant 0 : index
      %38 = vector.load %arg8[%c0_19, %c0_20] : memref<8x1024xf32, #tpu.memory_space<vmem>>, vector<8x1024xf32>
      tpu.vector_store %arg8[%c0_19, %c0_20], %37 {strides = array<i32>} : memref<8x1024xf32, #tpu.memory_space<vmem>>, vector<8x1024xf32>,
    } else {
    }
    %c0 = arith.constant 0 : index
    %c0_1 = arith.constant 0 : index
    %c0_2 = arith.constant 0 : index
    %3 = vector.load %arg2[%c0, %c0_1, %c0_2] : memref<1x64x64xbf16, #tpu.memory_space<vmem>>, vector<1x64x64xbf16>
    %4 = vector.shape_cast %3 : vector<1x64x64xbf16> to vector<64x64xbf16>
    %c0_3 = arith.constant 0 : index
    %c0_4 = arith.constant 0 : index
    %c0_5 = arith.constant 0 : index
    %5 = vector.load %arg3[%c0_3, %c0_4, %c0_5] : memref<1x64x128xbf16, #tpu.memory_space<vmem>>, vector<1x64x128xbf16>
    %6 = vector.shape_cast %5 : vector<1x64x128xbf16> to vector<64x128xbf16>
    %cst = arith.constant dense<0.000000e+00> : vector<64x128xf32>
    %7 = tpu.matmul %4, %6, %cst {dimension_numbers = #tpu.dot_dimension_numbers<[1], [0], [0], [1], [0, 0, 1, 1], [], []>} : vector<64x64xbf16>, vector<64x128xbf16>, vector<64x128xf32> -> vector<64x128xf32>
    %c0_6 = arith.constant 0 : index
    %c0_7 = arith.constant 0 : index
    %8 = vector.load %arg4[%c0_6, %c0_7] : memref<1x128xf32, #tpu.memory_space<vmem>>, vector<1x128xf32>
    %9 = vector.broadcast %8 : vector<1x128xf32> to vector<64x128xf32>
    %10 = arith.addf %7, %9 : vector<64x128xf32>
    %cst_8 = arith.constant 0.000000e+00 : f32
    %11 = vector.broadcast %cst_8 : f32 to vector<64x128xf32>
    %12 = arith.maximumf %10, %11 : vector<64x128xf32>
    %c0_9 = arith.constant 0 : index
    %c0_10 = arith.constant 0 : index
    %13 = vector.load %arg5[%c0_9, %c0_10] : memref<128x1024xbf16, #tpu.memory_space<vmem>>, vector<128x1024xbf16>
    %14 = arith.truncf %12 : vector<64x128xf32> to vector<64x128xbf16>
    %cst_11 = arith.constant dense<0.000000e+00> : vector<64x1024xf32>
    %15 = tpu.matmul %14, %13, %cst_11 {dimension_numbers = #tpu.dot_dimension_numbers<[1], [0], [0], [1], [0, 0, 1, 1], [], []>} : vector<64x128xbf16>, vector<128x1024xbf16>, vector<64x1024xf32> -> vector<64x1024xf32>
    %16 = vector.extract_strided_slice %15 {offsets = [0, 0], sizes = [8, 1024], strides = [1, 1]} : vector<64x1024xf32> to vector<8x1024xf32>
    %17 = vector.extract_strided_slice %15 {offsets = [8, 0], sizes = [8, 1024], strides = [1, 1]} : vector<64x1024xf32> to vector<8x1024xf32>
    %18 = arith.maximumf %16, %17 : vector<8x1024xf32>
    %19 = vector.extract_strided_slice %15 {offsets = [16, 0], sizes = [8, 1024], strides = [1, 1]} : vector<64x1024xf32> to vector<8x1024xf32>
    %20 = arith.maximumf %18, %19 : vector<8x1024xf32>
    %21 = vector.extract_strided_slice %15 {offsets = [24, 0], sizes = [8, 1024], strides = [1, 1]} : vector<64x1024xf32> to vector<8x1024xf32>
    %22 = arith.maximumf %20, %21 : vector<8x1024xf32>
    %23 = vector.extract_strided_slice %15 {offsets = [32, 0], sizes = [8, 1024], strides = [1, 1]} : vector<64x1024xf32> to vector<8x1024xf32>
    %24 = arith.maximumf %22, %23 : vector<8x1024xf32>
    %25 = vector.extract_strided_slice %15 {offsets = [40, 0], sizes = [8, 1024], strides = [1, 1]} : vector<64x1024xf32> to vector<8x1024xf32>
    %26 = arith.maximumf %24, %25 : vector<8x1024xf32>
    %27 = vector.extract_strided_slice %15 {offsets = [48, 0], sizes = [8, 1024], strides = [1, 1]} : vector<64x1024xf32> to vector<8x1024xf32>
    %28 = arith.maximumf %26, %27 : vector<8x1024xf32>
    %29 = vector.extract_strided_slice %15 {offsets = [56, 0], sizes = [8, 1024], strides = [1, 1]} : vector<64x1024xf32> to vector<8x1024xf32>
    %30 = arith.maximumf %28, %29 : vector<8x1024xf32>
    %c0_12 = arith.constant 0 : index
    %c0_13 = arith.constant 0 : index
    %31 = vector.load %arg8[%c0_12, %c0_13] : memref<8x1024xf32, #tpu.memory_space<vmem>>, vector<8x1024xf32>
    %32 = arith.maximumf %31, %30 : vector<8x1024xf32>
    %c0_14 = arith.constant 0 : index
    %c0_15 = arith.constant 0 : index
    %33 = vector.load %arg8[%c0_14, %c0_15] : memref<8x1024xf32, #tpu.memory_space<vmem>>, vector<8x1024xf32>
    tpu.vector_store %arg8[%c0_14, %c0_15], %32 {strides = array<i32>} : memref<8x1024xf32, #tpu.memory_space<vmem>>, vector<8x1024xf32>,
    %c0_i32_16 = arith.constant 0 : i32
    %34 = arith.cmpi eq, %arg1, %c0_i32_16 : i32
    %35 = arith.extui %34 : i1 to i32
    %c0_i32_17 = arith.constant 0 : i32
    %36 = arith.cmpi ne, %35, %c0_i32_17 : i32
    scf.if %36 {
      %c0_18 = arith.constant 0 : index
      %c0_19 = arith.constant 0 : index
      %37 = vector.load %arg8[%c0_18, %c0_19] : memref<8x1024xf32, #tpu.memory_space<vmem>>, vector<8x1024xf32>
      %cst_20 = arith.constant dense<0xFF800000> : vector<1024xf32>
      %38 = vector.multi_reduction <maximumf>, %37, %cst_20 [0] : vector<8x1024xf32> to vector<1024xf32>
      %39 = vector.shape_cast %38 : vector<1024xf32> to vector<1x1024xf32>
      %c0_21 = arith.constant 0 : index
      %c0_22 = arith.constant 0 : index
      %40 = vector.load %arg6[%c0_21, %c0_22] : memref<1x1024xf32, #tpu.memory_space<vmem>>, vector<1x1024xf32>
      %41 = arith.addf %39, %40 : vector<1x1024xf32>
      %c0_23 = arith.constant 0 : index
      %c0_24 = arith.constant 0 : index
      %c0_25 = arith.constant 0 : index
      %42 = vector.load %arg7[%c0_23, %c0_24, %c0_25] : memref<1x1x1024xf32, #tpu.memory_space<vmem>>, vector<1x1x1024xf32>
      %43 = vector.shape_cast %42 : vector<1x1x1024xf32> to vector<1x1024xf32>
      %44 = vector.shape_cast %41 : vector<1x1024xf32> to vector<1x1x1024xf32>
      tpu.vector_store %arg7[%c0_23, %c0_24, %c0_25], %44 {strides = array<i32>} : memref<1x1x1024xf32, #tpu.memory_space<vmem>>, vector<1x1x1024xf32>,
    } else {
    }
    return
  }
  func.func @transform_0(%arg0: i32, %arg1: i32) -> (i32, i32, i32) {
    %c0_i32 = arith.constant 0 : i32
    %c0_i32_0 = arith.constant 0 : i32
    return %arg0, %arg1, %c0_i32 : i32, i32, i32
  }
  func.func @transform_1(%arg0: i32, %arg1: i32) -> (i32, i32, i32) {
    %c0_i32 = arith.constant 0 : i32
    %c0_i32_0 = arith.constant 0 : i32
    %c0_i32_1 = arith.constant 0 : i32
    return %arg0, %c0_i32, %c0_i32_0 : i32, i32, i32
  }
  func.func @transform_2(%arg0: i32, %arg1: i32) -> (i32, i32) {
    %c0_i32 = arith.constant 0 : i32
    %c0_i32_0 = arith.constant 0 : i32
    %c0_i32_1 = arith.constant 0 : i32
    return %c0_i32, %c0_i32_0 : i32, i32
  }
  func.func @transform_3(%arg0: i32, %arg1: i32) -> (i32, i32) {
    %c0_i32 = arith.constant 0 : i32
    %c0_i32_0 = arith.constant 0 : i32
    %c0_i32_1 = arith.constant 0 : i32
    return %c0_i32, %c0_i32_0 : i32, i32
  }
  func.func @transform_4(%arg0: i32, %arg1: i32) -> (i32, i32) {
    %c0_i32 = arith.constant 0 : i32
    %c0_i32_0 = arith.constant 0 : i32
    %c0_i32_1 = arith.constant 0 : i32
    return %c0_i32, %c0_i32_0 : i32, i32
  }
  func.func @transform_5(%arg0: i32, %arg1: i32) -> (i32, i32, i32) {
    %c0_i32 = arith.constant 0 : i32
    %c0_i32_0 = arith.constant 0 : i32
    %c0_i32_1 = arith.constant 0 : i32
    return %arg0, %c0_i32, %c0_i32_0 : i32, i32, i32
  }
}

</mosaic_0001>

<bundles_post_ra>
// kernel: transform_forward.3
= control target key start
LH: loop header
LB: loop body
LE: loop exit
PB: predicated region body
PF: predicated region fallthrough
CT: control target
= control target key end

     0   :  { %s5344_s25 = smov 0   ;;  %s5346_s26 = smov 0   ;;  %s6821_s0 = inlined_call_operand.vmem [shape: bf16[2,64,3], index: 0, kind: input, shape index: {}]   ;;  %s6822_s1 = inlined_call_operand.vmem [shape: bf16[3,64], index: 1, kind: input, shape index: {}]   ;;  %s6823_s2 = inlined_call_operand.vmem [shape: f32[1,64], index: 2, kind: input, shape index: {}]   ;;  %s6824_s3 = inlined_call_operand.vmem [shape: bf16[64,128], index: 3, kind: input, shape index: {}]   ;;  %s6825_s4 = inlined_call_operand.vmem [shape: f32[1,128], index: 4, kind: input, shape index: {}]   ;;  %s6826_s5 = inlined_call_operand.vmem [shape: bf16[128,1024], index: 5, kind: input, shape index: {}]   ;;  %s6827_s6 = inlined_call_operand.vmem [shape: f32[1,1024], index: 6, kind: input, shape index: {}]   ;;  %s6828_s7 = inlined_call_operand.vmem [shape: bf16[1024,512], index: 7, kind: input, shape index: {}]   ;;  %s6829_s8 = inlined_call_operand.vmem [shape: f32[1,512], index: 8, kind: input, shape index: {}]   ;;  %s6830_s9 = inlined_call_operand.vmem [shape: bf16[512,256], index: 9, kind: input, shape index: {}]   ;;  %s6831_s10 = inlined_call_operand.vmem [shape: f32[1,256], index: 10, kind: input, shape index: {}]   ;;  %s6832_s11 = inlined_call_operand.vmem [shape: bf16[256,9], index: 11, kind: input, shape index: {}]   ;;  %s6833_s12 = inlined_call_operand.vmem [shape: f32[1,9], index: 12, kind: input, shape index: {}]   ;;  %s6834_s13 = inlined_call_operand.vmem [shape: f32[2,1,9], index: 13, kind: output, shape index: {}]  }
   0x1   :  { %s5348_s27 = smov 0  }
   0x2 LB: > { %s35_s28 = sadd.s32 1, %s5266_s26  ;;  %p4233_p0 = scmp.ge.s32.totalorder %s5270_s27, 1  ;;  %s5270_s27 = sphi %s5348_s27, %s23_s27   ;;  %s5266_s26 = sphi %s5346_s26, %s6836_s26   ;;  %s5262_s25 = sphi %s5344_s25, %s6835_s25  }
   0x3   : > { %p37_p1 = scmp.ge.s32.totalorder %s35_s28, 2  ;;  %p406_p2 = scmp.lt.s32.totalorder %s5270_s27, 3 }
   0x5   : > { %s6838_s28 = smov (%p37_p1, %s35_s28), 0  ;;  %p407_p3 = pnand %p4233_p0, %p406_p2 }
   0x6   : > { %p453_p4 = scmp.lt.s32.totalorder (!%p407_p3), %s5262_s25, 1 }
   0x7   : > { %410 = sbr.rel (%p407_p3) target bundleno = 1474 (0x5c2), region = 72 }
   0xc   : > { %v486_v0 = vld [vmem:[%s6822_s1] sm:$0x3]  ;;  %vm527_vm0 = vcmask 1040384   ;;  %vm528_vm1 = vcmask 1041408   ;;  %v5272_v1 = vmov 65535   ;;  %s6840_s25 = smov (!%p453_p4, %s5262_s25), 1 }
   0xd   : > { %v529_v2 = vsel %vm527_vm0, 4294967295, %v5272_v1  ;;  %v4748_v4 = vld [vmem:[%s6824_s3 + $0x18] sm:$0xff]   ;;  %s4656_s16 = sshll.u32 %s6840_s25, 5  ;;  %vm514_vm2 = vcmask 23552   ;;  %v4749_v10 = vld [vmem:[%s6824_s3 + $0x10] sm:$0xff]   ;;  %v4750_v11 = vld [vmem:[%s6824_s3 + $0x8] sm:$0xff]   ;;  %s464_s21 = scalar_lea.vmem %s6834_s13, %s6840_s25 }
   0xe   : > { %v530_v3 = vsel %vm528_vm1, %v529_v2, 0  ;;  %s460_s19 = scalar_lea.vmem %s6821_s0, %s4656_s16  ;;  %v4751_v12 = vld [vmem:[%s6824_s3] sm:$0xff]   ;;  %v5392_v15 = vld [vmem:[%s6826_s5 + $0x1c8] sm:$0xff]  ;;  %vm650_vm3 = vcmask 523264   ;;  %vm4166_vm4 = vcmask 65536  }
   0xf   : > { %v532_v5 = vand.u32 %v530_v3, %v486_v0  ;;  %v4744_v6 = vld [vmem:[%s460_s19] sm:$0xff]   ;;  %v4745_v7 = vld [vmem:[%s460_s19 + $0x8] sm:$0xff]   ;;  %v4746_v8 = vld [vmem:[%s460_s19 + $0x10] sm:$0xff]  }
  0x10   : > { %4694 = vmatprep.mubr.msk.bf16.mxu1 %vm514_vm2, %v4744_v6  ;;  %v4747_v9 = vld [vmem:[%s460_s19 + $0x18] sm:$0xff]   ;;  %v792_v13 = vld [vmem:[%s6826_s5 + $0x1c0] sm:$0xff]  ;;  %v5397_v17 = vld [vmem:[%s6826_s5 + $0x1e8] sm:$0xff] }
  0x11   : > { %4692 = vmatprep.subr.bf16.mxu1 %v532_v5  ;;  %v796_v14 = vld [vmem:[%s6826_s5 + $0x1e0] sm:$0xff]  ;;  %v4312_v21 = vcombine.low %v5392_v15, %v5397_v17  ;;  %v4313_v22 = vcombine.high %v5392_v15, %v5397_v17  ;;  %v785_v50 = vld [vmem:[%s6826_s5 + $0x188] sm:$0xff] }
  0x12   : > { %4693 = vmatpush3.bf16.msra.mxu1 %v532_v5  ;;  %v4311_v16 = vcombine.high %v792_v13, %v796_v14  ;;  %v4310_v18 = vcombine.low %v792_v13, %v796_v14  ;;  %v784_v19 = vld [vmem:[%s6826_s5 + $0x180] sm:$0xff]  ;;  %v789_v51 = vld [vmem:[%s6826_s5 + $0x1a8] sm:$0xff] }
  0x13   : > { %4702 = vmatprep.subr.bf16.mxu1 %v4748_v4  ;;  %v788_v20 = vld [vmem:[%s6826_s5 + $0x1a0] sm:$0xff]  ;;  %v4305_v59 = vcombine.high %v785_v50, %v789_v51  ;;  %v777_v61 = vld [vmem:[%s6826_s5 + $0x148] sm:$0xff] }
  0x14   : > { %v4303_v23 = vcombine.high %v784_v19, %v788_v20  ;;  %v776_v24 = vld [vmem:[%s6826_s5 + $0x140] sm:$0xff]  ;;  %1124 = vmatprep.subr.bf16.mxu0 %v4311_v16  ;;  %v4302_v26 = vcombine.low %v784_v19, %v788_v20  ;;  %v781_v62 = vld [vmem:[%s6826_s5 + $0x168] sm:$0xff] }
  0x15   : > { %4695 = vmatmul.mubr.msk.bf16.vlgmr.msra.gmra.mxu1 %vm514_vm2, %v4745_v7  ;;  %v780_v25 = vld [vmem:[%s6826_s5 + $0x160] sm:$0xff]  ;;  %1125 = vmatpush1.bf16.msra.mxu0 %v4310_v18  ;;  %v4297_v5 = vcombine.high %v777_v61, %v781_v62  ;;  %v769_v7 = vld [vmem:[%s6826_s5 + $0x108] sm:$0xff] }
  0x16   : > { %4698 = vmatprep.mubr.msk.bf16.mxu1 %vm514_vm2, %v4746_v8  ;;  %4703 = vmatpush3.bf16.msra.mxu1 %v4748_v4  ;;  %v4295_v27 = vcombine.high %v776_v24, %v780_v25  ;;  %v768_v28 = vld [vmem:[%s6826_s5 + $0x100] sm:$0xff]  ;;  %v4294_v30 = vcombine.low %v776_v24, %v780_v25  ;;  %v4304_v4 = vcombine.low %v785_v50, %v789_v51  ;;  %v773_v8 = vld [vmem:[%s6826_s5 + $0x128] sm:$0xff] }
  0x17   : > { %4704 = vmatprep.subr.bf16.mxu1 %v4749_v10  ;;  %1126 = vmatprep.subr.bf16.mxu0 %v4303_v23  ;;  %v772_v29 = vld [vmem:[%s6826_s5 + $0x120] sm:$0xff]  ;;  %v761_v13 = vld [vmem:[%s6826_s5 + $0xc8] sm:$0xff]  ;;  %v4288_v15 = vcombine.low %v769_v7, %v773_v8 }
  0x18   : > { %v760_v31 = vld [vmem:[%s6826_s5 + $0xc0] sm:$0xff]  ;;  %v4287_v33 = vcombine.high %v768_v28, %v772_v29  ;;  %v4286_v34 = vcombine.low %v768_v28, %v772_v29  ;;  %v765_v14 = vld [vmem:[%s6826_s5 + $0xe8] sm:$0xff] }
  0x19   : > { %1127 = vmatpush1.bf16.msra.mxu0 %v4302_v26  ;;  %v764_v32 = vld [vmem:[%s6826_s5 + $0xe0] sm:$0xff]  ;;  %v4281_v16 = vcombine.high %v761_v13, %v765_v14  ;;  %v4280_v17 = vcombine.low %v761_v13, %v765_v14  ;;  %v753_v20 = vld [vmem:[%s6826_s5 + $0x88] sm:$0xff] }
  0x1a   : > { %4705 = vmatpush3.bf16.msra.mxu1 %v4749_v10  ;;  %1128 = vmatprep.subr.bf16.mxu0 %v4295_v27  ;;  %v4279_v35 = vcombine.high %v760_v31, %v764_v32  ;;  %v4278_v36 = vcombine.low %v760_v31, %v764_v32  ;;  %v4236_v39 = vld [vmem:[%s6823_s2] ss:$0 sm:$0xff]  ;;  %v745_v28 = vld [vmem:[%s6826_s5 + $0x48] sm:$0xff] }
  0x1b   : > { %4706 = vmatprep.subr.bf16.mxu1 %v4750_v11  ;;  %v752_v18 = vld [vmem:[%s6826_s5 + $0x80] sm:$0xff] }
  0x1c   : > { %v756_v19 = vld [vmem:[%s6826_s5 + $0xa0] sm:$0xff] }
  0x1d   : > { %4699 = vmatmul.mubr.msk.bf16.gmra.mxu1 %vm514_vm2, %v4747_v9  ;;  %1129 = vmatpush1.bf16.msra.mxu0 %v4294_v30  ;;  %v4270_v25 = vcombine.low %v752_v18, %v756_v19  ;;  %v744_v26 = vld [vmem:[%s6826_s5 + $0x40] sm:$0xff]  ;;  %v749_v30 = vld [vmem:[%s6826_s5 + $0x68] sm:$0xff] }
  0x1e   : > { %4707 = vmatpush3.bf16.msra.mxu1 %v4750_v11  ;;  %1130 = vmatprep.subr.bf16.mxu0 %v4287_v33  ;;  %v4296_v11 = vcombine.low %v777_v61, %v781_v62  ;;  %v748_v27 = vld [vmem:[%s6826_s5 + $0x60] sm:$0xff]  ;;  %v4264_v31 = vcombine.low %v745_v28, %v749_v30  ;;  %v4265_v32 = vcombine.high %v745_v28, %v749_v30  ;;  %v787_v61 = vld [vmem:[%s6826_s5 + $0x198] sm:$0xff]  ;;  %v766_v30 = vld [vmem:[%s6826_s5 + $0xf0] sm:$0xff] }
  0x1f   : > { %4708 = vmatprep.subr.bf16.mxu1 %v4751_v12  ;;  %v4263_v29 = vcombine.high %v744_v26, %v748_v27  ;;  %v4262_v33 = vcombine.low %v744_v26, %v748_v27  ;;  %v791_v62 = vld [vmem:[%s6826_s5 + $0x1b8] sm:$0xff] }
  0x20   : > { %v4308_v13 = vcombine.low %v787_v61, %v791_v62 }
  0x21   : > { %1131 = vmatpush1.bf16.msra.mxu0 %v4286_v34  ;;  %v736_v34 = vld [vmem:[%s6826_s5] sm:$0xff] }
  0x22   : > { %4709 = vmatpush3.bf16.msra.mxu1 %v4751_v12  ;;  %1132 = vmatprep.subr.bf16.mxu0 %v4279_v35  ;;  %v4289_v12 = vcombine.high %v769_v7, %v773_v8  ;;  %v740_v35 = vld [vmem:[%s6826_s5 + $0x20] sm:$0xff]  ;;  %v782_v8 = vld [vmem:[%s6826_s5 + $0x170] sm:$0xff] }
  0x23   : > { %1197 = vmatprep.subr.bf16.mxu1 %v4313_v22  ;;  %v757_v22 = vld [vmem:[%s6826_s5 + $0xa8] sm:$0xff] }
  0x24   : > { %v4272_v23 = vcombine.low %v753_v20, %v757_v22  ;;  %v4273_v24 = vcombine.high %v753_v20, %v757_v22  ;;  %v771_v20 = vld [vmem:[%s6826_s5 + $0x118] sm:$0xff] }
  0x25   : > { %1133 = vmatpush1.bf16.msra.mxu0 %v4278_v36  ;;  %v737_v36 = vld [vmem:[%s6826_s5 + $0x8] sm:$0xff] }
  0xd5   : > { %v4696_v37 = vpop.f32.mrf.mxu1 }
  0xd6   : > { %v577_v43 = vadd.f32 %v4696_v37, %v4236_v39  ;;  %v4255_v37 = vcombine.high %v736_v34, %v740_v35 }
  0xd7   : > { %v568_v38 = vpop.f32.mrf.mxu1 }
  0xd8   : > { %v569_v41 = vadd.f32 %v4236_v39, %v568_v38  ;;  %v601_v52 = vmax.f32 %v577_v43, 0.0  ;;  %v741_v38 = vld [vmem:[%s6826_s5 + $0x28] sm:$0xff]  ;;  %v798_v43 = vld [vmem:[%s6826_s5 + $0x1f0] sm:$0xff] }
  0xd9   : > { %v4697_v40 = vpop.f32.mrf.mxu1 }
  0xda   : > { %v580_v42 = vadd.f32 %v4697_v40, %v4236_v39  ;;  %v599_v48 = vmax.f32 %v569_v41, 0.0  ;;  %v4257_v40 = vcombine.high %v737_v36, %v741_v38  ;;  %v4254_v41 = vcombine.low %v736_v34, %v740_v35 }
  0xdb   : > { %v571_v44 = vpop.f32.mrf.mxu1 }
  0xdc   : > { %v572_v45 = vadd.f32 %v4236_v39, %v571_v44  ;;  %v602_v46 = vmax.f32 %v580_v42, 0.0  ;;  %v794_v42 = vld [vmem:[%s6826_s5 + $0x1d0] sm:$0xff]  ;;  %v795_v44 = vld [vmem:[%s6826_s5 + $0x1d8] sm:$0xff] }
  0xdd   : > { %v4700_v47 = vpop.f32.mrf.mxu1 }
  0xde   : > { %v600_v49 = vmax.f32 %v572_v45, 0.0  ;;  %v593_v53 = vadd.f32 %v4700_v47, %v4236_v39  ;;  %v616_v57 = vpack.c.bf16 %v602_v46, %v601_v52  ;;  %v4315_v45 = vcombine.high %v794_v42, %v798_v43  ;;  %v799_v46 = vld [vmem:[%s6826_s5 + $0x1f8] sm:$0xff] }
  0xdf   : > { %v584_v54 = vpop.f32.mrf.mxu1  ;;  %v5273_v47 = vmov 0   ;;  %v4317_v50 = vcombine.high %v795_v44, %v799_v46 }
  0xe0   : > { %v615_v55 = vpack.c.bf16 %v600_v49, %v599_v48  ;;  %v585_v56 = vadd.f32 %v4236_v39, %v584_v54  ;;  %v605_v63 = vmax.f32 %v593_v53, 0.0  ;;  %1156 = vmatprep.mubr.bf16.mxu0 %v5273_v47  ;;  %v4314_v48 = vcombine.low %v794_v42, %v798_v43  ;;  %v5511_v53 = vld [vmem:[%s6825_s4] ss:$0 sm:$0xff]  ;;  %v759_v42 = vld [vmem:[%s6826_s5 + $0xb8] sm:$0xff] }
  0xe1   : > { %v4701_v58 = vpop.f32.mrf.mxu1  ;;  %v4316_v49 = vcombine.low %v795_v44, %v799_v46 }
  0xe2   : > { %v596_v60 = vadd.f32 %v4701_v58, %v4236_v39  ;;  %4710 = vmatprep.mubr.msk.bf16.mxu1 %vm650_vm3, %v615_v55  ;;  %v603_v1 = vmax.f32 %v585_v56, 0.0  ;;  %v786_v58 = vld [vmem:[%s6826_s5 + $0x190] sm:$0xff] }
  0xe3   : > { %v587_v0 = vpop.f32.mrf.mxu1  ;;  %4711 = vmatmul.mubr.msk.bf16.vlgmr.msra.gmra.mxu1 %vm650_vm3, %v616_v57 }
  0xe4   : > { %v606_v2 = vmax.f32 %v596_v60, 0.0  ;;  %v588_v3 = vadd.f32 %v4236_v39, %v587_v0  ;;  %1198 = vmatpush1.bf16.msra.mxu1 %v4312_v21  ;;  %v4271_v21 = vcombine.high %v752_v18, %v756_v19  ;;  %v4256_v39 = vcombine.low %v737_v36, %v741_v38  ;;  %v790_v60 = vld [vmem:[%s6826_s5 + $0x1b0] sm:$0xff] }
  0xe5   : > { %1199 = vmatprep.subr.bf16.mxu1 %v4305_v59  ;;  %v774_v18 = vld [vmem:[%s6826_s5 + $0x130] sm:$0xff] }
  0xe6   : > { %v604_v6 = vmax.f32 %v588_v3, 0.0  ;;  %v618_v9 = vpack.c.bf16 %v606_v2, %v605_v63  ;;  %1134 = vmatprep.subr.bf16.mxu0 %v4271_v21  ;;  %v775_v21 = vld [vmem:[%s6826_s5 + $0x138] sm:$0xff] }
  0xe7   : > { %1135 = vmatpush1.bf16.msra.mxu0 %v4270_v25  ;;  %v4293_v28 = vcombine.high %v771_v20, %v775_v21  ;;  %v4292_v35 = vcombine.low %v771_v20, %v775_v21  ;;  %v4767_v20 = vld [vmem:[%s6828_s7 + $0x2a0] ss:$16 sps:$4 sm:$0xff]   ;;  %v4772_v21 = vld [vmem:[%s6828_s7 + $0x84] ss:$16 sps:$4 sm:$0xff]  }
  0xe8   : > { %v617_v10 = vpack.c.bf16 %v604_v6, %v603_v1  ;;  %1200 = vmatpush1.bf16.msra.mxu1 %v4304_v4  ;;  %1136 = vmatprep.subr.bf16.mxu0 %v4263_v29  ;;  %v4307_v4 = vcombine.high %v786_v58, %v790_v60  ;;  %v778_v6 = vld [vmem:[%s6826_s5 + $0x150] sm:$0xff] }
  0xe9   : > { %1201 = vmatprep.subr.bf16.mxu1 %v4297_v5  ;;  %v4309_v5 = vcombine.high %v787_v61, %v791_v62  ;;  %v762_v29 = vld [vmem:[%s6826_s5 + $0xd0] sm:$0xff] }
  0xea   : > { %4714 = vmatprep.mubr.msk.bf16.mxu1 %vm650_vm3, %v617_v10  ;;  %v783_v10 = vld [vmem:[%s6826_s5 + $0x178] sm:$0xff]  ;;  %v4282_v44 = vcombine.low %v762_v29, %v766_v30 }
  0xeb   : > { %4715 = vmatmul.mubr.msk.bf16.gmra.mxu1 %vm650_vm3, %v618_v9  ;;  %1137 = vmatpush1.bf16.msra.mxu0 %v4262_v33  ;;  %v779_v9 = vld [vmem:[%s6826_s5 + $0x158] sm:$0xff] }
  0xec   : > { %1202 = vmatpush1.bf16.msra.mxu1 %v4296_v11  ;;  %1138 = vmatprep.subr.bf16.mxu0 %v4255_v37  ;;  %v4283_v37 = vcombine.high %v762_v29, %v766_v30  ;;  %v4787_v29 = vld [vmem:[%s6828_s7 + $0x244] ss:$16 sps:$4 sm:$0xff]   ;;  %v4782_v30 = vld [vmem:[%s6828_s7 + $0x40] ss:$16 sps:$4 sm:$0xff]  }
  0xed   : > { %1203 = vmatprep.subr.bf16.mxu1 %v4289_v12  ;;  %1229 = vmatprep.mubr.bf16.mxu1 %v5273_v47  ;;  %v4306_v12 = vcombine.low %v786_v58, %v790_v60 }
  0xef   : > { %1139 = vmatpush1.bf16.msra.mxu0 %v4254_v41  ;;  %v755_v41 = vld [vmem:[%s6826_s5 + $0x98] sm:$0xff] }
  0xf0   : > { %1204 = vmatpush1.bf16.msra.mxu1 %v4288_v15  ;;  %1270 = vmatprep.subr.bf16.mxu0 %v4315_v45  ;;  %v4299_v15 = vcombine.high %v778_v6, %v782_v8  ;;  %v4276_v58 = vcombine.low %v755_v41, %v759_v42 }
  0xf1   : > { %1205 = vmatprep.subr.bf16.mxu1 %v4281_v16  ;;  %v4301_v16 = vcombine.high %v779_v9, %v783_v10 }
  0xf4   : > { %1206 = vmatpush1.bf16.msra.mxu1 %v4280_v17  ;;  %v770_v17 = vld [vmem:[%s6826_s5 + $0x110] sm:$0xff] }
  0xf5   : > { %1207 = vmatprep.subr.bf16.mxu1 %v4273_v24  ;;  %v4300_v24 = vcombine.low %v779_v9, %v783_v10  ;;  %v4291_v25 = vcombine.high %v770_v17, %v774_v18  ;;  %v4290_v34 = vcombine.low %v770_v17, %v774_v18  ;;  %v4754_v10 = vld [vmem:[%s6828_s7 + $0xe4] ss:$16 sps:$4 sm:$0xff]   ;;  %v4761_v17 = vld [vmem:[%s6828_s7 + $0x2c0] ss:$16 sps:$4 sm:$0xff]  }
  0xf6   : > { %v4769_v18 = vld [vmem:[%s6828_s7 + $0x2a4] ss:$16 sps:$4 sm:$0xff]  }
  0xf8   : > { %1208 = vmatpush1.bf16.msra.mxu1 %v4272_v23  ;;  %v4298_v23 = vcombine.low %v778_v6, %v782_v8 }
  0xf9   : > { %1209 = vmatprep.subr.bf16.mxu1 %v4265_v32  ;;  %v767_v32 = vld [vmem:[%s6826_s5 + $0xf8] sm:$0xff] }
  0xfc   : > { %1210 = vmatpush1.bf16.msra.mxu1 %v4264_v31  ;;  %v763_v31 = vld [vmem:[%s6826_s5 + $0xd8] sm:$0xff] }
  0xfd   : > { %1211 = vmatprep.subr.bf16.mxu1 %v4257_v40  ;;  %v4285_v38 = vcombine.high %v763_v31, %v767_v32  ;;  %v758_v40 = vld [vmem:[%s6826_s5 + $0xb0] sm:$0xff]  ;;  %v4284_v45 = vcombine.low %v763_v31, %v767_v32 }
  0xfe   : > { %v4785_v31 = vld [vmem:[%s6828_s7 + $0x240] ss:$16 sps:$4 sm:$0xff]   ;;  %v4790_v32 = vld [vmem:[%s6828_s7 + $0x24] ss:$16 sps:$4 sm:$0xff]  }
 0x100   : > { %1212 = vmatpush1.bf16.msra.mxu1 %v4256_v39  ;;  %v754_v39 = vld [vmem:[%s6826_s5 + $0x90] sm:$0xff] }
 0x101   : > { %1343 = vmatprep.subr.bf16.mxu1 %v4317_v50  ;;  %v4275_v46 = vcombine.high %v754_v39, %v758_v40  ;;  %v4277_v50 = vcombine.high %v755_v41, %v759_v42  ;;  %v4805_v41 = vld [vmem:[%s6828_s7 + $0x3e4] ss:$16 sps:$4 sm:$0xff]   ;;  %v4800_v42 = vld [vmem:[%s6828_s7 + $0x1e0] ss:$16 sps:$4 sm:$0xff]  }
 0x1a3   : > { %v4712_v51 = vpop.f32.mrf.mxu1 }
 0x1a4   : > { %v706_v11 = vadd.f32 %v4712_v51, %v5511_v53  ;;  %v746_v51 = vld [vmem:[%s6826_s5 + $0x50] sm:$0xff] }
 0x1a5   : > { %v697_v52 = vpop.f32.mrf.mxu1 }
 0x1a6   : > { %v698_v55 = vadd.f32 %v5511_v53, %v697_v52  ;;  %v730_v22 = vmax.f32 %v706_v11, 0.0  ;;  %v750_v52 = vld [vmem:[%s6826_s5 + $0x70] sm:$0xff] }
 0x1a7   : > { %v4713_v54 = vpop.f32.mrf.mxu1  ;;  %v4267_v61 = vcombine.high %v746_v51, %v750_v52  ;;  %v4757_v11 = vld [vmem:[%s6828_s7 + $0x2e4] ss:$16 sps:$4 sm:$0xff]  }
 0x1a8   : > { %v728_v63 = vmax.f32 %v698_v55, 0.0  ;;  %v709_v2 = vadd.f32 %v4713_v54, %v5511_v53  ;;  %v747_v54 = vld [vmem:[%s6826_s5 + $0x58] sm:$0xff] }
 0x1a9   : > { %v700_v56 = vpop.f32.mrf.mxu1  ;;  %v751_v55 = vld [vmem:[%s6826_s5 + $0x78] sm:$0xff] }
 0x1aa   : > { %v701_v57 = vadd.f32 %v5511_v53, %v700_v56  ;;  %v731_v14 = vmax.f32 %v709_v2, 0.0  ;;  %v4269_v62 = vcombine.high %v747_v54, %v751_v55  ;;  %v4266_v2 = vcombine.low %v746_v51, %v750_v52  ;;  %v4812_v51 = vld [vmem:[%s6828_s7 + $0x1a0] ss:$16 sps:$4 sm:$0xff]  }
 0x1ab   : > { %v5518_v59 = vpop.f32.mrf.mxu1  ;;  %v4815_v52 = vld [vmem:[%s6828_s7 + $0x3a0] ss:$16 sps:$4 sm:$0xff]  }
 0x1ac   : > { %v729_v0 = vmax.f32 %v701_v57, 0.0  ;;  %v5561_v26 = vpack.c.bf16 %v731_v14, %v730_v22  ;;  %v722_v56 = vadd.f32 %v5518_v59, %v5511_v53  ;;  %v4274_v57 = vcombine.low %v754_v39, %v758_v40  ;;  %v739_v59 = vld [vmem:[%s6826_s5 + $0x18] sm:$0xff]  ;;  %v4760_v14 = vld [vmem:[%s6828_s7 + $0xc4] ss:$16 sps:$4 sm:$0xff]   ;;  %v4797_v39 = vld [vmem:[%s6828_s7 + $0x200] ss:$16 sps:$4 sm:$0xff]  }
 0x1ad   : > { %v713_v1 = vpop.f32.mrf.mxu1  ;;  %v4775_v22 = vld [vmem:[%s6828_s7 + $0x284] ss:$16 sps:$4 sm:$0xff]  }
 0x1ae   : > { %v5530_v3 = vpack.c.bf16 %v729_v0, %v728_v63  ;;  %v714_v33 = vadd.f32 %v5511_v53, %v713_v1  ;;  %v738_v63 = vld [vmem:[%s6826_s5 + $0x10] sm:$0xff]  ;;  %v743_v0 = vld [vmem:[%s6826_s5 + $0x38] sm:$0xff]  ;;  %v734_v1 = vmax.f32 %v722_v56, 0.0 }
 0x1af   : > { %v4717_v7 = vpop.f32.mrf.mxu1  ;;  %v4260_v9 = vcombine.low %v739_v59, %v743_v0  ;;  %v4802_v40 = vld [vmem:[%s6828_s7 + $0x1e4] ss:$16 sps:$4 sm:$0xff]   ;;  %v4818_v56 = vld [vmem:[%s6828_s7 + $0x180] ss:$16 sps:$4 sm:$0xff]  }
 0x1b0   : > { %1157 = vmatmul.mubr.bf16.vlgmr.msra.gmra.mxu0 %v5530_v3  ;;  %1230 = vmatmul.mubr.bf16.vlgmr.msra.gmra.mxu1 %v5530_v3  ;;  %v732_v43 = vmax.f32 %v714_v33, 0.0  ;;  %v4793_v33 = vld [vmem:[%s6828_s7 + $0x224] ss:$16 sps:$4 sm:$0xff]  }
 0x1b1   : > { %1271 = vmatpush1.bf16.msra.mxu0 %v4314_v48  ;;  %1344 = vmatpush1.bf16.msra.mxu1 %v4316_v49  ;;  %v716_v19 = vpop.f32.mrf.mxu1  ;;  %v725_v48 = vadd.f32 %v4717_v7, %v5511_v53  ;;  %v4261_v7 = vcombine.high %v739_v59, %v743_v0  ;;  %v4830_v59 = vld [vmem:[%s6828_s7 + $0x140] ss:$16 sps:$4 sm:$0xff]  }
 0x1b2   : > { %1272 = vmatprep.subr.bf16.mxu0 %v4307_v4  ;;  %1345 = vmatprep.subr.bf16.mxu1 %v4309_v5  ;;  %v717_v27 = vadd.f32 %v5511_v53, %v716_v19  ;;  %v742_v53 = vld [vmem:[%s6826_s5 + $0x30] sm:$0xff]  ;;  %v4268_v4 = vcombine.low %v747_v54, %v751_v55 }
 0x1b3   : > { %1166 = vmatprep.mubr.bf16.mxu0 %v5273_v47  ;;  %1239 = vmatprep.mubr.bf16.mxu1 %v5273_v47  ;;  %v735_v60 = vmax.f32 %v725_v48, 0.0  ;;  %v4259_v6 = vcombine.high %v738_v63, %v742_v53  ;;  %v4258_v8 = vcombine.low %v738_v63, %v742_v53  ;;  %v4764_v19 = vld [vmem:[%s6828_s7 + $0xa0] ss:$16 sps:$4 sm:$0xff]   ;;  %v4820_v54 = vld [vmem:[%s6828_s7 + $0x184] ss:$16 sps:$4 sm:$0xff]  }
 0x1b4   : > { %v733_v36 = vmax.f32 %v717_v27, 0.0  ;;  %v4776_v27 = vld [vmem:[%s6828_s7 + $0x60] ss:$16 sps:$4 sm:$0xff]   ;;  %v4823_v55 = vld [vmem:[%s6828_s7 + $0x384] ss:$16 sps:$4 sm:$0xff]  }
 0x1b5   : > { %1273 = vmatpush1.bf16.msra.mxu0 %v4306_v12  ;;  %1346 = vmatpush1.bf16.msra.mxu1 %v4308_v13  ;;  %v803_v5 = vpack.c.bf16 %v735_v60, %v734_v1  ;;  %v4752_v12 = vld [vmem:[%s6828_s7 + $0xe0] ss:$16 sps:$4 sm:$0xff]   ;;  %v4829_v60 = vld [vmem:[%s6828_s7 + $0x364] ss:$16 sps:$4 sm:$0xff]  }
 0x1b6   : > { %1274 = vmatprep.subr.bf16.mxu0 %v4299_v15  ;;  %1347 = vmatprep.subr.bf16.mxu1 %v4301_v16  ;;  %v5594_v49 = vpack.c.bf16 %v733_v36, %v732_v43  ;;  %v4755_v13 = vld [vmem:[%s6828_s7 + $0x2e0] ss:$16 sps:$4 sm:$0xff]   ;;  %v4763_v15 = vld [vmem:[%s6828_s7 + $0x2c4] ss:$16 sps:$4 sm:$0xff]  }
 0x1b7   : > { %v4758_v16 = vld [vmem:[%s6828_s7 + $0xc0] ss:$16 sps:$4 sm:$0xff]   ;;  %v4796_v36 = vld [vmem:[%s6828_s7 + $0x4] ss:$16 sps:$4 sm:$0xff]  }
 0x1b8   : > { %1167 = vmatmul.mubr.bf16.gmra.mxu0 %v5561_v26  ;;  %1240 = vmatmul.mubr.bf16.gmra.mxu1 %v5561_v26  ;;  %v4803_v43 = vld [vmem:[%s6828_s7 + $0x3e0] ss:$16 sps:$4 sm:$0xff]   ;;  %v4832_v63 = vld [vmem:[%s6828_s7 + $0x144] ss:$16 sps:$4 sm:$0xff]  }
 0x1b9   : > { %1275 = vmatpush1.bf16.msra.mxu0 %v4298_v23  ;;  %1348 = vmatpush1.bf16.msra.mxu1 %v4300_v24  ;;  %v4770_v23 = vld [vmem:[%s6828_s7 + $0x80] ss:$16 sps:$4 sm:$0xff]   ;;  %v4835_v53 = vld [vmem:[%s6828_s7 + $0x344] ss:$16 sps:$4 sm:$0xff]  }
 0x1ba   : > { %1276 = vmatprep.subr.bf16.mxu0 %v4291_v25  ;;  %1349 = vmatprep.subr.bf16.mxu1 %v4293_v28  ;;  %v4773_v24 = vld [vmem:[%s6828_s7 + $0x280] ss:$16 sps:$4 sm:$0xff]   ;;  %v4778_v25 = vld [vmem:[%s6828_s7 + $0x64] ss:$16 sps:$4 sm:$0xff]  }
 0x1bb   : > { %1176 = vmatprep.mubr.bf16.mxu0 %v5273_v47  ;;  %1249 = vmatprep.mubr.bf16.mxu1 %v5273_v47  ;;  %v4779_v28 = vld [vmem:[%s6828_s7 + $0x260] ss:$16 sps:$4 sm:$0xff]   ;;  %v4838_v1 = vld [vmem:[%s6828_s7 + $0x124] ss:$16 sps:$4 sm:$0xff]  }
 0x1bc   : > { %v4809_v48 = vld [vmem:[%s6828_s7 + $0x3c0] ss:$16 sps:$4 sm:$0xff]  }
 0x1bd   : > { %1277 = vmatpush1.bf16.msra.mxu0 %v4290_v34  ;;  %1350 = vmatpush1.bf16.msra.mxu1 %v4292_v35  ;;  %v4788_v34 = vld [vmem:[%s6828_s7 + $0x20] ss:$16 sps:$4 sm:$0xff]  }
 0x1be   : > { %1278 = vmatprep.subr.bf16.mxu0 %v4283_v37  ;;  %1351 = vmatprep.subr.bf16.mxu1 %v4285_v38  ;;  %v4791_v35 = vld [vmem:[%s6828_s7 + $0x220] ss:$16 sps:$4 sm:$0xff]   ;;  %v4799_v37 = vld [vmem:[%s6828_s7 + $0x204] ss:$16 sps:$4 sm:$0xff]  }
 0x1bf   : > { %v4794_v38 = vld [vmem:[%s6828_s7] ss:$16 sps:$4 sm:$0xff]  }
 0x1c0   : > { %1177 = vmatmul.mubr.bf16.gmra.mxu0 %v5594_v49  ;;  %1250 = vmatmul.mubr.bf16.gmra.mxu1 %v5594_v49  ;;  %v4833_v0 = vld [vmem:[%s6828_s7 + $0x340] ss:$16 sps:$4 sm:$0xff]  }
 0x1c1   : > { %1279 = vmatpush1.bf16.msra.mxu0 %v4282_v44  ;;  %1352 = vmatpush1.bf16.msra.mxu1 %v4284_v45  ;;  %v4808_v44 = vld [vmem:[%s6828_s7 + $0x1c4] ss:$16 sps:$4 sm:$0xff]  }
 0x1c2   : > { %1280 = vmatprep.subr.bf16.mxu0 %v4275_v46  ;;  %1353 = vmatprep.subr.bf16.mxu1 %v4277_v50  ;;  %v4811_v45 = vld [vmem:[%s6828_s7 + $0x3c4] ss:$16 sps:$4 sm:$0xff]   ;;  %v4806_v46 = vld [vmem:[%s6828_s7 + $0x1c0] ss:$16 sps:$4 sm:$0xff]  }
 0x1c3   : > { %1186 = vmatprep.mubr.bf16.mxu0 %v5273_v47  ;;  %1259 = vmatprep.mubr.bf16.mxu1 %v5273_v47  ;;  %v4817_v50 = vld [vmem:[%s6828_s7 + $0x3a4] ss:$16 sps:$4 sm:$0xff]  }
 0x1c5   : > { %1281 = vmatpush1.bf16.msra.mxu0 %v4274_v57  ;;  %1354 = vmatpush1.bf16.msra.mxu1 %v4276_v58  ;;  %v4821_v57 = vld [vmem:[%s6828_s7 + $0x380] ss:$16 sps:$4 sm:$0xff]   ;;  %v4826_v58 = vld [vmem:[%s6828_s7 + $0x164] ss:$16 sps:$4 sm:$0xff]  }
 0x1c6   : > { %1282 = vmatprep.subr.bf16.mxu0 %v4267_v61  ;;  %1355 = vmatprep.subr.bf16.mxu1 %v4269_v62  ;;  %v4824_v61 = vld [vmem:[%s6828_s7 + $0x160] ss:$16 sps:$4 sm:$0xff]  }
 0x1c7   : > { %v4827_v62 = vld [vmem:[%s6828_s7 + $0x360] ss:$16 sps:$4 sm:$0xff]  }
 0x1c8   : > { %1187 = vmatmul.mubr.bf16.gmra.mxu0 %v803_v5  ;;  %1260 = vmatmul.mubr.bf16.gmra.mxu1 %v803_v5 }
 0x1c9   : > { %1283 = vmatpush1.bf16.msra.mxu0 %v4266_v2  ;;  %1356 = vmatpush1.bf16.msra.mxu1 %v4268_v4  ;;  %v4841_v2 = vld [vmem:[%s6828_s7 + $0x324] ss:$16 sps:$4 sm:$0xff]   ;;  %v4836_v4 = vld [vmem:[%s6828_s7 + $0x120] ss:$16 sps:$4 sm:$0xff]  }
 0x1ca   : > { %1284 = vmatprep.subr.bf16.mxu0 %v4259_v6  ;;  %1357 = vmatprep.subr.bf16.mxu1 %v4261_v7  ;;  %v4844_v6 = vld [vmem:[%s6828_s7 + $0x104] ss:$16 sps:$4 sm:$0xff]  }
 0x1cb   : > { %1302 = vmatprep.mubr.bf16.mxu0 %v5273_v47  ;;  %1375 = vmatprep.mubr.bf16.mxu1 %v5273_v47  ;;  %v4847_v7 = vld [vmem:[%s6828_s7 + $0x304] ss:$16 sps:$4 sm:$0xff]  }
 0x1cd   : > { %1285 = vmatpush1.bf16.msra.mxu0 %v4258_v8  ;;  %1358 = vmatpush1.bf16.msra.mxu1 %v4260_v9  ;;  %v4842_v8 = vld [vmem:[%s6828_s7 + $0x100] ss:$16 sps:$4 sm:$0xff]  }
 0x1ce   : > { %3179 = vmatprep.subr.bf16.mxu0 %v4754_v10  ;;  %3220 = vmatprep.subr.bf16.mxu1 %v4757_v11  ;;  %v4845_v9 = vld [vmem:[%s6828_s7 + $0x300] ss:$16 sps:$4 sm:$0xff]   ;;  %v4850_v10 = vld [vmem:[%s6828_s7 + $0x4e4] ss:$16 sps:$4 sm:$0xff]  }
 0x1cf   : > { %v4853_v11 = vld [vmem:[%s6828_s7 + $0x6e4] ss:$16 sps:$4 sm:$0xff]  }
 0x1d0   : > { %1303 = vmatmul.mubr.bf16.vlgmr.msra.gmra.mxu0 %v5530_v3  ;;  %1376 = vmatmul.mubr.bf16.vlgmr.msra.gmra.mxu1 %v5530_v3  ;;  %v4766_v3 = vld [vmem:[%s6828_s7 + $0xa4] ss:$16 sps:$4 sm:$0xff]  }
 0x1d1   : > { %1312 = vmatprep.mubr.bf16.mxu0 %v5273_v47  ;;  %1385 = vmatprep.mubr.bf16.mxu1 %v5273_v47 }
 0x1d2   : > { %3180 = vmatpush1.bf16.msra.mxu0 %v4752_v12  ;;  %3221 = vmatpush1.bf16.msra.mxu1 %v4755_v13  ;;  %v1557_v12 = vlaneseq }
 0x1d3   : > { %3181 = vmatprep.subr.bf16.mxu0 %v4760_v14  ;;  %3222 = vmatprep.subr.bf16.mxu1 %v4763_v15 }
 0x1d4   : > { %v5838_v13 = vshrl.u32 %v1557_v12, 7 }
 0x1d6   : > { %3182 = vmatpush1.bf16.msra.mxu0 %v4758_v16  ;;  %3223 = vmatpush1.bf16.msra.mxu1 %v4761_v17  ;;  %v1575_v14 = vsub.s32 4, %v5838_v13  ;;  %v1583_v15 = vsub.s32 6, %v5838_v13  ;;  %v5845_v16 = vld [vmem:[%s6827_s6] sm:$0xff] }
 0x1d7   : > { %3183 = vmatprep.subr.bf16.mxu0 %v4766_v3  ;;  %3224 = vmatprep.subr.bf16.mxu1 %v4769_v18 }
 0x1d8   : > { %1313 = vmatmul.mubr.bf16.gmra.mxu0 %v5561_v26  ;;  %1386 = vmatmul.mubr.bf16.gmra.mxu1 %v5561_v26  ;;  %v4781_v26 = vld [vmem:[%s6828_s7 + $0x264] ss:$16 sps:$4 sm:$0xff]   ;;  %v5848_v17 = vrot.slane %v5845_v16, %v1575_v14  ;;  %v5851_v3 = vrot.slane %v5845_v16, %v1583_v15 }
 0x1d9   : > { %1322 = vmatprep.mubr.bf16.mxu0 %v5273_v47  ;;  %1395 = vmatprep.mubr.bf16.mxu1 %v5273_v47 }
 0x1da   : > { %3184 = vmatpush1.bf16.msra.mxu0 %v4764_v19  ;;  %3225 = vmatpush1.bf16.msra.mxu1 %v4767_v20 }
 0x1db   : > { %3185 = vmatprep.subr.bf16.mxu0 %v4772_v21  ;;  %3226 = vmatprep.subr.bf16.mxu1 %v4775_v22 }
 0x1de   : > { %3186 = vmatpush1.bf16.msra.mxu0 %v4770_v23  ;;  %3227 = vmatpush1.bf16.msra.mxu1 %v4773_v24 }
 0x1df   : > { %3187 = vmatprep.subr.bf16.mxu0 %v4778_v25  ;;  %3228 = vmatprep.subr.bf16.mxu1 %v4781_v26 }
 0x1e0   : > { %1323 = vmatmul.mubr.bf16.gmra.mxu0 %v5594_v49  ;;  %1396 = vmatmul.mubr.bf16.gmra.mxu1 %v5594_v49  ;;  %v4814_v49 = vld [vmem:[%s6828_s7 + $0x1a4] ss:$16 sps:$4 sm:$0xff]  }
 0x1e1   : > { %1332 = vmatprep.mubr.bf16.mxu0 %v5273_v47  ;;  %1405 = vmatprep.mubr.bf16.mxu1 %v5273_v47  ;;  %v4784_v47 = vld [vmem:[%s6828_s7 + $0x44] ss:$16 sps:$4 sm:$0xff]  }
 0x1e2   : > { %3188 = vmatpush1.bf16.msra.mxu0 %v4776_v27  ;;  %3229 = vmatpush1.bf16.msra.mxu1 %v4779_v28 }
 0x1e3   : > { %3189 = vmatprep.subr.bf16.mxu0 %v4784_v47  ;;  %3230 = vmatprep.subr.bf16.mxu1 %v4787_v29 }
 0x1e6   : > { %3190 = vmatpush1.bf16.msra.mxu0 %v4782_v30  ;;  %3231 = vmatpush1.bf16.msra.mxu1 %v4785_v31 }
 0x1e7   : > { %3191 = vmatprep.subr.bf16.mxu0 %v4790_v32  ;;  %3232 = vmatprep.subr.bf16.mxu1 %v4793_v33 }
 0x1e8   : > { %1333 = vmatmul.mubr.bf16.gmra.mxu0 %v803_v5  ;;  %1406 = vmatmul.mubr.bf16.gmra.mxu1 %v803_v5  ;;  %v4839_v5 = vld [vmem:[%s6828_s7 + $0x320] ss:$16 sps:$4 sm:$0xff]  }
 0x1ea   : > { %3192 = vmatpush1.bf16.msra.mxu0 %v4788_v34  ;;  %3233 = vmatpush1.bf16.msra.mxu1 %v4791_v35 }
 0x1eb   : > { %3193 = vmatprep.subr.bf16.mxu0 %v4796_v36  ;;  %3234 = vmatprep.subr.bf16.mxu1 %v4799_v37 }
 0x1ee   : > { %3194 = vmatpush1.bf16.msra.mxu0 %v4794_v38  ;;  %3235 = vmatpush1.bf16.msra.mxu1 %v4797_v39 }
 0x1ef   : > { %3195 = vmatprep.subr.bf16.mxu0 %v4802_v40  ;;  %3236 = vmatprep.subr.bf16.mxu1 %v4805_v41 }
 0x1f2   : > { %3196 = vmatpush2.bf16.msra.mxu0 %v4800_v42  ;;  %3237 = vmatpush2.bf16.msra.mxu1 %v4803_v43 }
 0x1f3   : > { %3197 = vmatprep.subr.bf16.mxu0 %v4808_v44  ;;  %3238 = vmatprep.subr.bf16.mxu1 %v4811_v45 }
 0x1f6   : > { %3198 = vmatpush2.bf16.msra.mxu0 %v4806_v46  ;;  %3239 = vmatpush2.bf16.msra.mxu1 %v4809_v48 }
 0x1f7   : > { %3199 = vmatprep.subr.bf16.mxu0 %v4814_v49  ;;  %3240 = vmatprep.subr.bf16.mxu1 %v4817_v50 }
 0x1fa   : > { %3200 = vmatpush2.bf16.msra.mxu0 %v4812_v51  ;;  %3241 = vmatpush2.bf16.msra.mxu1 %v4815_v52 }
 0x1fb   : > { %3201 = vmatprep.subr.bf16.mxu0 %v4820_v54  ;;  %3242 = vmatprep.subr.bf16.mxu1 %v4823_v55 }
 0x1fe   : > { %3202 = vmatpush2.bf16.msra.mxu0 %v4818_v56  ;;  %3243 = vmatpush2.bf16.msra.mxu1 %v4821_v57 }
 0x1ff   : > { %3203 = vmatprep.subr.bf16.mxu0 %v4826_v58  ;;  %3244 = vmatprep.subr.bf16.mxu1 %v4829_v60 }
 0x202   : > { %3204 = vmatpush2.bf16.msra.mxu0 %v4824_v61  ;;  %3245 = vmatpush2.bf16.msra.mxu1 %v4827_v62 }
 0x203   : > { %3205 = vmatprep.subr.bf16.mxu0 %v4832_v63  ;;  %3246 = vmatprep.subr.bf16.mxu1 %v4835_v53 }
 0x206   : > { %3206 = vmatpush2.bf16.msra.mxu0 %v4830_v59  ;;  %3247 = vmatpush2.bf16.msra.mxu1 %v4833_v0 }
 0x207   : > { %3207 = vmatprep.subr.bf16.mxu0 %v4838_v1  ;;  %3248 = vmatprep.subr.bf16.mxu1 %v4841_v2 }
 0x20a   : > { %3208 = vmatpush2.bf16.msra.mxu0 %v4836_v4  ;;  %3249 = vmatpush2.bf16.msra.mxu1 %v4839_v5 }
 0x20b   : > { %3209 = vmatprep.subr.bf16.mxu0 %v4844_v6  ;;  %3250 = vmatprep.subr.bf16.mxu1 %v4847_v7 }
 0x20e   : > { %3210 = vmatpush2.bf16.msra.mxu0 %v4842_v8  ;;  %3251 = vmatpush2.bf16.msra.mxu1 %v4845_v9 }
 0x20f   : > { %3261 = vmatprep.subr.bf16.mxu0 %v4850_v10  ;;  %3302 = vmatprep.subr.bf16.mxu1 %v4853_v11 }
 0x270   : > { %v1158_v18 = vpop.f32.mrf.mxu0  ;;  %v1231_v19 = vpop.f32.mrf.mxu1 }
 0x272   : > { %v1160_v20 = vpop.f32.mrf.mxu0  ;;  %v1233_v21 = vpop.f32.mrf.mxu1 }
 0x274   : > { %v1162_v22 = vpop.f32.mrf.mxu0  ;;  %v1235_v23 = vpop.f32.mrf.mxu1 }
 0x275   : > { %v1416_v35 = vmax.f32 %v1158_v18, %v1162_v22  ;;  %v1418_v36 = vmax.f32 %v1231_v19, %v1235_v23 }
 0x276   : > { %v1164_v24 = vpop.f32.mrf.mxu0  ;;  %v1237_v25 = vpop.f32.mrf.mxu1 }
 0x277   : > { %v1417_v39 = vmax.f32 %v1160_v20, %v1164_v24  ;;  %v1419_v40 = vmax.f32 %v1233_v21, %v1237_v25 }
 0x278   : > { %v1168_v26 = vpop.f32.mrf.mxu0  ;;  %v1241_v27 = vpop.f32.mrf.mxu1 }
 0x279   : > { %v1424_v41 = vmax.f32 %v1416_v35, %v1168_v26  ;;  %v1426_v42 = vmax.f32 %v1418_v36, %v1241_v27  ;;  %v5858_v26 = vsub.s32 0, %v5838_v13  ;;  %v1567_v27 = vsub.s32 2, %v5838_v13 }
 0x27a   : > { %v1170_v28 = vpop.f32.mrf.mxu0  ;;  %v1243_v47 = vpop.f32.mrf.mxu1 }
 0x27b   : > { %v1425_v45 = vmax.f32 %v1417_v39, %v1170_v28  ;;  %v1427_v46 = vmax.f32 %v1419_v40, %v1243_v47  ;;  %v1560_v39 = vrot.slane %v5845_v16, %v5858_v26  ;;  %v1568_v40 = vrot.slane %v5845_v16, %v1567_v27 }
 0x27c   : > { %v1172_v29 = vpop.f32.mrf.mxu0  ;;  %v1245_v30 = vpop.f32.mrf.mxu1 }
 0x27d   : > { %v1432_v48 = vmax.f32 %v1424_v41, %v1172_v29  ;;  %v1434_v49 = vmax.f32 %v1426_v42, %v1245_v30 }
 0x27e   : > { %v1174_v31 = vpop.f32.mrf.mxu0  ;;  %v1247_v32 = vpop.f32.mrf.mxu1 }
 0x27f   : > { %v1433_v52 = vmax.f32 %v1425_v45, %v1174_v31  ;;  %v1435_v54 = vmax.f32 %v1427_v46, %v1247_v32 }
 0x280   : > { %v1178_v33 = vpop.f32.mrf.mxu0  ;;  %v1251_v34 = vpop.f32.mrf.mxu1 }
 0x281   : > { %v1440_v55 = vmax.f32 %v1432_v48, %v1178_v33  ;;  %v1442_v56 = vmax.f32 %v1434_v49, %v1251_v34 }
 0x282   : > { %v1180_v37 = vpop.f32.mrf.mxu0  ;;  %v1253_v38 = vpop.f32.mrf.mxu1 }
 0x283   : > { %v1441_v60 = vmax.f32 %v1433_v52, %v1180_v37  ;;  %v1443_v61 = vmax.f32 %v1435_v54, %v1253_v38 }
 0x284   : > { %v1182_v43 = vpop.f32.mrf.mxu0  ;;  %v1255_v44 = vpop.f32.mrf.mxu1 }
 0x285   : > { %v1448_v62 = vmax.f32 %v1440_v55, %v1182_v43  ;;  %v1450_v63 = vmax.f32 %v1442_v56, %v1255_v44  ;;  %v5875_v43 = vsub.s32 1, %v5838_v13  ;;  %v1571_v44 = vsub.s32 3, %v5838_v13 }
 0x286   : > { %v1184_v50 = vpop.f32.mrf.mxu0  ;;  %v1257_v51 = vpop.f32.mrf.mxu1 }
 0x287   : > { %v1449_v0 = vmax.f32 %v1441_v60, %v1184_v50  ;;  %v1451_v1 = vmax.f32 %v1443_v61, %v1257_v51  ;;  %v1564_v60 = vrot.slane %v5845_v16, %v5875_v43  ;;  %v1572_v61 = vrot.slane %v5845_v16, %v1571_v44 }
 0x288   : > { %v1188_v57 = vpop.f32.mrf.mxu0  ;;  %v1261_v58 = vpop.f32.mrf.mxu1 }
 0x289   : > { %v1456_v2 = vmax.f32 %v1448_v62, %v1188_v57  ;;  %v1458_v4 = vmax.f32 %v1450_v63, %v1261_v58 }
 0x28a   : > { %v1190_v53 = vpop.f32.mrf.mxu0  ;;  %v1263_v59 = vpop.f32.mrf.mxu1 }
 0x28b   : > { %v1457_v7 = vmax.f32 %v1449_v0, %v1190_v53  ;;  %v1459_v8 = vmax.f32 %v1451_v1, %v1263_v59 }
 0x28c   : > { %v1192_v5 = vpop.f32.mrf.mxu0  ;;  %v1265_v6 = vpop.f32.mrf.mxu1 }
 0x28d   : > { %v1464_v9 = vmax.f32 %v1456_v2, %v1192_v5  ;;  %v1466_v10 = vmax.f32 %v1458_v4, %v1265_v6 }
 0x28e   : > { %v1194_v11 = vpop.f32.mrf.mxu0  ;;  %v1267_v12 = vpop.f32.mrf.mxu1 }
 0x28f   : > { %v1507_v14 = vrot.slane %v1464_v9, 4  ;;  %v1519_v15 = vrot.slane %v1466_v10, 4  ;;  %v1465_v18 = vmax.f32 %v1457_v7, %v1194_v11  ;;  %v1467_v19 = vmax.f32 %v1459_v8, %v1267_v12 }
 0x290   : > { %v5853_v20 = vpop.f32.mrf.mxu0  ;;  %v5855_v21 = vpop.f32.mrf.mxu1 }
 0x291   : > { %v1508_v22 = vmax.f32 %v1464_v9, %v1507_v14  ;;  %v1520_v23 = vmax.f32 %v1466_v10, %v1519_v15  ;;  %v1513_v24 = vrot.slane %v1465_v18, 4  ;;  %v1525_v25 = vrot.slane %v1467_v19, 4 }
 0x292   : > { %v5861_v28 = vpop.f32.mrf.mxu0  ;;  %v5863_v47 = vpop.f32.mrf.mxu1 }
 0x293   : > { %v1509_v29 = vrot.slane %v1508_v22, 2  ;;  %v1521_v30 = vrot.slane %v1520_v23, 2  ;;  %v1514_v31 = vmax.f32 %v1465_v18, %v1513_v24  ;;  %v1526_v32 = vmax.f32 %v1467_v19, %v1525_v25 }
 0x294   : > { %v5865_v33 = vpop.f32.mrf.mxu0  ;;  %v5867_v34 = vpop.f32.mrf.mxu1 }
 0x295   : > { %v1510_v35 = vmax.f32 %v1508_v22, %v1509_v29  ;;  %v1522_v36 = vmax.f32 %v1520_v23, %v1521_v30  ;;  %v1515_v37 = vrot.slane %v1514_v31, 2  ;;  %v1527_v38 = vrot.slane %v1526_v32, 2  ;;  %v4848_v22 = vld [vmem:[%s6828_s7 + $0x4e0] ss:$16 sps:$4 sm:$0xff]  }
 0x296   : > { %v1310_v41 = vpop.f32.mrf.mxu0  ;;  %v1383_v42 = vpop.f32.mrf.mxu1  ;;  %v4851_v23 = vld [vmem:[%s6828_s7 + $0x6e0] ss:$16 sps:$4 sm:$0xff]  }
 0x297   : > { %v1511_v45 = vrot.slane %v1510_v35, 1  ;;  %v1523_v46 = vrot.slane %v1522_v36, 1  ;;  %v1516_v48 = vmax.f32 %v1514_v31, %v1515_v37  ;;  %v1528_v49 = vmax.f32 %v1526_v32, %v1527_v38  ;;  %v4856_v31 = vld [vmem:[%s6828_s7 + $0x4c4] ss:$16 sps:$4 sm:$0xff]  }
 0x298   : > { %v5878_v50 = vpop.f32.mrf.mxu0  ;;  %v5880_v51 = vpop.f32.mrf.mxu1  ;;  %v1421_v29 = vmax.f32 %v5861_v28, %v1310_v41  ;;  %v1423_v30 = vmax.f32 %v5863_v47, %v1383_v42  ;;  %v4859_v32 = vld [vmem:[%s6828_s7 + $0x6c4] ss:$16 sps:$4 sm:$0xff]  }
 0x299   : > { %v1512_v52 = vmax.f32 %v1510_v35, %v1511_v45  ;;  %v1524_v54 = vmax.f32 %v1522_v36, %v1523_v46  ;;  %v1517_v55 = vrot.slane %v1516_v48, 1  ;;  %v1529_v56 = vrot.slane %v1528_v49, 1  ;;  %v4862_v45 = vld [vmem:[%s6828_s7 + $0x4a4] ss:$16 sps:$4 sm:$0xff]  }
 0x29a   : > { %v1316_v57 = vpop.f32.mrf.mxu0  ;;  %v1389_v58 = vpop.f32.mrf.mxu1  ;;  %v4865_v46 = vld [vmem:[%s6828_s7 + $0x6a4] ss:$16 sps:$4 sm:$0xff]  }
 0x29b   : > { %v1597_v62 = vadd.f32 %v1560_v39, %v1512_v52  ;;  %v1599_v63 = vadd.f32 %v1568_v40, %v1524_v54  ;;  %v1518_v53 = vmax.f32 %v1516_v48, %v1517_v55  ;;  %v1530_v59 = vmax.f32 %v1528_v49, %v1529_v56  ;;  %v4854_v39 = vld [vmem:[%s6828_s7 + $0x4c0] ss:$16 sps:$4 sm:$0xff]  }
 0x29c   : > { %v5887_v0 = vpop.f32.mrf.mxu0  ;;  %v5889_v1 = vpop.f32.mrf.mxu1  ;;  %v1429_v37 = vmax.f32 %v1421_v29, %v1316_v57  ;;  %v1431_v28 = vmax.f32 %v1423_v30, %v1389_v58  ;;  %v4857_v40 = vld [vmem:[%s6828_s7 + $0x6c0] ss:$16 sps:$4 sm:$0xff]   ;;  %v1420_v29 = vmax.f32 %v5853_v20, %v5865_v33  ;;  %v4880_v20 = vld [vmem:[%s6828_s7 + $0x444] ss:$16 sps:$4 sm:$0xff]  }
 0x29d   : > { %v1598_v5 = vadd.f32 %v1564_v60, %v1518_v53  ;;  %v1600_v6 = vadd.f32 %v1572_v61, %v1530_v59  ;;  %v1605_v7 = vmax.f32 %v1597_v62, 0.0  ;;  %v1607_v8 = vmax.f32 %v1599_v63, 0.0  ;;  %v4860_v57 = vld [vmem:[%s6828_s7 + $0x4a0] ss:$16 sps:$4 sm:$0xff]   ;;  %v4868_v62 = vld [vmem:[%s6828_s7 + $0x484] ss:$16 sps:$4 sm:$0xff]  }
 0x29e   : > { %v1320_v2 = vpop.f32.mrf.mxu0  ;;  %v1393_v4 = vpop.f32.mrf.mxu1  ;;  %v4863_v58 = vld [vmem:[%s6828_s7 + $0x6a0] ss:$16 sps:$4 sm:$0xff]   ;;  %v4871_v63 = vld [vmem:[%s6828_s7 + $0x684] ss:$16 sps:$4 sm:$0xff]  }
 0x29f   : > { %v1606_v11 = vmax.f32 %v1598_v5, 0.0  ;;  %v1608_v12 = vmax.f32 %v1600_v6, 0.0  ;;  %v5905_v24 = vpack.c.bf16 %v1605_v7, %v1605_v7  ;;  %v5907_v25 = vpack.c.bf16 %v1607_v8, %v1607_v8  ;;  %v4866_v7 = vld [vmem:[%s6828_s7 + $0x480] ss:$16 sps:$4 sm:$0xff]   ;;  %v4883_v33 = vld [vmem:[%s6828_s7 + $0x644] ss:$16 sps:$4 sm:$0xff]  }
 0x2a0   : > { %v5891_v9 = vpop.f32.mrf.mxu0  ;;  %v5893_v10 = vpop.f32.mrf.mxu1  ;;  %v1437_v41 = vmax.f32 %v1429_v37, %v1320_v2  ;;  %v1439_v42 = vmax.f32 %v1431_v28, %v1393_v4  ;;  %v4869_v8 = vld [vmem:[%s6828_s7 + $0x680] ss:$16 sps:$4 sm:$0xff]  }
 0x2a1   : > { %v5895_v18 = vpack.c.bf16 %v1606_v11, %v1606_v11  ;;  %v5897_v19 = vpack.c.bf16 %v1608_v12, %v1608_v12  ;;  %v4872_v30 = vld [vmem:[%s6828_s7 + $0x460] ss:$16 sps:$4 sm:$0xff]  }
 0x2a2   : > { %v1326_v14 = vpop.f32.mrf.mxu0  ;;  %v1399_v15 = vpop.f32.mrf.mxu1 }
 0x2a3   : > { %3211 = vmatprep.mubr.bf16.mxu0 %v5895_v18  ;;  %3252 = vmatprep.mubr.bf16.mxu1 %v5897_v19  ;;  %v1445_v52 = vmax.f32 %v1437_v41, %v1326_v14  ;;  %v1447_v54 = vmax.f32 %v1439_v42, %v1399_v15  ;;  %v4874_v14 = vld [vmem:[%s6828_s7 + $0x464] ss:$16 sps:$4 sm:$0xff]   ;;  %v4878_v42 = vld [vmem:[%s6828_s7 + $0x440] ss:$16 sps:$4 sm:$0xff]  }
 0x2a4   : > { %v5919_v35 = vpop.f32.mrf.mxu0  ;;  %v5921_v36 = vpop.f32.mrf.mxu1  ;;  %3212 = vmatmul.mubr.bf16.vlgmr.msra.gmra.mxu0 %v5905_v24  ;;  %3253 = vmatmul.mubr.bf16.vlgmr.msra.gmra.mxu1 %v5907_v25  ;;  %v4877_v15 = vld [vmem:[%s6828_s7 + $0x664] ss:$16 sps:$4 sm:$0xff]  }
 0x2a5   : > { %3262 = vmatpush1.bf16.msra.mxu0 %v4848_v22  ;;  %3303 = vmatpush1.bf16.msra.mxu1 %v4851_v23 }
 0x2a6   : > { %v1330_v47 = vpop.f32.mrf.mxu0  ;;  %v1403_v38 = vpop.f32.mrf.mxu1  ;;  %3263 = vmatprep.subr.bf16.mxu0 %v4856_v31  ;;  %3304 = vmatprep.subr.bf16.mxu1 %v4859_v32  ;;  %v4875_v31 = vld [vmem:[%s6828_s7 + $0x660] ss:$16 sps:$4 sm:$0xff]   ;;  %v1422_v32 = vmax.f32 %v5855_v21, %v5867_v34  ;;  %v1587_v34 = vsub.s32 7, %v5838_v13 }
 0x2a7   : > { %v1453_v60 = vmax.f32 %v1445_v52, %v1330_v47  ;;  %v1455_v61 = vmax.f32 %v1447_v54, %v1403_v38  ;;  %v1428_v47 = vmax.f32 %v1420_v29, %v5878_v50  ;;  %v1579_v38 = vsub.s32 5, %v5838_v13  ;;  %v4881_v50 = vld [vmem:[%s6828_s7 + $0x640] ss:$16 sps:$4 sm:$0xff]   ;;  %v4889_v52 = vld [vmem:[%s6828_s7 + $0x624] ss:$16 sps:$4 sm:$0xff]  }
 0x2a8   : > { %v5937_v48 = vpop.f32.mrf.mxu0  ;;  %v5939_v49 = vpop.f32.mrf.mxu1 }
 0x2a9   : > { %3264 = vmatpush1.bf16.msra.mxu0 %v4854_v39  ;;  %3305 = vmatpush1.bf16.msra.mxu1 %v4857_v40  ;;  %v1430_v39 = vmax.f32 %v1422_v32, %v5880_v51  ;;  %v1436_v41 = vmax.f32 %v1428_v47, %v5887_v0  ;;  %v4886_v0 = vld [vmem:[%s6828_s7 + $0x424] ss:$16 sps:$4 sm:$0xff]   ;;  %v4902_v32 = vld [vmem:[%s6828_s7 + $0x5c0] ss:$16 sps:$4 sm:$0xff]  }
 0x2aa   : > { %v1336_v55 = vpop.f32.mrf.mxu0  ;;  %v1409_v56 = vpop.f32.mrf.mxu1  ;;  %3265 = vmatprep.subr.bf16.mxu0 %v4862_v45  ;;  %3306 = vmatprep.subr.bf16.mxu1 %v4865_v46  ;;  %v4913_v47 = vld [vmem:[%s6828_s7 + $0x7a4] ss:$16 sps:$4 sm:$0xff]  }
 0x2ab   : > { %v1461_v2 = vmax.f32 %v1453_v60, %v1336_v55  ;;  %v1463_v4 = vmax.f32 %v1455_v61, %v1409_v56  ;;  %v1438_v45 = vmax.f32 %v1430_v39, %v5889_v1  ;;  %v1444_v54 = vmax.f32 %v1436_v41, %v5891_v9  ;;  %v4884_v61 = vld [vmem:[%s6828_s7 + $0x420] ss:$16 sps:$4 sm:$0xff]   ;;  %v4919_v41 = vld [vmem:[%s6828_s7 + $0x784] ss:$16 sps:$4 sm:$0xff]  }
 0x2ac   : > { %v5953_v53 = vpop.f32.mrf.mxu0  ;;  %v5955_v59 = vpop.f32.mrf.mxu1  ;;  %v1580_v55 = vrot.slane %v5845_v16, %v1579_v38  ;;  %v4887_v9 = vld [vmem:[%s6828_s7 + $0x620] ss:$16 sps:$4 sm:$0xff]  }
 0x2ad   : > { %3266 = vmatpush1.bf16.msra.mxu0 %v4860_v57  ;;  %3307 = vmatpush1.bf16.msra.mxu1 %v4863_v58  ;;  %v1446_v56 = vmax.f32 %v1438_v45, %v5893_v10  ;;  %v1588_v58 = vrot.slane %v5845_v16, %v1587_v34  ;;  %v1452_v60 = vmax.f32 %v1444_v54, %v5919_v35  ;;  %v4892_v16 = vld [vmem:[%s6828_s7 + $0x404] ss:$16 sps:$4 sm:$0xff]   ;;  %v4908_v38 = vld [vmem:[%s6828_s7 + $0x5a0] ss:$16 sps:$4 sm:$0xff]  }
 0x2ae   : > { %v1340_v5 = vpop.f32.mrf.mxu0  ;;  %v1413_v6 = vpop.f32.mrf.mxu1  ;;  %3267 = vmatprep.subr.bf16.mxu0 %v4868_v62  ;;  %3308 = vmatprep.subr.bf16.mxu1 %v4871_v63  ;;  %v4895_v35 = vld [vmem:[%s6828_s7 + $0x604] ss:$16 sps:$4 sm:$0xff]   ;;  %v4911_v39 = vld [vmem:[%s6828_s7 + $0x7a0] ss:$16 sps:$4 sm:$0xff]  }
 0x2af   : > { %v1469_v11 = vmax.f32 %v1461_v2, %v1340_v5  ;;  %v1471_v12 = vmax.f32 %v1463_v4, %v1413_v6  ;;  %v1454_v62 = vmax.f32 %v1446_v56, %v5921_v36  ;;  %v1460_v2 = vmax.f32 %v1452_v60, %v5937_v48  ;;  %v4890_v36 = vld [vmem:[%s6828_s7 + $0x400] ss:$16 sps:$4 sm:$0xff]   ;;  %v4898_v48 = vld [vmem:[%s6828_s7 + $0x5e4] ss:$16 sps:$4 sm:$0xff]  }
 0x2b0   : > { %v4916_v34 = vld [vmem:[%s6828_s7 + $0x584] ss:$16 sps:$4 sm:$0xff]   ;;  %v4923_v54 = vld [vmem:[%s6828_s7 + $0x760] ss:$16 sps:$4 sm:$0xff]  }
 0x2b1   : > { %v1537_v22 = vrot.slane %v1469_v11, 4  ;;  %v1549_v23 = vrot.slane %v1471_v12, 4  ;;  %3268 = vmatpush1.bf16.msra.mxu0 %v4866_v7  ;;  %3309 = vmatpush1.bf16.msra.mxu1 %v4869_v8  ;;  %v1462_v4 = vmax.f32 %v1454_v62, %v5939_v49  ;;  %v4893_v7 = vld [vmem:[%s6828_s7 + $0x600] ss:$16 sps:$4 sm:$0xff]   ;;  %v1468_v8 = vmax.f32 %v1460_v2, %v5953_v53  ;;  %v4934_v62 = vld [vmem:[%s6828_s7 + $0x524] ss:$16 sps:$4 sm:$0xff]  }
 0x2b2   : > { %3269 = vmatprep.subr.bf16.mxu0 %v4874_v14  ;;  %3310 = vmatprep.subr.bf16.mxu1 %v4877_v15  ;;  %v4901_v14 = vld [vmem:[%s6828_s7 + $0x7e4] ss:$16 sps:$4 sm:$0xff]   ;;  %v4896_v53 = vld [vmem:[%s6828_s7 + $0x5e0] ss:$16 sps:$4 sm:$0xff]  }
 0x2b3   : > { %v1538_v37 = vmax.f32 %v1469_v11, %v1537_v22  ;;  %v1550_v28 = vmax.f32 %v1471_v12, %v1549_v23  ;;  %v1470_v11 = vmax.f32 %v1462_v4, %v5955_v59  ;;  %v4899_v59 = vld [vmem:[%s6828_s7 + $0x7e0] ss:$16 sps:$4 sm:$0xff]   ;;  %v1531_v23 = vrot.slane %v1468_v8, 4  ;;  %v4943_v2 = vld [vmem:[%s6828_s7 + $0x704] ss:$16 sps:$4 sm:$0xff]  }
 0x2b4   : > { %v4929_v60 = vld [vmem:[%s6828_s7 + $0x740] ss:$16 sps:$4 sm:$0xff]  }
 0x2b5   : > { %v1539_v40 = vrot.slane %v1538_v37, 2  ;;  %v1551_v21 = vrot.slane %v1550_v28, 2  ;;  %3270 = vmatpush1.bf16.msra.mxu0 %v4872_v30  ;;  %3311 = vmatpush1.bf16.msra.mxu1 %v4875_v31  ;;  %v1543_v29 = vrot.slane %v1470_v11, 4  ;;  %v4904_v30 = vld [vmem:[%s6828_s7 + $0x5c4] ss:$16 sps:$4 sm:$0xff]  }
 0x2b6   : > { %3271 = vmatprep.subr.bf16.mxu0 %v4880_v20  ;;  %3312 = vmatprep.subr.bf16.mxu1 %v4883_v33  ;;  %v4907_v31 = vld [vmem:[%s6828_s7 + $0x7c4] ss:$16 sps:$4 sm:$0xff]  }
 0x2b7   : > { %v1540_v46 = vmax.f32 %v1538_v37, %v1539_v40  ;;  %v1552_v51 = vmax.f32 %v1550_v28, %v1551_v21  ;;  %v4905_v37 = vld [vmem:[%s6828_s7 + $0x7c0] ss:$16 sps:$4 sm:$0xff]   ;;  %v1532_v28 = vmax.f32 %v1468_v8, %v1531_v23  ;;  %v1544_v20 = vmax.f32 %v1470_v11, %v1543_v29  ;;  %v4910_v33 = vld [vmem:[%s6828_s7 + $0x5a4] ss:$16 sps:$4 sm:$0xff]   ;;  %v4944_v11 = vld [vmem:[%s6828_s7 + $0xe8] ss:$16 sps:$4 sm:$0xff]  }
 0x2b8   : > { %v4953_v23 = vld [vmem:[%s6828_s7 + $0x2c8] ss:$16 sps:$4 sm:$0xff]   ;;  %v4958_v29 = vld [vmem:[%s6828_s7 + $0xac] ss:$16 sps:$4 sm:$0xff]  }
 0x2b9   : > { %v1541_v57 = vrot.slane %v1540_v46, 1  ;;  %v1553_v1 = vrot.slane %v1552_v51, 1  ;;  %3272 = vmatpush1.bf16.msra.mxu0 %v4878_v42  ;;  %3313 = vmatpush1.bf16.msra.mxu1 %v4881_v50  ;;  %v1533_v40 = vrot.slane %v1532_v28, 2  ;;  %v1545_v21 = vrot.slane %v1544_v20, 2  ;;  %v4914_v42 = vld [vmem:[%s6828_s7 + $0x580] ss:$16 sps:$4 sm:$0xff]  }
 0x2ba   : > { %3273 = vmatprep.subr.bf16.mxu0 %v4886_v0  ;;  %3314 = vmatprep.subr.bf16.mxu1 %v4889_v52  ;;  %v4917_v50 = vld [vmem:[%s6828_s7 + $0x780] ss:$16 sps:$4 sm:$0xff]   ;;  %v4925_v0 = vld [vmem:[%s6828_s7 + $0x764] ss:$16 sps:$4 sm:$0xff]  }
 0x2bb   : > { %v1542_v63 = vmax.f32 %v1540_v46, %v1541_v57  ;;  %v1554_v10 = vmax.f32 %v1552_v51, %v1553_v1  ;;  %v1534_v45 = vmax.f32 %v1532_v28, %v1533_v40  ;;  %v1546_v46 = vmax.f32 %v1544_v20, %v1545_v21  ;;  %v4922_v51 = vld [vmem:[%s6828_s7 + $0x564] ss:$16 sps:$4 sm:$0xff]   ;;  %v4920_v52 = vld [vmem:[%s6828_s7 + $0x560] ss:$16 sps:$4 sm:$0xff]   ;;  %v4965_v28 = vld [vmem:[%s6828_s7 + $0x288] ss:$16 sps:$4 sm:$0xff]  }
 0x2bc   : > { %v4928_v57 = vld [vmem:[%s6828_s7 + $0x544] ss:$16 sps:$4 sm:$0xff]   ;;  %v4970_v20 = vld [vmem:[%s6828_s7 + $0x6c] ss:$16 sps:$4 sm:$0xff]   ;;  %v4974_v21 = vld [vmem:[%s6828_s7 + $0x48] ss:$16 sps:$4 sm:$0xff]  }
 0x2bd   : > { %v1602_v5 = vadd.f32 %v1580_v55, %v1542_v63  ;;  %v1604_v6 = vadd.f32 %v1588_v58, %v1554_v10  ;;  %3274 = vmatpush1.bf16.msra.mxu0 %v4884_v61  ;;  %3315 = vmatpush1.bf16.msra.mxu1 %v4887_v9  ;;  %v1535_v55 = vrot.slane %v1534_v45, 1  ;;  %v1547_v56 = vrot.slane %v1546_v46, 1  ;;  %v4931_v1 = vld [vmem:[%s6828_s7 + $0x744] ss:$16 sps:$4 sm:$0xff]   ;;  %v4926_v58 = vld [vmem:[%s6828_s7 + $0x540] ss:$16 sps:$4 sm:$0xff]  }
 0x2be   : > { %3275 = vmatprep.subr.bf16.mxu0 %v4892_v16  ;;  %3316 = vmatprep.subr.bf16.mxu1 %v4895_v35  ;;  %v4937_v63 = vld [vmem:[%s6828_s7 + $0x724] ss:$16 sps:$4 sm:$0xff]   ;;  %v4932_v10 = vld [vmem:[%s6828_s7 + $0x520] ss:$16 sps:$4 sm:$0xff]   ;;  %v4979_v40 = vld [vmem:[%s6828_s7 + $0x24c] ss:$16 sps:$4 sm:$0xff]  }
 0x2bf   : > { %v1610_v49 = vmax.f32 %v1602_v5, 0.0  ;;  %v1612_v12 = vmax.f32 %v1604_v6, 0.0  ;;  %v1536_v61 = vmax.f32 %v1534_v45, %v1535_v55  ;;  %v1548_v9 = vmax.f32 %v1546_v46, %v1547_v56  ;;  %v4935_v16 = vld [vmem:[%s6828_s7 + $0x720] ss:$16 sps:$4 sm:$0xff]   ;;  %v4940_v35 = vld [vmem:[%s6828_s7 + $0x504] ss:$16 sps:$4 sm:$0xff]  }
 0x2c0   : > { %v4938_v6 = vld [vmem:[%s6828_s7 + $0x500] ss:$16 sps:$4 sm:$0xff]   ;;  %v4983_v45 = vld [vmem:[%s6828_s7 + $0x228] ss:$16 sps:$4 sm:$0xff]   ;;  %v4988_v46 = vld [vmem:[%s6828_s7 + $0xc] ss:$16 sps:$4 sm:$0xff]  }
 0x2c1   : > { %v6037_v15 = vpack.c.bf16 %v1610_v49, %v1610_v49  ;;  %v6039_v22 = vpack.c.bf16 %v1612_v12, %v1612_v12  ;;  %3276 = vmatpush1.bf16.msra.mxu0 %v4890_v36  ;;  %3317 = vmatpush1.bf16.msra.mxu1 %v4893_v7  ;;  %v1601_v4 = vadd.f32 %v5848_v17, %v1536_v61  ;;  %v4941_v36 = vld [vmem:[%s6828_s7 + $0x700] ss:$16 sps:$4 sm:$0xff]   ;;  %v4946_v17 = vld [vmem:[%s6828_s7 + $0xec] ss:$16 sps:$4 sm:$0xff]   ;;  %v4947_v12 = vld [vmem:[%s6828_s7 + $0x2e8] ss:$16 sps:$4 sm:$0xff]  }
 0x2c2   : > { %3277 = vmatprep.subr.bf16.mxu0 %v4898_v48  ;;  %3318 = vmatprep.subr.bf16.mxu1 %v4901_v14  ;;  %v1603_v5 = vadd.f32 %v5851_v3, %v1548_v9  ;;  %v4949_v3 = vld [vmem:[%s6828_s7 + $0x2ec] ss:$16 sps:$4 sm:$0xff]   ;;  %v4992_v56 = vld [vmem:[%s6828_s7 + $0x1e8] ss:$16 sps:$4 sm:$0xff]  }
 0x2c3   : > { %3293 = vmatprep.mubr.bf16.mxu0 %v6037_v15  ;;  %3334 = vmatprep.mubr.bf16.mxu1 %v6039_v22  ;;  %v1609_v7 = vmax.f32 %v1601_v4, 0.0  ;;  %v4952_v14 = vld [vmem:[%s6828_s7 + $0xcc] ss:$16 sps:$4 sm:$0xff]   ;;  %v5001_v61 = vld [vmem:[%s6828_s7 + $0x3c8] ss:$16 sps:$4 sm:$0xff]  }
 0x2c4   : > { %v1611_v8 = vmax.f32 %v1603_v5, 0.0  ;;  %v4997_v55 = vld [vmem:[%s6828_s7 + $0x3ec] ss:$16 sps:$4 sm:$0xff]   ;;  %v5013_v4 = vld [vmem:[%s6828_s7 + $0x388] ss:$16 sps:$4 sm:$0xff]  }
 0x2c5   : > { %3278 = vmatpush2.bf16.msra.mxu0 %v4896_v53  ;;  %3319 = vmatpush2.bf16.msra.mxu1 %v4899_v59  ;;  %v6144_v48 = vpack.c.bf16 %v1609_v7, %v1609_v7  ;;  %v4955_v53 = vld [vmem:[%s6828_s7 + $0x2cc] ss:$16 sps:$4 sm:$0xff]   ;;  %v4950_v59 = vld [vmem:[%s6828_s7 + $0xc8] ss:$16 sps:$4 sm:$0xff]  }
 0x2c6   : > { %3279 = vmatprep.subr.bf16.mxu0 %v4904_v30  ;;  %3320 = vmatprep.subr.bf16.mxu1 %v4907_v31  ;;  %v6146_v49 = vpack.c.bf16 %v1611_v8, %v1611_v8  ;;  %v4956_v30 = vld [vmem:[%s6828_s7 + $0xa8] ss:$16 sps:$4 sm:$0xff]   ;;  %v4964_v31 = vld [vmem:[%s6828_s7 + $0x8c] ss:$16 sps:$4 sm:$0xff]  }
 0x2c7   : > { %v5006_v9 = vld [vmem:[%s6828_s7 + $0x1ac] ss:$16 sps:$4 sm:$0xff]   ;;  %v5019_v7 = vld [vmem:[%s6828_s7 + $0x368] ss:$16 sps:$4 sm:$0xff]  }
 0x2c8   : > { %v5018_v5 = vld [vmem:[%s6828_s7 + $0x16c] ss:$16 sps:$4 sm:$0xff]  }
 0x2c9   : > { %3280 = vmatpush2.bf16.msra.mxu0 %v4902_v32  ;;  %3321 = vmatpush2.bf16.msra.mxu1 %v4905_v37  ;;  %v4967_v32 = vld [vmem:[%s6828_s7 + $0x28c] ss:$16 sps:$4 sm:$0xff]   ;;  %v4962_v37 = vld [vmem:[%s6828_s7 + $0x88] ss:$16 sps:$4 sm:$0xff]  }
 0x2ca   : > { %3281 = vmatprep.subr.bf16.mxu0 %v4910_v33  ;;  %3322 = vmatprep.subr.bf16.mxu1 %v4913_v47  ;;  %v4973_v33 = vld [vmem:[%s6828_s7 + $0x26c] ss:$16 sps:$4 sm:$0xff]   ;;  %v4968_v47 = vld [vmem:[%s6828_s7 + $0x68] ss:$16 sps:$4 sm:$0xff]  }
 0x2cb   : > { %v5024_v8 = vld [vmem:[%s6828_s7 + $0x14c] ss:$16 sps:$4 sm:$0xff]  }
 0x2cd   : > { %3282 = vmatpush2.bf16.msra.mxu0 %v4908_v38  ;;  %3323 = vmatpush2.bf16.msra.mxu1 %v4911_v39  ;;  %v4971_v38 = vld [vmem:[%s6828_s7 + $0x268] ss:$16 sps:$4 sm:$0xff]   ;;  %v4976_v39 = vld [vmem:[%s6828_s7 + $0x4c] ss:$16 sps:$4 sm:$0xff]  }
 0x2ce   : > { %3283 = vmatprep.subr.bf16.mxu0 %v4916_v34  ;;  %3324 = vmatprep.subr.bf16.mxu1 %v4919_v41  ;;  %v4977_v34 = vld [vmem:[%s6828_s7 + $0x248] ss:$16 sps:$4 sm:$0xff]   ;;  %v4982_v41 = vld [vmem:[%s6828_s7 + $0x2c] ss:$16 sps:$4 sm:$0xff]  }
 0x2d1   : > { %3284 = vmatpush2.bf16.msra.mxu0 %v4914_v42  ;;  %3325 = vmatpush2.bf16.msra.mxu1 %v4917_v50  ;;  %v4985_v42 = vld [vmem:[%s6828_s7 + $0x22c] ss:$16 sps:$4 sm:$0xff]   ;;  %v4980_v50 = vld [vmem:[%s6828_s7 + $0x28] ss:$16 sps:$4 sm:$0xff]  }
 0x2d2   : > { %3285 = vmatprep.subr.bf16.mxu0 %v4922_v51  ;;  %3326 = vmatprep.subr.bf16.mxu1 %v4925_v0  ;;  %v4991_v51 = vld [vmem:[%s6828_s7 + $0x20c] ss:$16 sps:$4 sm:$0xff]   ;;  %v4986_v0 = vld [vmem:[%s6828_s7 + $0x8] ss:$16 sps:$4 sm:$0xff]  }
 0x2d5   : > { %3286 = vmatpush2.bf16.msra.mxu0 %v4920_v52  ;;  %3327 = vmatpush2.bf16.msra.mxu1 %v4923_v54  ;;  %v4989_v52 = vld [vmem:[%s6828_s7 + $0x208] ss:$16 sps:$4 sm:$0xff]   ;;  %v4994_v54 = vld [vmem:[%s6828_s7 + $0x1ec] ss:$16 sps:$4 sm:$0xff]  }
 0x2d6   : > { %3287 = vmatprep.subr.bf16.mxu0 %v4928_v57  ;;  %3328 = vmatprep.subr.bf16.mxu1 %v4931_v1  ;;  %v4995_v57 = vld [vmem:[%s6828_s7 + $0x3e8] ss:$16 sps:$4 sm:$0xff]   ;;  %v5000_v1 = vld [vmem:[%s6828_s7 + $0x1cc] ss:$16 sps:$4 sm:$0xff]  }
 0x2d9   : > { %3288 = vmatpush2.bf16.msra.mxu0 %v4926_v58  ;;  %3329 = vmatpush2.bf16.msra.mxu1 %v4929_v60  ;;  %v5003_v58 = vld [vmem:[%s6828_s7 + $0x3cc] ss:$16 sps:$4 sm:$0xff]   ;;  %v4998_v60 = vld [vmem:[%s6828_s7 + $0x1c8] ss:$16 sps:$4 sm:$0xff]  }
 0x2da   : > { %3289 = vmatprep.subr.bf16.mxu0 %v4934_v62  ;;  %3330 = vmatprep.subr.bf16.mxu1 %v4937_v63  ;;  %v5009_v62 = vld [vmem:[%s6828_s7 + $0x3ac] ss:$16 sps:$4 sm:$0xff]   ;;  %v5004_v63 = vld [vmem:[%s6828_s7 + $0x1a8] ss:$16 sps:$4 sm:$0xff]  }
 0x2dd   : > { %3290 = vmatpush2.bf16.msra.mxu0 %v4932_v10  ;;  %3331 = vmatpush2.bf16.msra.mxu1 %v4935_v16  ;;  %v5007_v10 = vld [vmem:[%s6828_s7 + $0x3a8] ss:$16 sps:$4 sm:$0xff]   ;;  %v5012_v16 = vld [vmem:[%s6828_s7 + $0x18c] ss:$16 sps:$4 sm:$0xff]  }
 0x2de   : > { %3291 = vmatprep.subr.bf16.mxu0 %v4940_v35  ;;  %3332 = vmatprep.subr.bf16.mxu1 %v4943_v2  ;;  %v5015_v35 = vld [vmem:[%s6828_s7 + $0x38c] ss:$16 sps:$4 sm:$0xff]   ;;  %v5010_v2 = vld [vmem:[%s6828_s7 + $0x188] ss:$16 sps:$4 sm:$0xff]  }
 0x2e1   : > { %3292 = vmatpush2.bf16.msra.mxu0 %v4938_v6  ;;  %3333 = vmatpush2.bf16.msra.mxu1 %v4941_v36  ;;  %v5021_v6 = vld [vmem:[%s6828_s7 + $0x36c] ss:$16 sps:$4 sm:$0xff]   ;;  %v5016_v36 = vld [vmem:[%s6828_s7 + $0x168] ss:$16 sps:$4 sm:$0xff]  }
 0x2e2   : > { %3343 = vmatprep.subr.bf16.mxu0 %v4946_v17  ;;  %3384 = vmatprep.subr.bf16.mxu1 %v4949_v3  ;;  %v5027_v17 = vld [vmem:[%s6828_s7 + $0x34c] ss:$16 sps:$4 sm:$0xff]   ;;  %v5022_v3 = vld [vmem:[%s6828_s7 + $0x148] ss:$16 sps:$4 sm:$0xff]  }
 0x2e4   : > { %3294 = vmatmul.mubr.bf16.vlgmr.msra.gmra.mxu0 %v6144_v48  ;;  %3335 = vmatmul.mubr.bf16.vlgmr.msra.gmra.mxu1 %v6146_v49 }
 0x2e5   : > { %3344 = vmatpush1.bf16.msra.mxu0 %v4944_v11  ;;  %3375 = vmatprep.mubr.bf16.mxu0 %v5895_v18  ;;  %v4961_v18 = vld [vmem:[%s6828_s7 + $0x2ac] ss:$16 sps:$4 sm:$0xff]   ;;  %v5025_v11 = vld [vmem:[%s6828_s7 + $0x348] ss:$16 sps:$4 sm:$0xff]  }
 0x2e6   : > { %3385 = vmatpush1.bf16.msra.mxu1 %v4947_v12  ;;  %3416 = vmatprep.mubr.bf16.mxu1 %v5897_v19  ;;  %v4959_v19 = vld [vmem:[%s6828_s7 + $0x2a8] ss:$16 sps:$4 sm:$0xff]   ;;  %v5030_v12 = vld [vmem:[%s6828_s7 + $0x12c] ss:$16 sps:$4 sm:$0xff]  }
 0x2e7   : > { %3345 = vmatprep.subr.bf16.mxu0 %v4952_v14  ;;  %3386 = vmatprep.subr.bf16.mxu1 %v4955_v53  ;;  %v5033_v14 = vld [vmem:[%s6828_s7 + $0x32c] ss:$16 sps:$4 sm:$0xff]   ;;  %v5028_v53 = vld [vmem:[%s6828_s7 + $0x128] ss:$16 sps:$4 sm:$0xff]  }
 0x2e9   : > { %3346 = vmatpush1.bf16.msra.mxu0 %v4950_v59  ;;  %v5031_v59 = vld [vmem:[%s6828_s7 + $0x328] ss:$16 sps:$4 sm:$0xff]  }
 0x2ea   : > { %3387 = vmatpush1.bf16.msra.mxu1 %v4953_v23  ;;  %3347 = vmatprep.subr.bf16.mxu0 %v4958_v29  ;;  %v5036_v23 = vld [vmem:[%s6828_s7 + $0x10c] ss:$16 sps:$4 sm:$0xff]  }
 0x2eb   : > { %3388 = vmatprep.subr.bf16.mxu1 %v4961_v18  ;;  %v5039_v29 = vld [vmem:[%s6828_s7 + $0x30c] ss:$16 sps:$4 sm:$0xff]   ;;  %v5034_v18 = vld [vmem:[%s6828_s7 + $0x108] ss:$16 sps:$4 sm:$0xff]  }
 0x2ed   : > { %3348 = vmatpush1.bf16.msra.mxu0 %v4956_v30  ;;  %v5037_v30 = vld [vmem:[%s6828_s7 + $0x308] ss:$16 sps:$4 sm:$0xff]  }
 0x2ee   : > { %3389 = vmatpush1.bf16.msra.mxu1 %v4959_v19  ;;  %3349 = vmatprep.subr.bf16.mxu0 %v4964_v31  ;;  %v5042_v19 = vld [vmem:[%s6828_s7 + $0x4ec] ss:$16 sps:$4 sm:$0xff]  }
 0x2ef   : > { %3390 = vmatprep.subr.bf16.mxu1 %v4967_v32  ;;  %v5045_v31 = vld [vmem:[%s6828_s7 + $0x6ec] ss:$16 sps:$4 sm:$0xff]   ;;  %v5040_v32 = vld [vmem:[%s6828_s7 + $0x4e8] ss:$16 sps:$4 sm:$0xff]  }
 0x2f1   : > { %3350 = vmatpush1.bf16.msra.mxu0 %v4962_v37  ;;  %v5043_v37 = vld [vmem:[%s6828_s7 + $0x6e8] ss:$16 sps:$4 sm:$0xff]  }
 0x2f2   : > { %3391 = vmatpush1.bf16.msra.mxu1 %v4965_v28  ;;  %3351 = vmatprep.subr.bf16.mxu0 %v4970_v20  ;;  %v5048_v28 = vld [vmem:[%s6828_s7 + $0x4cc] ss:$16 sps:$4 sm:$0xff]  }
 0x2f3   : > { %3392 = vmatprep.subr.bf16.mxu1 %v4973_v33  ;;  %v5051_v20 = vld [vmem:[%s6828_s7 + $0x6cc] ss:$16 sps:$4 sm:$0xff]   ;;  %v5046_v33 = vld [vmem:[%s6828_s7 + $0x4c8] ss:$16 sps:$4 sm:$0xff]  }
 0x2f5   : > { %3352 = vmatpush1.bf16.msra.mxu0 %v4968_v47  ;;  %v5049_v47 = vld [vmem:[%s6828_s7 + $0x6c8] ss:$16 sps:$4 sm:$0xff]  }
 0x2f6   : > { %3393 = vmatpush1.bf16.msra.mxu1 %v4971_v38  ;;  %3353 = vmatprep.subr.bf16.mxu0 %v4976_v39  ;;  %v5055_v38 = vld [vmem:[%s6828_s7 + $0x6a8] ss:$16 sps:$4 sm:$0xff]   ;;  %v5063_v39 = vld [vmem:[%s6828_s7 + $0x68c] ss:$16 sps:$4 sm:$0xff]  }
 0x2f7   : > { %3394 = vmatprep.subr.bf16.mxu1 %v4979_v40  ;;  %v5058_v40 = vld [vmem:[%s6828_s7 + $0x488] ss:$16 sps:$4 sm:$0xff]  }
 0x2f9   : > { %3354 = vmatpush1.bf16.msra.mxu0 %v4974_v21  ;;  %v5061_v21 = vld [vmem:[%s6828_s7 + $0x688] ss:$16 sps:$4 sm:$0xff]  }
 0x2fa   : > { %3395 = vmatpush1.bf16.msra.mxu1 %v4977_v34  ;;  %3355 = vmatprep.subr.bf16.mxu0 %v4982_v41  ;;  %v5066_v34 = vld [vmem:[%s6828_s7 + $0x46c] ss:$16 sps:$4 sm:$0xff]  }
 0x2fb   : > { %3396 = vmatprep.subr.bf16.mxu1 %v4985_v42  ;;  %v5069_v41 = vld [vmem:[%s6828_s7 + $0x66c] ss:$16 sps:$4 sm:$0xff]   ;;  %v5064_v42 = vld [vmem:[%s6828_s7 + $0x468] ss:$16 sps:$4 sm:$0xff]  }
 0x2fd   : > { %3356 = vmatpush1.bf16.msra.mxu0 %v4980_v50  ;;  %v5067_v50 = vld [vmem:[%s6828_s7 + $0x668] ss:$16 sps:$4 sm:$0xff]  }
 0x2fe   : > { %3397 = vmatpush1.bf16.msra.mxu1 %v4983_v45  ;;  %3357 = vmatprep.subr.bf16.mxu0 %v4988_v46  ;;  %v5072_v45 = vld [vmem:[%s6828_s7 + $0x44c] ss:$16 sps:$4 sm:$0xff]  }
 0x2ff   : > { %3398 = vmatprep.subr.bf16.mxu1 %v4991_v51  ;;  %v5075_v46 = vld [vmem:[%s6828_s7 + $0x64c] ss:$16 sps:$4 sm:$0xff]   ;;  %v5070_v51 = vld [vmem:[%s6828_s7 + $0x448] ss:$16 sps:$4 sm:$0xff]  }
 0x301   : > { %3358 = vmatpush1.bf16.msra.mxu0 %v4986_v0  ;;  %v5073_v0 = vld [vmem:[%s6828_s7 + $0x648] ss:$16 sps:$4 sm:$0xff]  }
 0x302   : > { %3399 = vmatpush1.bf16.msra.mxu1 %v4989_v52  ;;  %3359 = vmatprep.subr.bf16.mxu0 %v4994_v54  ;;  %v5078_v52 = vld [vmem:[%s6828_s7 + $0x42c] ss:$16 sps:$4 sm:$0xff]  }
 0x303   : > { %3400 = vmatprep.subr.bf16.mxu1 %v4997_v55  ;;  %v5081_v54 = vld [vmem:[%s6828_s7 + $0x62c] ss:$16 sps:$4 sm:$0xff]   ;;  %v5076_v55 = vld [vmem:[%s6828_s7 + $0x428] ss:$16 sps:$4 sm:$0xff]  }
 0x305   : > { %3360 = vmatpush2.bf16.msra.mxu0 %v4992_v56  ;;  %v5079_v56 = vld [vmem:[%s6828_s7 + $0x628] ss:$16 sps:$4 sm:$0xff]  }
 0x306   : > { %3401 = vmatpush2.bf16.msra.mxu1 %v4995_v57  ;;  %3361 = vmatprep.subr.bf16.mxu0 %v5000_v1  ;;  %v5084_v57 = vld [vmem:[%s6828_s7 + $0x40c] ss:$16 sps:$4 sm:$0xff]  }
 0x307   : > { %3402 = vmatprep.subr.bf16.mxu1 %v5003_v58  ;;  %v5087_v1 = vld [vmem:[%s6828_s7 + $0x60c] ss:$16 sps:$4 sm:$0xff]   ;;  %v5082_v58 = vld [vmem:[%s6828_s7 + $0x408] ss:$16 sps:$4 sm:$0xff]  }
 0x309   : > { %3362 = vmatpush2.bf16.msra.mxu0 %v4998_v60  ;;  %v5085_v60 = vld [vmem:[%s6828_s7 + $0x608] ss:$16 sps:$4 sm:$0xff]  }
 0x30a   : > { %3403 = vmatpush2.bf16.msra.mxu1 %v5001_v61  ;;  %3363 = vmatprep.subr.bf16.mxu0 %v5006_v9  ;;  %v5090_v61 = vld [vmem:[%s6828_s7 + $0x5ec] ss:$16 sps:$4 sm:$0xff]  }
 0x30b   : > { %3404 = vmatprep.subr.bf16.mxu1 %v5009_v62  ;;  %v5093_v9 = vld [vmem:[%s6828_s7 + $0x7ec] ss:$16 sps:$4 sm:$0xff]   ;;  %v5088_v62 = vld [vmem:[%s6828_s7 + $0x5e8] ss:$16 sps:$4 sm:$0xff]  }
 0x30d   : > { %3364 = vmatpush2.bf16.msra.mxu0 %v5004_v63  ;;  %v5091_v63 = vld [vmem:[%s6828_s7 + $0x7e8] ss:$16 sps:$4 sm:$0xff]  }
 0x30e   : > { %3405 = vmatpush2.bf16.msra.mxu1 %v5007_v10  ;;  %3365 = vmatprep.subr.bf16.mxu0 %v5012_v16  ;;  %v5096_v10 = vld [vmem:[%s6828_s7 + $0x5cc] ss:$16 sps:$4 sm:$0xff]  }
 0x30f   : > { %3406 = vmatprep.subr.bf16.mxu1 %v5015_v35  ;;  %v5099_v16 = vld [vmem:[%s6828_s7 + $0x7cc] ss:$16 sps:$4 sm:$0xff]   ;;  %v5094_v35 = vld [vmem:[%s6828_s7 + $0x5c8] ss:$16 sps:$4 sm:$0xff]  }
 0x311   : > { %3366 = vmatpush2.bf16.msra.mxu0 %v5010_v2  ;;  %v5097_v2 = vld [vmem:[%s6828_s7 + $0x7c8] ss:$16 sps:$4 sm:$0xff]  }
 0x312   : > { %3407 = vmatpush2.bf16.msra.mxu1 %v5013_v4  ;;  %3367 = vmatprep.subr.bf16.mxu0 %v5018_v5  ;;  %v5102_v4 = vld [vmem:[%s6828_s7 + $0x5ac] ss:$16 sps:$4 sm:$0xff]  }
 0x313   : > { %3408 = vmatprep.subr.bf16.mxu1 %v5021_v6  ;;  %v5105_v5 = vld [vmem:[%s6828_s7 + $0x7ac] ss:$16 sps:$4 sm:$0xff]   ;;  %v5100_v6 = vld [vmem:[%s6828_s7 + $0x5a8] ss:$16 sps:$4 sm:$0xff]  }
 0x315   : > { %3368 = vmatpush2.bf16.msra.mxu0 %v5016_v36  ;;  %v5103_v36 = vld [vmem:[%s6828_s7 + $0x7a8] ss:$16 sps:$4 sm:$0xff]  }
 0x316   : > { %3409 = vmatpush2.bf16.msra.mxu1 %v5019_v7  ;;  %3369 = vmatprep.subr.bf16.mxu0 %v5024_v8  ;;  %v5108_v7 = vld [vmem:[%s6828_s7 + $0x58c] ss:$16 sps:$4 sm:$0xff]  }
 0x317   : > { %3410 = vmatprep.subr.bf16.mxu1 %v5027_v17  ;;  %v5111_v8 = vld [vmem:[%s6828_s7 + $0x78c] ss:$16 sps:$4 sm:$0xff]   ;;  %v5106_v17 = vld [vmem:[%s6828_s7 + $0x588] ss:$16 sps:$4 sm:$0xff]  }
 0x319   : > { %3370 = vmatpush2.bf16.msra.mxu0 %v5022_v3  ;;  %v5109_v3 = vld [vmem:[%s6828_s7 + $0x788] ss:$16 sps:$4 sm:$0xff]  }
 0x31a   : > { %3411 = vmatpush2.bf16.msra.mxu1 %v5025_v11  ;;  %3371 = vmatprep.subr.bf16.mxu0 %v5030_v12  ;;  %v5114_v11 = vld [vmem:[%s6828_s7 + $0x56c] ss:$16 sps:$4 sm:$0xff]  }
 0x31b   : > { %3412 = vmatprep.subr.bf16.mxu1 %v5033_v14  ;;  %v5117_v12 = vld [vmem:[%s6828_s7 + $0x76c] ss:$16 sps:$4 sm:$0xff]   ;;  %v5112_v14 = vld [vmem:[%s6828_s7 + $0x568] ss:$16 sps:$4 sm:$0xff]  }
 0x31d   : > { %3372 = vmatpush2.bf16.msra.mxu0 %v5028_v53  ;;  %v5115_v53 = vld [vmem:[%s6828_s7 + $0x768] ss:$16 sps:$4 sm:$0xff]  }
 0x31e   : > { %3413 = vmatpush2.bf16.msra.mxu1 %v5031_v59  ;;  %3373 = vmatprep.subr.bf16.mxu0 %v5036_v23  ;;  %v5120_v59 = vld [vmem:[%s6828_s7 + $0x54c] ss:$16 sps:$4 sm:$0xff]  }
 0x31f   : > { %3414 = vmatprep.subr.bf16.mxu1 %v5039_v29  ;;  %v5123_v23 = vld [vmem:[%s6828_s7 + $0x74c] ss:$16 sps:$4 sm:$0xff]   ;;  %v5118_v29 = vld [vmem:[%s6828_s7 + $0x548] ss:$16 sps:$4 sm:$0xff]  }
 0x321   : > { %3374 = vmatpush2.bf16.msra.mxu0 %v5034_v18  ;;  %v5121_v18 = vld [vmem:[%s6828_s7 + $0x748] ss:$16 sps:$4 sm:$0xff]  }
 0x322   : > { %3415 = vmatpush2.bf16.msra.mxu1 %v5037_v30  ;;  %3425 = vmatprep.subr.bf16.mxu0 %v5042_v19  ;;  %v5126_v30 = vld [vmem:[%s6828_s7 + $0x52c] ss:$16 sps:$4 sm:$0xff]  }
 0x323   : > { %3466 = vmatprep.subr.bf16.mxu1 %v5045_v31  ;;  %v5129_v19 = vld [vmem:[%s6828_s7 + $0x72c] ss:$16 sps:$4 sm:$0xff]   ;;  %v5124_v31 = vld [vmem:[%s6828_s7 + $0x528] ss:$16 sps:$4 sm:$0xff]  }
 0x324   : > { %3376 = vmatmul.mubr.bf16.vlgmr.msra.gmra.mxu0 %v5905_v24  ;;  %v5054_v24 = vld [vmem:[%s6828_s7 + $0x4ac] ss:$16 sps:$4 sm:$0xff]  }
 0x325   : > { %3417 = vmatmul.mubr.bf16.vlgmr.msra.gmra.mxu1 %v5907_v25  ;;  %3426 = vmatpush1.bf16.msra.mxu0 %v5040_v32  ;;  %v5057_v25 = vld [vmem:[%s6828_s7 + $0x6ac] ss:$16 sps:$4 sm:$0xff]   ;;  %v5127_v32 = vld [vmem:[%s6828_s7 + $0x728] ss:$16 sps:$4 sm:$0xff]  }
 0x326   : > { %3457 = vmatprep.mubr.bf16.mxu0 %v6037_v15  ;;  %3467 = vmatpush1.bf16.msra.mxu1 %v5043_v37  ;;  %v5052_v15 = vld [vmem:[%s6828_s7 + $0x4a8] ss:$16 sps:$4 sm:$0xff]   ;;  %v5132_v37 = vld [vmem:[%s6828_s7 + $0x50c] ss:$16 sps:$4 sm:$0xff]  }
 0x327   : > { %3498 = vmatprep.mubr.bf16.mxu1 %v6039_v22  ;;  %3427 = vmatprep.subr.bf16.mxu0 %v5048_v28  ;;  %v5060_v22 = vld [vmem:[%s6828_s7 + $0x48c] ss:$16 sps:$4 sm:$0xff]  }
 0x328   : > { %3468 = vmatprep.subr.bf16.mxu1 %v5051_v20  ;;  %v5135_v28 = vld [vmem:[%s6828_s7 + $0x70c] ss:$16 sps:$4 sm:$0xff]   ;;  %v5130_v20 = vld [vmem:[%s6828_s7 + $0x508] ss:$16 sps:$4 sm:$0xff]  }
 0x329   : > { %3428 = vmatpush1.bf16.msra.mxu0 %v5046_v33  ;;  %v5133_v33 = vld [vmem:[%s6828_s7 + $0x708] ss:$16 sps:$4 sm:$0xff]  }
 0x32a   : > { %3469 = vmatpush1.bf16.msra.mxu1 %v5049_v47  ;;  %3429 = vmatprep.subr.bf16.mxu0 %v5054_v24  ;;  %v5138_v47 = vld [vmem:[%s6830_s9 + $0x74] ss:$8 sps:$4 sm:$0xff]   ;;  %v5136_v24 = vld [vmem:[%s6830_s9 + $0x70] ss:$8 sps:$4 sm:$0xff]  }
 0x32b   : > { %3470 = vmatprep.subr.bf16.mxu1 %v5057_v25  ;;  %v5141_v25 = vld [vmem:[%s6830_s9 + $0x64] ss:$8 sps:$4 sm:$0xff]  }
 0x32d   : > { %3430 = vmatpush1.bf16.msra.mxu0 %v5052_v15 }
 0x32e   : > { %3471 = vmatpush1.bf16.msra.mxu1 %v5055_v38  ;;  %3431 = vmatprep.subr.bf16.mxu0 %v5060_v22  ;;  %v5139_v22 = vld [vmem:[%s6830_s9 + $0x60] ss:$8 sps:$4 sm:$0xff]  }
 0x32f   : > { %3472 = vmatprep.subr.bf16.mxu1 %v5063_v39 }
 0x331   : > { %3432 = vmatpush1.bf16.msra.mxu0 %v5058_v40 }
 0x332   : > { %3473 = vmatpush1.bf16.msra.mxu1 %v5061_v21  ;;  %3433 = vmatprep.subr.bf16.mxu0 %v5066_v34 }
 0x333   : > { %3474 = vmatprep.subr.bf16.mxu1 %v5069_v41 }
 0x335   : > { %3434 = vmatpush1.bf16.msra.mxu0 %v5064_v42 }
 0x336   : > { %3475 = vmatpush1.bf16.msra.mxu1 %v5067_v50  ;;  %3435 = vmatprep.subr.bf16.mxu0 %v5072_v45  ;;  %v5147_v50 = vld [vmem:[%s6830_s9 + $0x44] ss:$8 sps:$4 sm:$0xff]   ;;  %v5184_v45 = vld [vmem:[%s6830_s9 + $0x170] ss:$8 sps:$4 sm:$0xff]  }
 0x337   : > { %3476 = vmatprep.subr.bf16.mxu1 %v5075_v46  ;;  %v5186_v46 = vld [vmem:[%s6830_s9 + $0x174] ss:$8 sps:$4 sm:$0xff]  }
 0x339   : > { %3436 = vmatpush1.bf16.msra.mxu0 %v5070_v51  ;;  %v5189_v51 = vld [vmem:[%s6830_s9 + $0x164] ss:$8 sps:$4 sm:$0xff]  }
 0x33a   : > { %3477 = vmatpush1.bf16.msra.mxu1 %v5073_v0  ;;  %3437 = vmatprep.subr.bf16.mxu0 %v5078_v52  ;;  %v5145_v0 = vld [vmem:[%s6830_s9 + $0x40] ss:$8 sps:$4 sm:$0xff]   ;;  %v5150_v52 = vld [vmem:[%s6830_s9 + $0x34] ss:$8 sps:$4 sm:$0xff]  }
 0x33b   : > { %3478 = vmatprep.subr.bf16.mxu1 %v5081_v54  ;;  %v5187_v54 = vld [vmem:[%s6830_s9 + $0x160] ss:$8 sps:$4 sm:$0xff]  }
 0x33d   : > { %3438 = vmatpush1.bf16.msra.mxu0 %v5076_v55  ;;  %v5192_v55 = vld [vmem:[%s6830_s9 + $0x154] ss:$8 sps:$4 sm:$0xff]  }
 0x33e   : > { %3479 = vmatpush1.bf16.msra.mxu1 %v5079_v56  ;;  %3439 = vmatprep.subr.bf16.mxu0 %v5084_v57  ;;  %v5148_v56 = vld [vmem:[%s6830_s9 + $0x30] ss:$8 sps:$4 sm:$0xff]   ;;  %v5153_v57 = vld [vmem:[%s6830_s9 + $0x24] ss:$8 sps:$4 sm:$0xff]  }
 0x33f   : > { %3480 = vmatprep.subr.bf16.mxu1 %v5087_v1  ;;  %v5190_v1 = vld [vmem:[%s6830_s9 + $0x150] ss:$8 sps:$4 sm:$0xff]  }
 0x341   : > { %3440 = vmatpush1.bf16.msra.mxu0 %v5082_v58  ;;  %v5195_v58 = vld [vmem:[%s6830_s9 + $0x144] ss:$8 sps:$4 sm:$0xff]  }
 0x342   : > { %3481 = vmatpush1.bf16.msra.mxu1 %v5085_v60  ;;  %3441 = vmatprep.subr.bf16.mxu0 %v5090_v61  ;;  %v5151_v60 = vld [vmem:[%s6830_s9 + $0x20] ss:$8 sps:$4 sm:$0xff]   ;;  %v5156_v61 = vld [vmem:[%s6830_s9 + $0x14] ss:$8 sps:$4 sm:$0xff]  }
 0x343   : > { %3482 = vmatprep.subr.bf16.mxu1 %v5093_v9  ;;  %v5193_v9 = vld [vmem:[%s6830_s9 + $0x140] ss:$8 sps:$4 sm:$0xff]  }
 0x345   : > { %3442 = vmatpush2.bf16.msra.mxu0 %v5088_v62  ;;  %v5198_v62 = vld [vmem:[%s6830_s9 + $0x134] ss:$8 sps:$4 sm:$0xff]  }
 0x346   : > { %3483 = vmatpush2.bf16.msra.mxu1 %v5091_v63  ;;  %3443 = vmatprep.subr.bf16.mxu0 %v5096_v10  ;;  %v5154_v63 = vld [vmem:[%s6830_s9 + $0x10] ss:$8 sps:$4 sm:$0xff]   ;;  %v5159_v10 = vld [vmem:[%s6830_s9 + $0x4] ss:$8 sps:$4 sm:$0xff]  }
 0x347   : > { %3484 = vmatprep.subr.bf16.mxu1 %v5099_v16  ;;  %v5196_v16 = vld [vmem:[%s6830_s9 + $0x130] ss:$8 sps:$4 sm:$0xff]  }
 0x349   : > { %3444 = vmatpush2.bf16.msra.mxu0 %v5094_v35  ;;  %v5201_v35 = vld [vmem:[%s6830_s9 + $0x124] ss:$8 sps:$4 sm:$0xff]  }
 0x34a   : > { %3485 = vmatpush2.bf16.msra.mxu1 %v5097_v2  ;;  %3445 = vmatprep.subr.bf16.mxu0 %v5102_v4  ;;  %v5157_v2 = vld [vmem:[%s6830_s9] ss:$8 sps:$4 sm:$0xff]   ;;  %v5162_v4 = vld [vmem:[%s6830_s9 + $0xf4] ss:$8 sps:$4 sm:$0xff]  }
 0x34b   : > { %3486 = vmatprep.subr.bf16.mxu1 %v5105_v5  ;;  %v5199_v5 = vld [vmem:[%s6830_s9 + $0x120] ss:$8 sps:$4 sm:$0xff]  }
 0x34d   : > { %3446 = vmatpush2.bf16.msra.mxu0 %v5100_v6  ;;  %v5204_v6 = vld [vmem:[%s6830_s9 + $0x114] ss:$8 sps:$4 sm:$0xff]  }
 0x34e   : > { %3487 = vmatpush2.bf16.msra.mxu1 %v5103_v36  ;;  %3447 = vmatprep.subr.bf16.mxu0 %v5108_v7  ;;  %v5160_v36 = vld [vmem:[%s6830_s9 + $0xf0] ss:$8 sps:$4 sm:$0xff]   ;;  %v5165_v7 = vld [vmem:[%s6830_s9 + $0xe4] ss:$8 sps:$4 sm:$0xff]  }
 0x34f   : > { %3488 = vmatprep.subr.bf16.mxu1 %v5111_v8  ;;  %v5202_v8 = vld [vmem:[%s6830_s9 + $0x110] ss:$8 sps:$4 sm:$0xff]  }
 0x351   : > { %3448 = vmatpush2.bf16.msra.mxu0 %v5106_v17  ;;  %v5207_v17 = vld [vmem:[%s6830_s9 + $0x104] ss:$8 sps:$4 sm:$0xff]  }
 0x352   : > { %3489 = vmatpush2.bf16.msra.mxu1 %v5109_v3  ;;  %3449 = vmatprep.subr.bf16.mxu0 %v5114_v11  ;;  %v5163_v3 = vld [vmem:[%s6830_s9 + $0xe0] ss:$8 sps:$4 sm:$0xff]   ;;  %v5168_v11 = vld [vmem:[%s6830_s9 + $0xd4] ss:$8 sps:$4 sm:$0xff]  }
 0x353   : > { %3490 = vmatprep.subr.bf16.mxu1 %v5117_v12  ;;  %v5205_v12 = vld [vmem:[%s6830_s9 + $0x100] ss:$8 sps:$4 sm:$0xff]  }
 0x355   : > { %3450 = vmatpush2.bf16.msra.mxu0 %v5112_v14  ;;  %v5210_v14 = vld [vmem:[%s6830_s9 + $0x1f4] ss:$8 sps:$4 sm:$0xff]  }
 0x356   : > { %3491 = vmatpush2.bf16.msra.mxu1 %v5115_v53  ;;  %3451 = vmatprep.subr.bf16.mxu0 %v5120_v59  ;;  %v5166_v53 = vld [vmem:[%s6830_s9 + $0xd0] ss:$8 sps:$4 sm:$0xff]   ;;  %v5171_v59 = vld [vmem:[%s6830_s9 + $0xc4] ss:$8 sps:$4 sm:$0xff]  }
 0x357   : > { %3492 = vmatprep.subr.bf16.mxu1 %v5123_v23  ;;  %v5208_v23 = vld [vmem:[%s6830_s9 + $0x1f0] ss:$8 sps:$4 sm:$0xff]  }
 0x359   : > { %3452 = vmatpush2.bf16.msra.mxu0 %v5118_v29  ;;  %v5213_v29 = vld [vmem:[%s6830_s9 + $0x1e4] ss:$8 sps:$4 sm:$0xff]  }
 0x35a   : > { %3493 = vmatpush2.bf16.msra.mxu1 %v5121_v18  ;;  %3453 = vmatprep.subr.bf16.mxu0 %v5126_v30  ;;  %v5169_v18 = vld [vmem:[%s6830_s9 + $0xc0] ss:$8 sps:$4 sm:$0xff]   ;;  %v5174_v30 = vld [vmem:[%s6830_s9 + $0xb4] ss:$8 sps:$4 sm:$0xff]  }
 0x35b   : > { %3494 = vmatprep.subr.bf16.mxu1 %v5129_v19  ;;  %v5211_v19 = vld [vmem:[%s6830_s9 + $0x1e0] ss:$8 sps:$4 sm:$0xff]  }
 0x35d   : > { %3454 = vmatpush2.bf16.msra.mxu0 %v5124_v31  ;;  %v5216_v31 = vld [vmem:[%s6830_s9 + $0x1d4] ss:$8 sps:$4 sm:$0xff]  }
 0x35e   : > { %3495 = vmatpush2.bf16.msra.mxu1 %v5127_v32  ;;  %3455 = vmatprep.subr.bf16.mxu0 %v5132_v37  ;;  %v5172_v32 = vld [vmem:[%s6830_s9 + $0xb0] ss:$8 sps:$4 sm:$0xff]   ;;  %v5177_v37 = vld [vmem:[%s6830_s9 + $0xa4] ss:$8 sps:$4 sm:$0xff]  }
 0x35f   : > { %3496 = vmatprep.subr.bf16.mxu1 %v5135_v28  ;;  %v5214_v28 = vld [vmem:[%s6830_s9 + $0x1d0] ss:$8 sps:$4 sm:$0xff]  }
 0x361   : > { %3456 = vmatpush2.bf16.msra.mxu0 %v5130_v20  ;;  %v5219_v20 = vld [vmem:[%s6830_s9 + $0x1c4] ss:$8 sps:$4 sm:$0xff]  }
 0x362   : > { %3497 = vmatpush2.bf16.msra.mxu1 %v5133_v33  ;;  %3911 = vmatprep.subr.bf16.mxu0 %v5138_v47  ;;  %v5175_v33 = vld [vmem:[%s6830_s9 + $0xa0] ss:$8 sps:$4 sm:$0xff]   ;;  %v5180_v47 = vld [vmem:[%s6830_s9 + $0x94] ss:$8 sps:$4 sm:$0xff]  }
 0x363   : > { %3952 = vmatprep.subr.bf16.mxu1 %v5186_v46 }
 0x364   : > { %3458 = vmatmul.mubr.bf16.vlgmr.msra.gmra.mxu0 %v6144_v48  ;;  %v6541_v15 = vpop.f32.mrf.mxu0  ;;  %v6543_v38 = vpop.f32.mrf.mxu1  ;;  %v5144_v48 = vld [vmem:[%s6830_s9 + $0x54] ss:$8 sps:$4 sm:$0xff]  }
 0x365   : > { %3499 = vmatmul.mubr.bf16.vlgmr.msra.gmra.mxu1 %v6146_v49  ;;  %3912 = vmatpush1.bf16.msra.mxu0 %v5136_v24  ;;  %v5142_v49 = vld [vmem:[%s6830_s9 + $0x50] ss:$8 sps:$4 sm:$0xff]   ;;  %v5217_v24 = vld [vmem:[%s6830_s9 + $0x1c0] ss:$8 sps:$4 sm:$0xff]  }
 0x366   : > { %v6549_v39 = vpop.f32.mrf.mxu0  ;;  %v6551_v40 = vpop.f32.mrf.mxu1  ;;  %3913 = vmatprep.subr.bf16.mxu0 %v5141_v25  ;;  %3953 = vmatpush1.bf16.msra.mxu1 %v5184_v45  ;;  %v5222_v25 = vld [vmem:[%s6830_s9 + $0x1b4] ss:$8 sps:$4 sm:$0xff]  }
 0x367   : > { %3954 = vmatprep.subr.bf16.mxu1 %v5189_v51 }
 0x368   : > { %v3217_v21 = vpop.f32.mrf.mxu0  ;;  %v3258_v34 = vpop.f32.mrf.mxu1 }
 0x369   : > { %3914 = vmatpush1.bf16.msra.mxu0 %v5139_v22  ;;  %v6706_v22 = vld [vmem:[%s6829_s8] sm:$0xf]  ;;  %v5183_v21 = vld [vmem:[%s6830_s9 + $0x84] ss:$8 sps:$4 sm:$0xff]   ;;  %v5220_v34 = vld [vmem:[%s6830_s9 + $0x1b0] ss:$8 sps:$4 sm:$0xff]  }
 0x36a   : > { %v3218_v41 = vpop.f32.mrf.mxu0  ;;  %v3259_v42 = vpop.f32.mrf.mxu1  ;;  %3915 = vmatprep.subr.bf16.mxu0 %v5144_v48  ;;  %3955 = vmatpush1.bf16.msra.mxu1 %v5187_v54  ;;  %v5178_v48 = vld [vmem:[%s6830_s9 + $0x90] ss:$8 sps:$4 sm:$0xff]  }
 0x36b   : > { %3956 = vmatprep.subr.bf16.mxu1 %v5192_v55  ;;  %v3166_v41 = vrot.slane %v6706_v22, %v5875_v43  ;;  %v5181_v42 = vld [vmem:[%s6830_s9 + $0x80] ss:$8 sps:$4 sm:$0xff]  }
 0x36d   : > { %3916 = vmatpush1.bf16.msra.mxu0 %v5142_v49  ;;  %v3162_v49 = vrot.slane %v6706_v22, %v5858_v26  ;;  %v3216_v45 = vadd.f32 %v6549_v39, %v3166_v41 }
 0x36e   : > { %3917 = vmatprep.subr.bf16.mxu0 %v5147_v50  ;;  %3957 = vmatpush1.bf16.msra.mxu1 %v5190_v1 }
 0x36f   : > { %3958 = vmatprep.subr.bf16.mxu1 %v5195_v58  ;;  %v3214_v50 = vadd.f32 %v6541_v15, %v3162_v49  ;;  %v3257_v54 = vadd.f32 %v6551_v40, %v3216_v45  ;;  %v5226_v40 = vld [vmem:[%s6830_s9 + $0x190] ss:$8 sps:$4 sm:$0xff]  }
 0x371   : > { %3918 = vmatpush1.bf16.msra.mxu0 %v5145_v0  ;;  %v3255_v46 = vadd.f32 %v6543_v38, %v3214_v50 }
 0x372   : > { %3919 = vmatprep.subr.bf16.mxu0 %v5150_v52  ;;  %3959 = vmatpush1.bf16.msra.mxu1 %v5193_v9  ;;  %v5225_v52 = vld [vmem:[%s6830_s9 + $0x1a4] ss:$8 sps:$4 sm:$0xff]  }
 0x373   : > { %3960 = vmatprep.subr.bf16.mxu1 %v5198_v62 }
 0x375   : > { %3920 = vmatpush1.bf16.msra.mxu0 %v5148_v56  ;;  %v5223_v56 = vld [vmem:[%s6830_s9 + $0x1a0] ss:$8 sps:$4 sm:$0xff]  }
 0x376   : > { %3921 = vmatprep.subr.bf16.mxu0 %v5153_v57  ;;  %3961 = vmatpush1.bf16.msra.mxu1 %v5196_v16  ;;  %v5231_v16 = vld [vmem:[%s6830_s9 + $0x184] ss:$8 sps:$4 sm:$0xff]  }
 0x377   : > { %3962 = vmatprep.subr.bf16.mxu1 %v5201_v35 }
 0x379   : > { %3922 = vmatpush1.bf16.msra.mxu0 %v5151_v60  ;;  %v5228_v60 = vld [vmem:[%s6830_s9 + $0x194] ss:$8 sps:$4 sm:$0xff]  }
 0x37a   : > { %3923 = vmatprep.subr.bf16.mxu0 %v5156_v61  ;;  %3963 = vmatpush1.bf16.msra.mxu1 %v5199_v5 }
 0x37b   : > { %3964 = vmatprep.subr.bf16.mxu1 %v5204_v6 }
 0x37d   : > { %3924 = vmatpush1.bf16.msra.mxu0 %v5154_v63 }
 0x37e   : > { %3925 = vmatprep.subr.bf16.mxu0 %v5159_v10  ;;  %3965 = vmatpush1.bf16.msra.mxu1 %v5202_v8 }
 0x37f   : > { %3966 = vmatprep.subr.bf16.mxu1 %v5207_v17 }
 0x381   : > { %3926 = vmatpush1.bf16.msra.mxu0 %v5157_v2  ;;  %v5229_v2 = vld [vmem:[%s6830_s9 + $0x180] ss:$8 sps:$4 sm:$0xff]  }
 0x382   : > { %3927 = vmatprep.subr.bf16.mxu0 %v5162_v4  ;;  %3967 = vmatpush1.bf16.msra.mxu1 %v5205_v12  ;;  %v5232_v12 = vld [vmem:[%s6832_s11 + $0x78] sm:$0xff]  }
 0x383   : > { %3968 = vmatprep.subr.bf16.mxu1 %v5210_v14  ;;  %v5233_v14 = vld [vmem:[%s6832_s11 + $0x38] sm:$0xff]  }
 0x385   : > { %3928 = vmatpush2.bf16.msra.mxu0 %v5160_v36 }
 0x386   : > { %3929 = vmatprep.subr.bf16.mxu0 %v5165_v7  ;;  %3969 = vmatpush2.bf16.msra.mxu1 %v5208_v23  ;;  %v5236_v23 = vld [vmem:[%s6832_s11 + $0x68] sm:$0xff]  }
 0x387   : > { %3970 = vmatprep.subr.bf16.mxu1 %v5213_v29  ;;  %v5237_v29 = vld [vmem:[%s6832_s11 + $0x28] sm:$0xff]  }
 0x389   : > { %3930 = vmatpush2.bf16.msra.mxu0 %v5163_v3 }
 0x38a   : > { %3931 = vmatprep.subr.bf16.mxu0 %v5168_v11  ;;  %3971 = vmatpush2.bf16.msra.mxu1 %v5211_v19  ;;  %v5240_v19 = vld [vmem:[%s6832_s11 + $0x58] sm:$0xff]  }
 0x38b   : > { %3972 = vmatprep.subr.bf16.mxu1 %v5216_v31  ;;  %v5241_v31 = vld [vmem:[%s6832_s11 + $0x18] sm:$0xff]  }
 0x38d   : > { %3932 = vmatpush2.bf16.msra.mxu0 %v5166_v53  ;;  %v5234_v53 = vld [vmem:[%s6832_s11 + $0x70] sm:$0xff]  }
 0x38e   : > { %3933 = vmatprep.subr.bf16.mxu0 %v5171_v59  ;;  %3973 = vmatpush2.bf16.msra.mxu1 %v5214_v28  ;;  %v5235_v59 = vld [vmem:[%s6832_s11 + $0x30] sm:$0xff]   ;;  %v3170_v28 = vrot.slane %v6706_v22, %v1567_v27 }
 0x38f   : > { %3974 = vmatprep.subr.bf16.mxu1 %v5219_v20  ;;  %v3174_v20 = vrot.slane %v6706_v22, %v1571_v44 }
 0x391   : > { %3934 = vmatpush2.bf16.msra.mxu0 %v5169_v18  ;;  %v5238_v18 = vld [vmem:[%s6832_s11 + $0x60] sm:$0xff]  }
 0x392   : > { %3935 = vmatprep.subr.bf16.mxu0 %v5174_v30  ;;  %3975 = vmatpush2.bf16.msra.mxu1 %v5217_v24  ;;  %v5239_v30 = vld [vmem:[%s6832_s11 + $0x20] sm:$0xff]  }
 0x393   : > { %3976 = vmatprep.subr.bf16.mxu1 %v5222_v25 }
 0x395   : > { %3936 = vmatpush2.bf16.msra.mxu0 %v5172_v32  ;;  %v5242_v32 = vld [vmem:[%s6832_s11 + $0x50] sm:$0xff]  }
 0x396   : > { %3937 = vmatprep.subr.bf16.mxu0 %v5177_v37  ;;  %3977 = vmatpush2.bf16.msra.mxu1 %v5220_v34  ;;  %v5243_v37 = vld [vmem:[%s6832_s11 + $0x10] sm:$0xff]  }
 0x397   : > { %3978 = vmatprep.subr.bf16.mxu1 %v5225_v52 }
 0x399   : > { %3938 = vmatpush2.bf16.msra.mxu0 %v5175_v33 }
 0x39a   : > { %3939 = vmatprep.subr.bf16.mxu0 %v5180_v47  ;;  %3979 = vmatpush2.bf16.msra.mxu1 %v5223_v56  ;;  %v5244_v56 = vld [vmem:[%s6832_s11 + $0x48] sm:$0xff]  }
 0x39b   : > { %3980 = vmatprep.subr.bf16.mxu1 %v5228_v60 }
 0x39d   : > { %3940 = vmatpush2.bf16.msra.mxu0 %v5178_v48 }
 0x39e   : > { %3941 = vmatprep.subr.bf16.mxu0 %v5183_v21  ;;  %3981 = vmatpush2.bf16.msra.mxu1 %v5226_v40 }
 0x39f   : > { %3982 = vmatprep.subr.bf16.mxu1 %v5231_v16 }
 0x3a1   : > { %3942 = vmatpush2.bf16.msra.mxu0 %v5181_v42 }
 0x3a2   : > { %3983 = vmatpush2.bf16.msra.mxu1 %v5229_v2  ;;  %4670 = vmatprep.subr.bf16.mxu0 %v5232_v12 }
 0x3a4   : > { %v3295_v51 = vpop.f32.mrf.mxu0  ;;  %v3336_v0 = vpop.f32.mrf.mxu1 }
 0x3a5   : > { %v3296_v55 = vadd.f32 %v3295_v51, %v3255_v46 }
 0x3a6   : > { %v3297_v57 = vpop.f32.mrf.mxu0  ;;  %v3338_v15 = vpop.f32.mrf.mxu1 }
 0x3a7   : > { %v3337_v39 = vadd.f32 %v3336_v0, %v3296_v55  ;;  %v3298_v1 = vadd.f32 %v3297_v57, %v3257_v54  ;;  %v5245_v57 = vld [vmem:[%s6832_s11 + $0x8] sm:$0xff]  }
 0x3a8   : > { %v3299_v38 = vpop.f32.mrf.mxu0  ;;  %v3340_v58 = vpop.f32.mrf.mxu1 }
 0x3a9   : > { %v3339_v61 = vadd.f32 %v3338_v15, %v3298_v1  ;;  %v3507_v9 = vmax.f32 %v3337_v39, 0.0  ;;  %v5246_v1 = vld [vmem:[%s6832_s11 + $0x40] sm:$0xff]  }
 0x3aa   : > { %v3300_v62 = vpop.f32.mrf.mxu0  ;;  %v3341_v63 = vpop.f32.mrf.mxu1  ;;  %v5247_v38 = vld [vmem:[%s6832_s11] sm:$0xff]  }
 0x3ab   : > { %v3508_v10 = vmax.f32 %v3339_v61, 0.0  ;;  %v3576_v4 = vpack.c.bf16 %v3507_v9, %v3507_v9  ;;  %v3575_v58 = vld [vmem:[%s6831_s10] sm:$0x3] }
 0x3ac   : > { %v3904_v60 = vrot.slane %v3575_v58, %v5858_v26  ;;  %v3908_v61 = vrot.slane %v3575_v58, %v5875_v43  ;;  %v4027_v26 = vld [vmem:[%s6833_s12] sm:$0x1] }
 0x3ad   : > { %v3577_v35 = vpack.c.bf16 %v3508_v10, %v3508_v10 }
 0x3af   : > { %3943 = vmatprep.mubr.bf16.mxu0 %v3577_v35 }
 0x3b0   : > { %3944 = vmatmul.mubr.bf16.vlgmr.msra.gmra.mxu0 %v3576_v4 }
 0x3b1   : > { %4671 = vmatpush3.bf16.msra.mxu0 %v5233_v14 }
 0x3b2   : > { %4672 = vmatprep.subr.bf16.mxu0 %v5234_v53 }
 0x3b5   : > { %4673 = vmatpush3.bf16.msra.mxu0 %v5235_v59 }
 0x3b6   : > { %4674 = vmatprep.subr.bf16.mxu0 %v5236_v23 }
 0x3b9   : > { %4675 = vmatpush3.bf16.msra.mxu0 %v5237_v29 }
 0x3ba   : > { %4676 = vmatprep.subr.bf16.mxu0 %v5238_v18 }
 0x3bd   : > { %4677 = vmatpush3.bf16.msra.mxu0 %v5239_v30 }
 0x3be   : > { %4678 = vmatprep.subr.bf16.mxu0 %v5240_v19 }
 0x3c1   : > { %4679 = vmatpush3.bf16.msra.mxu0 %v5241_v31 }
 0x3c2   : > { %4680 = vmatprep.subr.bf16.mxu0 %v5242_v32 }
 0x3c5   : > { %4681 = vmatpush3.bf16.msra.mxu0 %v5243_v37 }
 0x3c6   : > { %4682 = vmatprep.subr.bf16.mxu0 %v5244_v56 }
 0x3c9   : > { %4683 = vmatpush3.bf16.msra.mxu0 %v5245_v57 }
 0x3ca   : > { %4684 = vmatprep.subr.bf16.mxu0 %v5246_v1 }
 0x3cd   : > { %4685 = vmatpush3.bf16.msra.mxu0 %v5247_v38 }
 0x3e4   : > { %v3377_v5 = vpop.f32.mrf.mxu0 }
 0x3e5   : > { %v3418_v6 = vpop.f32.mrf.mxu1  ;;  %v3378_v33 = vadd.f32 %v3377_v5, %v3170_v28 }
 0x3e6   : > { %v3379_v36 = vpop.f32.mrf.mxu0 }
 0x3e7   : > { %v3420_v7 = vpop.f32.mrf.mxu1  ;;  %v3380_v47 = vadd.f32 %v3379_v36, %v3174_v20  ;;  %v3419_v24 = vadd.f32 %v3418_v6, %v3378_v33 }
 0x3e8   : > { %v3381_v8 = vpop.f32.mrf.mxu0 }
 0x3e9   : > { %v3422_v17 = vpop.f32.mrf.mxu1  ;;  %v3421_v48 = vadd.f32 %v3420_v7, %v3380_v47 }
 0x3ea   : > { %v3382_v3 = vpop.f32.mrf.mxu0 }
 0x3eb   : > { %v3423_v11 = vpop.f32.mrf.mxu1 }
 0x424   : > { %v3459_v25 = vpop.f32.mrf.mxu0 }
 0x425   : > { %v3460_v21 = vadd.f32 %v3459_v25, %v3419_v24  ;;  %v3500_v34 = vpop.f32.mrf.mxu1 }
 0x426   : > { %v3461_v49 = vpop.f32.mrf.mxu0 }
 0x427   : > { %v3501_v41 = vadd.f32 %v3500_v34, %v3460_v21  ;;  %v3462_v42 = vadd.f32 %v3461_v49, %v3421_v48  ;;  %v3502_v50 = vpop.f32.mrf.mxu1 }
 0x428   : > { %v3463_v45 = vpop.f32.mrf.mxu0 }
 0x429   : > { %v3503_v46 = vadd.f32 %v3502_v50, %v3462_v42  ;;  %v3504_v51 = vpop.f32.mrf.mxu1  ;;  %v3509_v0 = vmax.f32 %v3501_v41, 0.0 }
 0x42a   : > { %v3464_v27 = vpop.f32.mrf.mxu0 }
 0x42b   : > { %v3510_v52 = vmax.f32 %v3503_v46, 0.0  ;;  %v3505_v13 = vpop.f32.mrf.mxu1  ;;  %v3578_v44 = vpack.c.bf16 %v3509_v0, %v3509_v0 }
 0x42d   : > { %v3579_v54 = vpack.c.bf16 %v3510_v52, %v3510_v52 }
 0x42f   : > { %3984 = vmatprep.mubr.bf16.mxu1 %v3579_v54 }
 0x430   : > { %3985 = vmatmul.mubr.bf16.vlgmr.msra.gmra.mxu1 %v3578_v44 }
 0x470   : > { %v3945_v22 = vpop.f32.mrf.mxu0 }
 0x471   : > { %v3946_v40 = vadd.f32 %v3945_v22, %v3904_v60 }
 0x472   : > { %v3947_v55 = vpop.f32.mrf.mxu0 }
 0x473   : > { %v3948_v62 = vadd.f32 %v3947_v55, %v3908_v61 }
 0x474   : > { %v3949_v15 = vpop.f32.mrf.mxu0 }
 0x476   : > { %v3950_v39 = vpop.f32.mrf.mxu0 }
 0x4f0   : > { %v3986_v9 = vpop.f32.mrf.mxu1 }
 0x4f1   : > { %v3987_v63 = vadd.f32 %v3986_v9, %v3946_v40 }
 0x4f2   : > { %v3988_v10 = vpop.f32.mrf.mxu1 }
 0x4f3   : > { %v3989_v16 = vadd.f32 %v3988_v10, %v3948_v62  ;;  %v3993_v35 = vmax.f32 %v3987_v63, 0.0 }
 0x4f4   : > { %v3990_v2 = vpop.f32.mrf.mxu1 }
 0x4f5   : > { %v3994_v4 = vmax.f32 %v3989_v16, 0.0  ;;  %v4028_v36 = vpack.c.bf16 %v3993_v35, %v3993_v35 }
 0x4f6   : > { %v3991_v5 = vpop.f32.mrf.mxu1 }
 0x4f7   : > { %v4029_v6 = vpack.c.bf16 %v3994_v4, %v3994_v4 }
 0x4f9   : > { %4158 = vmatprep.mubr.bf16.mxu0 %v4029_v6 }
 0x4fa   : > { %4159 = vmatmul.mubr.bf16.vlgmr.msra.gmra.mxu0 %v4028_v36 }
 0x5ba   : > { %v4686_v7 = vpop.f32.mrf.mxu0 }
 0x5bc   : > { %v4687_v43 = vpop.f32.mrf.mxu0 }
 0x5bd   : > { %v4688_v8 = vadd.f32 %v4687_v43, %v4686_v7 }
 0x5be   : > { %v4689_v17 = vpop.f32.mrf.mxu0 }
 0x5bf   : > { %v4161_v3 = vadd.f32 %v4688_v8, %v4027_v26 }
 0x5c0   : > { %v4690_v11 = vpop.f32.mrf.mxu0 }
 0x5c1   : > { %4167 = vst.msk [vmem:[%s464_s21] sm:$0x1] %vm4166_vm4, %v4161_v3 }
 0x5c2 PF: > { %s23_s27 = sadd.s32 1, %s5270_s27   ;;  %s6835_s25 = smov %s5266_s26 }
 0x5c3   : > { %p20_p5 = scmp.ge.s32.totalorder %s23_s27, 4   ;;  %s6836_s26 = smov %s6838_s28 }
 0x5c5   :  { %22 = sbr.rel (!%p20_p5) target bundleno = 2 (0x2), region = 110 }

// kernel: transform_forward.5
= control target key start
LH: loop header
LB: loop body
LE: loop exit
PB: predicated region body
PF: predicated region fallthrough
CT: control target
= control target key end

     0   :  { %s1665_s18 = smov 0   ;;  %s1667_s19 = smov 0   ;;  %s2030_s0 = inlined_call_operand.vmem [shape: bf16[2,64,64], index: 0, kind: input, shape index: {}]   ;;  %s2031_s1 = inlined_call_operand.vmem [shape: bf16[2,64,128], index: 1, kind: input, shape index: {}]   ;;  %s2032_s2 = inlined_call_operand.vmem [shape: f32[1,128], index: 2, kind: input, shape index: {}]   ;;  %s2033_s3 = inlined_call_operand.vmem [shape: bf16[128,1024], index: 3, kind: input, shape index: {}]   ;;  %s2034_s4 = inlined_call_operand.vmem [shape: f32[1,1024], index: 4, kind: input, shape index: {}]   ;;  %s2035_s5 = inlined_call_operand.vmem [shape: f32[2,1,1024], index: 5, kind: output, shape index: {}]  }
   0x1   :  { %s1669_s20 = smov 0  }
   0x2 LB: > { %s27_s21 = sadd.s32 1, %s1627_s19  ;;  %p1448_p0 = scmp.ge.s32.totalorder %s1631_s20, 1  ;;  %s1631_s20 = sphi %s1669_s20, %s15_s20   ;;  %s1627_s19 = sphi %s1667_s19, %s2037_s19   ;;  %s1623_s18 = sphi %s1665_s18, %s2036_s18  }
   0x3   : > { %p29_p1 = scmp.ge.s32.totalorder %s27_s21, 2  ;;  %p216_p2 = scmp.lt.s32.totalorder %s1631_s20, 3 }
   0x5   : > { %s2039_s21 = smov (%p29_p1, %s27_s21), 0  ;;  %p217_p3 = pnand %p1448_p0, %p216_p2 }
   0x6   : > { %p253_p4 = scmp.lt.s32.totalorder (!%p217_p3), %s1623_s18, 1 }
   0x7   : > { %220 = sbr.rel (%p217_p3) target bundleno = 527 (0x20f), region = 40 }
   0xc   : > { %v493_v0 = vld [vmem:[%s2033_s3 + $0x1c0] sm:$0xff]  ;;  %s2041_s18 = smov (!%p253_p4, %s1623_s18), 1  ;;  %vm351_vm0 = vcmask 523264   ;;  %v494_v24 = vld [vmem:[%s2033_s3 + $0x1c8] sm:$0xff] }
   0xd   : > { %v497_v1 = vld [vmem:[%s2033_s3 + $0x1e0] sm:$0xff]  ;;  %s1533_s9 = sshll.u32 %s2041_s18, 5  ;;  %v498_v25 = vld [vmem:[%s2033_s3 + $0x1e8] sm:$0xff]  ;;  %s1453_s10 = sshll.u32 %s2041_s18, 3 }
   0xe   : > { %v1524_v2 = vcombine.high %v493_v0, %v497_v1  ;;  %v1523_v3 = vcombine.low %v493_v0, %v497_v1  ;;  %v485_v4 = vld [vmem:[%s2033_s3 + $0x180] sm:$0xff]  ;;  %s266_s12 = scalar_lea.vmem %s2031_s1, %s1533_s9  ;;  %s1716_s23 = scalar_lea.vmem %s2030_s0, %s1533_s9  ;;  %v1526_v27 = vcombine.high %v494_v24, %v498_v25  ;;  %v486_v28 = vld [vmem:[%s2033_s3 + $0x188] sm:$0xff]  ;;  %v1525_v32 = vcombine.low %v494_v24, %v498_v25  ;;  %v487_v24 = vld [vmem:[%s2033_s3 + $0x190] sm:$0xff] }
   0xf   : > { %v489_v5 = vld [vmem:[%s2033_s3 + $0x1a0] sm:$0xff]  ;;  %v1601_v13 = vld [vmem:[%s266_s12 + $0x18] sm:$0xff]   ;;  %v1602_v14 = vld [vmem:[%s266_s12 + $0x10] sm:$0xff]   ;;  %s270_s13 = scalar_lea.vmem %s2035_s5, %s1453_s10 }
  0x10   : > { %v1516_v6 = vcombine.high %v485_v4, %v489_v5  ;;  %v477_v7 = vld [vmem:[%s2033_s3 + $0x140] sm:$0xff]  ;;  %825 = vmatprep.subr.bf16.mxu1 %v1524_v2  ;;  %v1515_v9 = vcombine.low %v485_v4, %v489_v5  ;;  %1543 = vmatprep.subr.bf16.mxu0 %v1601_v13  ;;  %v1603_v18 = vld [vmem:[%s266_s12 + $0x8] sm:$0xff]   ;;  %v1607_v31 = vld [vmem:[%s1716_s23 + $0x10] sm:$0xff]  }
  0x11   : > { %v481_v8 = vld [vmem:[%s2033_s3 + $0x160] sm:$0xff]  ;;  %826 = vmatpush1.bf16.msra.mxu1 %v1523_v3  ;;  %1544 = vmatpush3.bf16.msra.mxu0 %v1601_v13  ;;  %v490_v29 = vld [vmem:[%s2033_s3 + $0x1a8] sm:$0xff]  ;;  %v1608_v40 = vld [vmem:[%s1716_s23 + $0x18] sm:$0xff]   ;;  %v1633_v13 = vmov 0  }
  0x12   : > { %827 = vmatprep.subr.bf16.mxu1 %v1516_v6  ;;  %v1508_v10 = vcombine.high %v477_v7, %v481_v8  ;;  %v469_v11 = vld [vmem:[%s2033_s3 + $0x100] sm:$0xff]  ;;  %v1507_v15 = vcombine.low %v477_v7, %v481_v8  ;;  %1545 = vmatprep.subr.bf16.mxu0 %v1602_v14  ;;  %v1606_v30 = vld [vmem:[%s1716_s23 + $0x8] sm:$0xff]   ;;  %v1518_v33 = vcombine.high %v486_v28, %v490_v29  ;;  %v495_v8 = vld [vmem:[%s2033_s3 + $0x1d0] sm:$0xff] }
  0x13   : > { %v473_v12 = vld [vmem:[%s2033_s3 + $0x120] sm:$0xff]  ;;  %v478_v34 = vld [vmem:[%s2033_s3 + $0x148] sm:$0xff]  ;;  %v1517_v36 = vcombine.low %v486_v28, %v490_v29  ;;  %857 = vmatprep.mubr.bf16.mxu1 %v1633_v13  ;;  %v492_v28 = vld [vmem:[%s2033_s3 + $0x1b8] sm:$0xff] }
  0x14   : > { %v461_v16 = vld [vmem:[%s2033_s3 + $0xc0] sm:$0xff]  ;;  %v1500_v19 = vcombine.high %v469_v11, %v473_v12  ;;  %v1499_v21 = vcombine.low %v469_v11, %v473_v12  ;;  %v482_v35 = vld [vmem:[%s2033_s3 + $0x168] sm:$0xff]  ;;  %v500_v12 = vld [vmem:[%s2033_s3 + $0x1f8] sm:$0xff] }
  0x15   : > { %828 = vmatpush1.bf16.msra.mxu1 %v1515_v9  ;;  %v465_v17 = vld [vmem:[%s2033_s3 + $0xe0] sm:$0xff]  ;;  %1546 = vmatpush3.bf16.msra.mxu0 %v1602_v14  ;;  %v1510_v37 = vcombine.high %v478_v34, %v482_v35  ;;  %v470_v38 = vld [vmem:[%s2033_s3 + $0x108] sm:$0xff]  ;;  %v1509_v41 = vcombine.low %v478_v34, %v482_v35  ;;  %v499_v9 = vld [vmem:[%s2033_s3 + $0x1f0] sm:$0xff] }
  0x16   : > { %829 = vmatprep.subr.bf16.mxu1 %v1508_v10  ;;  %v1605_v20 = vld [vmem:[%s1716_s23] sm:$0xff]   ;;  %v1492_v22 = vcombine.high %v461_v16, %v465_v17  ;;  %1547 = vmatprep.subr.bf16.mxu0 %v1603_v18  ;;  %v1491_v26 = vcombine.low %v461_v16, %v465_v17  ;;  %v474_v39 = vld [vmem:[%s2033_s3 + $0x128] sm:$0xff]  ;;  %v496_v10 = vld [vmem:[%s2033_s3 + $0x1d8] sm:$0xff]  ;;  %v1528_v11 = vcombine.high %v495_v8, %v499_v9 }
  0x17   : > { %1551 = vmatprep.mubr.msk.bf16.mxu0 %vm351_vm0, %v1605_v20  ;;  %v1604_v23 = vld [vmem:[%s266_s12] sm:$0xff]   ;;  %v1502_v42 = vcombine.high %v470_v38, %v474_v39  ;;  %v462_v43 = vld [vmem:[%s2033_s3 + $0xc8] sm:$0xff]  ;;  %v1501_v45 = vcombine.low %v470_v38, %v474_v39  ;;  %v1527_v14 = vcombine.low %v495_v8, %v499_v9  ;;  %v1814_v16 = vcombine.high %v496_v10, %v500_v12  ;;  %v483_v38 = vld [vmem:[%s2033_s3 + $0x170] sm:$0xff] }
  0x18   : > { %v466_v44 = vld [vmem:[%s2033_s3 + $0xe8] sm:$0xff]  ;;  %v453_v48 = vld [vmem:[%s2033_s3 + $0x80] sm:$0xff]  ;;  %v480_v39 = vld [vmem:[%s2033_s3 + $0x158] sm:$0xff] }
  0x19   : > { %830 = vmatpush1.bf16.msra.mxu1 %v1507_v15  ;;  %1548 = vmatpush3.bf16.msra.mxu0 %v1603_v18  ;;  %v1494_v46 = vcombine.high %v462_v43, %v466_v44  ;;  %v1493_v47 = vcombine.low %v462_v43, %v466_v44  ;;  %v457_v49 = vld [vmem:[%s2033_s3 + $0xa0] sm:$0xff]  ;;  %v454_v50 = vld [vmem:[%s2033_s3 + $0x88] sm:$0xff]  ;;  %v1812_v15 = vcombine.low %v496_v10, %v500_v12  ;;  %v471_v44 = vld [vmem:[%s2033_s3 + $0x110] sm:$0xff] }
  0x1a   : > { %831 = vmatprep.subr.bf16.mxu1 %v1500_v19  ;;  %1549 = vmatprep.subr.bf16.mxu0 %v1604_v23  ;;  %v1484_v51 = vcombine.high %v453_v48, %v457_v49  ;;  %v458_v52 = vld [vmem:[%s2033_s3 + $0xa8] sm:$0xff]  ;;  %v1483_v53 = vcombine.low %v453_v48, %v457_v49  ;;  %v445_v56 = vld [vmem:[%s2033_s3 + $0x40] sm:$0xff]  ;;  %v475_v48 = vld [vmem:[%s2033_s3 + $0x130] sm:$0xff] }
  0x1b   : > { %v1485_v54 = vcombine.low %v454_v50, %v458_v52  ;;  %v1486_v55 = vcombine.high %v454_v50, %v458_v52  ;;  %v449_v57 = vld [vmem:[%s2033_s3 + $0x60] sm:$0xff]  ;;  %v446_v58 = vld [vmem:[%s2033_s3 + $0x48] sm:$0xff]  ;;  %v472_v49 = vld [vmem:[%s2033_s3 + $0x118] sm:$0xff] }
  0x1c   : > { %v1476_v59 = vcombine.high %v445_v56, %v449_v57  ;;  %v450_v60 = vld [vmem:[%s2033_s3 + $0x68] sm:$0xff]  ;;  %v1475_v61 = vcombine.low %v445_v56, %v449_v57  ;;  %v437_v0 = vld [vmem:[%s2033_s3] sm:$0xff]  ;;  %v476_v50 = vld [vmem:[%s2033_s3 + $0x138] sm:$0xff] }
  0x1d   : > { %832 = vmatpush1.bf16.msra.mxu1 %v1499_v21  ;;  %1550 = vmatpush3.bf16.msra.mxu0 %v1604_v23  ;;  %v1477_v62 = vcombine.low %v446_v58, %v450_v60  ;;  %v1478_v63 = vcombine.high %v446_v58, %v450_v60  ;;  %v441_v1 = vld [vmem:[%s2033_s3 + $0x20] sm:$0xff]  ;;  %v438_v2 = vld [vmem:[%s2033_s3 + $0x8] sm:$0xff]  ;;  %v1883_v56 = vcombine.high %v472_v49, %v476_v50  ;;  %v463_v60 = vld [vmem:[%s2033_s3 + $0xd0] sm:$0xff] }
  0x1e   : > { %833 = vmatprep.subr.bf16.mxu1 %v1492_v22  ;;  %898 = vmatprep.subr.bf16.mxu0 %v1526_v27  ;;  %v1468_v3 = vcombine.high %v437_v0, %v441_v1  ;;  %v442_v4 = vld [vmem:[%s2033_s3 + $0x28] sm:$0xff]  ;;  %v1467_v5 = vcombine.low %v437_v0, %v441_v1  ;;  %v1820_v19 = vld [vmem:[%s2032_s2] ss:$0 sm:$0xff]  ;;  %v488_v27 = vld [vmem:[%s2033_s3 + $0x198] sm:$0xff]  ;;  %v1503_v0 = vcombine.low %v471_v44, %v475_v48 }
  0x1f   : > { %v1469_v6 = vcombine.low %v438_v2, %v442_v4  ;;  %v1470_v7 = vcombine.high %v438_v2, %v442_v4  ;;  %v1841_v35 = vcombine.high %v488_v27, %v492_v28  ;;  %v1861_v43 = vcombine.low %v488_v27, %v492_v28  ;;  %v455_v2 = vld [vmem:[%s2033_s3 + $0x90] sm:$0xff]  ;;  %v456_v8 = vld [vmem:[%s2033_s3 + $0x98] sm:$0xff] }
  0x20   : > { %1552 = vmatmul.mubr.msk.bf16.vlgmr.msra.gmra.mxu0 %vm351_vm0, %v1606_v30  ;;  %v1905_v1 = vcombine.low %v472_v49, %v476_v50  ;;  %v460_v9 = vld [vmem:[%s2033_s3 + $0xb8] sm:$0xff] }
  0x21   : > { %834 = vmatpush1.bf16.msra.mxu1 %v1491_v26  ;;  %1555 = vmatprep.mubr.msk.bf16.mxu0 %vm351_vm0, %v1607_v31  ;;  %v491_v26 = vld [vmem:[%s2033_s3 + $0x1b0] sm:$0xff] }
  0x22   : > { %899 = vmatpush1.bf16.msra.mxu0 %v1525_v32  ;;  %835 = vmatprep.subr.bf16.mxu1 %v1484_v51  ;;  %v1520_v34 = vcombine.high %v487_v24, %v491_v26 }
  0x23   : > { %900 = vmatprep.subr.bf16.mxu0 %v1518_v33 }
  0x25   : > { %836 = vmatpush1.bf16.msra.mxu1 %v1483_v53 }
  0x26   : > { %901 = vmatpush1.bf16.msra.mxu0 %v1517_v36  ;;  %837 = vmatprep.subr.bf16.mxu1 %v1476_v59  ;;  %v479_v36 = vld [vmem:[%s2033_s3 + $0x150] sm:$0xff] }
  0x27   : > { %902 = vmatprep.subr.bf16.mxu0 %v1510_v37  ;;  %v1511_v53 = vcombine.low %v479_v36, %v483_v38 }
  0x28   : > { %1556 = vmatmul.mubr.msk.bf16.gmra.mxu0 %vm351_vm0, %v1608_v40  ;;  %v484_v40 = vld [vmem:[%s2033_s3 + $0x178] sm:$0xff] }
  0x29   : > { %838 = vmatpush1.bf16.msra.mxu1 %v1475_v61  ;;  %930 = vmatprep.mubr.bf16.mxu0 %v1633_v13  ;;  %v467_v61 = vld [vmem:[%s2033_s3 + $0xf0] sm:$0xff] }
  0x2a   : > { %903 = vmatpush1.bf16.msra.mxu0 %v1509_v41  ;;  %839 = vmatprep.subr.bf16.mxu1 %v1468_v3  ;;  %v1495_v10 = vcombine.low %v463_v60, %v467_v61 }
  0x2b   : > { %904 = vmatprep.subr.bf16.mxu0 %v1502_v42  ;;  %v1519_v42 = vcombine.low %v487_v24, %v491_v26 }
  0x2d   : > { %840 = vmatpush1.bf16.msra.mxu1 %v1467_v5  ;;  %v1496_v5 = vcombine.high %v463_v60, %v467_v61 }
  0x2e   : > { %905 = vmatpush1.bf16.msra.mxu0 %v1501_v45  ;;  %971 = vmatprep.subr.bf16.mxu1 %v1528_v11 }
  0x2f   : > { %906 = vmatprep.subr.bf16.mxu0 %v1494_v46  ;;  %v1512_v46 = vcombine.high %v479_v36, %v483_v38 }
  0x32   : > { %907 = vmatpush1.bf16.msra.mxu0 %v1493_v47  ;;  %v1867_v47 = vcombine.high %v480_v39, %v484_v40 }
  0x33   : > { %908 = vmatprep.subr.bf16.mxu0 %v1486_v55  ;;  %v1504_v55 = vcombine.high %v471_v44, %v475_v48 }
  0x36   : > { %909 = vmatpush1.bf16.msra.mxu0 %v1485_v54  ;;  %v1881_v54 = vcombine.low %v480_v39, %v484_v40 }
  0x37   : > { %910 = vmatprep.subr.bf16.mxu0 %v1478_v63  ;;  %v468_v63 = vld [vmem:[%s2033_s3 + $0xf8] sm:$0xff] }
  0x3a   : > { %911 = vmatpush1.bf16.msra.mxu0 %v1477_v62  ;;  %v464_v62 = vld [vmem:[%s2033_s3 + $0xd8] sm:$0xff] }
  0x3b   : > { %912 = vmatprep.subr.bf16.mxu0 %v1470_v7  ;;  %v459_v7 = vld [vmem:[%s2033_s3 + $0xb0] sm:$0xff]  ;;  %v1925_v11 = vcombine.low %v464_v62, %v468_v63 }
  0x3c   : > { %v1488_v12 = vcombine.high %v455_v2, %v459_v7  ;;  %v1487_v24 = vcombine.low %v455_v2, %v459_v7 }
  0x3e   : > { %913 = vmatpush1.bf16.msra.mxu0 %v1469_v6  ;;  %v1911_v6 = vcombine.high %v464_v62, %v468_v63 }
  0x3f   : > { %1044 = vmatprep.subr.bf16.mxu0 %v1814_v16 }
  0xe0   : > { %v1553_v17 = vpop.f32.mrf.mxu0 }
  0xe1   : > { %v407_v41 = vadd.f32 %v1553_v17, %v1820_v19 }
  0xe2   : > { %v398_v18 = vpop.f32.mrf.mxu0 }
  0xe3   : > { %v399_v21 = vadd.f32 %v1820_v19, %v398_v18  ;;  %v431_v52 = vmax.f32 %v407_v41, 0.0 }
  0xe4   : > { %v1554_v20 = vpop.f32.mrf.mxu0 }
  0xe5   : > { %v429_v29 = vmax.f32 %v399_v21, 0.0  ;;  %v410_v32 = vadd.f32 %v1554_v20, %v1820_v19  ;;  %v447_v21 = vld [vmem:[%s2033_s3 + $0x50] sm:$0xff] }
  0xe6   : > { %v401_v22 = vpop.f32.mrf.mxu0 }
  0xe7   : > { %v402_v23 = vadd.f32 %v1820_v19, %v401_v22  ;;  %v432_v45 = vmax.f32 %v410_v32, 0.0  ;;  %v451_v22 = vld [vmem:[%s2033_s3 + $0x70] sm:$0xff]  ;;  %v440_v32 = vld [vmem:[%s2033_s3 + $0x18] sm:$0xff] }
  0xe8   : > { %v1827_v25 = vpop.f32.mrf.mxu0  ;;  %v1480_v28 = vcombine.high %v447_v21, %v451_v22  ;;  %v1479_v36 = vcombine.low %v447_v21, %v451_v22 }
  0xe9   : > { %v430_v30 = vmax.f32 %v402_v23, 0.0  ;;  %v1885_v57 = vpack.c.bf16 %v432_v45, %v431_v52  ;;  %v423_v17 = vadd.f32 %v1827_v25, %v1820_v19  ;;  %v448_v23 = vld [vmem:[%s2033_s3 + $0x58] sm:$0xff]  ;;  %v1489_v25 = vcombine.low %v456_v8, %v460_v9 }
  0xea   : > { %v414_v31 = vpop.f32.mrf.mxu0 }
  0xeb   : > { %v1839_v33 = vpack.c.bf16 %v430_v30, %v429_v29  ;;  %v415_v58 = vadd.f32 %v1820_v19, %v414_v31  ;;  %v435_v26 = vmax.f32 %v423_v17, 0.0  ;;  %v439_v30 = vld [vmem:[%s2033_s3 + $0x10] sm:$0xff] }
  0xec   : > { %v1846_v37 = vpop.f32.mrf.mxu0  ;;  %v443_v31 = vld [vmem:[%s2033_s3 + $0x30] sm:$0xff] }
  0xed   : > { %858 = vmatmul.mubr.bf16.vlgmr.msra.gmra.mxu1 %v1839_v33  ;;  %931 = vmatmul.mubr.bf16.vlgmr.msra.gmra.mxu0 %v1839_v33  ;;  %v433_v3 = vmax.f32 %v415_v58, 0.0  ;;  %v426_v18 = vadd.f32 %v1846_v37, %v1820_v19  ;;  %v1472_v39 = vcombine.high %v439_v30, %v443_v31  ;;  %v1471_v41 = vcombine.low %v439_v30, %v443_v31 }
  0xee   : > { %972 = vmatpush1.bf16.msra.mxu1 %v1527_v14  ;;  %1045 = vmatpush1.bf16.msra.mxu0 %v1812_v15  ;;  %v417_v51 = vpop.f32.mrf.mxu0  ;;  %v1927_v14 = vcombine.high %v456_v8, %v460_v9 }
  0xef   : > { %973 = vmatprep.subr.bf16.mxu1 %v1520_v34  ;;  %1046 = vmatprep.subr.bf16.mxu0 %v1841_v35  ;;  %v418_v59 = vadd.f32 %v1820_v19, %v417_v51  ;;  %v452_v19 = vld [vmem:[%s2033_s3 + $0x78] sm:$0xff]  ;;  %v436_v27 = vmax.f32 %v426_v18, 0.0 }
  0xf0   : > { %867 = vmatprep.mubr.bf16.mxu1 %v1633_v13  ;;  %940 = vmatprep.mubr.bf16.mxu0 %v1633_v13  ;;  %v1482_v29 = vcombine.high %v448_v23, %v452_v19  ;;  %v444_v34 = vld [vmem:[%s2033_s3 + $0x38] sm:$0xff]  ;;  %v1481_v37 = vcombine.low %v448_v23, %v452_v19 }
  0xf1   : > { %v434_v4 = vmax.f32 %v418_v59, 0.0  ;;  %v504_v38 = vpack.c.bf16 %v436_v27, %v435_v26  ;;  %v1474_v40 = vcombine.high %v440_v32, %v444_v34 }
  0xf2   : > { %974 = vmatpush1.bf16.msra.mxu1 %v1519_v42  ;;  %1047 = vmatpush1.bf16.msra.mxu0 %v1861_v43  ;;  %v1473_v42 = vcombine.low %v440_v32, %v444_v34 }
  0xf3   : > { %975 = vmatprep.subr.bf16.mxu1 %v1512_v46  ;;  %1048 = vmatprep.subr.bf16.mxu0 %v1867_v47  ;;  %v1933_v20 = vpack.c.bf16 %v434_v4, %v433_v3 }
  0xf5   : > { %868 = vmatmul.mubr.bf16.gmra.mxu1 %v1885_v57  ;;  %941 = vmatmul.mubr.bf16.gmra.mxu0 %v1885_v57 }
  0xf6   : > { %976 = vmatpush1.bf16.msra.mxu1 %v1511_v53  ;;  %1049 = vmatpush1.bf16.msra.mxu0 %v1881_v54 }
  0xf7   : > { %977 = vmatprep.subr.bf16.mxu1 %v1504_v55  ;;  %1050 = vmatprep.subr.bf16.mxu0 %v1883_v56 }
  0xf8   : > { %877 = vmatprep.mubr.bf16.mxu1 %v1633_v13  ;;  %950 = vmatprep.mubr.bf16.mxu0 %v1633_v13 }
  0xfa   : > { %978 = vmatpush1.bf16.msra.mxu1 %v1503_v0  ;;  %1051 = vmatpush1.bf16.msra.mxu0 %v1905_v1 }
  0xfb   : > { %979 = vmatprep.subr.bf16.mxu1 %v1496_v5  ;;  %1052 = vmatprep.subr.bf16.mxu0 %v1911_v6 }
  0xfd   : > { %878 = vmatmul.mubr.bf16.gmra.mxu1 %v1933_v20  ;;  %951 = vmatmul.mubr.bf16.gmra.mxu0 %v1933_v20 }
  0xfe   : > { %980 = vmatpush1.bf16.msra.mxu1 %v1495_v10  ;;  %1053 = vmatpush1.bf16.msra.mxu0 %v1925_v11 }
  0xff   : > { %981 = vmatprep.subr.bf16.mxu1 %v1488_v12  ;;  %1054 = vmatprep.subr.bf16.mxu0 %v1927_v14 }
 0x100   : > { %887 = vmatprep.mubr.bf16.mxu1 %v1633_v13  ;;  %960 = vmatprep.mubr.bf16.mxu0 %v1633_v13 }
 0x102   : > { %982 = vmatpush1.bf16.msra.mxu1 %v1487_v24  ;;  %1055 = vmatpush1.bf16.msra.mxu0 %v1489_v25 }
 0x103   : > { %983 = vmatprep.subr.bf16.mxu1 %v1480_v28  ;;  %1056 = vmatprep.subr.bf16.mxu0 %v1482_v29 }
 0x105   : > { %888 = vmatmul.mubr.bf16.gmra.mxu1 %v504_v38  ;;  %961 = vmatmul.mubr.bf16.gmra.mxu0 %v504_v38 }
 0x106   : > { %984 = vmatpush1.bf16.msra.mxu1 %v1479_v36  ;;  %1057 = vmatpush1.bf16.msra.mxu0 %v1481_v37 }
 0x107   : > { %985 = vmatprep.subr.bf16.mxu1 %v1472_v39  ;;  %1058 = vmatprep.subr.bf16.mxu0 %v1474_v40 }
 0x108   : > { %1003 = vmatprep.mubr.bf16.mxu1 %v1633_v13  ;;  %1076 = vmatprep.mubr.bf16.mxu0 %v1633_v13 }
 0x10a   : > { %986 = vmatpush1.bf16.msra.mxu1 %v1471_v41  ;;  %1059 = vmatpush1.bf16.msra.mxu0 %v1473_v42 }
 0x10b   : > { %1559 = vmatprep.subr.bf16.mxu1 %v1814_v16 }
 0x10d   : > { %1004 = vmatmul.mubr.bf16.vlgmr.msra.gmra.mxu1 %v1839_v33  ;;  %1077 = vmatmul.mubr.bf16.vlgmr.msra.gmra.mxu0 %v1839_v33 }
 0x10e   : > { %1567 = vmatpush1.bf16.msra.mxu1 %v1812_v15  ;;  %1013 = vmatprep.mubr.bf16.mxu1 %v1633_v13 }
 0x10f   : > { %1560 = vmatprep.subr.bf16.mxu1 %v1841_v35  ;;  %1086 = vmatprep.mubr.bf16.mxu0 %v1633_v13 }
 0x112   : > { %1568 = vmatpush1.bf16.msra.mxu1 %v1861_v43 }
 0x113   : > { %1561 = vmatprep.subr.bf16.mxu1 %v1867_v47 }
 0x115   : > { %1014 = vmatmul.mubr.bf16.gmra.mxu1 %v1885_v57  ;;  %1087 = vmatmul.mubr.bf16.gmra.mxu0 %v1885_v57 }
 0x116   : > { %1569 = vmatpush1.bf16.msra.mxu1 %v1881_v54  ;;  %1023 = vmatprep.mubr.bf16.mxu1 %v1633_v13 }
 0x117   : > { %1562 = vmatprep.subr.bf16.mxu1 %v1883_v56  ;;  %1096 = vmatprep.mubr.bf16.mxu0 %v1633_v13 }
 0x11a   : > { %1570 = vmatpush1.bf16.msra.mxu1 %v1905_v1 }
 0x11b   : > { %1563 = vmatprep.subr.bf16.mxu1 %v1911_v6 }
 0x11d   : > { %1024 = vmatmul.mubr.bf16.gmra.mxu1 %v1933_v20  ;;  %1097 = vmatmul.mubr.bf16.gmra.mxu0 %v1933_v20 }
 0x11e   : > { %1571 = vmatpush1.bf16.msra.mxu1 %v1925_v11  ;;  %1033 = vmatprep.mubr.bf16.mxu1 %v1633_v13 }
 0x11f   : > { %1564 = vmatprep.subr.bf16.mxu1 %v1927_v14 }
 0x122   : > { %1572 = vmatpush1.bf16.msra.mxu1 %v1489_v25 }
 0x123   : > { %1565 = vmatprep.subr.bf16.mxu1 %v1482_v29 }
 0x125   : > { %1034 = vmatmul.mubr.bf16.gmra.mxu1 %v504_v38 }
 0x126   : > { %1573 = vmatpush1.bf16.msra.mxu1 %v1481_v37  ;;  %1106 = vmatprep.mubr.bf16.mxu1 %v1633_v13 }
 0x127   : > { %1566 = vmatprep.subr.bf16.mxu1 %v1474_v40 }
 0x12a   : > { %1574 = vmatpush1.bf16.msra.mxu1 %v1473_v42 }
 0x12d   : > { %1107 = vmatmul.mubr.bf16.vlgmr.msra.gmra.mxu1 %v504_v38 }
 0x1ad   : > { %v859_v15 = vpop.f32.mrf.mxu1  ;;  %v932_v16 = vpop.f32.mrf.mxu0 }
 0x1af   : > { %v861_v33 = vpop.f32.mrf.mxu1  ;;  %v934_v35 = vpop.f32.mrf.mxu0 }
 0x1b1   : > { %v863_v43 = vpop.f32.mrf.mxu1  ;;  %v936_v44 = vpop.f32.mrf.mxu0 }
 0x1b2   : > { %v1117_v17 = vmax.f32 %v859_v15, %v863_v43  ;;  %v1119_v18 = vmax.f32 %v932_v16, %v936_v44 }
 0x1b3   : > { %v865_v45 = vpop.f32.mrf.mxu1  ;;  %v938_v46 = vpop.f32.mrf.mxu0 }
 0x1b4   : > { %v1118_v10 = vmax.f32 %v861_v33, %v865_v45  ;;  %v1120_v11 = vmax.f32 %v934_v35, %v938_v46 }
 0x1b5   : > { %v869_v47 = vpop.f32.mrf.mxu1  ;;  %v942_v48 = vpop.f32.mrf.mxu0 }
 0x1b6   : > { %v1125_v19 = vmax.f32 %v1117_v17, %v869_v47  ;;  %v1127_v24 = vmax.f32 %v1119_v18, %v942_v48 }
 0x1b7   : > { %v871_v49 = vpop.f32.mrf.mxu1  ;;  %v944_v50 = vpop.f32.mrf.mxu0 }
 0x1b8   : > { %v1126_v20 = vmax.f32 %v1118_v10, %v871_v49  ;;  %v1128_v21 = vmax.f32 %v1120_v11, %v944_v50 }
 0x1b9   : > { %v873_v51 = vpop.f32.mrf.mxu1  ;;  %v946_v52 = vpop.f32.mrf.mxu0 }
 0x1ba   : > { %v1133_v29 = vmax.f32 %v1125_v19, %v873_v51  ;;  %v1135_v30 = vmax.f32 %v1127_v24, %v946_v52 }
 0x1bb   : > { %v875_v53 = vpop.f32.mrf.mxu1  ;;  %v948_v54 = vpop.f32.mrf.mxu0 }
 0x1bc   : > { %v1134_v25 = vmax.f32 %v1126_v20, %v875_v53  ;;  %v1136_v26 = vmax.f32 %v1128_v21, %v948_v54 }
 0x1bd   : > { %v879_v13 = vpop.f32.mrf.mxu1  ;;  %v952_v55 = vpop.f32.mrf.mxu0 }
 0x1be   : > { %v1141_v37 = vmax.f32 %v1133_v29, %v879_v13  ;;  %v1143_v38 = vmax.f32 %v1135_v30, %v952_v55 }
 0x1bf   : > { %v881_v56 = vpop.f32.mrf.mxu1  ;;  %v954_v57 = vpop.f32.mrf.mxu0 }
 0x1c0   : > { %v1142_v31 = vmax.f32 %v1134_v25, %v881_v56  ;;  %v1144_v32 = vmax.f32 %v1136_v26, %v954_v57 }
 0x1c1   : > { %v883_v58 = vpop.f32.mrf.mxu1  ;;  %v956_v59 = vpop.f32.mrf.mxu0 }
 0x1c2   : > { %v1149_v15 = vmax.f32 %v1141_v37, %v883_v58  ;;  %v1151_v16 = vmax.f32 %v1143_v38, %v956_v59 }
 0x1c3   : > { %v885_v60 = vpop.f32.mrf.mxu1  ;;  %v958_v61 = vpop.f32.mrf.mxu0 }
 0x1c4   : > { %v1150_v39 = vmax.f32 %v1142_v31, %v885_v60  ;;  %v1152_v40 = vmax.f32 %v1144_v32, %v958_v61 }
 0x1c5   : > { %v889_v62 = vpop.f32.mrf.mxu1  ;;  %v962_v63 = vpop.f32.mrf.mxu0 }
 0x1c6   : > { %v1157_v44 = vmax.f32 %v1149_v15, %v889_v62  ;;  %v1159_v45 = vmax.f32 %v1151_v16, %v962_v63 }
 0x1c7   : > { %v891_v0 = vpop.f32.mrf.mxu1  ;;  %v964_v1 = vpop.f32.mrf.mxu0 }
 0x1c8   : > { %v1158_v33 = vmax.f32 %v1150_v39, %v891_v0  ;;  %v1160_v35 = vmax.f32 %v1152_v40, %v964_v1 }
 0x1c9   : > { %v893_v2 = vpop.f32.mrf.mxu1  ;;  %v966_v3 = vpop.f32.mrf.mxu0 }
 0x1ca   : > { %v1165_v51 = vmax.f32 %v1157_v44, %v893_v2  ;;  %v1167_v52 = vmax.f32 %v1159_v45, %v966_v3 }
 0x1cb   : > { %v895_v4 = vpop.f32.mrf.mxu1  ;;  %v968_v5 = vpop.f32.mrf.mxu0 }
 0x1cc   : > { %v1166_v46 = vmax.f32 %v1158_v33, %v895_v4  ;;  %v1168_v47 = vmax.f32 %v1160_v35, %v968_v5  ;;  %v1208_v61 = vrot.slane %v1165_v51, 4  ;;  %v1220_v0 = vrot.slane %v1167_v52, 4 }
 0x1cd   : > { %v1005_v6 = vpop.f32.mrf.mxu1  ;;  %v1991_v7 = vpop.f32.mrf.mxu0 }
 0x1ce   : > { %v1214_v55 = vrot.slane %v1166_v46, 4  ;;  %v1226_v56 = vrot.slane %v1168_v47, 4  ;;  %v1209_v11 = vmax.f32 %v1165_v51, %v1208_v61  ;;  %v1221_v17 = vmax.f32 %v1167_v52, %v1220_v0 }
 0x1cf   : > { %v1007_v8 = vpop.f32.mrf.mxu1  ;;  %v1993_v9 = vpop.f32.mrf.mxu0  ;;  %v1634_v0 = vmov 1966171168  }
 0x1d0   : > { %v1215_v4 = vmax.f32 %v1166_v46, %v1214_v55  ;;  %v1227_v5 = vmax.f32 %v1168_v47, %v1226_v56  ;;  %v1256_v46 = vld [vmem:[%s2034_s4] sm:$0xff] }
 0x1d1   : > { %v1009_v12 = vpop.f32.mrf.mxu1  ;;  %v1995_v14 = vpop.f32.mrf.mxu0 }
 0x1d2   : > { %v1121_v50 = vmax.f32 %v1005_v6, %v1009_v12  ;;  %v1123_v2 = vmax.f32 %v1991_v7, %v1995_v14  ;;  %v1258_v12 = vlaneseq  ;;  %v1216_v24 = vrot.slane %v1215_v4, 2 }
 0x1d3   : > { %v1011_v22 = vpop.f32.mrf.mxu1  ;;  %v1997_v23 = vpop.f32.mrf.mxu0  ;;  %v1228_v25 = vrot.slane %v1227_v5, 2  ;;  %v1210_v14 = vrot.slane %v1209_v11, 2 }
 0x1d4   : > { %v1122_v54 = vmax.f32 %v1007_v8, %v1011_v22  ;;  %v1124_v20 = vmax.f32 %v1993_v9, %v1997_v23  ;;  %v2003_v32 = vshrl.u32 %v1258_v12, 7  ;;  %v1217_v23 = vmax.f32 %v1215_v4, %v1216_v24 }
 0x1d5   : > { %v1015_v27 = vpop.f32.mrf.mxu1  ;;  %v1088_v28 = vpop.f32.mrf.mxu0 }
 0x1d6   : > { %v1129_v13 = vmax.f32 %v1121_v50, %v1015_v27  ;;  %v1131_v21 = vmax.f32 %v1123_v2, %v1088_v28  ;;  %v1229_v28 = vmax.f32 %v1227_v5, %v1228_v25  ;;  %v1268_v51 = vsub.s32 2, %v2003_v32 }
 0x1d7   : > { %v1017_v34 = vpop.f32.mrf.mxu1  ;;  %v1090_v36 = vpop.f32.mrf.mxu0  ;;  %v1218_v52 = vrot.slane %v1217_v23, 1 }
 0x1d8   : > { %v1130_v59 = vmax.f32 %v1122_v54, %v1017_v34  ;;  %v1132_v29 = vmax.f32 %v1124_v20, %v1090_v36  ;;  %v1222_v34 = vrot.slane %v1221_v17, 2  ;;  %v1272_v54 = vsub.s32 3, %v2003_v32 }
 0x1d9   : > { %v1019_v41 = vpop.f32.mrf.mxu1  ;;  %v1092_v42 = vpop.f32.mrf.mxu0  ;;  %v1230_v55 = vrot.slane %v1229_v28, 1 }
 0x1da   : > { %v1137_v60 = vmax.f32 %v1129_v13, %v1019_v41  ;;  %v1139_v30 = vmax.f32 %v1131_v21, %v1092_v42  ;;  %v1211_v42 = vmax.f32 %v1209_v11, %v1210_v14  ;;  %v1223_v44 = vmax.f32 %v1221_v17, %v1222_v34 }
 0x1db   : > { %v1021_v43 = vpop.f32.mrf.mxu1  ;;  %v1094_v48 = vpop.f32.mrf.mxu0  ;;  %v1231_v11 = vmax.f32 %v1229_v28, %v1230_v55  ;;  %v1269_v21 = vrot.slane %v1256_v46, %v1268_v51 }
 0x1dc   : > { %v1138_v63 = vmax.f32 %v1130_v59, %v1021_v43  ;;  %v1140_v38 = vmax.f32 %v1132_v29, %v1094_v48  ;;  %v1260_v43 = vsub.s32 0, %v2003_v32  ;;  %v1212_v59 = vrot.slane %v1211_v42, 1 }
 0x1dd   : > { %v1025_v49 = vpop.f32.mrf.mxu1  ;;  %v1098_v57 = vpop.f32.mrf.mxu0  ;;  %v1224_v61 = vrot.slane %v1223_v44, 1 }
 0x1de   : > { %v1145_v1 = vmax.f32 %v1137_v60, %v1025_v49  ;;  %v1147_v39 = vmax.f32 %v1139_v30, %v1098_v57  ;;  %v1261_v60 = vrot.slane %v1256_v46, %v1260_v43  ;;  %v1213_v20 = vmax.f32 %v1211_v42, %v1212_v59 }
 0x1df   : > { %v1027_v53 = vpop.f32.mrf.mxu1  ;;  %v1100_v10 = vpop.f32.mrf.mxu0  ;;  %v1225_v24 = vmax.f32 %v1223_v44, %v1224_v61 }
 0x1e0   : > { %v1146_v3 = vmax.f32 %v1138_v63, %v1027_v53  ;;  %v1148_v16 = vmax.f32 %v1140_v38, %v1100_v10  ;;  %v1264_v53 = vsub.s32 1, %v2003_v32 }
 0x1e1   : > { %v1029_v58 = vpop.f32.mrf.mxu1  ;;  %v1102_v26 = vpop.f32.mrf.mxu0 }
 0x1e2   : > { %v1153_v8 = vmax.f32 %v1145_v1, %v1029_v58  ;;  %v1155_v33 = vmax.f32 %v1147_v39, %v1102_v26  ;;  %v1265_v2 = vrot.slane %v1256_v46, %v1264_v53  ;;  %v1298_v39 = vadd.f32 %v1261_v60, %v1213_v20 }
 0x1e3   : > { %v1031_v62 = vpop.f32.mrf.mxu1  ;;  %v1104_v41 = vpop.f32.mrf.mxu0 }
 0x1e4   : > { %v1154_v22 = vmax.f32 %v1146_v3, %v1031_v62  ;;  %v1156_v47 = vmax.f32 %v1148_v16, %v1104_v41  ;;  %v1319_v62 = vunpack.c.l.s4 %v1634_v0  ;;  %v1273_v3 = vrot.slane %v1256_v46, %v1272_v54 }
 0x1e5   : > { %v1035_v6 = vpop.f32.mrf.mxu1 }
 0x1e6   : > { %v1161_v19 = vmax.f32 %v1153_v8, %v1035_v6  ;;  %v1219_v6 = vmax.f32 %v1217_v23, %v1218_v52  ;;  %v1280_v8 = vsub.s32 5, %v2003_v32  ;;  %v1301_v14 = vadd.f32 %v1273_v3, %v1231_v11 }
 0x1e7   : > { %v1037_v18 = vpop.f32.mrf.mxu1 }
 0x1e8   : > { %v1162_v31 = vmax.f32 %v1154_v22, %v1037_v18  ;;  %v1320_v22 = vunpack.c.0.s8 %v1319_v62  ;;  %v1299_v29 = vadd.f32 %v1265_v2, %v1219_v6  ;;  %v1281_v30 = vrot.slane %v1256_v46, %v1280_v8 }
 0x1e9   : > { %v1039_v27 = vpop.f32.mrf.mxu1 }
 0x1ea   : > { %v1169_v7 = vmax.f32 %v1161_v19, %v1039_v27  ;;  %v1276_v19 = vsub.s32 4, %v2003_v32  ;;  %v1323_v16 = vsub.s32 %v1320_v22, %v2003_v32 }
 0x1eb   : > { %v1041_v37 = vpop.f32.mrf.mxu1 }
 0x1ec   : > { %v1232_v40 = vrot.slane %v1169_v7, 4  ;;  %v1170_v9 = vmax.f32 %v1162_v31, %v1041_v37  ;;  %v1284_v31 = vsub.s32 6, %v2003_v32 }
 0x1ed   : > { %v1108_v15 = vpop.f32.mrf.mxu1 }
 0x1ee   : > { %v1233_v35 = vmax.f32 %v1169_v7, %v1232_v40  ;;  %v1238_v36 = vrot.slane %v1170_v9, 4  ;;  %v1163_v50 = vmax.f32 %v1155_v33, %v1108_v15  ;;  %v1288_v7 = vsub.s32 7, %v2003_v32 }
 0x1ef   : > { %v1110_v45 = vpop.f32.mrf.mxu1  ;;  %v1277_v40 = vrot.slane %v1256_v46, %v1276_v19  ;;  %v1314_v15 = vcombine.low %v1298_v39, %v1299_v29  ;;  %v1285_v33 = vrot.slane %v1256_v46, %v1284_v31 }
 0x1f0   : > { %v1234_v48 = vrot.slane %v1233_v35, 2  ;;  %v1239_v49 = vmax.f32 %v1170_v9, %v1238_v36  ;;  %v1164_v57 = vmax.f32 %v1156_v47, %v1110_v45  ;;  %v1300_v9 = vadd.f32 %v1269_v21, %v1225_v24 }
 0x1f1   : > { %v1112_v13 = vpop.f32.mrf.mxu1 }
 0x1f2   : > { %v1240_v56 = vrot.slane %v1239_v49, 2  ;;  %v1171_v58 = vmax.f32 %v1163_v50, %v1112_v13  ;;  %v1235_v1 = vmax.f32 %v1233_v35, %v1234_v48  ;;  %v1289_v35 = vrot.slane %v1256_v46, %v1288_v7 }
 0x1f3   : > { %v1114_v63 = vpop.f32.mrf.mxu1  ;;  %v1315_v36 = vcombine.low %v1300_v9, %v1301_v14  ;;  %v1324_v48 = vrot.slane %v1314_v15, %v1323_v16 }
 0x1f4   : > { %v1241_v4 = vmax.f32 %v1239_v49, %v1240_v56  ;;  %v1244_v5 = vrot.slane %v1171_v58, 4  ;;  %v1172_v10 = vmax.f32 %v1164_v57, %v1114_v63  ;;  %v1236_v25 = vrot.slane %v1235_v1, 1 }
 0x1f5   : > { %v1331_v49 = vrot.slane %v1315_v36, %v1323_v16 }
 0x1f6   : > { %v1242_v12 = vrot.slane %v1241_v4, 1  ;;  %v1245_v17 = vmax.f32 %v1171_v58, %v1244_v5  ;;  %v1250_v18 = vrot.slane %v1172_v10, 4  ;;  %v1237_v23 = vmax.f32 %v1235_v1, %v1236_v25 }
 0x1f7   : > { %v1346_v54 = vcombine.low %v1324_v48, %v1331_v49 }
 0x1f8   : > { %v1246_v26 = vrot.slane %v1245_v17, 2  ;;  %v1251_v27 = vmax.f32 %v1172_v10, %v1250_v18  ;;  %v1243_v34 = vmax.f32 %v1241_v4, %v1242_v12  ;;  %v1302_v45 = vadd.f32 %v1277_v40, %v1237_v23 }
 0x1f9   : > { %v1354_v56 = vrot.slane %v1346_v54, %v1323_v16 }
 0x1fa   : > { %v1247_v37 = vmax.f32 %v1245_v17, %v1246_v26  ;;  %v1252_v38 = vrot.slane %v1251_v27, 2  ;;  %v1303_v42 = vadd.f32 %v1281_v30, %v1243_v34 }
 0x1fc   : > { %v1248_v28 = vrot.slane %v1247_v37, 1  ;;  %v1253_v41 = vmax.f32 %v1251_v27, %v1252_v38  ;;  %v1316_v50 = vcombine.low %v1302_v45, %v1303_v42 }
 0x1fe   : > { %v1249_v43 = vmax.f32 %v1247_v37, %v1248_v28  ;;  %v1254_v44 = vrot.slane %v1253_v41, 1  ;;  %v1338_v13 = vrot.slane %v1316_v50, %v1323_v16 }
 0x200   : > { %v1255_v47 = vmax.f32 %v1253_v41, %v1254_v44  ;;  %v1304_v51 = vadd.f32 %v1285_v33, %v1249_v43 }
 0x202   : > { %v1305_v52 = vadd.f32 %v1289_v35, %v1255_v47 }
 0x204   : > { %v1317_v53 = vcombine.low %v1304_v51, %v1305_v52 }
 0x206   : > { %v1345_v55 = vrot.slane %v1317_v53, %v1323_v16 }
 0x208   : > { %v1347_v32 = vcombine.low %v1338_v13, %v1345_v55 }
 0x20a   : > { %v1361_v46 = vrot.slane %v1347_v32, %v1323_v16 }
 0x20c   : > { %v1362_v57 = vcombine.low %v1354_v56, %v1361_v46 }
 0x20e   : > { %1364 = vst [vmem:[%s270_s13] sm:$0xff] %v1362_v57 }
 0x20f PF: > { %s15_s20 = sadd.s32 1, %s1631_s20   ;;  %s2036_s18 = smov %s1627_s19 }
 0x210   : > { %p12_p5 = scmp.ge.s32.totalorder %s15_s20, 4   ;;  %s2037_s19 = smov %s2039_s21 }
 0x212   :  { %14 = sbr.rel (!%p12_p5) target bundleno = 2 (0x2), region = 81 }

// kernel: transform_forward.4
= control target key start
LH: loop header
LB: loop body
LE: loop exit
PB: predicated region body
PF: predicated region fallthrough
CT: control target
= control target key end

     0   :  { %s10196_s21 = smov 0   ;;  %s10198_s22 = smov 0   ;;  %s13376_s0 = inlined_call_operand.vmem [shape: bf16[2,64,3], index: 0, kind: input, shape index: {}]   ;;  %s13377_s1 = inlined_call_operand.vmem [shape: bf16[2,3,64], index: 1, kind: input, shape index: {}]   ;;  %s13378_s2 = inlined_call_operand.vmem [shape: f32[1,64], index: 2, kind: input, shape index: {}]   ;;  %s13379_s3 = inlined_call_operand.vmem [shape: bf16[64,64], index: 3, kind: input, shape index: {}]   ;;  %s13380_s4 = inlined_call_operand.vmem [shape: f32[1,64], index: 4, kind: input, shape index: {}]   ;;  %s13381_s5 = inlined_call_operand.vmem [shape: bf16[64,128], index: 5, kind: input, shape index: {}]   ;;  %s13382_s6 = inlined_call_operand.vmem [shape: f32[1,128], index: 6, kind: input, shape index: {}]   ;;  %s13383_s7 = inlined_call_operand.vmem [shape: bf16[128,1024], index: 7, kind: input, shape index: {}]   ;;  %s13384_s8 = inlined_call_operand.vmem [shape: f32[1,1024], index: 8, kind: input, shape index: {}]   ;;  %s13385_s9 = inlined_call_operand.vmem [shape: bf16[1024,512], index: 9, kind: input, shape index: {}]   ;;  %s13386_s10 = inlined_call_operand.vmem [shape: f32[1,512], index: 10, kind: input, shape index: {}]   ;;  %s13387_s11 = inlined_call_operand.vmem [shape: bf16[512,256], index: 11, kind: input, shape index: {}]   ;;  %s13388_s12 = inlined_call_operand.vmem [shape: f32[1,256], index: 12, kind: input, shape index: {}]   ;;  %s13389_s13 = inlined_call_operand.vmem [shape: bf16[256,4096], index: 13, kind: input, shape index: {}]   ;;  %s13390_s14 = inlined_call_operand.vmem [shape: f32[1,4096], index: 14, kind: input, shape index: {}]   ;;  %s13391_s15 = inlined_call_operand.vmem [shape: f32[2,1,4096], index: 15, kind: output, shape index: {0}]   ;;  %s13392_s16 = inlined_call_operand.vmem [shape: bf16[2,64,64], index: 16, kind: output, shape index: {1}]  }
   0x1   :  { %13393 = sst [smem:[#allocation3_spill]] %s13376_s0  ;;  %s10200_s23 = smov 0  }
   0x2 LB: > { %s39_s24 = sadd.s32 1, %s10102_s22  ;;  %p8552_p0 = scmp.ge.s32.totalorder %s10106_s23, 1  ;;  %s10106_s23 = sphi %s10200_s23, %s27_s23   ;;  %s10102_s22 = sphi %s10198_s22, %s13396_s22   ;;  %s10098_s21 = sphi %s10196_s21, %s13395_s21  }
   0x3   : > { %p41_p1 = scmp.ge.s32.totalorder %s39_s24, 2  ;;  %p495_p2 = scmp.lt.s32.totalorder %s10106_s23, 3 }
   0x5   : > { %s13398_s24 = smov (%p41_p1, %s39_s24), 0  ;;  %p496_p3 = pnand %p8552_p0, %p495_p2 }
   0x6   : > { %p562_p4 = scmp.lt.s32.totalorder (!%p496_p3), %s10098_s21, 1  ;;  %s13394_s0 = sld [smem:[#allocation3_spill]] (!%p496_p3) }
   0x7   : > { %499 = sbr.rel (%p496_p3) target bundleno = 2138 (0x85a), region = 80 }
   0xc   : > { %vm651_vm0 = vcmask 1040384   ;;  %vm652_vm1 = vcmask 1041408   ;;  %vm638_vm2 = vcmask 23552   ;;  %v9596_v0 = vld [vmem:[%s13379_s3 + $0x18] sm:$0xff]   ;;  %v10108_v1 = vmov 65535   ;;  %s13400_s21 = smov (!%p562_p4, %s10098_s21), 1 }
   0xd   : > { %v653_v2 = vsel %vm651_vm0, 4294967295, %v10108_v1  ;;  %9533 = vmatprep.subr.bf16.mxu1 %v9596_v0  ;;  %s10217_s27 = sshll.u32 %s13400_s21, 5  ;;  %s8555_s28 = sshll.u32 %s13400_s21, 1  ;;  %v9597_v10 = vld [vmem:[%s13379_s3 + $0x10] sm:$0xff]   ;;  %v9598_v11 = vld [vmem:[%s13379_s3 + $0x8] sm:$0xff]   ;;  %v9599_v12 = vld [vmem:[%s13379_s3] sm:$0xff]  }
   0xe   : > { %v654_v3 = vsel %vm652_vm1, %v653_v2, 0  ;;  %9534 = vmatpush3.bf16.msra.mxu1 %v9596_v0  ;;  %s569_s17 = scalar_lea.vmem %s13394_s0, %s10217_s27  ;;  %s574_s20 = scalar_lea.vmem %s13377_s1, %s8555_s28  ;;  %v9600_v13 = vld [vmem:[%s13381_s5 + $0x18] sm:$0xff]   ;;  %v8559_v14 = vld [vmem:[%s13378_s2] ss:$0 sm:$0xff]  ;;  %vm763_vm3 = vcmask 519168   ;;  %vm811_vm4 = vcmask 523264  }
   0xf   : > { %v610_v4 = vld [vmem:[%s574_s20] sm:$0x3]  ;;  %v9593_v7 = vld [vmem:[%s569_s17 + $0x8] sm:$0xff]   ;;  %v9594_v8 = vld [vmem:[%s569_s17 + $0x10] sm:$0xff]   ;;  %9535 = vmatprep.subr.bf16.mxu1 %v9597_v10  ;;  %s10249_s25 = scalar_lea.vmem %s13392_s16, %s10217_s27  ;;  %s12771_s21 = scalar_lea.vmem %s13391_s15, %s10217_s27 }
  0x10   : > { %v656_v5 = vand.u32 %v654_v3, %v610_v4  ;;  %v9592_v6 = vld [vmem:[%s569_s17] sm:$0xff]   ;;  %v9595_v9 = vld [vmem:[%s569_s17 + $0x18] sm:$0xff]   ;;  %v9601_v51 = vld [vmem:[%s13381_s5 + $0x10] sm:$0xff]  }
  0x11   : > { %9525 = vmatprep.mubr.msk.bf16.mxu0 %vm638_vm2, %v9592_v6  ;;  %v9602_v52 = vld [vmem:[%s13381_s5 + $0x8] sm:$0xff]   ;;  %v9603_v53 = vld [vmem:[%s13381_s5] sm:$0xff]  }
  0x12   : > { %9523 = vmatprep.subr.bf16.mxu0 %v656_v5  ;;  %9536 = vmatpush3.bf16.msra.mxu1 %v9597_v10  ;;  %v1081_v54 = vld [vmem:[%s13383_s7 + $0x1c0] sm:$0xff]  ;;  %v10289_v56 = vld [vmem:[%s13383_s7 + $0x1c8] sm:$0xff] }
  0x13   : > { %9524 = vmatpush3.bf16.msra.mxu0 %v656_v5  ;;  %9537 = vmatprep.subr.bf16.mxu1 %v9598_v11  ;;  %v1085_v55 = vld [vmem:[%s13383_s7 + $0x1e0] sm:$0xff]  ;;  %v1086_v59 = vld [vmem:[%s13383_s7 + $0x1e8] sm:$0xff] }
  0x14   : > { %9549 = vmatprep.subr.bf16.mxu0 %v9600_v13  ;;  %v8650_v57 = vcombine.low %v1081_v54, %v1085_v55  ;;  %v8651_v58 = vcombine.high %v1081_v54, %v1085_v55  ;;  %v1073_v60 = vld [vmem:[%s13383_s7 + $0x180] sm:$0xff]  ;;  %v8652_v62 = vcombine.low %v10289_v56, %v1086_v59  ;;  %v8653_v63 = vcombine.high %v10289_v56, %v1086_v59  ;;  %v1050_v54 = vld [vmem:[%s13383_s7 + $0xc8] sm:$0xff] }
  0x15   : > { %v1077_v61 = vld [vmem:[%s13383_s7 + $0x1a0] sm:$0xff]  ;;  %v1054_v55 = vld [vmem:[%s13383_s7 + $0xe8] sm:$0xff] }
  0x16   : > { %9526 = vmatmul.mubr.msk.bf16.vlgmr.msra.gmra.mxu0 %vm638_vm2, %v9593_v7  ;;  %9538 = vmatpush3.bf16.msra.mxu1 %v9598_v11  ;;  %v8643_v0 = vcombine.high %v1073_v60, %v1077_v61  ;;  %v1065_v1 = vld [vmem:[%s13383_s7 + $0x140] sm:$0xff]  ;;  %v8642_v3 = vcombine.low %v1073_v60, %v1077_v61  ;;  %v1042_v61 = vld [vmem:[%s13383_s7 + $0x88] sm:$0xff] }
  0x17   : > { %9529 = vmatprep.mubr.msk.bf16.mxu0 %vm638_vm2, %v9594_v8  ;;  %9539 = vmatprep.subr.bf16.mxu1 %v9599_v12  ;;  %v1069_v2 = vld [vmem:[%s13383_s7 + $0x160] sm:$0xff] }
  0x18   : > { %9550 = vmatpush3.bf16.msra.mxu0 %v9600_v13  ;;  %v8635_v4 = vcombine.high %v1065_v1, %v1069_v2  ;;  %v1057_v5 = vld [vmem:[%s13383_s7 + $0x100] sm:$0xff]  ;;  %v8634_v7 = vcombine.low %v1065_v1, %v1069_v2 }
  0x19   : > { %9551 = vmatprep.subr.bf16.mxu0 %v9601_v51  ;;  %v1061_v6 = vld [vmem:[%s13383_s7 + $0x120] sm:$0xff] }
  0x1a   : > { %9540 = vmatpush3.bf16.msra.mxu1 %v9599_v12  ;;  %v8627_v8 = vcombine.high %v1057_v5, %v1061_v6  ;;  %v1053_v10 = vld [vmem:[%s13383_s7 + $0xe0] sm:$0xff]  ;;  %v8626_v11 = vcombine.low %v1057_v5, %v1061_v6  ;;  %v1034_v5 = vld [vmem:[%s13383_s7 + $0x48] sm:$0xff] }
  0x1b   : > { %1413 = vmatprep.subr.bf16.mxu1 %v8651_v58  ;;  %v8620_v58 = vcombine.low %v1050_v54, %v1054_v55  ;;  %v1041_v59 = vld [vmem:[%s13383_s7 + $0x80] sm:$0xff] }
  0x1c   : > { %9552 = vmatpush3.bf16.msra.mxu0 %v9601_v51  ;;  %v1045_v60 = vld [vmem:[%s13383_s7 + $0xa0] sm:$0xff] }
  0x1d   : > { %9553 = vmatprep.subr.bf16.mxu0 %v9602_v52 }
  0x1e   : > { %9530 = vmatmul.mubr.msk.bf16.gmra.mxu0 %vm638_vm2, %v9595_v9  ;;  %v1049_v9 = vld [vmem:[%s13383_s7 + $0xc0] sm:$0xff] }
  0x1f   : > { %v8619_v12 = vcombine.high %v1049_v9, %v1053_v10  ;;  %v8618_v13 = vcombine.low %v1049_v9, %v1053_v10 }
  0x20   : > { %9554 = vmatpush3.bf16.msra.mxu0 %v9602_v52 }
  0x21   : > { %9555 = vmatprep.subr.bf16.mxu0 %v9603_v53 }
  0x24   : > { %9556 = vmatpush3.bf16.msra.mxu0 %v9603_v53 }
  0x25   : > { %1486 = vmatprep.subr.bf16.mxu0 %v8653_v63  ;;  %v1046_v63 = vld [vmem:[%s13383_s7 + $0xa8] sm:$0xff] }
  0x26   : > { %v8612_v1 = vcombine.low %v1042_v61, %v1046_v63  ;;  %v8613_v2 = vcombine.high %v1042_v61, %v1046_v63  ;;  %v1060_v61 = vld [vmem:[%s13383_s7 + $0x118] sm:$0xff] }
  0xd6   : > { %v9527_v15 = vpop.f32.mrf.mxu0 }
  0xd7   : > { %v701_v16 = vadd.f32 %v9527_v15, %v8559_v14 }
  0xd8   : > { %v692_v17 = vpop.f32.mrf.mxu0 }
  0xd9   : > { %v725_v18 = vmax.f32 %v701_v16, 0.0  ;;  %v693_v19 = vadd.f32 %v8559_v14, %v692_v17  ;;  %v8576_v16 = vld [vmem:[%s13380_s4] ss:$0 sm:$0xff] }
  0xda   : > { %v9528_v20 = vpop.f32.mrf.mxu0 }
  0xdb   : > { %v9496_v21 = vpack.c.bf16 %v725_v18, %v725_v18  ;;  %v723_v22 = vmax.f32 %v693_v19, 0.0  ;;  %v704_v23 = vadd.f32 %v9528_v20, %v8559_v14 }
  0xdc   : > { %v695_v24 = vpop.f32.mrf.mxu0 }
  0xdd   : > { %766 = vst.msk [vmem:[%s10249_s25 + $0x8] sm:$0xf] %vm763_vm3, %v9496_v21  ;;  %v9494_v25 = vpack.c.bf16 %v723_v22, %v723_v22  ;;  %v726_v26 = vmax.f32 %v704_v23, 0.0  ;;  %v696_v27 = vadd.f32 %v8559_v14, %v695_v24 }
  0xde   : > { %v9531_v28 = vpop.f32.mrf.mxu0 }
  0xdf   : > { %764 = vst.msk [vmem:[%s10249_s25] sm:$0xf] %vm763_vm3, %v9494_v25  ;;  %v9497_v29 = vpack.c.bf16 %v726_v26, %v726_v26  ;;  %v724_v30 = vmax.f32 %v696_v27, 0.0  ;;  %v717_v31 = vadd.f32 %v9531_v28, %v8559_v14  ;;  %v732_v37 = vpack.c.bf16 %v726_v26, %v725_v18  ;;  %v1074_v27 = vld [vmem:[%s13383_s7 + $0x188] sm:$0xff] }
  0xe0   : > { %v708_v32 = vpop.f32.mrf.mxu0  ;;  %v1078_v28 = vld [vmem:[%s13383_s7 + $0x1a8] sm:$0xff] }
  0xe1   : > { %767 = vst.msk [vmem:[%s10249_s25 + $0xc] sm:$0xf] %vm763_vm3, %v9497_v29  ;;  %v9495_v33 = vpack.c.bf16 %v724_v30, %v724_v30  ;;  %v729_v34 = vmax.f32 %v717_v31, 0.0  ;;  %v709_v35 = vadd.f32 %v8559_v14, %v708_v32  ;;  %v731_v36 = vpack.c.bf16 %v724_v30, %v723_v22 }
  0xe2   : > { %v9532_v38 = vpop.f32.mrf.mxu0 }
  0xe3   : > { %765 = vst.msk [vmem:[%s10249_s25 + $0x4] sm:$0xf] %vm763_vm3, %v9495_v33  ;;  %v9500_v39 = vpack.c.bf16 %v729_v34, %v729_v34  ;;  %v727_v40 = vmax.f32 %v709_v35, 0.0  ;;  %v720_v41 = vadd.f32 %v9532_v38, %v8559_v14  ;;  %9541 = vmatprep.mubr.msk.bf16.mxu1 %vm811_vm4, %v731_v36  ;;  %v1070_v38 = vld [vmem:[%s13383_s7 + $0x168] sm:$0xff] }
  0xe4   : > { %v711_v42 = vpop.f32.mrf.mxu0  ;;  %9542 = vmatmul.mubr.msk.bf16.vlgmr.msra.gmra.mxu1 %vm811_vm4, %v732_v37  ;;  %v1066_v37 = vld [vmem:[%s13383_s7 + $0x148] sm:$0xff] }
  0xe5   : > { %770 = vst.msk [vmem:[%s10249_s25 + $0x18] sm:$0xf] %vm763_vm3, %v9500_v39  ;;  %v9498_v43 = vpack.c.bf16 %v727_v40, %v727_v40  ;;  %v730_v44 = vmax.f32 %v720_v41, 0.0  ;;  %v712_v45 = vadd.f32 %v8559_v14, %v711_v42  ;;  %1414 = vmatpush1.bf16.msra.mxu1 %v8650_v57  ;;  %v8644_v42 = vcombine.low %v1074_v27, %v1078_v28 }
  0xe6   : > { %1415 = vmatprep.subr.bf16.mxu1 %v8643_v0  ;;  %v8636_v51 = vcombine.low %v1066_v37, %v1070_v38  ;;  %v8621_v57 = vcombine.high %v1050_v54, %v1054_v55  ;;  %v8610_v0 = vcombine.low %v1041_v59, %v1045_v60 }
  0xe7   : > { %768 = vst.msk [vmem:[%s10249_s25 + $0x10] sm:$0xf] %vm763_vm3, %v9498_v43  ;;  %v9501_v46 = vpack.c.bf16 %v730_v44, %v730_v44  ;;  %v728_v47 = vmax.f32 %v712_v45, 0.0  ;;  %v734_v48 = vpack.c.bf16 %v730_v44, %v729_v34  ;;  %v8645_v34 = vcombine.high %v1074_v27, %v1078_v28 }
  0xe8   : > { %v8637_v44 = vcombine.high %v1066_v37, %v1070_v38  ;;  %v1079_v37 = vld [vmem:[%s13383_s7 + $0x1b0] sm:$0xff]  ;;  %v1076_v38 = vld [vmem:[%s13383_s7 + $0x198] sm:$0xff] }
  0xe9   : > { %771 = vst.msk [vmem:[%s10249_s25 + $0x1c] sm:$0xf] %vm763_vm3, %v9501_v46  ;;  %v733_v49 = vpack.c.bf16 %v728_v47, %v727_v40  ;;  %v9499_v50 = vpack.c.bf16 %v728_v47, %v728_v47  ;;  %1416 = vmatpush1.bf16.msra.mxu1 %v8642_v3  ;;  %v1058_v47 = vld [vmem:[%s13383_s7 + $0x108] sm:$0xff]  ;;  %v1033_v3 = vld [vmem:[%s13383_s7 + $0x40] sm:$0xff] }
  0xea   : > { %1417 = vmatprep.subr.bf16.mxu1 %v8635_v4  ;;  %v1037_v4 = vld [vmem:[%s13383_s7 + $0x60] sm:$0xff] }
  0xeb   : > { %769 = vst.msk [vmem:[%s10249_s25 + $0x14] sm:$0xf] %vm763_vm3, %v9499_v50  ;;  %9545 = vmatprep.mubr.msk.bf16.mxu1 %vm811_vm4, %v733_v49  ;;  %v8603_v6 = vcombine.high %v1033_v3, %v1037_v4 }
  0xec   : > { %9546 = vmatmul.mubr.msk.bf16.gmra.mxu1 %vm811_vm4, %v734_v48  ;;  %v1062_v48 = vld [vmem:[%s13383_s7 + $0x128] sm:$0xff] }
  0xed   : > { %1418 = vmatpush1.bf16.msra.mxu1 %v8634_v7  ;;  %v8629_v53 = vcombine.high %v1058_v47, %v1062_v48  ;;  %v8628_v56 = vcombine.low %v1058_v47, %v1062_v48  ;;  %v1038_v7 = vld [vmem:[%s13383_s7 + $0x68] sm:$0xff]  ;;  %v1067_v47 = vld [vmem:[%s13383_s7 + $0x150] sm:$0xff] }
  0xee   : > { %1419 = vmatprep.subr.bf16.mxu1 %v8627_v8  ;;  %v8602_v8 = vcombine.low %v1033_v3, %v1037_v4  ;;  %v8604_v9 = vcombine.low %v1034_v5, %v1038_v7  ;;  %v8605_v10 = vcombine.high %v1034_v5, %v1038_v7  ;;  %v1055_v7 = vld [vmem:[%s13383_s7 + $0xf0] sm:$0xff] }
  0xf1   : > { %1420 = vmatpush1.bf16.msra.mxu1 %v8626_v11  ;;  %v1025_v11 = vld [vmem:[%s13383_s7] sm:$0xff] }
  0xf2   : > { %1421 = vmatprep.subr.bf16.mxu1 %v8619_v12  ;;  %v1029_v12 = vld [vmem:[%s13383_s7 + $0x20] sm:$0xff] }
  0xf5   : > { %1422 = vmatpush1.bf16.msra.mxu1 %v8618_v13  ;;  %v1026_v13 = vld [vmem:[%s13383_s7 + $0x8] sm:$0xff] }
 0x1a4   : > { %v9543_v14 = vpop.f32.mrf.mxu1 }
 0x1a5   : > { %v867_v20 = vadd.f32 %v9543_v14, %v8576_v16  ;;  %v8595_v14 = vcombine.high %v1025_v11, %v1029_v12 }
 0x1a6   : > { %v858_v15 = vpop.f32.mrf.mxu1 }
 0x1a7   : > { %v859_v18 = vadd.f32 %v8576_v16, %v858_v15  ;;  %v891_v29 = vmax.f32 %v867_v20, 0.0  ;;  %v1030_v15 = vld [vmem:[%s13383_s7 + $0x28] sm:$0xff]  ;;  %v1087_v20 = vld [vmem:[%s13383_s7 + $0x1f0] sm:$0xff] }
 0x1a8   : > { %v9544_v17 = vpop.f32.mrf.mxu1 }
 0x1a9   : > { %v870_v19 = vadd.f32 %v9544_v17, %v8576_v16  ;;  %v889_v25 = vmax.f32 %v859_v18, 0.0  ;;  %v8596_v17 = vcombine.low %v1026_v13, %v1030_v15  ;;  %v8597_v18 = vcombine.high %v1026_v13, %v1030_v15 }
 0x1aa   : > { %v861_v21 = vpop.f32.mrf.mxu1 }
 0x1ab   : > { %v862_v22 = vadd.f32 %v8576_v16, %v861_v21  ;;  %v892_v23 = vmax.f32 %v870_v19, 0.0  ;;  %v1083_v19 = vld [vmem:[%s13383_s7 + $0x1d0] sm:$0xff]  ;;  %v1084_v21 = vld [vmem:[%s13383_s7 + $0x1d8] sm:$0xff] }
 0x1ac   : > { %v9547_v24 = vpop.f32.mrf.mxu1 }
 0x1ad   : > { %v890_v26 = vmax.f32 %v862_v22, 0.0  ;;  %v906_v32 = vpack.c.bf16 %v892_v23, %v891_v29  ;;  %v883_v39 = vadd.f32 %v9547_v24, %v8576_v16  ;;  %v8655_v22 = vcombine.high %v1083_v19, %v1087_v20  ;;  %v1088_v23 = vld [vmem:[%s13383_s7 + $0x1f8] sm:$0xff] }
 0x1ae   : > { %v874_v30 = vpop.f32.mrf.mxu1  ;;  %v10109_v24 = vmov 0   ;;  %v8657_v27 = vcombine.high %v1084_v21, %v1088_v23 }
 0x1af   : > { %v905_v31 = vpack.c.bf16 %v890_v26, %v889_v25  ;;  %v875_v35 = vadd.f32 %v8576_v16, %v874_v30  ;;  %v895_v49 = vmax.f32 %v883_v39, 0.0  ;;  %1445 = vmatprep.mubr.bf16.mxu1 %v10109_v24  ;;  %v8654_v25 = vcombine.low %v1083_v19, %v1087_v20  ;;  %v10404_v30 = vld [vmem:[%s13382_s6] ss:$0 sm:$0xff]  ;;  %v1080_v39 = vld [vmem:[%s13383_s7 + $0x1b8] sm:$0xff] }
 0x1b0   : > { %v9548_v33 = vpop.f32.mrf.mxu1  ;;  %v8656_v26 = vcombine.low %v1084_v21, %v1088_v23  ;;  %v8648_v54 = vcombine.low %v1076_v38, %v1080_v39  ;;  %v1048_v19 = vld [vmem:[%s13383_s7 + $0xb8] sm:$0xff] }
 0x1b1   : > { %v886_v36 = vadd.f32 %v9548_v33, %v8576_v16  ;;  %9557 = vmatprep.mubr.msk.bf16.mxu0 %vm811_vm4, %v905_v31  ;;  %v893_v45 = vmax.f32 %v875_v35, 0.0  ;;  %v1075_v35 = vld [vmem:[%s13383_s7 + $0x190] sm:$0xff] }
 0x1b2   : > { %v877_v40 = vpop.f32.mrf.mxu1  ;;  %9558 = vmatmul.mubr.msk.bf16.vlgmr.msra.gmra.mxu0 %vm811_vm4, %v906_v32 }
 0x1b3   : > { %v878_v41 = vadd.f32 %v8576_v16, %v877_v40  ;;  %1487 = vmatpush1.bf16.msra.mxu0 %v8652_v62  ;;  %v896_v43 = vmax.f32 %v886_v36, 0.0  ;;  %v8611_v62 = vcombine.high %v1041_v59, %v1045_v60  ;;  %v8594_v16 = vcombine.low %v1025_v11, %v1029_v12  ;;  %v1063_v59 = vld [vmem:[%s13383_s7 + $0x130] sm:$0xff] }
 0x1b4   : > { %1488 = vmatprep.subr.bf16.mxu0 %v8645_v34 }
 0x1b5   : > { %v894_v46 = vmax.f32 %v878_v41, 0.0  ;;  %v908_v52 = vpack.c.bf16 %v896_v43, %v895_v49  ;;  %1423 = vmatprep.subr.bf16.mxu1 %v8611_v62  ;;  %v1071_v49 = vld [vmem:[%s13383_s7 + $0x170] sm:$0xff]  ;;  %v1064_v62 = vld [vmem:[%s13383_s7 + $0x138] sm:$0xff] }
 0x1b6   : > { %1424 = vmatpush1.bf16.msra.mxu1 %v8610_v0  ;;  %v8638_v0 = vcombine.low %v1067_v47, %v1071_v49  ;;  %v8633_v5 = vcombine.high %v1060_v61, %v1064_v62  ;;  %v8632_v12 = vcombine.low %v1060_v61, %v1064_v62  ;;  %v9619_v61 = vld [vmem:[%s13385_s9 + $0x2a0] ss:$16 sps:$4 sm:$0xff]   ;;  %v9624_v62 = vld [vmem:[%s13385_s9 + $0x84] ss:$16 sps:$4 sm:$0xff]  }
 0x1b7   : > { %v907_v50 = vpack.c.bf16 %v894_v46, %v893_v45  ;;  %1489 = vmatpush1.bf16.msra.mxu0 %v8644_v42  ;;  %1425 = vmatprep.subr.bf16.mxu1 %v8603_v6  ;;  %v8647_v45 = vcombine.high %v1075_v35, %v1079_v37  ;;  %v8649_v46 = vcombine.high %v1076_v38, %v1080_v39  ;;  %v1051_v6 = vld [vmem:[%s13383_s7 + $0xd0] sm:$0xff] }
 0x1b8   : > { %1490 = vmatprep.subr.bf16.mxu0 %v8637_v44  ;;  %v8622_v21 = vcombine.low %v1051_v6, %v1055_v7 }
 0x1b9   : > { %9561 = vmatprep.mubr.msk.bf16.mxu0 %vm811_vm4, %v907_v50  ;;  %v1068_v50 = vld [vmem:[%s13383_s7 + $0x158] sm:$0xff] }
 0x1ba   : > { %9562 = vmatmul.mubr.msk.bf16.gmra.mxu0 %vm811_vm4, %v908_v52  ;;  %1426 = vmatpush1.bf16.msra.mxu1 %v8602_v8  ;;  %v1052_v8 = vld [vmem:[%s13383_s7 + $0xd8] sm:$0xff] }
 0x1bb   : > { %1491 = vmatpush1.bf16.msra.mxu0 %v8636_v51  ;;  %1427 = vmatprep.subr.bf16.mxu1 %v8595_v14  ;;  %v1072_v51 = vld [vmem:[%s13383_s7 + $0x178] sm:$0xff]  ;;  %v8623_v14 = vcombine.high %v1051_v6, %v1055_v7  ;;  %v9639_v6 = vld [vmem:[%s13385_s9 + $0x244] ss:$16 sps:$4 sm:$0xff]   ;;  %v9634_v7 = vld [vmem:[%s13385_s9 + $0x40] ss:$16 sps:$4 sm:$0xff]  }
 0x1bc   : > { %1492 = vmatprep.subr.bf16.mxu0 %v8629_v53  ;;  %1518 = vmatprep.mubr.bf16.mxu0 %v10109_v24  ;;  %v8646_v53 = vcombine.low %v1075_v35, %v1079_v37 }
 0x1be   : > { %1428 = vmatpush1.bf16.msra.mxu1 %v8594_v16  ;;  %v1043_v16 = vld [vmem:[%s13383_s7 + $0x90] sm:$0xff] }
 0x1bf   : > { %1493 = vmatpush1.bf16.msra.mxu0 %v8628_v56  ;;  %1559 = vmatprep.subr.bf16.mxu1 %v8655_v22  ;;  %v8639_v56 = vcombine.high %v1067_v47, %v1071_v49 }
 0x1c0   : > { %1494 = vmatprep.subr.bf16.mxu0 %v8621_v57  ;;  %v8641_v57 = vcombine.high %v1068_v50, %v1072_v51 }
 0x1c3   : > { %1495 = vmatpush1.bf16.msra.mxu0 %v8620_v58  ;;  %v1059_v58 = vld [vmem:[%s13383_s7 + $0x110] sm:$0xff] }
 0x1c4   : > { %1496 = vmatprep.subr.bf16.mxu0 %v8613_v2  ;;  %v8631_v2 = vcombine.high %v1059_v58, %v1063_v59  ;;  %v8630_v11 = vcombine.low %v1059_v58, %v1063_v59  ;;  %v9613_v58 = vld [vmem:[%s13385_s9 + $0x2c0] ss:$16 sps:$4 sm:$0xff]   ;;  %v9621_v59 = vld [vmem:[%s13385_s9 + $0x2a4] ss:$16 sps:$4 sm:$0xff]  }
 0x1c7   : > { %1497 = vmatpush1.bf16.msra.mxu0 %v8612_v1  ;;  %v8640_v1 = vcombine.low %v1068_v50, %v1072_v51  ;;  %v9606_v51 = vld [vmem:[%s13385_s9 + $0xe4] ss:$16 sps:$4 sm:$0xff]  }
 0x1c8   : > { %1498 = vmatprep.subr.bf16.mxu0 %v8605_v10 }
 0x1cb   : > { %1499 = vmatpush1.bf16.msra.mxu0 %v8604_v9  ;;  %v1056_v9 = vld [vmem:[%s13383_s7 + $0xf8] sm:$0xff] }
 0x1cc   : > { %1500 = vmatprep.subr.bf16.mxu0 %v8597_v18  ;;  %v8625_v15 = vcombine.high %v1052_v8, %v1056_v9  ;;  %v1044_v18 = vld [vmem:[%s13383_s7 + $0x98] sm:$0xff]  ;;  %v8624_v22 = vcombine.low %v1052_v8, %v1056_v9  ;;  %v9637_v8 = vld [vmem:[%s13385_s9 + $0x240] ss:$16 sps:$4 sm:$0xff]   ;;  %v9642_v9 = vld [vmem:[%s13385_s9 + $0x24] ss:$16 sps:$4 sm:$0xff]  }
 0x1cd   : > { %v8616_v35 = vcombine.low %v1044_v18, %v1048_v19 }
 0x1cf   : > { %1501 = vmatpush1.bf16.msra.mxu0 %v8596_v17  ;;  %v1047_v17 = vld [vmem:[%s13383_s7 + $0xb0] sm:$0xff] }
 0x1d0   : > { %1632 = vmatprep.subr.bf16.mxu0 %v8657_v27  ;;  %v8615_v23 = vcombine.high %v1043_v16, %v1047_v17  ;;  %v8617_v27 = vcombine.high %v1044_v18, %v1048_v19  ;;  %v9657_v18 = vld [vmem:[%s13385_s9 + $0x3e4] ss:$16 sps:$4 sm:$0xff]   ;;  %v9652_v19 = vld [vmem:[%s13385_s9 + $0x1e0] ss:$16 sps:$4 sm:$0xff]  }
 0x272   : > { %v9559_v28 = vpop.f32.mrf.mxu0 }
 0x273   : > { %v995_v52 = vadd.f32 %v9559_v28, %v10404_v30  ;;  %v1035_v28 = vld [vmem:[%s13383_s7 + $0x50] sm:$0xff] }
 0x274   : > { %v986_v29 = vpop.f32.mrf.mxu0 }
 0x275   : > { %v987_v32 = vadd.f32 %v10404_v30, %v986_v29  ;;  %v1019_v63 = vmax.f32 %v995_v52, 0.0  ;;  %v1039_v29 = vld [vmem:[%s13383_s7 + $0x70] sm:$0xff] }
 0x276   : > { %v9560_v31 = vpop.f32.mrf.mxu0  ;;  %v8607_v38 = vcombine.high %v1035_v28, %v1039_v29  ;;  %v9609_v52 = vld [vmem:[%s13385_s9 + $0x2e4] ss:$16 sps:$4 sm:$0xff]  }
 0x277   : > { %v1017_v40 = vmax.f32 %v987_v32, 0.0  ;;  %v998_v43 = vadd.f32 %v9560_v31, %v10404_v30  ;;  %v1036_v31 = vld [vmem:[%s13383_s7 + $0x58] sm:$0xff] }
 0x278   : > { %v989_v33 = vpop.f32.mrf.mxu0  ;;  %v1040_v32 = vld [vmem:[%s13383_s7 + $0x78] sm:$0xff] }
 0x279   : > { %v990_v34 = vadd.f32 %v10404_v30, %v989_v33  ;;  %v1020_v55 = vmax.f32 %v998_v43, 0.0  ;;  %v8609_v39 = vcombine.high %v1036_v31, %v1040_v32  ;;  %v8606_v43 = vcombine.low %v1035_v28, %v1039_v29  ;;  %v9664_v28 = vld [vmem:[%s13385_s9 + $0x1a0] ss:$16 sps:$4 sm:$0xff]  }
 0x27a   : > { %v10411_v36 = vpop.f32.mrf.mxu0  ;;  %v9667_v29 = vld [vmem:[%s13385_s9 + $0x3a0] ss:$16 sps:$4 sm:$0xff]  }
 0x27b   : > { %v1018_v41 = vmax.f32 %v990_v34, 0.0  ;;  %v10454_v3 = vpack.c.bf16 %v1020_v55, %v1019_v63  ;;  %v1011_v33 = vadd.f32 %v10411_v36, %v10404_v30  ;;  %v8614_v34 = vcombine.low %v1043_v16, %v1047_v17  ;;  %v1028_v36 = vld [vmem:[%s13383_s7 + $0x18] sm:$0xff]  ;;  %v9612_v55 = vld [vmem:[%s13385_s9 + $0xc4] ss:$16 sps:$4 sm:$0xff]   ;;  %v9649_v16 = vld [vmem:[%s13385_s9 + $0x200] ss:$16 sps:$4 sm:$0xff]  }
 0x27c   : > { %v1002_v42 = vpop.f32.mrf.mxu0  ;;  %v9627_v63 = vld [vmem:[%s13385_s9 + $0x284] ss:$16 sps:$4 sm:$0xff]  }
 0x27d   : > { %v10423_v44 = vpack.c.bf16 %v1018_v41, %v1017_v40  ;;  %v1003_v10 = vadd.f32 %v10404_v30, %v1002_v42  ;;  %v1027_v40 = vld [vmem:[%s13383_s7 + $0x10] sm:$0xff]  ;;  %v1032_v41 = vld [vmem:[%s13383_s7 + $0x38] sm:$0xff]  ;;  %v1023_v42 = vmax.f32 %v1011_v33, 0.0 }
 0x27e   : > { %v9564_v48 = vpop.f32.mrf.mxu0  ;;  %v8600_v50 = vcombine.low %v1028_v36, %v1032_v41  ;;  %v9654_v17 = vld [vmem:[%s13385_s9 + $0x1e4] ss:$16 sps:$4 sm:$0xff]   ;;  %v9670_v33 = vld [vmem:[%s13385_s9 + $0x180] ss:$16 sps:$4 sm:$0xff]  }
 0x27f   : > { %1446 = vmatmul.mubr.bf16.vlgmr.msra.gmra.mxu1 %v10423_v44  ;;  %1519 = vmatmul.mubr.bf16.vlgmr.msra.gmra.mxu0 %v10423_v44  ;;  %v1021_v20 = vmax.f32 %v1003_v10, 0.0  ;;  %v9645_v10 = vld [vmem:[%s13385_s9 + $0x224] ss:$16 sps:$4 sm:$0xff]  }
 0x280   : > { %1560 = vmatpush1.bf16.msra.mxu1 %v8654_v25  ;;  %1633 = vmatpush1.bf16.msra.mxu0 %v8656_v26  ;;  %v1005_v60 = vpop.f32.mrf.mxu0  ;;  %v1014_v25 = vadd.f32 %v9564_v48, %v10404_v30  ;;  %v8601_v48 = vcombine.high %v1028_v36, %v1032_v41  ;;  %v9682_v36 = vld [vmem:[%s13385_s9 + $0x140] ss:$16 sps:$4 sm:$0xff]  }
 0x281   : > { %1561 = vmatprep.subr.bf16.mxu1 %v8647_v45  ;;  %1634 = vmatprep.subr.bf16.mxu0 %v8649_v46  ;;  %v1006_v4 = vadd.f32 %v10404_v30, %v1005_v60  ;;  %v1031_v30 = vld [vmem:[%s13383_s7 + $0x30] sm:$0xff]  ;;  %v8608_v45 = vcombine.low %v1036_v31, %v1040_v32 }
 0x282   : > { %1455 = vmatprep.mubr.bf16.mxu1 %v10109_v24  ;;  %1528 = vmatprep.mubr.bf16.mxu0 %v10109_v24  ;;  %v1024_v37 = vmax.f32 %v1014_v25, 0.0  ;;  %v8599_v47 = vcombine.high %v1027_v40, %v1031_v30  ;;  %v8598_v49 = vcombine.low %v1027_v40, %v1031_v30  ;;  %v9616_v60 = vld [vmem:[%s13385_s9 + $0xa0] ss:$16 sps:$4 sm:$0xff]   ;;  %v9672_v31 = vld [vmem:[%s13385_s9 + $0x184] ss:$16 sps:$4 sm:$0xff]  }
 0x283   : > { %v1022_v13 = vmax.f32 %v1006_v4, 0.0  ;;  %v9628_v4 = vld [vmem:[%s13385_s9 + $0x60] ss:$16 sps:$4 sm:$0xff]   ;;  %v9675_v32 = vld [vmem:[%s13385_s9 + $0x384] ss:$16 sps:$4 sm:$0xff]  }
 0x284   : > { %1562 = vmatpush1.bf16.msra.mxu1 %v8646_v53  ;;  %1635 = vmatpush1.bf16.msra.mxu0 %v8648_v54  ;;  %v1092_v46 = vpack.c.bf16 %v1024_v37, %v1023_v42  ;;  %v9604_v53 = vld [vmem:[%s13385_s9 + $0xe0] ss:$16 sps:$4 sm:$0xff]   ;;  %v9681_v37 = vld [vmem:[%s13385_s9 + $0x364] ss:$16 sps:$4 sm:$0xff]  }
 0x285   : > { %1563 = vmatprep.subr.bf16.mxu1 %v8639_v56  ;;  %1636 = vmatprep.subr.bf16.mxu0 %v8641_v57  ;;  %v10487_v26 = vpack.c.bf16 %v1022_v13, %v1021_v20  ;;  %v9607_v54 = vld [vmem:[%s13385_s9 + $0x2e0] ss:$16 sps:$4 sm:$0xff]   ;;  %v9615_v56 = vld [vmem:[%s13385_s9 + $0x2c4] ss:$16 sps:$4 sm:$0xff]  }
 0x286   : > { %v9610_v57 = vld [vmem:[%s13385_s9 + $0xc0] ss:$16 sps:$4 sm:$0xff]   ;;  %v9648_v13 = vld [vmem:[%s13385_s9 + $0x4] ss:$16 sps:$4 sm:$0xff]  }
 0x287   : > { %1456 = vmatmul.mubr.bf16.gmra.mxu1 %v10454_v3  ;;  %1529 = vmatmul.mubr.bf16.gmra.mxu0 %v10454_v3  ;;  %v9655_v20 = vld [vmem:[%s13385_s9 + $0x3e0] ss:$16 sps:$4 sm:$0xff]   ;;  %v9684_v40 = vld [vmem:[%s13385_s9 + $0x144] ss:$16 sps:$4 sm:$0xff]  }
 0x288   : > { %1564 = vmatpush1.bf16.msra.mxu1 %v8638_v0  ;;  %1637 = vmatpush1.bf16.msra.mxu0 %v8640_v1  ;;  %v9622_v0 = vld [vmem:[%s13385_s9 + $0x80] ss:$16 sps:$4 sm:$0xff]   ;;  %v9687_v30 = vld [vmem:[%s13385_s9 + $0x344] ss:$16 sps:$4 sm:$0xff]  }
 0x289   : > { %1565 = vmatprep.subr.bf16.mxu1 %v8631_v2  ;;  %1638 = vmatprep.subr.bf16.mxu0 %v8633_v5  ;;  %v9625_v1 = vld [vmem:[%s13385_s9 + $0x280] ss:$16 sps:$4 sm:$0xff]   ;;  %v9630_v2 = vld [vmem:[%s13385_s9 + $0x64] ss:$16 sps:$4 sm:$0xff]  }
 0x28a   : > { %1465 = vmatprep.mubr.bf16.mxu1 %v10109_v24  ;;  %1538 = vmatprep.mubr.bf16.mxu0 %v10109_v24  ;;  %v9631_v5 = vld [vmem:[%s13385_s9 + $0x260] ss:$16 sps:$4 sm:$0xff]   ;;  %v9690_v42 = vld [vmem:[%s13385_s9 + $0x124] ss:$16 sps:$4 sm:$0xff]  }
 0x28b   : > { %v9661_v25 = vld [vmem:[%s13385_s9 + $0x3c0] ss:$16 sps:$4 sm:$0xff]  }
 0x28c   : > { %1566 = vmatpush1.bf16.msra.mxu1 %v8630_v11  ;;  %1639 = vmatpush1.bf16.msra.mxu0 %v8632_v12  ;;  %v9640_v11 = vld [vmem:[%s13385_s9 + $0x20] ss:$16 sps:$4 sm:$0xff]  }
 0x28d   : > { %1567 = vmatprep.subr.bf16.mxu1 %v8623_v14  ;;  %1640 = vmatprep.subr.bf16.mxu0 %v8625_v15  ;;  %v9643_v12 = vld [vmem:[%s13385_s9 + $0x220] ss:$16 sps:$4 sm:$0xff]   ;;  %v9651_v14 = vld [vmem:[%s13385_s9 + $0x204] ss:$16 sps:$4 sm:$0xff]  }
 0x28e   : > { %v9646_v15 = vld [vmem:[%s13385_s9] ss:$16 sps:$4 sm:$0xff]  }
 0x28f   : > { %1466 = vmatmul.mubr.bf16.gmra.mxu1 %v10487_v26  ;;  %1539 = vmatmul.mubr.bf16.gmra.mxu0 %v10487_v26  ;;  %v9685_v41 = vld [vmem:[%s13385_s9 + $0x340] ss:$16 sps:$4 sm:$0xff]  }
 0x290   : > { %1568 = vmatpush1.bf16.msra.mxu1 %v8622_v21  ;;  %1641 = vmatpush1.bf16.msra.mxu0 %v8624_v22  ;;  %v9660_v21 = vld [vmem:[%s13385_s9 + $0x1c4] ss:$16 sps:$4 sm:$0xff]  }
 0x291   : > { %1569 = vmatprep.subr.bf16.mxu1 %v8615_v23  ;;  %1642 = vmatprep.subr.bf16.mxu0 %v8617_v27  ;;  %v9663_v22 = vld [vmem:[%s13385_s9 + $0x3c4] ss:$16 sps:$4 sm:$0xff]   ;;  %v9658_v23 = vld [vmem:[%s13385_s9 + $0x1c0] ss:$16 sps:$4 sm:$0xff]  }
 0x292   : > { %1475 = vmatprep.mubr.bf16.mxu1 %v10109_v24  ;;  %1548 = vmatprep.mubr.bf16.mxu0 %v10109_v24  ;;  %v9669_v27 = vld [vmem:[%s13385_s9 + $0x3a4] ss:$16 sps:$4 sm:$0xff]  }
 0x294   : > { %1570 = vmatpush1.bf16.msra.mxu1 %v8614_v34  ;;  %1643 = vmatpush1.bf16.msra.mxu0 %v8616_v35  ;;  %v9673_v34 = vld [vmem:[%s13385_s9 + $0x380] ss:$16 sps:$4 sm:$0xff]   ;;  %v9678_v35 = vld [vmem:[%s13385_s9 + $0x164] ss:$16 sps:$4 sm:$0xff]  }
 0x295   : > { %1571 = vmatprep.subr.bf16.mxu1 %v8607_v38  ;;  %1644 = vmatprep.subr.bf16.mxu0 %v8609_v39  ;;  %v9676_v38 = vld [vmem:[%s13385_s9 + $0x160] ss:$16 sps:$4 sm:$0xff]  }
 0x296   : > { %v9679_v39 = vld [vmem:[%s13385_s9 + $0x360] ss:$16 sps:$4 sm:$0xff]  }
 0x297   : > { %1476 = vmatmul.mubr.bf16.gmra.mxu1 %v1092_v46  ;;  %1549 = vmatmul.mubr.bf16.gmra.mxu0 %v1092_v46 }
 0x298   : > { %1572 = vmatpush1.bf16.msra.mxu1 %v8606_v43  ;;  %1645 = vmatpush1.bf16.msra.mxu0 %v8608_v45  ;;  %v9693_v43 = vld [vmem:[%s13385_s9 + $0x324] ss:$16 sps:$4 sm:$0xff]   ;;  %v9688_v45 = vld [vmem:[%s13385_s9 + $0x120] ss:$16 sps:$4 sm:$0xff]  }
 0x299   : > { %1573 = vmatprep.subr.bf16.mxu1 %v8599_v47  ;;  %1646 = vmatprep.subr.bf16.mxu0 %v8601_v48  ;;  %v9696_v47 = vld [vmem:[%s13385_s9 + $0x104] ss:$16 sps:$4 sm:$0xff]  }
 0x29a   : > { %1591 = vmatprep.mubr.bf16.mxu1 %v10109_v24  ;;  %1664 = vmatprep.mubr.bf16.mxu0 %v10109_v24  ;;  %v9699_v48 = vld [vmem:[%s13385_s9 + $0x304] ss:$16 sps:$4 sm:$0xff]  }
 0x29c   : > { %1574 = vmatpush1.bf16.msra.mxu1 %v8598_v49  ;;  %1647 = vmatpush1.bf16.msra.mxu0 %v8600_v50  ;;  %v9694_v49 = vld [vmem:[%s13385_s9 + $0x100] ss:$16 sps:$4 sm:$0xff]  }
 0x29d   : > { %3468 = vmatprep.subr.bf16.mxu1 %v9606_v51  ;;  %3509 = vmatprep.subr.bf16.mxu0 %v9609_v52  ;;  %v9697_v50 = vld [vmem:[%s13385_s9 + $0x300] ss:$16 sps:$4 sm:$0xff]   ;;  %v9702_v51 = vld [vmem:[%s13385_s9 + $0x4e4] ss:$16 sps:$4 sm:$0xff]  }
 0x29e   : > { %v9705_v52 = vld [vmem:[%s13385_s9 + $0x6e4] ss:$16 sps:$4 sm:$0xff]  }
 0x29f   : > { %1592 = vmatmul.mubr.bf16.vlgmr.msra.gmra.mxu1 %v10423_v44  ;;  %1665 = vmatmul.mubr.bf16.vlgmr.msra.gmra.mxu0 %v10423_v44  ;;  %v9618_v44 = vld [vmem:[%s13385_s9 + $0xa4] ss:$16 sps:$4 sm:$0xff]  }
 0x2a0   : > { %1601 = vmatprep.mubr.bf16.mxu1 %v10109_v24  ;;  %1674 = vmatprep.mubr.bf16.mxu0 %v10109_v24 }
 0x2a1   : > { %3469 = vmatpush1.bf16.msra.mxu1 %v9604_v53  ;;  %3510 = vmatpush1.bf16.msra.mxu0 %v9607_v54 }
 0x2a2   : > { %3470 = vmatprep.subr.bf16.mxu1 %v9612_v55  ;;  %3511 = vmatprep.subr.bf16.mxu0 %v9615_v56 }
 0x2a5   : > { %3471 = vmatpush1.bf16.msra.mxu1 %v9610_v57  ;;  %3512 = vmatpush1.bf16.msra.mxu0 %v9613_v58 }
 0x2a6   : > { %3472 = vmatprep.subr.bf16.mxu1 %v9618_v44  ;;  %3513 = vmatprep.subr.bf16.mxu0 %v9621_v59 }
 0x2a7   : > { %1602 = vmatmul.mubr.bf16.gmra.mxu1 %v10454_v3  ;;  %1675 = vmatmul.mubr.bf16.gmra.mxu0 %v10454_v3  ;;  %v9633_v3 = vld [vmem:[%s13385_s9 + $0x264] ss:$16 sps:$4 sm:$0xff]  }
 0x2a8   : > { %1611 = vmatprep.mubr.bf16.mxu1 %v10109_v24  ;;  %1684 = vmatprep.mubr.bf16.mxu0 %v10109_v24 }
 0x2a9   : > { %3473 = vmatpush1.bf16.msra.mxu1 %v9616_v60  ;;  %3514 = vmatpush1.bf16.msra.mxu0 %v9619_v61 }
 0x2aa   : > { %3474 = vmatprep.subr.bf16.mxu1 %v9624_v62  ;;  %3515 = vmatprep.subr.bf16.mxu0 %v9627_v63 }
 0x2ad   : > { %3475 = vmatpush1.bf16.msra.mxu1 %v9622_v0  ;;  %3516 = vmatpush1.bf16.msra.mxu0 %v9625_v1 }
 0x2ae   : > { %3476 = vmatprep.subr.bf16.mxu1 %v9630_v2  ;;  %3517 = vmatprep.subr.bf16.mxu0 %v9633_v3 }
 0x2af   : > { %1612 = vmatmul.mubr.bf16.gmra.mxu1 %v10487_v26  ;;  %1685 = vmatmul.mubr.bf16.gmra.mxu0 %v10487_v26  ;;  %v9666_v26 = vld [vmem:[%s13385_s9 + $0x1a4] ss:$16 sps:$4 sm:$0xff]  }
 0x2b0   : > { %1621 = vmatprep.mubr.bf16.mxu1 %v10109_v24  ;;  %1694 = vmatprep.mubr.bf16.mxu0 %v10109_v24  ;;  %v9636_v24 = vld [vmem:[%s13385_s9 + $0x44] ss:$16 sps:$4 sm:$0xff]  }
 0x2b1   : > { %3477 = vmatpush1.bf16.msra.mxu1 %v9628_v4  ;;  %3518 = vmatpush1.bf16.msra.mxu0 %v9631_v5 }
 0x2b2   : > { %3478 = vmatprep.subr.bf16.mxu1 %v9636_v24  ;;  %3519 = vmatprep.subr.bf16.mxu0 %v9639_v6 }
 0x2b5   : > { %3479 = vmatpush1.bf16.msra.mxu1 %v9634_v7  ;;  %3520 = vmatpush1.bf16.msra.mxu0 %v9637_v8 }
 0x2b6   : > { %3480 = vmatprep.subr.bf16.mxu1 %v9642_v9  ;;  %3521 = vmatprep.subr.bf16.mxu0 %v9645_v10 }
 0x2b7   : > { %1622 = vmatmul.mubr.bf16.gmra.mxu1 %v1092_v46  ;;  %1695 = vmatmul.mubr.bf16.gmra.mxu0 %v1092_v46  ;;  %v9691_v46 = vld [vmem:[%s13385_s9 + $0x320] ss:$16 sps:$4 sm:$0xff]  }
 0x2b9   : > { %3481 = vmatpush1.bf16.msra.mxu1 %v9640_v11  ;;  %3522 = vmatpush1.bf16.msra.mxu0 %v9643_v12 }
 0x2ba   : > { %3482 = vmatprep.subr.bf16.mxu1 %v9648_v13  ;;  %3523 = vmatprep.subr.bf16.mxu0 %v9651_v14 }
 0x2bd   : > { %3483 = vmatpush1.bf16.msra.mxu1 %v9646_v15  ;;  %3524 = vmatpush1.bf16.msra.mxu0 %v9649_v16 }
 0x2be   : > { %3484 = vmatprep.subr.bf16.mxu1 %v9654_v17  ;;  %3525 = vmatprep.subr.bf16.mxu0 %v9657_v18 }
 0x2c1   : > { %3485 = vmatpush2.bf16.msra.mxu1 %v9652_v19  ;;  %3526 = vmatpush2.bf16.msra.mxu0 %v9655_v20 }
 0x2c2   : > { %3486 = vmatprep.subr.bf16.mxu1 %v9660_v21  ;;  %3527 = vmatprep.subr.bf16.mxu0 %v9663_v22 }
 0x2c5   : > { %3487 = vmatpush2.bf16.msra.mxu1 %v9658_v23  ;;  %3528 = vmatpush2.bf16.msra.mxu0 %v9661_v25 }
 0x2c6   : > { %3488 = vmatprep.subr.bf16.mxu1 %v9666_v26  ;;  %3529 = vmatprep.subr.bf16.mxu0 %v9669_v27 }
 0x2c9   : > { %3489 = vmatpush2.bf16.msra.mxu1 %v9664_v28  ;;  %3530 = vmatpush2.bf16.msra.mxu0 %v9667_v29 }
 0x2ca   : > { %3490 = vmatprep.subr.bf16.mxu1 %v9672_v31  ;;  %3531 = vmatprep.subr.bf16.mxu0 %v9675_v32 }
 0x2cd   : > { %3491 = vmatpush2.bf16.msra.mxu1 %v9670_v33  ;;  %3532 = vmatpush2.bf16.msra.mxu0 %v9673_v34 }
 0x2ce   : > { %3492 = vmatprep.subr.bf16.mxu1 %v9678_v35  ;;  %3533 = vmatprep.subr.bf16.mxu0 %v9681_v37  ;;  %v1846_v35 = vlaneseq }
 0x2d1   : > { %3493 = vmatpush2.bf16.msra.mxu1 %v9676_v38  ;;  %3534 = vmatpush2.bf16.msra.mxu0 %v9679_v39 }
 0x2d2   : > { %3494 = vmatprep.subr.bf16.mxu1 %v9684_v40  ;;  %3535 = vmatprep.subr.bf16.mxu0 %v9687_v30 }
 0x2d5   : > { %3495 = vmatpush2.bf16.msra.mxu1 %v9682_v36  ;;  %3536 = vmatpush2.bf16.msra.mxu0 %v9685_v41 }
 0x2d6   : > { %3496 = vmatprep.subr.bf16.mxu1 %v9690_v42  ;;  %3537 = vmatprep.subr.bf16.mxu0 %v9693_v43 }
 0x2d9   : > { %3497 = vmatpush2.bf16.msra.mxu1 %v9688_v45  ;;  %3538 = vmatpush2.bf16.msra.mxu0 %v9691_v46  ;;  %v10731_v46 = vshrl.u32 %v1846_v35, 7 }
 0x2da   : > { %3498 = vmatprep.subr.bf16.mxu1 %v9696_v47  ;;  %3539 = vmatprep.subr.bf16.mxu0 %v9699_v48 }
 0x2dd   : > { %3499 = vmatpush2.bf16.msra.mxu1 %v9694_v49  ;;  %3540 = vmatpush2.bf16.msra.mxu0 %v9697_v50 }
 0x2de   : > { %3550 = vmatprep.subr.bf16.mxu1 %v9702_v51  ;;  %3591 = vmatprep.subr.bf16.mxu0 %v9705_v52 }
 0x33f   : > { %v1447_v53 = vpop.f32.mrf.mxu1  ;;  %v1520_v54 = vpop.f32.mrf.mxu0 }
 0x341   : > { %v1449_v55 = vpop.f32.mrf.mxu1  ;;  %v1522_v56 = vpop.f32.mrf.mxu0 }
 0x343   : > { %v1451_v57 = vpop.f32.mrf.mxu1  ;;  %v1524_v58 = vpop.f32.mrf.mxu0 }
 0x344   : > { %v1705_v24 = vmax.f32 %v1447_v53, %v1451_v57  ;;  %v1707_v6 = vmax.f32 %v1520_v54, %v1524_v58 }
 0x345   : > { %v1453_v44 = vpop.f32.mrf.mxu1  ;;  %v1526_v59 = vpop.f32.mrf.mxu0 }
 0x346   : > { %v1706_v9 = vmax.f32 %v1449_v55, %v1453_v44  ;;  %v1708_v10 = vmax.f32 %v1522_v56, %v1526_v59  ;;  %v10738_v44 = vsub.s32 0, %v10731_v46  ;;  %v10741_v59 = vsub.s32 2, %v10731_v46 }
 0x347   : > { %v1457_v60 = vpop.f32.mrf.mxu1  ;;  %v1530_v61 = vpop.f32.mrf.mxu0 }
 0x348   : > { %v1713_v11 = vmax.f32 %v1705_v24, %v1457_v60  ;;  %v1715_v12 = vmax.f32 %v1707_v6, %v1530_v61 }
 0x349   : > { %v1459_v62 = vpop.f32.mrf.mxu1  ;;  %v1532_v63 = vpop.f32.mrf.mxu0 }
 0x34a   : > { %v1714_v15 = vmax.f32 %v1706_v9, %v1459_v62  ;;  %v1716_v16 = vmax.f32 %v1708_v10, %v1532_v63  ;;  %v10750_v63 = vld [vmem:[%s13384_s8] sm:$0xff] }
 0x34b   : > { %v1461_v0 = vpop.f32.mrf.mxu1  ;;  %v1534_v1 = vpop.f32.mrf.mxu0  ;;  %v1857_v9 = vrot.slane %v10750_v63, %v10741_v59 }
 0x34c   : > { %v1721_v17 = vmax.f32 %v1713_v11, %v1461_v0  ;;  %v1723_v18 = vmax.f32 %v1715_v12, %v1534_v1  ;;  %v10761_v12 = vsub.s32 1, %v10731_v46 }
 0x34d   : > { %v1463_v2 = vpop.f32.mrf.mxu1  ;;  %v1536_v3 = vpop.f32.mrf.mxu0 }
 0x34e   : > { %v1722_v21 = vmax.f32 %v1714_v15, %v1463_v2  ;;  %v1724_v22 = vmax.f32 %v1716_v16, %v1536_v3 }
 0x34f   : > { %v1467_v4 = vpop.f32.mrf.mxu1  ;;  %v1540_v5 = vpop.f32.mrf.mxu0 }
 0x350   : > { %v1729_v23 = vmax.f32 %v1721_v17, %v1467_v4  ;;  %v1731_v25 = vmax.f32 %v1723_v18, %v1540_v5 }
 0x351   : > { %v1469_v7 = vpop.f32.mrf.mxu1  ;;  %v1542_v8 = vpop.f32.mrf.mxu0 }
 0x352   : > { %v1730_v28 = vmax.f32 %v1722_v21, %v1469_v7  ;;  %v1732_v29 = vmax.f32 %v1724_v22, %v1542_v8  ;;  %v1849_v8 = vrot.slane %v10750_v63, %v10738_v44 }
 0x353   : > { %v1471_v13 = vpop.f32.mrf.mxu1  ;;  %v1544_v14 = vpop.f32.mrf.mxu0 }
 0x354   : > { %v1737_v31 = vmax.f32 %v1729_v23, %v1471_v13  ;;  %v1739_v32 = vmax.f32 %v1731_v25, %v1544_v14  ;;  %v10764_v13 = vsub.s32 3, %v10731_v46 }
 0x355   : > { %v1473_v19 = vpop.f32.mrf.mxu1  ;;  %v1546_v20 = vpop.f32.mrf.mxu0 }
 0x356   : > { %v1738_v37 = vmax.f32 %v1730_v28, %v1473_v19  ;;  %v1740_v38 = vmax.f32 %v1732_v29, %v1546_v20  ;;  %v1861_v28 = vrot.slane %v10750_v63, %v10764_v13 }
 0x357   : > { %v1477_v26 = vpop.f32.mrf.mxu1  ;;  %v1550_v27 = vpop.f32.mrf.mxu0 }
 0x358   : > { %v1745_v39 = vmax.f32 %v1737_v31, %v1477_v26  ;;  %v1747_v40 = vmax.f32 %v1739_v32, %v1550_v27  ;;  %v1853_v27 = vrot.slane %v10750_v63, %v10761_v12 }
 0x359   : > { %v1479_v33 = vpop.f32.mrf.mxu1  ;;  %v1552_v34 = vpop.f32.mrf.mxu0 }
 0x35a   : > { %v1746_v41 = vmax.f32 %v1738_v37, %v1479_v33  ;;  %v1748_v42 = vmax.f32 %v1740_v38, %v1552_v34 }
 0x35b   : > { %v1481_v30 = vpop.f32.mrf.mxu1  ;;  %v1554_v36 = vpop.f32.mrf.mxu0 }
 0x35c   : > { %v1753_v43 = vmax.f32 %v1745_v39, %v1481_v30  ;;  %v1755_v45 = vmax.f32 %v1747_v40, %v1554_v36 }
 0x35d   : > { %v1483_v47 = vpop.f32.mrf.mxu1  ;;  %v1556_v48 = vpop.f32.mrf.mxu0 }
 0x35e   : > { %v1796_v49 = vrot.slane %v1753_v43, 4  ;;  %v1808_v50 = vrot.slane %v1755_v45, 4  ;;  %v1754_v51 = vmax.f32 %v1746_v41, %v1483_v47  ;;  %v1756_v52 = vmax.f32 %v1748_v42, %v1556_v48 }
 0x35f   : > { %v10733_v53 = vpop.f32.mrf.mxu1  ;;  %v10735_v54 = vpop.f32.mrf.mxu0 }
 0x360   : > { %v1797_v55 = vmax.f32 %v1753_v43, %v1796_v49  ;;  %v1809_v56 = vmax.f32 %v1755_v45, %v1808_v50  ;;  %v1802_v57 = vrot.slane %v1754_v51, 4  ;;  %v1814_v58 = vrot.slane %v1756_v52, 4 }
 0x361   : > { %v10743_v60 = vpop.f32.mrf.mxu1  ;;  %v10745_v61 = vpop.f32.mrf.mxu0 }
 0x362   : > { %v1798_v62 = vrot.slane %v1797_v55, 2  ;;  %v1810_v0 = vrot.slane %v1809_v56, 2  ;;  %v1803_v1 = vmax.f32 %v1754_v51, %v1802_v57  ;;  %v1815_v2 = vmax.f32 %v1756_v52, %v1814_v58  ;;  %v9700_v51 = vld [vmem:[%s13385_s9 + $0x4e0] ss:$16 sps:$4 sm:$0xff]  }
 0x363   : > { %v10752_v3 = vpop.f32.mrf.mxu1  ;;  %v10754_v4 = vpop.f32.mrf.mxu0  ;;  %v9703_v52 = vld [vmem:[%s13385_s9 + $0x6e0] ss:$16 sps:$4 sm:$0xff]  }
 0x364   : > { %v1799_v5 = vmax.f32 %v1797_v55, %v1798_v62  ;;  %v1811_v24 = vmax.f32 %v1809_v56, %v1810_v0  ;;  %v1804_v6 = vrot.slane %v1803_v1, 2  ;;  %v1816_v7 = vrot.slane %v1815_v2, 2  ;;  %v9708_v62 = vld [vmem:[%s13385_s9 + $0x4c4] ss:$16 sps:$4 sm:$0xff]  }
 0x365   : > { %v1599_v10 = vpop.f32.mrf.mxu1  ;;  %v1672_v11 = vpop.f32.mrf.mxu0  ;;  %v9711_v0 = vld [vmem:[%s13385_s9 + $0x6c4] ss:$16 sps:$4 sm:$0xff]  }
 0x366   : > { %v1800_v14 = vrot.slane %v1799_v5, 1  ;;  %v1812_v15 = vrot.slane %v1811_v24, 1  ;;  %v1805_v16 = vmax.f32 %v1803_v1, %v1804_v6  ;;  %v1817_v17 = vmax.f32 %v1815_v2, %v1816_v7  ;;  %v9706_v6 = vld [vmem:[%s13385_s9 + $0x4c0] ss:$16 sps:$4 sm:$0xff]  }
 0x367   : > { %v10766_v18 = vpop.f32.mrf.mxu1  ;;  %v10768_v19 = vpop.f32.mrf.mxu0  ;;  %v1710_v57 = vmax.f32 %v10743_v60, %v1599_v10  ;;  %v1712_v58 = vmax.f32 %v10745_v61, %v1672_v11  ;;  %v9709_v7 = vld [vmem:[%s13385_s9 + $0x6c0] ss:$16 sps:$4 sm:$0xff]   ;;  %v9714_v10 = vld [vmem:[%s13385_s9 + $0x4a4] ss:$16 sps:$4 sm:$0xff]  }
 0x368   : > { %v1801_v20 = vmax.f32 %v1799_v5, %v1800_v14  ;;  %v1813_v21 = vmax.f32 %v1811_v24, %v1812_v15  ;;  %v1806_v22 = vrot.slane %v1805_v16, 1  ;;  %v1818_v23 = vrot.slane %v1817_v17, 1  ;;  %v9717_v11 = vld [vmem:[%s13385_s9 + $0x6a4] ss:$16 sps:$4 sm:$0xff]  }
 0x369   : > { %v1605_v25 = vpop.f32.mrf.mxu1  ;;  %v1678_v26 = vpop.f32.mrf.mxu0 }
 0x36a   : > { %v1886_v29 = vadd.f32 %v1849_v8, %v1801_v20  ;;  %v1888_v31 = vadd.f32 %v1857_v9, %v1813_v21  ;;  %v1807_v32 = vmax.f32 %v1805_v16, %v1806_v22  ;;  %v1819_v33 = vmax.f32 %v1817_v17, %v1818_v23  ;;  %v9712_v22 = vld [vmem:[%s13385_s9 + $0x4a0] ss:$16 sps:$4 sm:$0xff]  }
 0x36b   : > { %v10774_v34 = vpop.f32.mrf.mxu1  ;;  %v10776_v35 = vpop.f32.mrf.mxu0  ;;  %v1718_v5 = vmax.f32 %v1710_v57, %v1605_v25  ;;  %v1720_v60 = vmax.f32 %v1712_v58, %v1678_v26  ;;  %v9715_v23 = vld [vmem:[%s13385_s9 + $0x6a0] ss:$16 sps:$4 sm:$0xff]   ;;  %v1711_v58 = vmax.f32 %v10735_v54, %v10754_v4 }
 0x36c   : > { %v1887_v39 = vadd.f32 %v1853_v27, %v1807_v32  ;;  %v1889_v40 = vadd.f32 %v1861_v28, %v1819_v33  ;;  %v1894_v30 = vmax.f32 %v1886_v29, 0.0  ;;  %v1896_v36 = vmax.f32 %v1888_v31, 0.0  ;;  %v9720_v27 = vld [vmem:[%s13385_s9 + $0x484] ss:$16 sps:$4 sm:$0xff]   ;;  %v9727_v57 = vld [vmem:[%s13385_s9 + $0x660] ss:$16 sps:$4 sm:$0xff]  }
 0x36d   : > { %v1609_v37 = vpop.f32.mrf.mxu1  ;;  %v1682_v38 = vpop.f32.mrf.mxu0  ;;  %v9723_v28 = vld [vmem:[%s13385_s9 + $0x684] ss:$16 sps:$4 sm:$0xff]  }
 0x36e   : > { %v1895_v43 = vmax.f32 %v1887_v39, 0.0  ;;  %v1897_v45 = vmax.f32 %v1889_v40, 0.0  ;;  %v10792_v55 = vpack.c.bf16 %v1894_v30, %v1894_v30  ;;  %v10794_v56 = vpack.c.bf16 %v1896_v36, %v1896_v36  ;;  %v9718_v39 = vld [vmem:[%s13385_s9 + $0x480] ss:$16 sps:$4 sm:$0xff]  }
 0x36f   : > { %v10778_v41 = vpop.f32.mrf.mxu1  ;;  %v10780_v42 = vpop.f32.mrf.mxu0  ;;  %v1726_v8 = vmax.f32 %v1718_v5, %v1609_v37  ;;  %v1728_v9 = vmax.f32 %v1720_v60, %v1682_v38  ;;  %v9721_v40 = vld [vmem:[%s13385_s9 + $0x680] ss:$16 sps:$4 sm:$0xff]   ;;  %v10874_v60 = vsub.s32 5, %v10731_v46 }
 0x370   : > { %v10782_v49 = vpack.c.bf16 %v1895_v43, %v1895_v43  ;;  %v10784_v50 = vpack.c.bf16 %v1897_v45, %v1897_v45  ;;  %v9726_v43 = vld [vmem:[%s13385_s9 + $0x464] ss:$16 sps:$4 sm:$0xff]  }
 0x371   : > { %v1615_v47 = vpop.f32.mrf.mxu1  ;;  %v1688_v48 = vpop.f32.mrf.mxu0  ;;  %v9729_v45 = vld [vmem:[%s13385_s9 + $0x664] ss:$16 sps:$4 sm:$0xff]  }
 0x372   : > { %3500 = vmatprep.mubr.bf16.mxu1 %v10782_v49  ;;  %3541 = vmatprep.mubr.bf16.mxu0 %v10784_v50  ;;  %v1734_v16 = vmax.f32 %v1726_v8, %v1615_v47  ;;  %v1736_v17 = vmax.f32 %v1728_v9, %v1688_v48 }
 0x373   : > { %v10806_v1 = vpop.f32.mrf.mxu1  ;;  %v10808_v2 = vpop.f32.mrf.mxu0  ;;  %3501 = vmatmul.mubr.bf16.vlgmr.msra.gmra.mxu1 %v10792_v55  ;;  %3542 = vmatmul.mubr.bf16.vlgmr.msra.gmra.mxu0 %v10794_v56 }
 0x374   : > { %3551 = vmatpush1.bf16.msra.mxu1 %v9700_v51  ;;  %3592 = vmatpush1.bf16.msra.mxu0 %v9703_v52  ;;  %v1709_v51 = vmax.f32 %v10733_v53, %v10752_v3  ;;  %v9724_v52 = vld [vmem:[%s13385_s9 + $0x460] ss:$16 sps:$4 sm:$0xff]   ;;  %v9732_v53 = vld [vmem:[%s13385_s9 + $0x444] ss:$16 sps:$4 sm:$0xff]  }
 0x375   : > { %v1619_v61 = vpop.f32.mrf.mxu1  ;;  %v1692_v24 = vpop.f32.mrf.mxu0  ;;  %3552 = vmatprep.subr.bf16.mxu1 %v9708_v62  ;;  %3593 = vmatprep.subr.bf16.mxu0 %v9711_v0  ;;  %v9735_v3 = vld [vmem:[%s13385_s9 + $0x644] ss:$16 sps:$4 sm:$0xff]  }
 0x376   : > { %v1742_v25 = vmax.f32 %v1734_v16, %v1619_v61  ;;  %v1744_v26 = vmax.f32 %v1736_v17, %v1692_v24  ;;  %v1717_v5 = vmax.f32 %v1709_v51, %v10766_v18  ;;  %v1719_v61 = vmax.f32 %v1711_v58, %v10768_v19  ;;  %v9733_v18 = vld [vmem:[%s13385_s9 + $0x640] ss:$16 sps:$4 sm:$0xff]   ;;  %v9756_v51 = vld [vmem:[%s13385_s9 + $0x5c4] ss:$16 sps:$4 sm:$0xff]  }
 0x377   : > { %v10824_v14 = vpop.f32.mrf.mxu1  ;;  %v10826_v15 = vpop.f32.mrf.mxu0  ;;  %v10878_v24 = vsub.s32 7, %v10731_v46  ;;  %v1869_v16 = vrot.slane %v10750_v63, %v10874_v60  ;;  %v9757_v58 = vld [vmem:[%s13385_s9 + $0x7c0] ss:$16 sps:$4 sm:$0xff]  }
 0x378   : > { %3553 = vmatpush1.bf16.msra.mxu1 %v9706_v6  ;;  %3594 = vmatpush1.bf16.msra.mxu0 %v9709_v7  ;;  %v1725_v6 = vmax.f32 %v1717_v5, %v10774_v34  ;;  %v9730_v7 = vld [vmem:[%s13385_s9 + $0x440] ss:$16 sps:$4 sm:$0xff]   ;;  %v1727_v8 = vmax.f32 %v1719_v61, %v10776_v35  ;;  %v9738_v34 = vld [vmem:[%s13385_s9 + $0x424] ss:$16 sps:$4 sm:$0xff]  }
 0x379   : > { %v1625_v20 = vpop.f32.mrf.mxu1  ;;  %v1698_v21 = vpop.f32.mrf.mxu0  ;;  %3554 = vmatprep.subr.bf16.mxu1 %v9714_v10  ;;  %3595 = vmatprep.subr.bf16.mxu0 %v9717_v11  ;;  %v9741_v10 = vld [vmem:[%s13385_s9 + $0x624] ss:$16 sps:$4 sm:$0xff]   ;;  %v9760_v5 = vld [vmem:[%s13385_s9 + $0x5a0] ss:$16 sps:$4 sm:$0xff]  }
 0x37a   : > { %v1750_v32 = vmax.f32 %v1742_v25, %v1625_v20  ;;  %v1752_v33 = vmax.f32 %v1744_v26, %v1698_v21  ;;  %v1733_v11 = vmax.f32 %v1725_v6, %v10778_v41  ;;  %v1735_v17 = vmax.f32 %v1727_v8, %v10780_v42  ;;  %v9739_v41 = vld [vmem:[%s13385_s9 + $0x620] ss:$16 sps:$4 sm:$0xff]   ;;  %v9768_v6 = vld [vmem:[%s13385_s9 + $0x584] ss:$16 sps:$4 sm:$0xff]  }
 0x37b   : > { %v10840_v29 = vpop.f32.mrf.mxu1  ;;  %v10842_v31 = vpop.f32.mrf.mxu0  ;;  %v1877_v21 = vrot.slane %v10750_v63, %v10878_v24  ;;  %v9763_v61 = vld [vmem:[%s13385_s9 + $0x7a0] ss:$16 sps:$4 sm:$0xff]  }
 0x37c   : > { %3555 = vmatpush1.bf16.msra.mxu1 %v9712_v22  ;;  %3596 = vmatpush1.bf16.msra.mxu0 %v9715_v23  ;;  %v1741_v22 = vmax.f32 %v1733_v11, %v10806_v1  ;;  %v9736_v23 = vld [vmem:[%s13385_s9 + $0x420] ss:$16 sps:$4 sm:$0xff]   ;;  %v1743_v25 = vmax.f32 %v1735_v17, %v10808_v2  ;;  %v9744_v1 = vld [vmem:[%s13385_s9 + $0x404] ss:$16 sps:$4 sm:$0xff]   ;;  %v10991_v17 = vsub.s32 4, %v10731_v46 }
 0x37d   : > { %v1629_v37 = vpop.f32.mrf.mxu1  ;;  %v1702_v38 = vpop.f32.mrf.mxu0  ;;  %3556 = vmatprep.subr.bf16.mxu1 %v9720_v27  ;;  %3597 = vmatprep.subr.bf16.mxu0 %v9723_v28  ;;  %v9747_v27 = vld [vmem:[%s13385_s9 + $0x604] ss:$16 sps:$4 sm:$0xff]   ;;  %v9742_v2 = vld [vmem:[%s13385_s9 + $0x400] ss:$16 sps:$4 sm:$0xff]  }
 0x37e   : > { %v1758_v30 = vmax.f32 %v1750_v32, %v1629_v37  ;;  %v1760_v36 = vmax.f32 %v1752_v33, %v1702_v38  ;;  %v1749_v28 = vmax.f32 %v1741_v22, %v10824_v14  ;;  %v1751_v32 = vmax.f32 %v1743_v25, %v10826_v15  ;;  %v9745_v38 = vld [vmem:[%s13385_s9 + $0x600] ss:$16 sps:$4 sm:$0xff]   ;;  %v9750_v14 = vld [vmem:[%s13385_s9 + $0x5e4] ss:$16 sps:$4 sm:$0xff]  }
 0x37f   : > { %v9769_v8 = vld [vmem:[%s13385_s9 + $0x780] ss:$16 sps:$4 sm:$0xff]   ;;  %v9780_v22 = vld [vmem:[%s13385_s9 + $0x544] ss:$16 sps:$4 sm:$0xff]  }
 0x380   : > { %v1826_v47 = vrot.slane %v1758_v30, 4  ;;  %v1838_v48 = vrot.slane %v1760_v36, 4  ;;  %3557 = vmatpush1.bf16.msra.mxu1 %v9718_v39  ;;  %3598 = vmatpush1.bf16.msra.mxu0 %v9721_v40  ;;  %v1757_v39 = vmax.f32 %v1749_v28, %v10840_v29  ;;  %v1759_v40 = vmax.f32 %v1751_v32, %v10842_v31  ;;  %v9748_v29 = vld [vmem:[%s13385_s9 + $0x5e0] ss:$16 sps:$4 sm:$0xff]   ;;  %v9789_v28 = vld [vmem:[%s13385_s9 + $0x724] ss:$16 sps:$4 sm:$0xff]  }
 0x381   : > { %3558 = vmatprep.subr.bf16.mxu1 %v9726_v43  ;;  %3599 = vmatprep.subr.bf16.mxu0 %v9729_v45  ;;  %v9751_v31 = vld [vmem:[%s13385_s9 + $0x7e0] ss:$16 sps:$4 sm:$0xff]  }
 0x382   : > { %v1827_v62 = vmax.f32 %v1758_v30, %v1826_v47  ;;  %v1839_v0 = vmax.f32 %v1760_v36, %v1838_v48  ;;  %v9753_v36 = vld [vmem:[%s13385_s9 + $0x7e4] ss:$16 sps:$4 sm:$0xff]   ;;  %v1820_v47 = vrot.slane %v1757_v39, 4  ;;  %v1832_v48 = vrot.slane %v1759_v40, 4  ;;  %v9772_v11 = vld [vmem:[%s13385_s9 + $0x560] ss:$16 sps:$4 sm:$0xff]  }
 0x383   : > { %v9781_v25 = vld [vmem:[%s13385_s9 + $0x740] ss:$16 sps:$4 sm:$0xff]  }
 0x384   : > { %v1828_v54 = vrot.slane %v1827_v62, 2  ;;  %v1840_v4 = vrot.slane %v1839_v0, 2  ;;  %3559 = vmatpush1.bf16.msra.mxu1 %v9724_v52  ;;  %3600 = vmatpush1.bf16.msra.mxu0 %v9727_v57  ;;  %v9759_v52 = vld [vmem:[%s13385_s9 + $0x7c4] ss:$16 sps:$4 sm:$0xff]   ;;  %v9754_v57 = vld [vmem:[%s13385_s9 + $0x5c0] ss:$16 sps:$4 sm:$0xff]  }
 0x385   : > { %3560 = vmatprep.subr.bf16.mxu1 %v9732_v53  ;;  %3601 = vmatprep.subr.bf16.mxu0 %v9735_v3  ;;  %v9762_v53 = vld [vmem:[%s13385_s9 + $0x5a4] ss:$16 sps:$4 sm:$0xff]  }
 0x386   : > { %v1829_v19 = vmax.f32 %v1827_v62, %v1828_v54  ;;  %v1841_v9 = vmax.f32 %v1839_v0, %v1840_v4  ;;  %v1821_v62 = vmax.f32 %v1757_v39, %v1820_v47  ;;  %v1833_v0 = vmax.f32 %v1759_v40, %v1832_v48  ;;  %v9765_v3 = vld [vmem:[%s13385_s9 + $0x7a4] ss:$16 sps:$4 sm:$0xff]   ;;  %v9790_v40 = vld [vmem:[%s13385_s9 + $0x500] ss:$16 sps:$4 sm:$0xff]  }
 0x388   : > { %v1830_v35 = vrot.slane %v1829_v19, 1  ;;  %v1842_v20 = vrot.slane %v1841_v9, 1  ;;  %3561 = vmatpush1.bf16.msra.mxu1 %v9730_v7  ;;  %3602 = vmatpush1.bf16.msra.mxu0 %v9733_v18  ;;  %v1822_v54 = vrot.slane %v1821_v62, 2  ;;  %v1834_v4 = vrot.slane %v1833_v0, 2  ;;  %v9771_v7 = vld [vmem:[%s13385_s9 + $0x784] ss:$16 sps:$4 sm:$0xff]  }
 0x389   : > { %3562 = vmatprep.subr.bf16.mxu1 %v9738_v34  ;;  %3603 = vmatprep.subr.bf16.mxu0 %v9741_v10  ;;  %v9766_v18 = vld [vmem:[%s13385_s9 + $0x580] ss:$16 sps:$4 sm:$0xff]   ;;  %v9774_v34 = vld [vmem:[%s13385_s9 + $0x564] ss:$16 sps:$4 sm:$0xff]  }
 0x38a   : > { %v1831_v42 = vmax.f32 %v1829_v19, %v1830_v35  ;;  %v1843_v26 = vmax.f32 %v1841_v9, %v1842_v20  ;;  %v1823_v19 = vmax.f32 %v1821_v62, %v1822_v54  ;;  %v1835_v9 = vmax.f32 %v1833_v0, %v1834_v4  ;;  %v9777_v10 = vld [vmem:[%s13385_s9 + $0x764] ss:$16 sps:$4 sm:$0xff]   ;;  %v9805_v62 = vld [vmem:[%s13385_s9 + $0x2c8] ss:$16 sps:$4 sm:$0xff]   ;;  %v9810_v0 = vld [vmem:[%s13385_s9 + $0xac] ss:$16 sps:$4 sm:$0xff]  }
 0x38b   : > { %v10994_v35 = vsub.s32 6, %v10731_v46  ;;  %v9817_v54 = vld [vmem:[%s13385_s9 + $0x288] ss:$16 sps:$4 sm:$0xff]   ;;  %v9822_v4 = vld [vmem:[%s13385_s9 + $0x6c] ss:$16 sps:$4 sm:$0xff]  }
 0x38c   : > { %v1891_v33 = vadd.f32 %v1869_v16, %v1831_v42  ;;  %v1893_v37 = vadd.f32 %v1877_v21, %v1843_v26  ;;  %3563 = vmatpush1.bf16.msra.mxu1 %v9736_v23  ;;  %3604 = vmatpush1.bf16.msra.mxu0 %v9739_v41  ;;  %v9775_v16 = vld [vmem:[%s13385_s9 + $0x760] ss:$16 sps:$4 sm:$0xff]   ;;  %v1824_v20 = vrot.slane %v1823_v19, 1  ;;  %v1836_v21 = vrot.slane %v1835_v9, 1  ;;  %v9783_v23 = vld [vmem:[%s13385_s9 + $0x744] ss:$16 sps:$4 sm:$0xff]  }
 0x38d   : > { %3564 = vmatprep.subr.bf16.mxu1 %v9744_v1  ;;  %3605 = vmatprep.subr.bf16.mxu0 %v9747_v27  ;;  %v9778_v41 = vld [vmem:[%s13385_s9 + $0x540] ss:$16 sps:$4 sm:$0xff]   ;;  %v1865_v42 = vrot.slane %v10750_v63, %v10991_v17  ;;  %v9786_v27 = vld [vmem:[%s13385_s9 + $0x524] ss:$16 sps:$4 sm:$0xff]   ;;  %v1873_v32 = vrot.slane %v10750_v63, %v10994_v35 }
 0x38e   : > { %v1899_v15 = vmax.f32 %v1891_v33, 0.0  ;;  %v1901_v30 = vmax.f32 %v1893_v37, 0.0  ;;  %v1825_v26 = vmax.f32 %v1823_v19, %v1824_v20  ;;  %v1837_v1 = vmax.f32 %v1835_v9, %v1836_v21  ;;  %v9784_v33 = vld [vmem:[%s13385_s9 + $0x520] ss:$16 sps:$4 sm:$0xff]   ;;  %v9795_v63 = vld [vmem:[%s13385_s9 + $0x704] ss:$16 sps:$4 sm:$0xff]  }
 0x38f   : > { %v9787_v37 = vld [vmem:[%s13385_s9 + $0x720] ss:$16 sps:$4 sm:$0xff]   ;;  %v9831_v19 = vld [vmem:[%s13385_s9 + $0x24c] ss:$16 sps:$4 sm:$0xff]   ;;  %v9826_v9 = vld [vmem:[%s13385_s9 + $0x48] ss:$16 sps:$4 sm:$0xff]  }
 0x390   : > { %v10930_v43 = vpack.c.bf16 %v1899_v15, %v1899_v15  ;;  %v10932_v45 = vpack.c.bf16 %v1901_v30, %v1901_v30  ;;  %3565 = vmatpush1.bf16.msra.mxu1 %v9742_v2  ;;  %3606 = vmatpush1.bf16.msra.mxu0 %v9745_v38  ;;  %v9792_v2 = vld [vmem:[%s13385_s9 + $0x504] ss:$16 sps:$4 sm:$0xff]   ;;  %v1890_v38 = vadd.f32 %v1865_v42, %v1825_v26  ;;  %v9835_v20 = vld [vmem:[%s13385_s9 + $0x228] ss:$16 sps:$4 sm:$0xff]   ;;  %v9840_v21 = vld [vmem:[%s13385_s9 + $0xc] ss:$16 sps:$4 sm:$0xff]  }
 0x391   : > { %3566 = vmatprep.subr.bf16.mxu1 %v9750_v14  ;;  %3607 = vmatprep.subr.bf16.mxu0 %v9753_v36  ;;  %v1892_v39 = vadd.f32 %v1873_v32, %v1837_v1  ;;  %v9793_v14 = vld [vmem:[%s13385_s9 + $0x700] ss:$16 sps:$4 sm:$0xff]   ;;  %v9798_v36 = vld [vmem:[%s13385_s9 + $0xec] ss:$16 sps:$4 sm:$0xff]   ;;  %v9844_v26 = vld [vmem:[%s13385_s9 + $0x1e8] ss:$16 sps:$4 sm:$0xff]  }
 0x392   : > { %3582 = vmatprep.mubr.bf16.mxu1 %v10930_v43  ;;  %3623 = vmatprep.mubr.bf16.mxu0 %v10932_v45  ;;  %v1898_v15 = vmax.f32 %v1890_v38, 0.0  ;;  %v9849_v42 = vld [vmem:[%s13385_s9 + $0x3ec] ss:$16 sps:$4 sm:$0xff]   ;;  %v9847_v1 = vld [vmem:[%s13385_s9 + $0x3e8] ss:$16 sps:$4 sm:$0xff]  }
 0x393   : > { %v1900_v30 = vmax.f32 %v1892_v39, 0.0  ;;  %v9850_v32 = vld [vmem:[%s13385_s9 + $0x1c8] ss:$16 sps:$4 sm:$0xff]   ;;  %v9864_v39 = vld [vmem:[%s13385_s9 + $0x18c] ss:$16 sps:$4 sm:$0xff]  }
 0x394   : > { %3567 = vmatpush2.bf16.msra.mxu1 %v9748_v29  ;;  %3608 = vmatpush2.bf16.msra.mxu0 %v9751_v31  ;;  %v9801_v29 = vld [vmem:[%s13385_s9 + $0x2ec] ss:$16 sps:$4 sm:$0xff]   ;;  %v9796_v31 = vld [vmem:[%s13385_s9 + $0xe8] ss:$16 sps:$4 sm:$0xff]   ;;  %v11045_v47 = vpack.c.bf16 %v1898_v15, %v1898_v15 }
 0x395   : > { %3568 = vmatprep.subr.bf16.mxu1 %v9756_v51  ;;  %3609 = vmatprep.subr.bf16.mxu0 %v9759_v52  ;;  %v11047_v48 = vpack.c.bf16 %v1900_v30, %v1900_v30  ;;  %v9799_v51 = vld [vmem:[%s13385_s9 + $0x2e8] ss:$16 sps:$4 sm:$0xff]   ;;  %v9804_v52 = vld [vmem:[%s13385_s9 + $0xcc] ss:$16 sps:$4 sm:$0xff]  }
 0x396   : > { %v9859_v38 = vld [vmem:[%s13385_s9 + $0x3a8] ss:$16 sps:$4 sm:$0xff]   ;;  %v9870_v30 = vld [vmem:[%s13385_s9 + $0x16c] ss:$16 sps:$4 sm:$0xff]  }
 0x397   : > { %v9865_v15 = vld [vmem:[%s13385_s9 + $0x388] ss:$16 sps:$4 sm:$0xff]  }
 0x398   : > { %3569 = vmatpush2.bf16.msra.mxu1 %v9754_v57  ;;  %3610 = vmatpush2.bf16.msra.mxu0 %v9757_v58  ;;  %v9807_v57 = vld [vmem:[%s13385_s9 + $0x2cc] ss:$16 sps:$4 sm:$0xff]   ;;  %v9802_v58 = vld [vmem:[%s13385_s9 + $0xc8] ss:$16 sps:$4 sm:$0xff]  }
 0x399   : > { %3570 = vmatprep.subr.bf16.mxu1 %v9762_v53  ;;  %3611 = vmatprep.subr.bf16.mxu0 %v9765_v3  ;;  %v9808_v53 = vld [vmem:[%s13385_s9 + $0xa8] ss:$16 sps:$4 sm:$0xff]   ;;  %v9816_v3 = vld [vmem:[%s13385_s9 + $0x8c] ss:$16 sps:$4 sm:$0xff]  }
 0x39c   : > { %3571 = vmatpush2.bf16.msra.mxu1 %v9760_v5  ;;  %3612 = vmatpush2.bf16.msra.mxu0 %v9763_v61  ;;  %v9819_v5 = vld [vmem:[%s13385_s9 + $0x28c] ss:$16 sps:$4 sm:$0xff]   ;;  %v9814_v61 = vld [vmem:[%s13385_s9 + $0x88] ss:$16 sps:$4 sm:$0xff]  }
 0x39d   : > { %3572 = vmatprep.subr.bf16.mxu1 %v9768_v6  ;;  %3613 = vmatprep.subr.bf16.mxu0 %v9771_v7  ;;  %v9825_v6 = vld [vmem:[%s13385_s9 + $0x26c] ss:$16 sps:$4 sm:$0xff]   ;;  %v9820_v7 = vld [vmem:[%s13385_s9 + $0x68] ss:$16 sps:$4 sm:$0xff]  }
 0x3a0   : > { %3573 = vmatpush2.bf16.msra.mxu1 %v9766_v18  ;;  %3614 = vmatpush2.bf16.msra.mxu0 %v9769_v8  ;;  %v9823_v18 = vld [vmem:[%s13385_s9 + $0x268] ss:$16 sps:$4 sm:$0xff]   ;;  %v9828_v8 = vld [vmem:[%s13385_s9 + $0x4c] ss:$16 sps:$4 sm:$0xff]  }
 0x3a1   : > { %3574 = vmatprep.subr.bf16.mxu1 %v9774_v34  ;;  %3615 = vmatprep.subr.bf16.mxu0 %v9777_v10  ;;  %v9829_v34 = vld [vmem:[%s13385_s9 + $0x248] ss:$16 sps:$4 sm:$0xff]   ;;  %v9834_v10 = vld [vmem:[%s13385_s9 + $0x2c] ss:$16 sps:$4 sm:$0xff]  }
 0x3a4   : > { %3575 = vmatpush2.bf16.msra.mxu1 %v9772_v11  ;;  %3616 = vmatpush2.bf16.msra.mxu0 %v9775_v16  ;;  %v9837_v11 = vld [vmem:[%s13385_s9 + $0x22c] ss:$16 sps:$4 sm:$0xff]   ;;  %v9832_v16 = vld [vmem:[%s13385_s9 + $0x28] ss:$16 sps:$4 sm:$0xff]  }
 0x3a5   : > { %3576 = vmatprep.subr.bf16.mxu1 %v9780_v22  ;;  %3617 = vmatprep.subr.bf16.mxu0 %v9783_v23  ;;  %v9843_v22 = vld [vmem:[%s13385_s9 + $0x20c] ss:$16 sps:$4 sm:$0xff]   ;;  %v9838_v23 = vld [vmem:[%s13385_s9 + $0x8] ss:$16 sps:$4 sm:$0xff]  }
 0x3a8   : > { %3577 = vmatpush2.bf16.msra.mxu1 %v9778_v41  ;;  %3618 = vmatpush2.bf16.msra.mxu0 %v9781_v25  ;;  %v9841_v41 = vld [vmem:[%s13385_s9 + $0x208] ss:$16 sps:$4 sm:$0xff]   ;;  %v9846_v25 = vld [vmem:[%s13385_s9 + $0x1ec] ss:$16 sps:$4 sm:$0xff]  }
 0x3a9   : > { %3578 = vmatprep.subr.bf16.mxu1 %v9786_v27  ;;  %3619 = vmatprep.subr.bf16.mxu0 %v9789_v28  ;;  %v9852_v27 = vld [vmem:[%s13385_s9 + $0x1cc] ss:$16 sps:$4 sm:$0xff]  }
 0x3aa   : > { %v9855_v28 = vld [vmem:[%s13385_s9 + $0x3cc] ss:$16 sps:$4 sm:$0xff]  }
 0x3ac   : > { %3579 = vmatpush2.bf16.msra.mxu1 %v9784_v33  ;;  %3620 = vmatpush2.bf16.msra.mxu0 %v9787_v37  ;;  %v9853_v33 = vld [vmem:[%s13385_s9 + $0x3c8] ss:$16 sps:$4 sm:$0xff]   ;;  %v9858_v37 = vld [vmem:[%s13385_s9 + $0x1ac] ss:$16 sps:$4 sm:$0xff]  }
 0x3ad   : > { %3580 = vmatprep.subr.bf16.mxu1 %v9792_v2  ;;  %3621 = vmatprep.subr.bf16.mxu0 %v9795_v63  ;;  %v9861_v2 = vld [vmem:[%s13385_s9 + $0x3ac] ss:$16 sps:$4 sm:$0xff]   ;;  %v9856_v63 = vld [vmem:[%s13385_s9 + $0x1a8] ss:$16 sps:$4 sm:$0xff]  }
 0x3b0   : > { %3581 = vmatpush2.bf16.msra.mxu1 %v9790_v40  ;;  %3622 = vmatpush2.bf16.msra.mxu0 %v9793_v14  ;;  %v9867_v40 = vld [vmem:[%s13385_s9 + $0x38c] ss:$16 sps:$4 sm:$0xff]   ;;  %v9862_v14 = vld [vmem:[%s13385_s9 + $0x188] ss:$16 sps:$4 sm:$0xff]  }
 0x3b1   : > { %3632 = vmatprep.subr.bf16.mxu1 %v9798_v36  ;;  %3673 = vmatprep.subr.bf16.mxu0 %v9801_v29  ;;  %v9873_v36 = vld [vmem:[%s13385_s9 + $0x36c] ss:$16 sps:$4 sm:$0xff]   ;;  %v9868_v29 = vld [vmem:[%s13385_s9 + $0x168] ss:$16 sps:$4 sm:$0xff]  }
 0x3b3   : > { %3583 = vmatmul.mubr.bf16.vlgmr.msra.gmra.mxu1 %v11045_v47  ;;  %3624 = vmatmul.mubr.bf16.vlgmr.msra.gmra.mxu0 %v11047_v48 }
 0x3b4   : > { %3633 = vmatpush1.bf16.msra.mxu1 %v9796_v31  ;;  %3664 = vmatprep.mubr.bf16.mxu1 %v10782_v49  ;;  %v9813_v49 = vld [vmem:[%s13385_s9 + $0x2ac] ss:$16 sps:$4 sm:$0xff]   ;;  %v9871_v31 = vld [vmem:[%s13385_s9 + $0x368] ss:$16 sps:$4 sm:$0xff]  }
 0x3b5   : > { %3674 = vmatpush1.bf16.msra.mxu0 %v9799_v51  ;;  %3705 = vmatprep.mubr.bf16.mxu0 %v10784_v50  ;;  %v9811_v50 = vld [vmem:[%s13385_s9 + $0x2a8] ss:$16 sps:$4 sm:$0xff]   ;;  %v9876_v51 = vld [vmem:[%s13385_s9 + $0x14c] ss:$16 sps:$4 sm:$0xff]  }
 0x3b6   : > { %3634 = vmatprep.subr.bf16.mxu1 %v9804_v52  ;;  %3675 = vmatprep.subr.bf16.mxu0 %v9807_v57  ;;  %v9879_v52 = vld [vmem:[%s13385_s9 + $0x34c] ss:$16 sps:$4 sm:$0xff]   ;;  %v9874_v57 = vld [vmem:[%s13385_s9 + $0x148] ss:$16 sps:$4 sm:$0xff]  }
 0x3b8   : > { %3635 = vmatpush1.bf16.msra.mxu1 %v9802_v58  ;;  %v9877_v58 = vld [vmem:[%s13385_s9 + $0x348] ss:$16 sps:$4 sm:$0xff]  }
 0x3b9   : > { %3676 = vmatpush1.bf16.msra.mxu0 %v9805_v62  ;;  %3636 = vmatprep.subr.bf16.mxu1 %v9810_v0  ;;  %v9882_v62 = vld [vmem:[%s13385_s9 + $0x12c] ss:$16 sps:$4 sm:$0xff]  }
 0x3ba   : > { %3677 = vmatprep.subr.bf16.mxu0 %v9813_v49  ;;  %v9885_v0 = vld [vmem:[%s13385_s9 + $0x32c] ss:$16 sps:$4 sm:$0xff]   ;;  %v9880_v49 = vld [vmem:[%s13385_s9 + $0x128] ss:$16 sps:$4 sm:$0xff]  }
 0x3bc   : > { %3637 = vmatpush1.bf16.msra.mxu1 %v9808_v53  ;;  %v9883_v53 = vld [vmem:[%s13385_s9 + $0x328] ss:$16 sps:$4 sm:$0xff]  }
 0x3bd   : > { %3678 = vmatpush1.bf16.msra.mxu0 %v9811_v50  ;;  %3638 = vmatprep.subr.bf16.mxu1 %v9816_v3  ;;  %v9888_v50 = vld [vmem:[%s13385_s9 + $0x10c] ss:$16 sps:$4 sm:$0xff]  }
 0x3be   : > { %3679 = vmatprep.subr.bf16.mxu0 %v9819_v5  ;;  %v9891_v3 = vld [vmem:[%s13385_s9 + $0x30c] ss:$16 sps:$4 sm:$0xff]   ;;  %v9886_v5 = vld [vmem:[%s13385_s9 + $0x108] ss:$16 sps:$4 sm:$0xff]  }
 0x3c0   : > { %3639 = vmatpush1.bf16.msra.mxu1 %v9814_v61  ;;  %v9889_v61 = vld [vmem:[%s13385_s9 + $0x308] ss:$16 sps:$4 sm:$0xff]  }
 0x3c1   : > { %3680 = vmatpush1.bf16.msra.mxu0 %v9817_v54  ;;  %3640 = vmatprep.subr.bf16.mxu1 %v9822_v4  ;;  %v9894_v54 = vld [vmem:[%s13385_s9 + $0x4ec] ss:$16 sps:$4 sm:$0xff]  }
 0x3c2   : > { %3681 = vmatprep.subr.bf16.mxu0 %v9825_v6  ;;  %v9897_v4 = vld [vmem:[%s13385_s9 + $0x6ec] ss:$16 sps:$4 sm:$0xff]   ;;  %v9892_v6 = vld [vmem:[%s13385_s9 + $0x4e8] ss:$16 sps:$4 sm:$0xff]  }
 0x3c4   : > { %3641 = vmatpush1.bf16.msra.mxu1 %v9820_v7  ;;  %v9895_v7 = vld [vmem:[%s13385_s9 + $0x6e8] ss:$16 sps:$4 sm:$0xff]  }
 0x3c5   : > { %3682 = vmatpush1.bf16.msra.mxu0 %v9823_v18  ;;  %3642 = vmatprep.subr.bf16.mxu1 %v9828_v8  ;;  %v9900_v18 = vld [vmem:[%s13385_s9 + $0x4cc] ss:$16 sps:$4 sm:$0xff]  }
 0x3c6   : > { %3683 = vmatprep.subr.bf16.mxu0 %v9831_v19  ;;  %v9903_v8 = vld [vmem:[%s13385_s9 + $0x6cc] ss:$16 sps:$4 sm:$0xff]   ;;  %v9898_v19 = vld [vmem:[%s13385_s9 + $0x4c8] ss:$16 sps:$4 sm:$0xff]  }
 0x3c8   : > { %3643 = vmatpush1.bf16.msra.mxu1 %v9826_v9  ;;  %v9901_v9 = vld [vmem:[%s13385_s9 + $0x6c8] ss:$16 sps:$4 sm:$0xff]  }
 0x3c9   : > { %3684 = vmatpush1.bf16.msra.mxu0 %v9829_v34  ;;  %3644 = vmatprep.subr.bf16.mxu1 %v9834_v10  ;;  %v9907_v34 = vld [vmem:[%s13385_s9 + $0x6a8] ss:$16 sps:$4 sm:$0xff]   ;;  %v9915_v10 = vld [vmem:[%s13385_s9 + $0x68c] ss:$16 sps:$4 sm:$0xff]  }
 0x3ca   : > { %3685 = vmatprep.subr.bf16.mxu0 %v9837_v11  ;;  %v9910_v11 = vld [vmem:[%s13385_s9 + $0x488] ss:$16 sps:$4 sm:$0xff]  }
 0x3cc   : > { %3645 = vmatpush1.bf16.msra.mxu1 %v9832_v16  ;;  %v9913_v16 = vld [vmem:[%s13385_s9 + $0x688] ss:$16 sps:$4 sm:$0xff]  }
 0x3cd   : > { %3686 = vmatpush1.bf16.msra.mxu0 %v9835_v20  ;;  %3646 = vmatprep.subr.bf16.mxu1 %v9840_v21  ;;  %v9918_v20 = vld [vmem:[%s13385_s9 + $0x46c] ss:$16 sps:$4 sm:$0xff]  }
 0x3ce   : > { %3687 = vmatprep.subr.bf16.mxu0 %v9843_v22  ;;  %v9921_v21 = vld [vmem:[%s13385_s9 + $0x66c] ss:$16 sps:$4 sm:$0xff]   ;;  %v9916_v22 = vld [vmem:[%s13385_s9 + $0x468] ss:$16 sps:$4 sm:$0xff]  }
 0x3d0   : > { %3647 = vmatpush1.bf16.msra.mxu1 %v9838_v23  ;;  %v9919_v23 = vld [vmem:[%s13385_s9 + $0x668] ss:$16 sps:$4 sm:$0xff]  }
 0x3d1   : > { %3688 = vmatpush1.bf16.msra.mxu0 %v9841_v41  ;;  %3648 = vmatprep.subr.bf16.mxu1 %v9846_v25  ;;  %v9924_v41 = vld [vmem:[%s13385_s9 + $0x44c] ss:$16 sps:$4 sm:$0xff]  }
 0x3d2   : > { %3689 = vmatprep.subr.bf16.mxu0 %v9849_v42  ;;  %v9927_v25 = vld [vmem:[%s13385_s9 + $0x64c] ss:$16 sps:$4 sm:$0xff]   ;;  %v9922_v42 = vld [vmem:[%s13385_s9 + $0x448] ss:$16 sps:$4 sm:$0xff]  }
 0x3d4   : > { %3649 = vmatpush2.bf16.msra.mxu1 %v9844_v26  ;;  %v9925_v26 = vld [vmem:[%s13385_s9 + $0x648] ss:$16 sps:$4 sm:$0xff]  }
 0x3d5   : > { %3690 = vmatpush2.bf16.msra.mxu0 %v9847_v1  ;;  %3650 = vmatprep.subr.bf16.mxu1 %v9852_v27  ;;  %v9930_v1 = vld [vmem:[%s13385_s9 + $0x42c] ss:$16 sps:$4 sm:$0xff]  }
 0x3d6   : > { %3691 = vmatprep.subr.bf16.mxu0 %v9855_v28  ;;  %v9933_v27 = vld [vmem:[%s13385_s9 + $0x62c] ss:$16 sps:$4 sm:$0xff]   ;;  %v9928_v28 = vld [vmem:[%s13385_s9 + $0x428] ss:$16 sps:$4 sm:$0xff]  }
 0x3d8   : > { %3651 = vmatpush2.bf16.msra.mxu1 %v9850_v32  ;;  %v9931_v32 = vld [vmem:[%s13385_s9 + $0x628] ss:$16 sps:$4 sm:$0xff]  }
 0x3d9   : > { %3692 = vmatpush2.bf16.msra.mxu0 %v9853_v33  ;;  %3652 = vmatprep.subr.bf16.mxu1 %v9858_v37  ;;  %v9936_v33 = vld [vmem:[%s13385_s9 + $0x40c] ss:$16 sps:$4 sm:$0xff]  }
 0x3da   : > { %3693 = vmatprep.subr.bf16.mxu0 %v9861_v2  ;;  %v9939_v37 = vld [vmem:[%s13385_s9 + $0x60c] ss:$16 sps:$4 sm:$0xff]   ;;  %v9934_v2 = vld [vmem:[%s13385_s9 + $0x408] ss:$16 sps:$4 sm:$0xff]  }
 0x3dc   : > { %3653 = vmatpush2.bf16.msra.mxu1 %v9856_v63  ;;  %v9937_v63 = vld [vmem:[%s13385_s9 + $0x608] ss:$16 sps:$4 sm:$0xff]  }
 0x3dd   : > { %3694 = vmatpush2.bf16.msra.mxu0 %v9859_v38  ;;  %3654 = vmatprep.subr.bf16.mxu1 %v9864_v39  ;;  %v9942_v38 = vld [vmem:[%s13385_s9 + $0x5ec] ss:$16 sps:$4 sm:$0xff]  }
 0x3de   : > { %3695 = vmatprep.subr.bf16.mxu0 %v9867_v40  ;;  %v9945_v39 = vld [vmem:[%s13385_s9 + $0x7ec] ss:$16 sps:$4 sm:$0xff]   ;;  %v9940_v40 = vld [vmem:[%s13385_s9 + $0x5e8] ss:$16 sps:$4 sm:$0xff]  }
 0x3e0   : > { %3655 = vmatpush2.bf16.msra.mxu1 %v9862_v14  ;;  %v9943_v14 = vld [vmem:[%s13385_s9 + $0x7e8] ss:$16 sps:$4 sm:$0xff]  }
 0x3e1   : > { %3696 = vmatpush2.bf16.msra.mxu0 %v9865_v15  ;;  %3656 = vmatprep.subr.bf16.mxu1 %v9870_v30  ;;  %v9948_v15 = vld [vmem:[%s13385_s9 + $0x5cc] ss:$16 sps:$4 sm:$0xff]  }
 0x3e2   : > { %3697 = vmatprep.subr.bf16.mxu0 %v9873_v36  ;;  %v9951_v30 = vld [vmem:[%s13385_s9 + $0x7cc] ss:$16 sps:$4 sm:$0xff]   ;;  %v9946_v36 = vld [vmem:[%s13385_s9 + $0x5c8] ss:$16 sps:$4 sm:$0xff]  }
 0x3e4   : > { %3657 = vmatpush2.bf16.msra.mxu1 %v9868_v29  ;;  %v9949_v29 = vld [vmem:[%s13385_s9 + $0x7c8] ss:$16 sps:$4 sm:$0xff]  }
 0x3e5   : > { %3698 = vmatpush2.bf16.msra.mxu0 %v9871_v31  ;;  %3658 = vmatprep.subr.bf16.mxu1 %v9876_v51  ;;  %v9954_v31 = vld [vmem:[%s13385_s9 + $0x5ac] ss:$16 sps:$4 sm:$0xff]  }
 0x3e6   : > { %3699 = vmatprep.subr.bf16.mxu0 %v9879_v52  ;;  %v9957_v51 = vld [vmem:[%s13385_s9 + $0x7ac] ss:$16 sps:$4 sm:$0xff]   ;;  %v9952_v52 = vld [vmem:[%s13385_s9 + $0x5a8] ss:$16 sps:$4 sm:$0xff]  }
 0x3e8   : > { %3659 = vmatpush2.bf16.msra.mxu1 %v9874_v57  ;;  %v9955_v57 = vld [vmem:[%s13385_s9 + $0x7a8] ss:$16 sps:$4 sm:$0xff]  }
 0x3e9   : > { %3700 = vmatpush2.bf16.msra.mxu0 %v9877_v58  ;;  %3660 = vmatprep.subr.bf16.mxu1 %v9882_v62  ;;  %v9960_v58 = vld [vmem:[%s13385_s9 + $0x58c] ss:$16 sps:$4 sm:$0xff]  }
 0x3ea   : > { %3701 = vmatprep.subr.bf16.mxu0 %v9885_v0  ;;  %v9963_v62 = vld [vmem:[%s13385_s9 + $0x78c] ss:$16 sps:$4 sm:$0xff]   ;;  %v9958_v0 = vld [vmem:[%s13385_s9 + $0x588] ss:$16 sps:$4 sm:$0xff]  }
 0x3ec   : > { %3661 = vmatpush2.bf16.msra.mxu1 %v9880_v49  ;;  %v9961_v49 = vld [vmem:[%s13385_s9 + $0x788] ss:$16 sps:$4 sm:$0xff]  }
 0x3ed   : > { %3702 = vmatpush2.bf16.msra.mxu0 %v9883_v53  ;;  %3662 = vmatprep.subr.bf16.mxu1 %v9888_v50  ;;  %v9966_v53 = vld [vmem:[%s13385_s9 + $0x56c] ss:$16 sps:$4 sm:$0xff]  }
 0x3ee   : > { %3703 = vmatprep.subr.bf16.mxu0 %v9891_v3  ;;  %v9969_v50 = vld [vmem:[%s13385_s9 + $0x76c] ss:$16 sps:$4 sm:$0xff]   ;;  %v9964_v3 = vld [vmem:[%s13385_s9 + $0x568] ss:$16 sps:$4 sm:$0xff]  }
 0x3f0   : > { %3663 = vmatpush2.bf16.msra.mxu1 %v9886_v5  ;;  %v9967_v5 = vld [vmem:[%s13385_s9 + $0x768] ss:$16 sps:$4 sm:$0xff]  }
 0x3f1   : > { %3704 = vmatpush2.bf16.msra.mxu0 %v9889_v61  ;;  %3714 = vmatprep.subr.bf16.mxu1 %v9894_v54  ;;  %v9972_v61 = vld [vmem:[%s13385_s9 + $0x54c] ss:$16 sps:$4 sm:$0xff]  }
 0x3f2   : > { %3755 = vmatprep.subr.bf16.mxu0 %v9897_v4  ;;  %v9975_v54 = vld [vmem:[%s13385_s9 + $0x74c] ss:$16 sps:$4 sm:$0xff]   ;;  %v9970_v4 = vld [vmem:[%s13385_s9 + $0x548] ss:$16 sps:$4 sm:$0xff]  }
 0x3f3   : > { %3665 = vmatmul.mubr.bf16.vlgmr.msra.gmra.mxu1 %v10792_v55  ;;  %v9906_v55 = vld [vmem:[%s13385_s9 + $0x4ac] ss:$16 sps:$4 sm:$0xff]  }
 0x3f4   : > { %3706 = vmatmul.mubr.bf16.vlgmr.msra.gmra.mxu0 %v10794_v56  ;;  %3715 = vmatpush1.bf16.msra.mxu1 %v9892_v6  ;;  %v9909_v56 = vld [vmem:[%s13385_s9 + $0x6ac] ss:$16 sps:$4 sm:$0xff]   ;;  %v9973_v6 = vld [vmem:[%s13385_s9 + $0x748] ss:$16 sps:$4 sm:$0xff]  }
 0x3f5   : > { %3746 = vmatprep.mubr.bf16.mxu1 %v10930_v43  ;;  %3756 = vmatpush1.bf16.msra.mxu0 %v9895_v7  ;;  %v9904_v43 = vld [vmem:[%s13385_s9 + $0x4a8] ss:$16 sps:$4 sm:$0xff]   ;;  %v9978_v7 = vld [vmem:[%s13385_s9 + $0x52c] ss:$16 sps:$4 sm:$0xff]  }
 0x3f6   : > { %3787 = vmatprep.mubr.bf16.mxu0 %v10932_v45  ;;  %3716 = vmatprep.subr.bf16.mxu1 %v9900_v18  ;;  %v9912_v45 = vld [vmem:[%s13385_s9 + $0x48c] ss:$16 sps:$4 sm:$0xff]  }
 0x3f7   : > { %3757 = vmatprep.subr.bf16.mxu0 %v9903_v8  ;;  %v9981_v18 = vld [vmem:[%s13385_s9 + $0x72c] ss:$16 sps:$4 sm:$0xff]   ;;  %v9976_v8 = vld [vmem:[%s13385_s9 + $0x528] ss:$16 sps:$4 sm:$0xff]  }
 0x3f8   : > { %3717 = vmatpush1.bf16.msra.mxu1 %v9898_v19  ;;  %v9979_v19 = vld [vmem:[%s13385_s9 + $0x728] ss:$16 sps:$4 sm:$0xff]  }
 0x3f9   : > { %3758 = vmatpush1.bf16.msra.mxu0 %v9901_v9  ;;  %3718 = vmatprep.subr.bf16.mxu1 %v9906_v55  ;;  %v9984_v9 = vld [vmem:[%s13385_s9 + $0x50c] ss:$16 sps:$4 sm:$0xff]  }
 0x3fa   : > { %3759 = vmatprep.subr.bf16.mxu0 %v9909_v56  ;;  %v9987_v55 = vld [vmem:[%s13385_s9 + $0x70c] ss:$16 sps:$4 sm:$0xff]   ;;  %v9982_v56 = vld [vmem:[%s13385_s9 + $0x508] ss:$16 sps:$4 sm:$0xff]  }
 0x3fc   : > { %3719 = vmatpush1.bf16.msra.mxu1 %v9904_v43  ;;  %v9985_v43 = vld [vmem:[%s13385_s9 + $0x708] ss:$16 sps:$4 sm:$0xff]  }
 0x3fd   : > { %3760 = vmatpush1.bf16.msra.mxu0 %v9907_v34  ;;  %3720 = vmatprep.subr.bf16.mxu1 %v9912_v45  ;;  %v9990_v34 = vld [vmem:[%s13387_s11 + $0x74] ss:$8 sps:$4 sm:$0xff]   ;;  %v9988_v45 = vld [vmem:[%s13387_s11 + $0x70] ss:$8 sps:$4 sm:$0xff]  }
 0x3fe   : > { %3761 = vmatprep.subr.bf16.mxu0 %v9915_v10  ;;  %v9993_v10 = vld [vmem:[%s13387_s11 + $0x64] ss:$8 sps:$4 sm:$0xff]  }
 0x400   : > { %3721 = vmatpush1.bf16.msra.mxu1 %v9910_v11 }
 0x401   : > { %3762 = vmatpush1.bf16.msra.mxu0 %v9913_v16  ;;  %3722 = vmatprep.subr.bf16.mxu1 %v9918_v20  ;;  %v9991_v20 = vld [vmem:[%s13387_s11 + $0x60] ss:$8 sps:$4 sm:$0xff]  }
 0x402   : > { %3763 = vmatprep.subr.bf16.mxu0 %v9921_v21 }
 0x404   : > { %3723 = vmatpush1.bf16.msra.mxu1 %v9916_v22 }
 0x405   : > { %3764 = vmatpush1.bf16.msra.mxu0 %v9919_v23  ;;  %3724 = vmatprep.subr.bf16.mxu1 %v9924_v41 }
 0x406   : > { %3765 = vmatprep.subr.bf16.mxu0 %v9927_v25 }
 0x408   : > { %3725 = vmatpush1.bf16.msra.mxu1 %v9922_v42 }
 0x409   : > { %3766 = vmatpush1.bf16.msra.mxu0 %v9925_v26  ;;  %3726 = vmatprep.subr.bf16.mxu1 %v9930_v1  ;;  %v9999_v26 = vld [vmem:[%s13387_s11 + $0x44] ss:$8 sps:$4 sm:$0xff]   ;;  %v10036_v1 = vld [vmem:[%s13387_s11 + $0x170] ss:$8 sps:$4 sm:$0xff]  }
 0x40a   : > { %3767 = vmatprep.subr.bf16.mxu0 %v9933_v27  ;;  %v10038_v27 = vld [vmem:[%s13387_s11 + $0x174] ss:$8 sps:$4 sm:$0xff]  }
 0x40c   : > { %3727 = vmatpush1.bf16.msra.mxu1 %v9928_v28  ;;  %v10041_v28 = vld [vmem:[%s13387_s11 + $0x164] ss:$8 sps:$4 sm:$0xff]  }
 0x40d   : > { %3768 = vmatpush1.bf16.msra.mxu0 %v9931_v32  ;;  %3728 = vmatprep.subr.bf16.mxu1 %v9936_v33  ;;  %v9997_v32 = vld [vmem:[%s13387_s11 + $0x40] ss:$8 sps:$4 sm:$0xff]   ;;  %v10002_v33 = vld [vmem:[%s13387_s11 + $0x34] ss:$8 sps:$4 sm:$0xff]  }
 0x40e   : > { %3769 = vmatprep.subr.bf16.mxu0 %v9939_v37  ;;  %v10039_v37 = vld [vmem:[%s13387_s11 + $0x160] ss:$8 sps:$4 sm:$0xff]  }
 0x410   : > { %3729 = vmatpush1.bf16.msra.mxu1 %v9934_v2  ;;  %v10044_v2 = vld [vmem:[%s13387_s11 + $0x154] ss:$8 sps:$4 sm:$0xff]  }
 0x411   : > { %3770 = vmatpush1.bf16.msra.mxu0 %v9937_v63  ;;  %3730 = vmatprep.subr.bf16.mxu1 %v9942_v38  ;;  %v10000_v63 = vld [vmem:[%s13387_s11 + $0x30] ss:$8 sps:$4 sm:$0xff]   ;;  %v10005_v38 = vld [vmem:[%s13387_s11 + $0x24] ss:$8 sps:$4 sm:$0xff]  }
 0x412   : > { %3771 = vmatprep.subr.bf16.mxu0 %v9945_v39  ;;  %v10042_v39 = vld [vmem:[%s13387_s11 + $0x150] ss:$8 sps:$4 sm:$0xff]  }
 0x414   : > { %3731 = vmatpush2.bf16.msra.mxu1 %v9940_v40  ;;  %v10047_v40 = vld [vmem:[%s13387_s11 + $0x144] ss:$8 sps:$4 sm:$0xff]  }
 0x415   : > { %3772 = vmatpush2.bf16.msra.mxu0 %v9943_v14  ;;  %3732 = vmatprep.subr.bf16.mxu1 %v9948_v15  ;;  %v10003_v14 = vld [vmem:[%s13387_s11 + $0x20] ss:$8 sps:$4 sm:$0xff]   ;;  %v10008_v15 = vld [vmem:[%s13387_s11 + $0x14] ss:$8 sps:$4 sm:$0xff]  }
 0x416   : > { %3773 = vmatprep.subr.bf16.mxu0 %v9951_v30  ;;  %v10045_v30 = vld [vmem:[%s13387_s11 + $0x140] ss:$8 sps:$4 sm:$0xff]  }
 0x418   : > { %3733 = vmatpush2.bf16.msra.mxu1 %v9946_v36  ;;  %v10050_v36 = vld [vmem:[%s13387_s11 + $0x134] ss:$8 sps:$4 sm:$0xff]  }
 0x419   : > { %3774 = vmatpush2.bf16.msra.mxu0 %v9949_v29  ;;  %3734 = vmatprep.subr.bf16.mxu1 %v9954_v31  ;;  %v10006_v29 = vld [vmem:[%s13387_s11 + $0x10] ss:$8 sps:$4 sm:$0xff]   ;;  %v10011_v31 = vld [vmem:[%s13387_s11 + $0x4] ss:$8 sps:$4 sm:$0xff]  }
 0x41a   : > { %3775 = vmatprep.subr.bf16.mxu0 %v9957_v51  ;;  %v10048_v51 = vld [vmem:[%s13387_s11 + $0x130] ss:$8 sps:$4 sm:$0xff]  }
 0x41c   : > { %3735 = vmatpush2.bf16.msra.mxu1 %v9952_v52  ;;  %v10053_v52 = vld [vmem:[%s13387_s11 + $0x124] ss:$8 sps:$4 sm:$0xff]  }
 0x41d   : > { %3776 = vmatpush2.bf16.msra.mxu0 %v9955_v57  ;;  %3736 = vmatprep.subr.bf16.mxu1 %v9960_v58  ;;  %v10009_v57 = vld [vmem:[%s13387_s11] ss:$8 sps:$4 sm:$0xff]   ;;  %v10014_v58 = vld [vmem:[%s13387_s11 + $0xf4] ss:$8 sps:$4 sm:$0xff]  }
 0x41e   : > { %3777 = vmatprep.subr.bf16.mxu0 %v9963_v62  ;;  %v10051_v62 = vld [vmem:[%s13387_s11 + $0x120] ss:$8 sps:$4 sm:$0xff]  }
 0x420   : > { %3737 = vmatpush2.bf16.msra.mxu1 %v9958_v0  ;;  %v10056_v0 = vld [vmem:[%s13387_s11 + $0x114] ss:$8 sps:$4 sm:$0xff]  }
 0x421   : > { %3778 = vmatpush2.bf16.msra.mxu0 %v9961_v49  ;;  %3738 = vmatprep.subr.bf16.mxu1 %v9966_v53  ;;  %v10012_v49 = vld [vmem:[%s13387_s11 + $0xf0] ss:$8 sps:$4 sm:$0xff]   ;;  %v10017_v53 = vld [vmem:[%s13387_s11 + $0xe4] ss:$8 sps:$4 sm:$0xff]  }
 0x422   : > { %3779 = vmatprep.subr.bf16.mxu0 %v9969_v50  ;;  %v10054_v50 = vld [vmem:[%s13387_s11 + $0x110] ss:$8 sps:$4 sm:$0xff]  }
 0x424   : > { %3739 = vmatpush2.bf16.msra.mxu1 %v9964_v3  ;;  %v10059_v3 = vld [vmem:[%s13387_s11 + $0x104] ss:$8 sps:$4 sm:$0xff]  }
 0x425   : > { %3780 = vmatpush2.bf16.msra.mxu0 %v9967_v5  ;;  %3740 = vmatprep.subr.bf16.mxu1 %v9972_v61  ;;  %v10015_v5 = vld [vmem:[%s13387_s11 + $0xe0] ss:$8 sps:$4 sm:$0xff]   ;;  %v10020_v61 = vld [vmem:[%s13387_s11 + $0xd4] ss:$8 sps:$4 sm:$0xff]  }
 0x426   : > { %3781 = vmatprep.subr.bf16.mxu0 %v9975_v54  ;;  %v10057_v54 = vld [vmem:[%s13387_s11 + $0x100] ss:$8 sps:$4 sm:$0xff]  }
 0x428   : > { %3741 = vmatpush2.bf16.msra.mxu1 %v9970_v4  ;;  %v10062_v4 = vld [vmem:[%s13387_s11 + $0x1f4] ss:$8 sps:$4 sm:$0xff]  }
 0x429   : > { %3782 = vmatpush2.bf16.msra.mxu0 %v9973_v6  ;;  %3742 = vmatprep.subr.bf16.mxu1 %v9978_v7  ;;  %v10018_v6 = vld [vmem:[%s13387_s11 + $0xd0] ss:$8 sps:$4 sm:$0xff]   ;;  %v10023_v7 = vld [vmem:[%s13387_s11 + $0xc4] ss:$8 sps:$4 sm:$0xff]  }
 0x42a   : > { %3783 = vmatprep.subr.bf16.mxu0 %v9981_v18  ;;  %v10060_v18 = vld [vmem:[%s13387_s11 + $0x1f0] ss:$8 sps:$4 sm:$0xff]  }
 0x42c   : > { %3743 = vmatpush2.bf16.msra.mxu1 %v9976_v8  ;;  %v10065_v8 = vld [vmem:[%s13387_s11 + $0x1e4] ss:$8 sps:$4 sm:$0xff]  }
 0x42d   : > { %3784 = vmatpush2.bf16.msra.mxu0 %v9979_v19  ;;  %3744 = vmatprep.subr.bf16.mxu1 %v9984_v9  ;;  %v10021_v19 = vld [vmem:[%s13387_s11 + $0xc0] ss:$8 sps:$4 sm:$0xff]   ;;  %v10026_v9 = vld [vmem:[%s13387_s11 + $0xb4] ss:$8 sps:$4 sm:$0xff]  }
 0x42e   : > { %3785 = vmatprep.subr.bf16.mxu0 %v9987_v55  ;;  %v10063_v55 = vld [vmem:[%s13387_s11 + $0x1e0] ss:$8 sps:$4 sm:$0xff]  }
 0x430   : > { %3745 = vmatpush2.bf16.msra.mxu1 %v9982_v56  ;;  %v10068_v56 = vld [vmem:[%s13387_s11 + $0x1d4] ss:$8 sps:$4 sm:$0xff]  }
 0x431   : > { %3786 = vmatpush2.bf16.msra.mxu0 %v9985_v43  ;;  %4200 = vmatprep.subr.bf16.mxu1 %v9990_v34  ;;  %v10024_v43 = vld [vmem:[%s13387_s11 + $0xb0] ss:$8 sps:$4 sm:$0xff]   ;;  %v10029_v34 = vld [vmem:[%s13387_s11 + $0xa4] ss:$8 sps:$4 sm:$0xff]  }
 0x432   : > { %4241 = vmatprep.subr.bf16.mxu0 %v10038_v27 }
 0x433   : > { %3747 = vmatmul.mubr.bf16.vlgmr.msra.gmra.mxu1 %v11045_v47  ;;  %v11442_v11 = vpop.f32.mrf.mxu1  ;;  %v11444_v16 = vpop.f32.mrf.mxu0  ;;  %v9996_v47 = vld [vmem:[%s13387_s11 + $0x54] ss:$8 sps:$4 sm:$0xff]  }
 0x434   : > { %3788 = vmatmul.mubr.bf16.vlgmr.msra.gmra.mxu0 %v11047_v48  ;;  %4201 = vmatpush1.bf16.msra.mxu1 %v9988_v45  ;;  %v9994_v48 = vld [vmem:[%s13387_s11 + $0x50] ss:$8 sps:$4 sm:$0xff]  }
 0x435   : > { %v11450_v21 = vpop.f32.mrf.mxu1  ;;  %v11452_v22 = vpop.f32.mrf.mxu0  ;;  %4202 = vmatprep.subr.bf16.mxu1 %v9993_v10  ;;  %4242 = vmatpush1.bf16.msra.mxu0 %v10036_v1  ;;  %v10066_v45 = vld [vmem:[%s13387_s11 + $0x1d0] ss:$8 sps:$4 sm:$0xff]   ;;  %v10071_v10 = vld [vmem:[%s13387_s11 + $0x1c4] ss:$8 sps:$4 sm:$0xff]  }
 0x436   : > { %4243 = vmatprep.subr.bf16.mxu0 %v10041_v28  ;;  %v10033_v28 = vld [vmem:[%s13387_s11 + $0x80] ss:$8 sps:$4 sm:$0xff]  }
 0x437   : > { %v3506_v23 = vpop.f32.mrf.mxu1  ;;  %v3547_v41 = vpop.f32.mrf.mxu0 }
 0x438   : > { %4203 = vmatpush1.bf16.msra.mxu1 %v9991_v20  ;;  %v10027_v20 = vld [vmem:[%s13387_s11 + $0xa0] ss:$8 sps:$4 sm:$0xff]   ;;  %v10074_v41 = vld [vmem:[%s13387_s11 + $0x1b4] ss:$8 sps:$4 sm:$0xff]  }
 0x439   : > { %v3507_v25 = vpop.f32.mrf.mxu1  ;;  %v3548_v42 = vpop.f32.mrf.mxu0  ;;  %4204 = vmatprep.subr.bf16.mxu1 %v9996_v47  ;;  %4244 = vmatpush1.bf16.msra.mxu0 %v10039_v37  ;;  %v10032_v47 = vld [vmem:[%s13387_s11 + $0x94] ss:$8 sps:$4 sm:$0xff]   ;;  %v10069_v23 = vld [vmem:[%s13387_s11 + $0x1c0] ss:$8 sps:$4 sm:$0xff]  }
 0x43a   : > { %4245 = vmatprep.subr.bf16.mxu0 %v10044_v2  ;;  %v10030_v25 = vld [vmem:[%s13387_s11 + $0x90] ss:$8 sps:$4 sm:$0xff]   ;;  %v10035_v42 = vld [vmem:[%s13387_s11 + $0x84] ss:$8 sps:$4 sm:$0xff]  }
 0x43c   : > { %4205 = vmatpush1.bf16.msra.mxu1 %v9994_v48  ;;  %v11607_v48 = vld [vmem:[%s13386_s10] sm:$0xf] }
 0x43d   : > { %4206 = vmatprep.subr.bf16.mxu1 %v9999_v26  ;;  %4246 = vmatpush1.bf16.msra.mxu0 %v10042_v39  ;;  %v10072_v26 = vld [vmem:[%s13387_s11 + $0x1b0] ss:$8 sps:$4 sm:$0xff]   ;;  %v3451_v1 = vrot.slane %v11607_v48, %v10738_v44  ;;  %v3455_v27 = vrot.slane %v11607_v48, %v10761_v12 }
 0x43e   : > { %4247 = vmatprep.subr.bf16.mxu0 %v10047_v40 }
 0x440   : > { %4207 = vmatpush1.bf16.msra.mxu1 %v9997_v32  ;;  %v3503_v32 = vadd.f32 %v11442_v11, %v3451_v1 }
 0x441   : > { %4208 = vmatprep.subr.bf16.mxu1 %v10002_v33  ;;  %4248 = vmatpush1.bf16.msra.mxu0 %v10045_v30  ;;  %v3505_v33 = vadd.f32 %v11450_v21, %v3455_v27  ;;  %v4380_v27 = vld [vmem:[%s13389_s13 + $0x300] sm:$0xff] }
 0x442   : > { %4249 = vmatprep.subr.bf16.mxu0 %v10050_v36  ;;  %v3544_v37 = vadd.f32 %v11444_v16, %v3503_v32 }
 0x443   : > { %v3546_v39 = vadd.f32 %v11452_v22, %v3505_v33  ;;  %v10078_v22 = vld [vmem:[%s13387_s11 + $0x190] ss:$8 sps:$4 sm:$0xff]  }
 0x444   : > { %4209 = vmatpush1.bf16.msra.mxu1 %v10000_v63 }
 0x445   : > { %4210 = vmatprep.subr.bf16.mxu1 %v10005_v38  ;;  %4250 = vmatpush1.bf16.msra.mxu0 %v10048_v51  ;;  %v10077_v38 = vld [vmem:[%s13387_s11 + $0x1a4] ss:$8 sps:$4 sm:$0xff]  }
 0x446   : > { %4251 = vmatprep.subr.bf16.mxu0 %v10053_v52 }
 0x448   : > { %4211 = vmatpush1.bf16.msra.mxu1 %v10003_v14  ;;  %v10075_v14 = vld [vmem:[%s13387_s11 + $0x1a0] ss:$8 sps:$4 sm:$0xff]  }
 0x449   : > { %4212 = vmatprep.subr.bf16.mxu1 %v10008_v15  ;;  %4252 = vmatpush1.bf16.msra.mxu0 %v10051_v62  ;;  %v10083_v62 = vld [vmem:[%s13387_s11 + $0x184] ss:$8 sps:$4 sm:$0xff]  }
 0x44a   : > { %4253 = vmatprep.subr.bf16.mxu0 %v10056_v0 }
 0x44c   : > { %4213 = vmatpush1.bf16.msra.mxu1 %v10006_v29  ;;  %v10080_v29 = vld [vmem:[%s13387_s11 + $0x194] ss:$8 sps:$4 sm:$0xff]  }
 0x44d   : > { %4214 = vmatprep.subr.bf16.mxu1 %v10011_v31  ;;  %4254 = vmatpush1.bf16.msra.mxu0 %v10054_v50 }
 0x44e   : > { %4255 = vmatprep.subr.bf16.mxu0 %v10059_v3 }
 0x450   : > { %4215 = vmatpush1.bf16.msra.mxu1 %v10009_v57 }
 0x451   : > { %4216 = vmatprep.subr.bf16.mxu1 %v10014_v58  ;;  %4256 = vmatpush1.bf16.msra.mxu0 %v10057_v54 }
 0x452   : > { %4257 = vmatprep.subr.bf16.mxu0 %v10062_v4 }
 0x454   : > { %4217 = vmatpush2.bf16.msra.mxu1 %v10012_v49  ;;  %v10081_v49 = vld [vmem:[%s13387_s11 + $0x180] ss:$8 sps:$4 sm:$0xff]  }
 0x455   : > { %4218 = vmatprep.subr.bf16.mxu1 %v10017_v53  ;;  %4258 = vmatpush2.bf16.msra.mxu0 %v10060_v18  ;;  %v4508_v18 = vld [vmem:[%s13389_s13 + $0x700] sm:$0xff] }
 0x456   : > { %4259 = vmatprep.subr.bf16.mxu0 %v10065_v8  ;;  %v4524_v8 = vld [vmem:[%s13389_s13 + $0x780] sm:$0xff] }
 0x458   : > { %4219 = vmatpush2.bf16.msra.mxu1 %v10015_v5 }
 0x459   : > { %4220 = vmatprep.subr.bf16.mxu1 %v10020_v61  ;;  %4260 = vmatpush2.bf16.msra.mxu0 %v10063_v55  ;;  %v9203_v55 = vcombine.high %v4508_v18, %v4524_v8 }
 0x45a   : > { %4261 = vmatprep.subr.bf16.mxu0 %v10068_v56  ;;  %v11669_v56 = vld [vmem:[%s13389_s13 + $0x788] sm:$0xff] }
 0x45c   : > { %4221 = vmatpush2.bf16.msra.mxu1 %v10018_v6 }
 0x45d   : > { %4222 = vmatprep.subr.bf16.mxu1 %v10023_v7  ;;  %4262 = vmatpush2.bf16.msra.mxu0 %v10066_v45 }
 0x45e   : > { %4263 = vmatprep.subr.bf16.mxu0 %v10071_v10 }
 0x460   : > { %4223 = vmatpush2.bf16.msra.mxu1 %v10021_v19  ;;  %v11664_v19 = vld [vmem:[%s13389_s13 + $0x708] sm:$0xff] }
 0x461   : > { %4224 = vmatprep.subr.bf16.mxu1 %v10026_v9  ;;  %4264 = vmatpush2.bf16.msra.mxu0 %v10069_v23  ;;  %v9202_v9 = vcombine.low %v4508_v18, %v4524_v8  ;;  %v9205_v45 = vcombine.high %v11664_v19, %v11669_v56 }
 0x462   : > { %4265 = vmatprep.subr.bf16.mxu0 %v10074_v41 }
 0x464   : > { %4225 = vmatpush2.bf16.msra.mxu1 %v10024_v43  ;;  %v4476_v43 = vld [vmem:[%s13389_s13 + $0x600] sm:$0xff] }
 0x465   : > { %4226 = vmatprep.subr.bf16.mxu1 %v10029_v34  ;;  %4266 = vmatpush2.bf16.msra.mxu0 %v10072_v26  ;;  %v4492_v34 = vld [vmem:[%s13389_s13 + $0x680] sm:$0xff] }
 0x466   : > { %4267 = vmatprep.subr.bf16.mxu0 %v10077_v38  ;;  %v9171_v10 = vcombine.high %v4476_v43, %v4492_v34  ;;  %v9170_v23 = vcombine.low %v4476_v43, %v4492_v34  ;;  %v4652_v43 = vld [vmem:[%s13389_s13 + $0xb80] sm:$0xff] }
 0x468   : > { %4227 = vmatpush2.bf16.msra.mxu1 %v10027_v20  ;;  %v4444_v20 = vld [vmem:[%s13389_s13 + $0x500] sm:$0xff] }
 0x469   : > { %4228 = vmatprep.subr.bf16.mxu1 %v10032_v47  ;;  %4268 = vmatpush2.bf16.msra.mxu0 %v10075_v14  ;;  %v4460_v47 = vld [vmem:[%s13389_s13 + $0x580] sm:$0xff] }
 0x46a   : > { %4269 = vmatprep.subr.bf16.mxu0 %v10080_v29  ;;  %v9139_v41 = vcombine.high %v4444_v20, %v4460_v47  ;;  %v9138_v26 = vcombine.low %v4444_v20, %v4460_v47  ;;  %v4780_v29 = vld [vmem:[%s13389_s13 + $0xf80] sm:$0xff] }
 0x46b   : > { %v4620_v47 = vld [vmem:[%s13389_s13 + $0xa80] sm:$0xff] }
 0x46c   : > { %4229 = vmatpush2.bf16.msra.mxu1 %v10030_v25  ;;  %v4412_v25 = vld [vmem:[%s13389_s13 + $0x400] sm:$0xff] }
 0x46d   : > { %4230 = vmatprep.subr.bf16.mxu1 %v10035_v42  ;;  %4270 = vmatpush2.bf16.msra.mxu0 %v10078_v22  ;;  %v4428_v42 = vld [vmem:[%s13389_s13 + $0x480] sm:$0xff] }
 0x46e   : > { %4271 = vmatprep.subr.bf16.mxu0 %v10083_v62  ;;  %v9107_v1 = vcombine.high %v4412_v25, %v4428_v42  ;;  %v9106_v32 = vcombine.low %v4412_v25, %v4428_v42  ;;  %v4700_v62 = vld [vmem:[%s13389_s13 + $0xd00] sm:$0xff] }
 0x470   : > { %4231 = vmatpush2.bf16.msra.mxu1 %v10033_v28  ;;  %v4396_v28 = vld [vmem:[%s13389_s13 + $0x380] sm:$0xff] }
 0x471   : > { %4272 = vmatpush2.bf16.msra.mxu0 %v10081_v49  ;;  %7526 = vmatprep.subr.bf16.mxu1 %v9203_v55  ;;  %v9075_v33 = vcombine.high %v4380_v27, %v4396_v28  ;;  %v4636_v55 = vld [vmem:[%s13389_s13 + $0xb00] sm:$0xff] }
 0x472   : > { %7567 = vmatprep.subr.bf16.mxu0 %v9205_v45  ;;  %v9330_v42 = vcombine.low %v4636_v55, %v4652_v43 }
 0x473   : > { %v3584_v2 = vpop.f32.mrf.mxu1  ;;  %v3625_v63 = vpop.f32.mrf.mxu0 }
 0x474   : > { %v3585_v40 = vadd.f32 %v3584_v2, %v3544_v37  ;;  %v4348_v37 = vld [vmem:[%s13389_s13 + $0x200] sm:$0xff] }
 0x475   : > { %v3586_v15 = vpop.f32.mrf.mxu1  ;;  %v3627_v11 = vpop.f32.mrf.mxu0  ;;  %v4364_v2 = vld [vmem:[%s13389_s13 + $0x280] sm:$0xff] }
 0x476   : > { %v3626_v21 = vadd.f32 %v3625_v63, %v3585_v40  ;;  %v3587_v30 = vadd.f32 %v3586_v15, %v3546_v39  ;;  %v9074_v63 = vcombine.low %v4380_v27, %v4396_v28  ;;  %v9043_v38 = vcombine.high %v4348_v37, %v4364_v2  ;;  %v4316_v39 = vld [vmem:[%s13389_s13 + $0x100] sm:$0xff] }
 0x477   : > { %v3588_v16 = vpop.f32.mrf.mxu1  ;;  %v3629_v36 = vpop.f32.mrf.mxu0  ;;  %v4332_v40 = vld [vmem:[%s13389_s13 + $0x180] sm:$0xff]  ;;  %v9042_v14 = vcombine.low %v4348_v37, %v4364_v2 }
 0x478   : > { %v3628_v31 = vadd.f32 %v3627_v11, %v3587_v30  ;;  %v3796_v51 = vmax.f32 %v3626_v21, 0.0  ;;  %v9011_v15 = vcombine.high %v4316_v39, %v4332_v40  ;;  %v4284_v11 = vld [vmem:[%s13389_s13] sm:$0xff]  ;;  %v9010_v30 = vcombine.low %v4316_v39, %v4332_v40  ;;  %v4493_v40 = vld [vmem:[%s13389_s13 + $0x688] sm:$0xff] }
 0x479   : > { %v3589_v52 = vpop.f32.mrf.mxu1  ;;  %v3630_v57 = vpop.f32.mrf.mxu0  ;;  %v4300_v21 = vld [vmem:[%s13389_s13 + $0x80] sm:$0xff] }
 0x47a   : > { %v3797_v58 = vmax.f32 %v3628_v31, 0.0  ;;  %v3865_v53 = vpack.c.bf16 %v3796_v51, %v3796_v51  ;;  %v8979_v16 = vcombine.high %v4284_v11, %v4300_v21  ;;  %v4764_v36 = vld [vmem:[%s13389_s13 + $0xf00] sm:$0xff]  ;;  %v8978_v31 = vcombine.low %v4284_v11, %v4300_v21 }
 0x47b   : > { %v9459_v22 = vcombine.high %v4764_v36, %v4780_v29  ;;  %v4732_v51 = vld [vmem:[%s13389_s13 + $0xe00] sm:$0xff]  ;;  %v9458_v57 = vcombine.low %v4764_v36, %v4780_v29 }
 0x47c   : > { %v3866_v0 = vpack.c.bf16 %v3797_v58, %v3797_v58  ;;  %v4748_v52 = vld [vmem:[%s13389_s13 + $0xe80] sm:$0xff] }
 0x47d   : > { %v9427_v58 = vcombine.high %v4732_v51, %v4748_v52  ;;  %v9426_v49 = vcombine.low %v4732_v51, %v4748_v52  ;;  %v4381_v51 = vld [vmem:[%s13389_s13 + $0x308] sm:$0xff] }
 0x47e   : > { %4232 = vmatprep.mubr.bf16.mxu1 %v3866_v0  ;;  %v4716_v0 = vld [vmem:[%s13389_s13 + $0xd80] sm:$0xff]  ;;  %v4397_v52 = vld [vmem:[%s13389_s13 + $0x388] sm:$0xff] }
 0x47f   : > { %4233 = vmatmul.mubr.bf16.vlgmr.msra.gmra.mxu1 %v3865_v53  ;;  %v3459_v53 = vrot.slane %v11607_v48, %v10741_v59  ;;  %v9394_v18 = vcombine.low %v4700_v62, %v4716_v0 }
 0x480   : > { %7527 = vmatpush1.bf16.msra.mxu1 %v9202_v9 }
 0x481   : > { %7528 = vmatprep.subr.bf16.mxu1 %v9171_v10  ;;  %v9331_v10 = vcombine.high %v4636_v55, %v4652_v43  ;;  %v4765_v43 = vld [vmem:[%s13389_s13 + $0xf08] sm:$0xff] }
 0x484   : > { %7529 = vmatpush1.bf16.msra.mxu1 %v9170_v23 }
 0x485   : > { %7530 = vmatprep.subr.bf16.mxu1 %v9139_v41 }
 0x488   : > { %7531 = vmatpush1.bf16.msra.mxu1 %v9138_v26 }
 0x489   : > { %7532 = vmatprep.subr.bf16.mxu1 %v9107_v1 }
 0x48c   : > { %7533 = vmatpush1.bf16.msra.mxu1 %v9106_v32 }
 0x48d   : > { %7534 = vmatprep.subr.bf16.mxu1 %v9075_v33 }
 0x490   : > { %7535 = vmatpush1.bf16.msra.mxu1 %v9074_v63 }
 0x491   : > { %7536 = vmatprep.subr.bf16.mxu1 %v9043_v38 }
 0x494   : > { %7537 = vmatpush1.bf16.msra.mxu1 %v9042_v14 }
 0x495   : > { %7538 = vmatprep.subr.bf16.mxu1 %v9011_v15  ;;  %v9204_v15 = vcombine.low %v11664_v19, %v11669_v56  ;;  %v4413_v19 = vld [vmem:[%s13389_s13 + $0x408] sm:$0xff] }
 0x496   : > { %v4429_v56 = vld [vmem:[%s13389_s13 + $0x488] sm:$0xff] }
 0x498   : > { %7539 = vmatpush1.bf16.msra.mxu1 %v9010_v30  ;;  %v4445_v30 = vld [vmem:[%s13389_s13 + $0x508] sm:$0xff] }
 0x499   : > { %7540 = vmatprep.subr.bf16.mxu1 %v8979_v16  ;;  %v4461_v16 = vld [vmem:[%s13389_s13 + $0x588] sm:$0xff] }
 0x49a   : > { %v9141_v29 = vcombine.high %v4445_v30, %v4461_v16 }
 0x49c   : > { %7541 = vmatpush1.bf16.msra.mxu1 %v8978_v31  ;;  %v9140_v31 = vcombine.low %v4445_v30, %v4461_v16 }
 0x49d   : > { %7542 = vmatprep.subr.bf16.mxu1 %v9459_v22  ;;  %v9109_v22 = vcombine.high %v4413_v19, %v4429_v56 }
 0x4a0   : > { %7543 = vmatpush2.bf16.msra.mxu1 %v9458_v57  ;;  %v9108_v57 = vcombine.low %v4413_v19, %v4429_v56  ;;  %v4540_v56 = vld [vmem:[%s13389_s13 + $0x800] sm:$0xff] }
 0x4a1   : > { %7544 = vmatprep.subr.bf16.mxu1 %v9427_v58  ;;  %v9077_v58 = vcombine.high %v4381_v51, %v4397_v52 }
 0x4a4   : > { %7545 = vmatpush2.bf16.msra.mxu1 %v9426_v49  ;;  %v9076_v49 = vcombine.low %v4381_v51, %v4397_v52  ;;  %v4557_v52 = vld [vmem:[%s13389_s13 + $0x888] sm:$0xff] }
 0x4b3   : > { %v11647_v50 = vpop.f32.mrf.mxu1 }
 0x4b4   : > { %v11649_v3 = vpop.f32.mrf.mxu0  ;;  %v3667_v8 = vadd.f32 %v11647_v50, %v3459_v53  ;;  %v4604_v50 = vld [vmem:[%s13389_s13 + $0xa00] sm:$0xff] }
 0x4b5   : > { %v11651_v5 = vpop.f32.mrf.mxu1  ;;  %v9299_v27 = vcombine.high %v4604_v50, %v4620_v47  ;;  %v9298_v63 = vcombine.low %v4604_v50, %v4620_v47 }
 0x4b6   : > { %v11653_v61 = vpop.f32.mrf.mxu0 }
 0x4b7   : > { %v3670_v54 = vpop.f32.mrf.mxu1 }
 0x4b8   : > { %v3711_v4 = vpop.f32.mrf.mxu0  ;;  %v9395_v54 = vcombine.high %v4700_v62, %v4716_v0  ;;  %v4349_v62 = vld [vmem:[%s13389_s13 + $0x208] sm:$0xff] }
 0x4b9   : > { %v3671_v6 = vpop.f32.mrf.mxu1  ;;  %v4668_v4 = vld [vmem:[%s13389_s13 + $0xc00] sm:$0xff]  ;;  %v4365_v0 = vld [vmem:[%s13389_s13 + $0x288] sm:$0xff] }
 0x4ba   : > { %v3712_v7 = vpop.f32.mrf.mxu0  ;;  %v4684_v6 = vld [vmem:[%s13389_s13 + $0xc80] sm:$0xff]  ;;  %7546 = vmatprep.subr.bf16.mxu1 %v9395_v54  ;;  %v9045_v53 = vcombine.high %v4349_v62, %v4365_v0  ;;  %v4317_v54 = vld [vmem:[%s13389_s13 + $0x108] sm:$0xff] }
 0x4bb   : > { %v3463_v7 = vrot.slane %v11607_v48, %v10764_v13  ;;  %v9363_v9 = vcombine.high %v4668_v4, %v4684_v6  ;;  %7547 = vmatpush2.bf16.msra.mxu1 %v9394_v18  ;;  %v9362_v45 = vcombine.low %v4668_v4, %v4684_v6  ;;  %v3708_v48 = vadd.f32 %v11649_v3, %v3667_v8  ;;  %v4333_v4 = vld [vmem:[%s13389_s13 + $0x188] sm:$0xff] }
 0x4bc   : > { %v9044_v6 = vcombine.low %v4349_v62, %v4365_v0  ;;  %v4285_v18 = vld [vmem:[%s13389_s13 + $0x8] sm:$0xff] }
 0x4bd   : > { %v3669_v34 = vadd.f32 %v11651_v5, %v3463_v7  ;;  %7548 = vmatprep.subr.bf16.mxu1 %v9363_v9  ;;  %v9013_v7 = vcombine.high %v4317_v54, %v4333_v4  ;;  %v4301_v8 = vld [vmem:[%s13389_s13 + $0x88] sm:$0xff]  ;;  %v9012_v9 = vcombine.low %v4317_v54, %v4333_v4  ;;  %v4511_v54 = vld [vmem:[%s13389_s13 + $0x718] sm:$0xff] }
 0x4be   : > { %v8981_v55 = vcombine.high %v4285_v18, %v4301_v8 }
 0x4bf   : > { %v3710_v23 = vadd.f32 %v11653_v61, %v3669_v34  ;;  %7549 = vmatpush2.bf16.msra.mxu1 %v9362_v45  ;;  %v4477_v61 = vld [vmem:[%s13389_s13 + $0x608] sm:$0xff]  ;;  %v8980_v45 = vcombine.low %v4285_v18, %v4301_v8 }
 0x4c0   : > { %7550 = vmatprep.subr.bf16.mxu1 %v9331_v10  ;;  %v9173_v21 = vcombine.high %v4477_v61, %v4493_v40  ;;  %v9172_v36 = vcombine.low %v4477_v61, %v4493_v40  ;;  %v4781_v34 = vld [vmem:[%s13389_s13 + $0xf88] sm:$0xff]  ;;  %v4572_v40 = vld [vmem:[%s13389_s13 + $0x900] sm:$0xff] }
 0x4c1   : > { %v4733_v10 = vld [vmem:[%s13389_s13 + $0xe08] sm:$0xff]  ;;  %v9460_v50 = vcombine.low %v4765_v43, %v4781_v34 }
 0x4c3   : > { %7551 = vmatpush2.bf16.msra.mxu1 %v9330_v42  ;;  %v4669_v42 = vld [vmem:[%s13389_s13 + $0xc08] sm:$0xff] }
 0x4c4   : > { %7552 = vmatprep.subr.bf16.mxu1 %v9299_v27  ;;  %v4637_v27 = vld [vmem:[%s13389_s13 + $0xb08] sm:$0xff] }
 0x4c7   : > { %7553 = vmatpush2.bf16.msra.mxu1 %v9298_v63 }
 0x4f3   : > { %v3748_v20 = vpop.f32.mrf.mxu1 }
 0x4f4   : > { %v3749_v41 = vadd.f32 %v3748_v20, %v3708_v48  ;;  %v3789_v25 = vpop.f32.mrf.mxu0  ;;  %v9461_v48 = vcombine.high %v4765_v43, %v4781_v34  ;;  %v4749_v20 = vld [vmem:[%s13389_s13 + $0xe88] sm:$0xff] }
 0x4f5   : > { %v3750_v5 = vpop.f32.mrf.mxu1  ;;  %v9429_v47 = vcombine.high %v4733_v10, %v4749_v20 }
 0x4f6   : > { %v3790_v26 = vadd.f32 %v3789_v25, %v3749_v41  ;;  %v3751_v3 = vadd.f32 %v3750_v5, %v3710_v23  ;;  %v3791_v1 = vpop.f32.mrf.mxu0  ;;  %v4701_v23 = vld [vmem:[%s13389_s13 + $0xd08] sm:$0xff]  ;;  %v9428_v25 = vcombine.low %v4733_v10, %v4749_v20 }
 0x4f7   : > { %v3752_v28 = vpop.f32.mrf.mxu1  ;;  %v4717_v41 = vld [vmem:[%s13389_s13 + $0xd88] sm:$0xff] }
 0x4f8   : > { %v3792_v32 = vadd.f32 %v3791_v1, %v3751_v3  ;;  %v3793_v33 = vpop.f32.mrf.mxu0  ;;  %v3798_v37 = vmax.f32 %v3790_v26, 0.0  ;;  %v9397_v5 = vcombine.high %v4701_v23, %v4717_v41  ;;  %v4685_v26 = vld [vmem:[%s13389_s13 + $0xc88] sm:$0xff]  ;;  %v9396_v3 = vcombine.low %v4701_v23, %v4717_v41 }
 0x4f9   : > { %v3753_v2 = vpop.f32.mrf.mxu1  ;;  %v9365_v1 = vcombine.high %v4669_v42, %v4685_v26  ;;  %v4653_v28 = vld [vmem:[%s13389_s13 + $0xb88] sm:$0xff] }
 0x4fa   : > { %v3799_v38 = vmax.f32 %v3792_v32, 0.0  ;;  %v3794_v39 = vpop.f32.mrf.mxu0  ;;  %v3867_v11 = vpack.c.bf16 %v3798_v37, %v3798_v37  ;;  %v9364_v32 = vcombine.low %v4669_v42, %v4685_v26  ;;  %v9333_v33 = vcombine.high %v4637_v27, %v4653_v28  ;;  %v4605_v37 = vld [vmem:[%s13389_s13 + $0xa08] sm:$0xff]  ;;  %v4494_v42 = vld [vmem:[%s13389_s13 + $0x690] sm:$0xff]  ;;  %v4479_v26 = vld [vmem:[%s13389_s13 + $0x618] sm:$0xff] }
 0x4fb   : > { %v4621_v2 = vld [vmem:[%s13389_s13 + $0xa88] sm:$0xff]  ;;  %v9332_v63 = vcombine.low %v4637_v27, %v4653_v28  ;;  %v4446_v28 = vld [vmem:[%s13389_s13 + $0x510] sm:$0xff] }
 0x4fc   : > { %v3868_v14 = vpack.c.bf16 %v3799_v38, %v3799_v38  ;;  %v9301_v38 = vcombine.high %v4605_v37, %v4621_v2  ;;  %v9300_v39 = vcombine.low %v4605_v37, %v4621_v2  ;;  %v4462_v37 = vld [vmem:[%s13389_s13 + $0x590] sm:$0xff]  ;;  %v4447_v2 = vld [vmem:[%s13389_s13 + $0x518] sm:$0xff] }
 0x4fe   : > { %4273 = vmatprep.mubr.bf16.mxu0 %v3868_v14  ;;  %v4588_v14 = vld [vmem:[%s13389_s13 + $0x980] sm:$0xff] }
 0x4ff   : > { %4274 = vmatmul.mubr.bf16.vlgmr.msra.gmra.mxu0 %v3867_v11  ;;  %v9267_v11 = vcombine.high %v4572_v40, %v4588_v14  ;;  %v9266_v16 = vcombine.low %v4572_v40, %v4588_v14  ;;  %v4414_v14 = vld [vmem:[%s13389_s13 + $0x410] sm:$0xff] }
 0x500   : > { %7568 = vmatpush1.bf16.msra.mxu0 %v9204_v15  ;;  %v4573_v15 = vld [vmem:[%s13389_s13 + $0x908] sm:$0xff] }
 0x501   : > { %7569 = vmatprep.subr.bf16.mxu0 %v9173_v21  ;;  %v4589_v21 = vld [vmem:[%s13389_s13 + $0x988] sm:$0xff]  ;;  %7554 = vmatprep.subr.bf16.mxu1 %v9267_v11  ;;  %v4415_v11 = vld [vmem:[%s13389_s13 + $0x418] sm:$0xff] }
 0x502   : > { %7555 = vmatpush2.bf16.msra.mxu1 %v9266_v16 }
 0x504   : > { %7570 = vmatpush1.bf16.msra.mxu0 %v9172_v36  ;;  %v9268_v36 = vcombine.low %v4573_v15, %v4589_v21 }
 0x505   : > { %7571 = vmatprep.subr.bf16.mxu0 %v9141_v29  ;;  %v9269_v29 = vcombine.high %v4573_v15, %v4589_v21  ;;  %v4430_v15 = vld [vmem:[%s13389_s13 + $0x490] sm:$0xff]  ;;  %v4431_v21 = vld [vmem:[%s13389_s13 + $0x498] sm:$0xff] }
 0x508   : > { %7572 = vmatpush1.bf16.msra.mxu0 %v9140_v31  ;;  %v4556_v31 = vld [vmem:[%s13389_s13 + $0x880] sm:$0xff] }
 0x509   : > { %7573 = vmatprep.subr.bf16.mxu0 %v9109_v22  ;;  %v4541_v22 = vld [vmem:[%s13389_s13 + $0x808] sm:$0xff]  ;;  %v9235_v51 = vcombine.high %v4540_v56, %v4556_v31 }
 0x50a   : > { %v9236_v62 = vcombine.low %v4541_v22, %v4557_v52  ;;  %v9237_v0 = vcombine.high %v4541_v22, %v4557_v52  ;;  %v4399_v22 = vld [vmem:[%s13389_s13 + $0x398] sm:$0xff]  ;;  %v9112_v52 = vcombine.low %v4415_v11, %v4431_v21 }
 0x50b   : > { %7556 = vmatprep.subr.bf16.mxu1 %v9235_v51  ;;  %v9110_v51 = vcombine.low %v4414_v14, %v4430_v15 }
 0x50c   : > { %7574 = vmatpush1.bf16.msra.mxu0 %v9108_v57 }
 0x50d   : > { %7575 = vmatprep.subr.bf16.mxu0 %v9077_v58  ;;  %v9234_v58 = vcombine.low %v4540_v56, %v4556_v31  ;;  %v4398_v56 = vld [vmem:[%s13389_s13 + $0x390] sm:$0xff]  ;;  %v4383_v31 = vld [vmem:[%s13389_s13 + $0x318] sm:$0xff] }
 0x50f   : > { %7557 = vmatpush2.bf16.msra.mxu1 %v9234_v58  ;;  %v9081_v58 = vcombine.high %v4383_v31, %v4399_v22 }
 0x510   : > { %7576 = vmatpush1.bf16.msra.mxu0 %v9076_v49  ;;  %v4510_v49 = vld [vmem:[%s13389_s13 + $0x710] sm:$0xff] }
 0x511   : > { %7577 = vmatprep.subr.bf16.mxu0 %v9045_v53  ;;  %v4526_v53 = vld [vmem:[%s13389_s13 + $0x790] sm:$0xff] }
 0x512   : > { %v9206_v4 = vcombine.low %v4510_v49, %v4526_v53 }
 0x514   : > { %7578 = vmatpush1.bf16.msra.mxu0 %v9044_v6  ;;  %v9207_v6 = vcombine.high %v4510_v49, %v4526_v53  ;;  %v4351_v49 = vld [vmem:[%s13389_s13 + $0x218] sm:$0xff] }
 0x515   : > { %7579 = vmatprep.subr.bf16.mxu0 %v9013_v7  ;;  %v4527_v7 = vld [vmem:[%s13389_s13 + $0x798] sm:$0xff] }
 0x516   : > { %v9208_v18 = vcombine.low %v4511_v54, %v4527_v7  ;;  %v9209_v8 = vcombine.high %v4511_v54, %v4527_v7  ;;  %7608 = vmatprep.subr.bf16.mxu1 %v9207_v6  ;;  %v4367_v53 = vld [vmem:[%s13389_s13 + $0x298] sm:$0xff] }
 0x517   : > { %v9049_v7 = vcombine.high %v4351_v49, %v4367_v53 }
 0x518   : > { %7580 = vmatpush1.bf16.msra.mxu0 %v9012_v9  ;;  %v3864_v9 = vld [vmem:[%s13388_s12] sm:$0x3] }
 0x519   : > { %7581 = vmatprep.subr.bf16.mxu0 %v8981_v55  ;;  %v4193_v55 = vrot.slane %v3864_v9, %v10738_v44  ;;  %v4197_v43 = vrot.slane %v3864_v9, %v10761_v12  ;;  %v4319_v9 = vld [vmem:[%s13389_s13 + $0x118] sm:$0xff] }
 0x51c   : > { %7582 = vmatpush1.bf16.msra.mxu0 %v8980_v45 }
 0x51d   : > { %7583 = vmatprep.subr.bf16.mxu0 %v9461_v48 }
 0x520   : > { %7584 = vmatpush2.bf16.msra.mxu0 %v9460_v50 }
 0x521   : > { %7585 = vmatprep.subr.bf16.mxu0 %v9429_v47 }
 0x524   : > { %7586 = vmatpush2.bf16.msra.mxu0 %v9428_v25  ;;  %v4478_v25 = vld [vmem:[%s13389_s13 + $0x610] sm:$0xff] }
 0x525   : > { %7587 = vmatprep.subr.bf16.mxu0 %v9397_v5 }
 0x528   : > { %7588 = vmatpush2.bf16.msra.mxu0 %v9396_v3  ;;  %v4495_v3 = vld [vmem:[%s13389_s13 + $0x698] sm:$0xff] }
 0x529   : > { %7589 = vmatprep.subr.bf16.mxu0 %v9365_v1 }
 0x52c   : > { %7590 = vmatpush2.bf16.msra.mxu0 %v9364_v32  ;;  %v9175_v32 = vcombine.high %v4478_v25, %v4494_v42 }
 0x52d   : > { %7591 = vmatprep.subr.bf16.mxu0 %v9333_v33  ;;  %v9177_v33 = vcombine.high %v4479_v26, %v4495_v3 }
 0x530   : > { %7592 = vmatpush2.bf16.msra.mxu0 %v9332_v63  ;;  %v4463_v63 = vld [vmem:[%s13389_s13 + $0x598] sm:$0xff] }
 0x531   : > { %7593 = vmatprep.subr.bf16.mxu0 %v9301_v38  ;;  %v9174_v38 = vcombine.low %v4478_v25, %v4494_v42  ;;  %v9145_v40 = vcombine.high %v4447_v2, %v4463_v63  ;;  %v9144_v16 = vcombine.low %v4447_v2, %v4463_v63  ;;  %v4766_v42 = vld [vmem:[%s13389_s13 + $0xf10] sm:$0xff] }
 0x532   : > { %v4734_v63 = vld [vmem:[%s13389_s13 + $0xe10] sm:$0xff] }
 0x534   : > { %7594 = vmatpush2.bf16.msra.mxu0 %v9300_v39  ;;  %v9176_v39 = vcombine.low %v4479_v26, %v4495_v3  ;;  %v4782_v26 = vld [vmem:[%s13389_s13 + $0xf90] sm:$0xff]  ;;  %v4767_v3 = vld [vmem:[%s13389_s13 + $0xf18] sm:$0xff] }
 0x535   : > { %7595 = vmatprep.subr.bf16.mxu0 %v9269_v29  ;;  %v9113_v29 = vcombine.high %v4415_v11, %v4431_v21  ;;  %v4702_v21 = vld [vmem:[%s13389_s13 + $0xd10] sm:$0xff] }
 0x538   : > { %7596 = vmatpush2.bf16.msra.mxu0 %v9268_v36  ;;  %v9111_v36 = vcombine.high %v4414_v14, %v4430_v15 }
 0x539   : > { %7597 = vmatprep.subr.bf16.mxu0 %v9237_v0  ;;  %v4366_v0 = vld [vmem:[%s13389_s13 + $0x290] sm:$0xff] }
 0x53c   : > { %7598 = vmatpush2.bf16.msra.mxu0 %v9236_v62  ;;  %v4350_v62 = vld [vmem:[%s13389_s13 + $0x210] sm:$0xff] }
 0x53d   : > { %7649 = vmatprep.subr.bf16.mxu0 %v9209_v8  ;;  %v9047_v6 = vcombine.high %v4350_v62, %v4366_v0  ;;  %v4334_v8 = vld [vmem:[%s13389_s13 + $0x190] sm:$0xff] }
 0x53f   : > { %v4234_v61 = vpop.f32.mrf.mxu1 }
 0x540   : > { %v4235_v34 = vadd.f32 %v4234_v61, %v4193_v55  ;;  %v9143_v61 = vcombine.high %v4446_v28, %v4462_v37  ;;  %v4335_v55 = vld [vmem:[%s13389_s13 + $0x198] sm:$0xff] }
 0x541   : > { %v4236_v30 = vpop.f32.mrf.mxu1 }
 0x542   : > { %v4237_v48 = vadd.f32 %v4236_v30, %v4197_v43  ;;  %v9142_v30 = vcombine.low %v4446_v28, %v4462_v37  ;;  %v9046_v43 = vcombine.low %v4350_v62, %v4366_v0  ;;  %v4783_v28 = vld [vmem:[%s13389_s13 + $0xf98] sm:$0xff]  ;;  %v9463_v37 = vcombine.high %v4766_v42, %v4782_v26 }
 0x543   : > { %v4238_v19 = vpop.f32.mrf.mxu1  ;;  %v9465_v2 = vcombine.high %v4767_v3, %v4783_v28  ;;  %v9464_v14 = vcombine.low %v4767_v3, %v4783_v28  ;;  %v4542_v28 = vld [vmem:[%s13389_s13 + $0x810] sm:$0xff] }
 0x544   : > { %v4382_v19 = vld [vmem:[%s13389_s13 + $0x310] sm:$0xff] }
 0x545   : > { %v4239_v57 = vpop.f32.mrf.mxu1  ;;  %v9078_v54 = vcombine.low %v4382_v19, %v4398_v56 }
 0x546   : > { %v9079_v57 = vcombine.high %v4382_v19, %v4398_v56 }
 0x5bf   : > { %v4275_v45 = vpop.f32.mrf.mxu0 }
 0x5c0   : > { %v4276_v10 = vadd.f32 %v4275_v45, %v4235_v34  ;;  %v9048_v34 = vcombine.low %v4351_v49, %v4367_v53  ;;  %v4638_v53 = vld [vmem:[%s13389_s13 + $0xb10] sm:$0xff] }
 0x5c1   : > { %v4277_v20 = vpop.f32.mrf.mxu0 }
 0x5c2   : > { %v4278_v50 = vadd.f32 %v4277_v20, %v4237_v48  ;;  %v4282_v47 = vmax.f32 %v4276_v10, 0.0  ;;  %v9017_v48 = vcombine.high %v4319_v9, %v4335_v55  ;;  %v4286_v10 = vld [vmem:[%s13389_s13 + $0x10] sm:$0xff] }
 0x5c3   : > { %v4279_v23 = vpop.f32.mrf.mxu0  ;;  %v4302_v20 = vld [vmem:[%s13389_s13 + $0x90] sm:$0xff] }
 0x5c4   : > { %v4283_v41 = vmax.f32 %v4278_v50, 0.0  ;;  %v11894_v27 = vpack.c.bf16 %v4282_v47, %v4282_v47  ;;  %v4287_v50 = vld [vmem:[%s13389_s13 + $0x18] sm:$0xff]  ;;  %v8983_v25 = vcombine.high %v4286_v10, %v4302_v20 }
 0x5c5   : > { %v4280_v5 = vpop.f32.mrf.mxu0  ;;  %v4303_v47 = vld [vmem:[%s13389_s13 + $0x98] sm:$0xff] }
 0x5c6   : > { %v11892_v1 = vpack.c.bf16 %v4283_v41, %v4283_v41  ;;  %v9016_v41 = vcombine.low %v4319_v9, %v4335_v55  ;;  %v8985_v5 = vcombine.high %v4287_v50, %v4303_v47  ;;  %v4606_v55 = vld [vmem:[%s13389_s13 + $0xa10] sm:$0xff] }
 0x5c8   : > { %7558 = vmatprep.mubr.bf16.mxu1 %v11892_v1  ;;  %7599 = vmatprep.mubr.bf16.mxu0 %v11892_v1 }
 0x5c9   : > { %7559 = vmatmul.mubr.bf16.vlgmr.msra.gmra.mxu1 %v11894_v27  ;;  %7600 = vmatmul.mubr.bf16.vlgmr.msra.gmra.mxu0 %v11894_v27 }
 0x5ca   : > { %7609 = vmatpush1.bf16.msra.mxu1 %v9206_v4  ;;  %7650 = vmatpush1.bf16.msra.mxu0 %v9208_v18  ;;  %v9080_v4 = vcombine.low %v4383_v31, %v4399_v22  ;;  %v4318_v18 = vld [vmem:[%s13389_s13 + $0x110] sm:$0xff] }
 0x5cb   : > { %7640 = vmatprep.mubr.bf16.mxu1 %v11892_v1  ;;  %7681 = vmatprep.mubr.bf16.mxu0 %v11892_v1  ;;  %v9015_v45 = vcombine.high %v4318_v18, %v4334_v8  ;;  %v9014_v23 = vcombine.low %v4318_v18, %v4334_v8  ;;  %v4670_v22 = vld [vmem:[%s13389_s13 + $0xc10] sm:$0xff] }
 0x5cc   : > { %7610 = vmatprep.subr.bf16.mxu1 %v9175_v32  ;;  %7651 = vmatprep.subr.bf16.mxu0 %v9177_v33  ;;  %v8982_v32 = vcombine.low %v4286_v10, %v4302_v20  ;;  %v8984_v33 = vcombine.low %v4287_v50, %v4303_v47  ;;  %v4574_v47 = vld [vmem:[%s13389_s13 + $0x910] sm:$0xff] }
 0x5ce   : > { %7611 = vmatpush1.bf16.msra.mxu1 %v9174_v38  ;;  %7652 = vmatpush1.bf16.msra.mxu0 %v9176_v39  ;;  %v4750_v38 = vld [vmem:[%s13389_s13 + $0xe90] sm:$0xff]  ;;  %v4735_v39 = vld [vmem:[%s13389_s13 + $0xe18] sm:$0xff] }
 0x5cf   : > { %7612 = vmatprep.subr.bf16.mxu1 %v9143_v61  ;;  %7653 = vmatprep.subr.bf16.mxu0 %v9145_v40  ;;  %v4751_v61 = vld [vmem:[%s13389_s13 + $0xe98] sm:$0xff]  ;;  %v9462_v40 = vcombine.low %v4766_v42, %v4782_v26  ;;  %v9431_v15 = vcombine.high %v4734_v63, %v4750_v38 }
 0x5d0   : > { %v9433_v11 = vcombine.high %v4735_v39, %v4751_v61  ;;  %v9432_v19 = vcombine.low %v4735_v39, %v4751_v61  ;;  %v4512_v61 = vld [vmem:[%s13389_s13 + $0x720] sm:$0xff] }
 0x5d2   : > { %7613 = vmatpush1.bf16.msra.mxu1 %v9142_v30  ;;  %7654 = vmatpush1.bf16.msra.mxu0 %v9144_v16  ;;  %v4718_v30 = vld [vmem:[%s13389_s13 + $0xd90] sm:$0xff]  ;;  %v4703_v16 = vld [vmem:[%s13389_s13 + $0xd18] sm:$0xff] }
 0x5d3   : > { %7614 = vmatprep.subr.bf16.mxu1 %v9111_v36  ;;  %7655 = vmatprep.subr.bf16.mxu0 %v9113_v29  ;;  %v4719_v36 = vld [vmem:[%s13389_s13 + $0xd98] sm:$0xff]  ;;  %v9430_v29 = vcombine.low %v4734_v63, %v4750_v38  ;;  %v9399_v56 = vcombine.high %v4702_v21, %v4718_v30 }
 0x5d4   : > { %v9401_v31 = vcombine.high %v4703_v16, %v4719_v36  ;;  %v9400_v62 = vcombine.low %v4703_v16, %v4719_v36  ;;  %v4480_v36 = vld [vmem:[%s13389_s13 + $0x620] sm:$0xff] }
 0x5d6   : > { %7615 = vmatpush1.bf16.msra.mxu1 %v9110_v51  ;;  %7656 = vmatpush1.bf16.msra.mxu0 %v9112_v52  ;;  %v4686_v51 = vld [vmem:[%s13389_s13 + $0xc90] sm:$0xff]  ;;  %v4671_v52 = vld [vmem:[%s13389_s13 + $0xc18] sm:$0xff] }
 0x5d7   : > { %7616 = vmatprep.subr.bf16.mxu1 %v9079_v57  ;;  %7657 = vmatprep.subr.bf16.mxu0 %v9081_v58  ;;  %v4687_v57 = vld [vmem:[%s13389_s13 + $0xc98] sm:$0xff]  ;;  %v9398_v58 = vcombine.low %v4702_v21, %v4718_v30  ;;  %v9367_v0 = vcombine.high %v4670_v22, %v4686_v51 }
 0x5d8   : > { %v9369_v49 = vcombine.high %v4671_v52, %v4687_v57  ;;  %v9368_v18 = vcombine.low %v4671_v52, %v4687_v57  ;;  %v4448_v57 = vld [vmem:[%s13389_s13 + $0x520] sm:$0xff] }
 0x5da   : > { %7617 = vmatpush1.bf16.msra.mxu1 %v9078_v54  ;;  %7658 = vmatpush1.bf16.msra.mxu0 %v9080_v4  ;;  %v4654_v54 = vld [vmem:[%s13389_s13 + $0xb90] sm:$0xff]  ;;  %v4639_v4 = vld [vmem:[%s13389_s13 + $0xb18] sm:$0xff] }
 0x5db   : > { %7618 = vmatprep.subr.bf16.mxu1 %v9047_v6  ;;  %7659 = vmatprep.subr.bf16.mxu0 %v9049_v7  ;;  %v4655_v6 = vld [vmem:[%s13389_s13 + $0xb98] sm:$0xff]  ;;  %v9366_v7 = vcombine.low %v4670_v22, %v4686_v51  ;;  %v9335_v8 = vcombine.high %v4638_v53, %v4654_v54 }
 0x5dc   : > { %v9337_v9 = vcombine.high %v4639_v4, %v4655_v6  ;;  %v9336_v10 = vcombine.low %v4639_v4, %v4655_v6  ;;  %v4416_v6 = vld [vmem:[%s13389_s13 + $0x420] sm:$0xff] }
 0x5de   : > { %7619 = vmatpush1.bf16.msra.mxu1 %v9046_v43  ;;  %7660 = vmatpush1.bf16.msra.mxu0 %v9048_v34  ;;  %v4622_v43 = vld [vmem:[%s13389_s13 + $0xa90] sm:$0xff]  ;;  %v4607_v34 = vld [vmem:[%s13389_s13 + $0xa18] sm:$0xff] }
 0x5df   : > { %7620 = vmatprep.subr.bf16.mxu1 %v9015_v45  ;;  %7661 = vmatprep.subr.bf16.mxu0 %v9017_v48  ;;  %v4623_v45 = vld [vmem:[%s13389_s13 + $0xa98] sm:$0xff]  ;;  %v9334_v48 = vcombine.low %v4638_v53, %v4654_v54  ;;  %v9303_v20 = vcombine.high %v4606_v55, %v4622_v43 }
 0x5e0   : > { %v9305_v50 = vcombine.high %v4607_v34, %v4623_v45  ;;  %v9304_v42 = vcombine.low %v4607_v34, %v4623_v45  ;;  %v4384_v45 = vld [vmem:[%s13389_s13 + $0x320] sm:$0xff] }
 0x5e2   : > { %7621 = vmatpush1.bf16.msra.mxu1 %v9014_v23  ;;  %7662 = vmatpush1.bf16.msra.mxu0 %v9016_v41  ;;  %v4590_v23 = vld [vmem:[%s13389_s13 + $0x990] sm:$0xff]  ;;  %v4575_v41 = vld [vmem:[%s13389_s13 + $0x918] sm:$0xff] }
 0x5e3   : > { %7622 = vmatprep.subr.bf16.mxu1 %v8983_v25  ;;  %7663 = vmatprep.subr.bf16.mxu0 %v8985_v5  ;;  %v4591_v25 = vld [vmem:[%s13389_s13 + $0x998] sm:$0xff]  ;;  %v9302_v5 = vcombine.low %v4606_v55, %v4622_v43  ;;  %v9271_v26 = vcombine.high %v4574_v47, %v4590_v23 }
 0x5e4   : > { %v9273_v3 = vcombine.high %v4575_v41, %v4591_v25  ;;  %v9272_v63 = vcombine.low %v4575_v41, %v4591_v25  ;;  %v4352_v25 = vld [vmem:[%s13389_s13 + $0x220] sm:$0xff] }
 0x5e6   : > { %7623 = vmatpush1.bf16.msra.mxu1 %v8982_v32  ;;  %7664 = vmatpush1.bf16.msra.mxu0 %v8984_v33  ;;  %v4558_v32 = vld [vmem:[%s13389_s13 + $0x890] sm:$0xff]  ;;  %v4543_v33 = vld [vmem:[%s13389_s13 + $0x818] sm:$0xff] }
 0x5e7   : > { %7624 = vmatprep.subr.bf16.mxu1 %v9463_v37  ;;  %7665 = vmatprep.subr.bf16.mxu0 %v9465_v2  ;;  %v4559_v37 = vld [vmem:[%s13389_s13 + $0x898] sm:$0xff]  ;;  %v9270_v2 = vcombine.low %v4574_v47, %v4590_v23  ;;  %v9239_v38 = vcombine.high %v4542_v28, %v4558_v32 }
 0x5e8   : > { %v9241_v39 = vcombine.high %v4543_v33, %v4559_v37  ;;  %v9240_v21 = vcombine.low %v4543_v33, %v4559_v37  ;;  %v4320_v37 = vld [vmem:[%s13389_s13 + $0x120] sm:$0xff] }
 0x5ea   : > { %7625 = vmatpush2.bf16.msra.mxu1 %v9462_v40  ;;  %7666 = vmatpush2.bf16.msra.mxu0 %v9464_v14  ;;  %v4528_v40 = vld [vmem:[%s13389_s13 + $0x7a0] sm:$0xff]  ;;  %v4513_v14 = vld [vmem:[%s13389_s13 + $0x728] sm:$0xff] }
 0x5eb   : > { %7626 = vmatprep.subr.bf16.mxu1 %v9431_v15  ;;  %7667 = vmatprep.subr.bf16.mxu0 %v9433_v11  ;;  %v4529_v15 = vld [vmem:[%s13389_s13 + $0x7a8] sm:$0xff]  ;;  %v9238_v11 = vcombine.low %v4542_v28, %v4558_v32  ;;  %v9211_v30 = vcombine.high %v4512_v61, %v4528_v40 }
 0x5ec   : > { %v9213_v16 = vcombine.high %v4513_v14, %v4529_v15  ;;  %v9212_v22 = vcombine.low %v4513_v14, %v4529_v15  ;;  %v4288_v15 = vld [vmem:[%s13389_s13 + $0x20] sm:$0xff] }
 0x5ee   : > { %7627 = vmatpush2.bf16.msra.mxu1 %v9430_v29  ;;  %7668 = vmatpush2.bf16.msra.mxu0 %v9432_v19  ;;  %v4496_v29 = vld [vmem:[%s13389_s13 + $0x6a0] sm:$0xff]  ;;  %v4481_v19 = vld [vmem:[%s13389_s13 + $0x628] sm:$0xff] }
 0x5ef   : > { %7628 = vmatprep.subr.bf16.mxu1 %v9399_v56  ;;  %7669 = vmatprep.subr.bf16.mxu0 %v9401_v31  ;;  %v4497_v56 = vld [vmem:[%s13389_s13 + $0x6a8] sm:$0xff]  ;;  %v9210_v31 = vcombine.low %v4512_v61, %v4528_v40  ;;  %v9179_v51 = vcombine.high %v4480_v36, %v4496_v29 }
 0x5f0   : > { %v9181_v52 = vcombine.high %v4481_v19, %v4497_v56  ;;  %v9180_v53 = vcombine.low %v4481_v19, %v4497_v56  ;;  %v4768_v56 = vld [vmem:[%s13389_s13 + $0xf20] sm:$0xff] }
 0x5f2   : > { %7629 = vmatpush2.bf16.msra.mxu1 %v9398_v58  ;;  %7670 = vmatpush2.bf16.msra.mxu0 %v9400_v62  ;;  %v4464_v58 = vld [vmem:[%s13389_s13 + $0x5a0] sm:$0xff]  ;;  %v4449_v62 = vld [vmem:[%s13389_s13 + $0x528] sm:$0xff] }
 0x5f3   : > { %7630 = vmatprep.subr.bf16.mxu1 %v9367_v0  ;;  %7671 = vmatprep.subr.bf16.mxu0 %v9369_v49  ;;  %v4465_v0 = vld [vmem:[%s13389_s13 + $0x5a8] sm:$0xff]  ;;  %v9178_v49 = vcombine.low %v4480_v36, %v4496_v29  ;;  %v9147_v54 = vcombine.high %v4448_v57, %v4464_v58 }
 0x5f4   : > { %v9149_v4 = vcombine.high %v4449_v62, %v4465_v0  ;;  %v9148_v55 = vcombine.low %v4449_v62, %v4465_v0  ;;  %v4736_v0 = vld [vmem:[%s13389_s13 + $0xe20] sm:$0xff] }
 0x5f6   : > { %7631 = vmatpush2.bf16.msra.mxu1 %v9366_v7  ;;  %7672 = vmatpush2.bf16.msra.mxu0 %v9368_v18  ;;  %v4432_v7 = vld [vmem:[%s13389_s13 + $0x4a0] sm:$0xff]  ;;  %v4417_v18 = vld [vmem:[%s13389_s13 + $0x428] sm:$0xff] }
 0x5f7   : > { %7632 = vmatprep.subr.bf16.mxu1 %v9335_v8  ;;  %7673 = vmatprep.subr.bf16.mxu0 %v9337_v9  ;;  %v4433_v8 = vld [vmem:[%s13389_s13 + $0x4a8] sm:$0xff]  ;;  %v9146_v9 = vcombine.low %v4448_v57, %v4464_v58  ;;  %v9115_v43 = vcombine.high %v4416_v6, %v4432_v7 }
 0x5f8   : > { %v9117_v34 = vcombine.high %v4417_v18, %v4433_v8  ;;  %v9116_v47 = vcombine.low %v4417_v18, %v4433_v8  ;;  %v4704_v8 = vld [vmem:[%s13389_s13 + $0xd20] sm:$0xff] }
 0x5fa   : > { %7633 = vmatpush2.bf16.msra.mxu1 %v9334_v48  ;;  %7674 = vmatpush2.bf16.msra.mxu0 %v9336_v10  ;;  %v4400_v48 = vld [vmem:[%s13389_s13 + $0x3a0] sm:$0xff]  ;;  %v4385_v10 = vld [vmem:[%s13389_s13 + $0x328] sm:$0xff] }
 0x5fb   : > { %7634 = vmatprep.subr.bf16.mxu1 %v9303_v20  ;;  %7675 = vmatprep.subr.bf16.mxu0 %v9305_v50  ;;  %v4401_v20 = vld [vmem:[%s13389_s13 + $0x3a8] sm:$0xff]  ;;  %v9114_v50 = vcombine.low %v4416_v6, %v4432_v7  ;;  %v9083_v23 = vcombine.high %v4384_v45, %v4400_v48 }
 0x5fc   : > { %v9085_v41 = vcombine.high %v4385_v10, %v4401_v20  ;;  %v9084_v28 = vcombine.low %v4385_v10, %v4401_v20  ;;  %v4672_v20 = vld [vmem:[%s13389_s13 + $0xc20] sm:$0xff] }
 0x5fe   : > { %7635 = vmatpush2.bf16.msra.mxu1 %v9302_v5  ;;  %7676 = vmatpush2.bf16.msra.mxu0 %v9304_v42  ;;  %v4368_v5 = vld [vmem:[%s13389_s13 + $0x2a0] sm:$0xff]  ;;  %v4353_v42 = vld [vmem:[%s13389_s13 + $0x228] sm:$0xff] }
 0x5ff   : > { %7636 = vmatprep.subr.bf16.mxu1 %v9271_v26  ;;  %7677 = vmatprep.subr.bf16.mxu0 %v9273_v3  ;;  %v4369_v26 = vld [vmem:[%s13389_s13 + $0x2a8] sm:$0xff]  ;;  %v9082_v3 = vcombine.low %v4384_v45, %v4400_v48  ;;  %v9051_v32 = vcombine.high %v4352_v25, %v4368_v5 }
 0x600   : > { %v9053_v33 = vcombine.high %v4353_v42, %v4369_v26  ;;  %v9052_v61 = vcombine.low %v4353_v42, %v4369_v26  ;;  %v4640_v26 = vld [vmem:[%s13389_s13 + $0xb20] sm:$0xff] }
 0x602   : > { %7637 = vmatpush2.bf16.msra.mxu1 %v9270_v2  ;;  %7678 = vmatpush2.bf16.msra.mxu0 %v9272_v63  ;;  %v4336_v2 = vld [vmem:[%s13389_s13 + $0x1a0] sm:$0xff]  ;;  %v4321_v63 = vld [vmem:[%s13389_s13 + $0x128] sm:$0xff] }
 0x603   : > { %7638 = vmatprep.subr.bf16.mxu1 %v9239_v38  ;;  %7679 = vmatprep.subr.bf16.mxu0 %v9241_v39  ;;  %v4337_v38 = vld [vmem:[%s13389_s13 + $0x1a8] sm:$0xff]  ;;  %v9050_v39 = vcombine.low %v4352_v25, %v4368_v5  ;;  %v9019_v40 = vcombine.high %v4320_v37, %v4336_v2 }
 0x604   : > { %v9021_v14 = vcombine.high %v4321_v63, %v4337_v38  ;;  %v9020_v36 = vcombine.low %v4321_v63, %v4337_v38  ;;  %v4608_v38 = vld [vmem:[%s13389_s13 + $0xa20] sm:$0xff] }
 0x606   : > { %7639 = vmatpush2.bf16.msra.mxu1 %v9238_v11  ;;  %7680 = vmatpush2.bf16.msra.mxu0 %v9240_v21  ;;  %v4304_v11 = vld [vmem:[%s13389_s13 + $0xa0] sm:$0xff]  ;;  %v4289_v21 = vld [vmem:[%s13389_s13 + $0x28] sm:$0xff] }
 0x607   : > { %7690 = vmatprep.subr.bf16.mxu1 %v9211_v30  ;;  %7731 = vmatprep.subr.bf16.mxu0 %v9213_v16  ;;  %v4305_v30 = vld [vmem:[%s13389_s13 + $0xa8] sm:$0xff]  ;;  %v9018_v16 = vcombine.low %v4320_v37, %v4336_v2  ;;  %v8987_v29 = vcombine.high %v4288_v15, %v4304_v11 }
 0x608   : > { %v8989_v19 = vcombine.high %v4289_v21, %v4305_v30  ;;  %v8988_v57 = vcombine.low %v4289_v21, %v4305_v30  ;;  %v4576_v30 = vld [vmem:[%s13389_s13 + $0x920] sm:$0xff] }
 0x609   : > { %7641 = vmatmul.mubr.bf16.vlgmr.msra.gmra.mxu1 %v11894_v27  ;;  %7682 = vmatmul.mubr.bf16.vlgmr.msra.gmra.mxu0 %v11894_v27 }
 0x60a   : > { %7691 = vmatpush1.bf16.msra.mxu1 %v9210_v31  ;;  %7722 = vmatprep.mubr.bf16.mxu1 %v11892_v1  ;;  %v4784_v31 = vld [vmem:[%s13389_s13 + $0xfa0] sm:$0xff] }
 0x60b   : > { %7732 = vmatpush1.bf16.msra.mxu0 %v9212_v22  ;;  %7763 = vmatprep.mubr.bf16.mxu0 %v11892_v1  ;;  %v4769_v22 = vld [vmem:[%s13389_s13 + $0xf28] sm:$0xff]  ;;  %v9467_v58 = vcombine.high %v4768_v56, %v4784_v31 }
 0x60c   : > { %7692 = vmatprep.subr.bf16.mxu1 %v9179_v51  ;;  %7733 = vmatprep.subr.bf16.mxu0 %v9181_v52  ;;  %v4785_v51 = vld [vmem:[%s13389_s13 + $0xfa8] sm:$0xff]  ;;  %v8986_v52 = vcombine.low %v4288_v15, %v4304_v11 }
 0x60d   : > { %v9469_v62 = vcombine.high %v4769_v22, %v4785_v51  ;;  %v9468_v6 = vcombine.low %v4769_v22, %v4785_v51  ;;  %v4544_v51 = vld [vmem:[%s13389_s13 + $0x820] sm:$0xff] }
 0x60e   : > { %7693 = vmatpush1.bf16.msra.mxu1 %v9178_v49  ;;  %v4752_v49 = vld [vmem:[%s13389_s13 + $0xea0] sm:$0xff] }
 0x60f   : > { %7734 = vmatpush1.bf16.msra.mxu0 %v9180_v53  ;;  %7694 = vmatprep.subr.bf16.mxu1 %v9147_v54  ;;  %v4737_v53 = vld [vmem:[%s13389_s13 + $0xe28] sm:$0xff]  ;;  %v9435_v7 = vcombine.high %v4736_v0, %v4752_v49 }
 0x610   : > { %7735 = vmatprep.subr.bf16.mxu0 %v9149_v4  ;;  %v4753_v54 = vld [vmem:[%s13389_s13 + $0xea8] sm:$0xff]  ;;  %v9466_v4 = vcombine.low %v4768_v56, %v4784_v31 }
 0x611   : > { %v9437_v18 = vcombine.high %v4737_v53, %v4753_v54  ;;  %v9436_v45 = vcombine.low %v4737_v53, %v4753_v54  ;;  %v4514_v54 = vld [vmem:[%s13389_s13 + $0x730] sm:$0xff] }
 0x612   : > { %7695 = vmatpush1.bf16.msra.mxu1 %v9146_v9  ;;  %v4720_v9 = vld [vmem:[%s13389_s13 + $0xda0] sm:$0xff] }
 0x613   : > { %7736 = vmatpush1.bf16.msra.mxu0 %v9148_v55  ;;  %7696 = vmatprep.subr.bf16.mxu1 %v9115_v43  ;;  %v4705_v55 = vld [vmem:[%s13389_s13 + $0xd28] sm:$0xff]  ;;  %v9403_v48 = vcombine.high %v4704_v8, %v4720_v9 }
 0x614   : > { %7737 = vmatprep.subr.bf16.mxu0 %v9117_v34  ;;  %v4721_v43 = vld [vmem:[%s13389_s13 + $0xda8] sm:$0xff]  ;;  %v9434_v34 = vcombine.low %v4736_v0, %v4752_v49 }
 0x615   : > { %v9405_v10 = vcombine.high %v4705_v55, %v4721_v43  ;;  %v9404_v25 = vcombine.low %v4705_v55, %v4721_v43  ;;  %v4482_v43 = vld [vmem:[%s13389_s13 + $0x630] sm:$0xff] }
 0x616   : > { %7697 = vmatpush1.bf16.msra.mxu1 %v9114_v50  ;;  %v4688_v50 = vld [vmem:[%s13389_s13 + $0xca0] sm:$0xff] }
 0x617   : > { %7738 = vmatpush1.bf16.msra.mxu0 %v9116_v47  ;;  %7698 = vmatprep.subr.bf16.mxu1 %v9083_v23  ;;  %v4673_v47 = vld [vmem:[%s13389_s13 + $0xc28] sm:$0xff]  ;;  %v9371_v5 = vcombine.high %v4672_v20, %v4688_v50 }
 0x618   : > { %7739 = vmatprep.subr.bf16.mxu0 %v9085_v41  ;;  %v4689_v23 = vld [vmem:[%s13389_s13 + $0xca8] sm:$0xff]  ;;  %v9402_v41 = vcombine.low %v4704_v8, %v4720_v9 }
 0x619   : > { %v9373_v42 = vcombine.high %v4673_v47, %v4689_v23  ;;  %v9372_v37 = vcombine.low %v4673_v47, %v4689_v23  ;;  %v4450_v47 = vld [vmem:[%s13389_s13 + $0x530] sm:$0xff] }
 0x61a   : > { %7699 = vmatpush1.bf16.msra.mxu1 %v9082_v3  ;;  %v4656_v3 = vld [vmem:[%s13389_s13 + $0xba0] sm:$0xff]  ;;  %v4466_v23 = vld [vmem:[%s13389_s13 + $0x5b0] sm:$0xff] }
 0x61b   : > { %7740 = vmatpush1.bf16.msra.mxu0 %v9084_v28  ;;  %7700 = vmatprep.subr.bf16.mxu1 %v9051_v32  ;;  %v4641_v28 = vld [vmem:[%s13389_s13 + $0xb28] sm:$0xff]  ;;  %v9339_v2 = vcombine.high %v4640_v26, %v4656_v3 }
 0x61c   : > { %7741 = vmatprep.subr.bf16.mxu0 %v9053_v33  ;;  %v4657_v32 = vld [vmem:[%s13389_s13 + $0xba8] sm:$0xff]  ;;  %v9370_v33 = vcombine.low %v4672_v20, %v4688_v50 }
 0x61d   : > { %v9341_v63 = vcombine.high %v4641_v28, %v4657_v32  ;;  %v9340_v15 = vcombine.low %v4641_v28, %v4657_v32  ;;  %v4418_v32 = vld [vmem:[%s13389_s13 + $0x430] sm:$0xff] }
 0x61e   : > { %7701 = vmatpush1.bf16.msra.mxu1 %v9050_v39  ;;  %v4624_v39 = vld [vmem:[%s13389_s13 + $0xaa0] sm:$0xff] }
 0x61f   : > { %7742 = vmatpush1.bf16.msra.mxu0 %v9052_v61  ;;  %7702 = vmatprep.subr.bf16.mxu1 %v9019_v40  ;;  %v4609_v61 = vld [vmem:[%s13389_s13 + $0xa28] sm:$0xff]  ;;  %v9307_v11 = vcombine.high %v4608_v38, %v4624_v39 }
 0x620   : > { %7743 = vmatprep.subr.bf16.mxu0 %v9021_v14  ;;  %v4625_v40 = vld [vmem:[%s13389_s13 + $0xaa8] sm:$0xff]  ;;  %v9338_v14 = vcombine.low %v4640_v26, %v4656_v3  ;;  %v9151_v3 = vcombine.high %v4450_v47, %v4466_v23 }
 0x621   : > { %v9309_v21 = vcombine.high %v4609_v61, %v4625_v40  ;;  %v9308_v56 = vcombine.low %v4609_v61, %v4625_v40  ;;  %v4386_v40 = vld [vmem:[%s13389_s13 + $0x330] sm:$0xff] }
 0x622   : > { %7703 = vmatpush1.bf16.msra.mxu1 %v9018_v16  ;;  %v4592_v16 = vld [vmem:[%s13389_s13 + $0x9a0] sm:$0xff] }
 0x623   : > { %7744 = vmatpush1.bf16.msra.mxu0 %v9020_v36  ;;  %7704 = vmatprep.subr.bf16.mxu1 %v8987_v29  ;;  %v4577_v36 = vld [vmem:[%s13389_s13 + $0x928] sm:$0xff]  ;;  %v9275_v31 = vcombine.high %v4576_v30, %v4592_v16 }
 0x624   : > { %7745 = vmatprep.subr.bf16.mxu0 %v8989_v19  ;;  %v4593_v29 = vld [vmem:[%s13389_s13 + $0x9a8] sm:$0xff]  ;;  %v9306_v19 = vcombine.low %v4608_v38, %v4624_v39 }
 0x625   : > { %v9277_v22 = vcombine.high %v4577_v36, %v4593_v29  ;;  %v9276_v0 = vcombine.low %v4577_v36, %v4593_v29  ;;  %v4354_v29 = vld [vmem:[%s13389_s13 + $0x230] sm:$0xff] }
 0x626   : > { %7705 = vmatpush1.bf16.msra.mxu1 %v8986_v52  ;;  %v4560_v52 = vld [vmem:[%s13389_s13 + $0x8a0] sm:$0xff] }
 0x627   : > { %7746 = vmatpush1.bf16.msra.mxu0 %v8988_v57  ;;  %7706 = vmatprep.subr.bf16.mxu1 %v9467_v58  ;;  %v4545_v57 = vld [vmem:[%s13389_s13 + $0x828] sm:$0xff]  ;;  %v9243_v49 = vcombine.high %v4544_v51, %v4560_v52 }
 0x628   : > { %7747 = vmatprep.subr.bf16.mxu0 %v9469_v62  ;;  %v4561_v58 = vld [vmem:[%s13389_s13 + $0x8a8] sm:$0xff]  ;;  %v9274_v62 = vcombine.low %v4576_v30, %v4592_v16 }
 0x629   : > { %v9245_v53 = vcombine.high %v4545_v57, %v4561_v58  ;;  %v9244_v8 = vcombine.low %v4545_v57, %v4561_v58  ;;  %v4322_v58 = vld [vmem:[%s13389_s13 + $0x130] sm:$0xff] }
 0x62a   : > { %7707 = vmatpush2.bf16.msra.mxu1 %v9466_v4  ;;  %v4530_v4 = vld [vmem:[%s13389_s13 + $0x7b0] sm:$0xff] }
 0x62b   : > { %7748 = vmatpush2.bf16.msra.mxu0 %v9468_v6  ;;  %7708 = vmatprep.subr.bf16.mxu1 %v9435_v7  ;;  %v4515_v6 = vld [vmem:[%s13389_s13 + $0x738] sm:$0xff]  ;;  %v9215_v9 = vcombine.high %v4514_v54, %v4530_v4 }
 0x62c   : > { %7749 = vmatprep.subr.bf16.mxu0 %v9437_v18  ;;  %v4531_v7 = vld [vmem:[%s13389_s13 + $0x7b8] sm:$0xff]  ;;  %v9242_v18 = vcombine.low %v4544_v51, %v4560_v52 }
 0x62d   : > { %v9217_v55 = vcombine.high %v4515_v6, %v4531_v7  ;;  %v9216_v20 = vcombine.low %v4515_v6, %v4531_v7  ;;  %v4290_v7 = vld [vmem:[%s13389_s13 + $0x30] sm:$0xff] }
 0x62e   : > { %7709 = vmatpush2.bf16.msra.mxu1 %v9434_v34  ;;  %v4498_v34 = vld [vmem:[%s13389_s13 + $0x6b0] sm:$0xff] }
 0x62f   : > { %7750 = vmatpush2.bf16.msra.mxu0 %v9436_v45  ;;  %7710 = vmatprep.subr.bf16.mxu1 %v9403_v48  ;;  %v9214_v45 = vcombine.low %v4514_v54, %v4530_v4  ;;  %v4483_v48 = vld [vmem:[%s13389_s13 + $0x638] sm:$0xff]  ;;  %v9183_v50 = vcombine.high %v4482_v43, %v4498_v34 }
 0x630   : > { %7751 = vmatprep.subr.bf16.mxu0 %v9405_v10  ;;  %v4499_v10 = vld [vmem:[%s13389_s13 + $0x6b8] sm:$0xff] }
 0x631   : > { %v9184_v26 = vcombine.low %v4483_v48, %v4499_v10 }
 0x632   : > { %7711 = vmatpush2.bf16.msra.mxu1 %v9402_v41  ;;  %v9185_v41 = vcombine.high %v4483_v48, %v4499_v10  ;;  %v4770_v48 = vld [vmem:[%s13389_s13 + $0xf30] sm:$0xff] }
 0x633   : > { %7752 = vmatpush2.bf16.msra.mxu0 %v9404_v25  ;;  %7712 = vmatprep.subr.bf16.mxu1 %v9371_v5  ;;  %v4451_v25 = vld [vmem:[%s13389_s13 + $0x538] sm:$0xff]  ;;  %v4786_v10 = vld [vmem:[%s13389_s13 + $0xfb0] sm:$0xff] }
 0x634   : > { %7753 = vmatprep.subr.bf16.mxu0 %v9373_v42  ;;  %v4467_v5 = vld [vmem:[%s13389_s13 + $0x5b8] sm:$0xff]  ;;  %v9182_v42 = vcombine.low %v4482_v43, %v4498_v34 }
 0x635   : > { %v9153_v28 = vcombine.high %v4451_v25, %v4467_v5  ;;  %v9152_v38 = vcombine.low %v4451_v25, %v4467_v5  ;;  %v4738_v5 = vld [vmem:[%s13389_s13 + $0xe30] sm:$0xff] }
 0x636   : > { %7713 = vmatpush2.bf16.msra.mxu1 %v9370_v33  ;;  %v4434_v33 = vld [vmem:[%s13389_s13 + $0x4b0] sm:$0xff] }
 0x637   : > { %7754 = vmatpush2.bf16.msra.mxu0 %v9372_v37  ;;  %7714 = vmatprep.subr.bf16.mxu1 %v9339_v2  ;;  %v4419_v37 = vld [vmem:[%s13389_s13 + $0x438] sm:$0xff]  ;;  %v9119_v39 = vcombine.high %v4418_v32, %v4434_v33 }
 0x638   : > { %7755 = vmatprep.subr.bf16.mxu0 %v9341_v63  ;;  %v4435_v2 = vld [vmem:[%s13389_s13 + $0x4b8] sm:$0xff]  ;;  %v9150_v63 = vcombine.low %v4450_v47, %v4466_v23 }
 0x639   : > { %v9121_v61 = vcombine.high %v4419_v37, %v4435_v2  ;;  %v9120_v30 = vcombine.low %v4419_v37, %v4435_v2  ;;  %v4706_v2 = vld [vmem:[%s13389_s13 + $0xd30] sm:$0xff] }
 0x63a   : > { %7715 = vmatpush2.bf16.msra.mxu1 %v9338_v14  ;;  %v4402_v14 = vld [vmem:[%s13389_s13 + $0x3b0] sm:$0xff] }
 0x63b   : > { %7756 = vmatpush2.bf16.msra.mxu0 %v9340_v15  ;;  %7716 = vmatprep.subr.bf16.mxu1 %v9307_v11  ;;  %v4387_v15 = vld [vmem:[%s13389_s13 + $0x338] sm:$0xff]  ;;  %v9087_v16 = vcombine.high %v4386_v40, %v4402_v14 }
 0x63c   : > { %7757 = vmatprep.subr.bf16.mxu0 %v9309_v21  ;;  %v4403_v11 = vld [vmem:[%s13389_s13 + $0x3b8] sm:$0xff]  ;;  %v9118_v21 = vcombine.low %v4418_v32, %v4434_v33 }
 0x63d   : > { %v9089_v36 = vcombine.high %v4387_v15, %v4403_v11  ;;  %v9088_v51 = vcombine.low %v4387_v15, %v4403_v11  ;;  %v4674_v11 = vld [vmem:[%s13389_s13 + $0xc30] sm:$0xff] }
 0x63e   : > { %7717 = vmatpush2.bf16.msra.mxu1 %v9306_v19  ;;  %v4370_v19 = vld [vmem:[%s13389_s13 + $0x2b0] sm:$0xff] }
 0x63f   : > { %7758 = vmatpush2.bf16.msra.mxu0 %v9308_v56  ;;  %7718 = vmatprep.subr.bf16.mxu1 %v9275_v31  ;;  %v4355_v56 = vld [vmem:[%s13389_s13 + $0x238] sm:$0xff]  ;;  %v9055_v52 = vcombine.high %v4354_v29, %v4370_v19 }
 0x640   : > { %7759 = vmatprep.subr.bf16.mxu0 %v9277_v22  ;;  %v4371_v31 = vld [vmem:[%s13389_s13 + $0x2b8] sm:$0xff]  ;;  %v9086_v22 = vcombine.low %v4386_v40, %v4402_v14 }
 0x641   : > { %v9057_v57 = vcombine.high %v4355_v56, %v4371_v31  ;;  %v9056_v54 = vcombine.low %v4355_v56, %v4371_v31  ;;  %v4642_v31 = vld [vmem:[%s13389_s13 + $0xb30] sm:$0xff] }
 0x642   : > { %7719 = vmatpush2.bf16.msra.mxu1 %v9274_v62  ;;  %v4338_v62 = vld [vmem:[%s13389_s13 + $0x1b0] sm:$0xff] }
 0x643   : > { %7760 = vmatpush2.bf16.msra.mxu0 %v9276_v0  ;;  %7720 = vmatprep.subr.bf16.mxu1 %v9243_v49  ;;  %v4323_v0 = vld [vmem:[%s13389_s13 + $0x138] sm:$0xff]  ;;  %v9023_v4 = vcombine.high %v4322_v58, %v4338_v62 }
 0x644   : > { %7761 = vmatprep.subr.bf16.mxu0 %v9245_v53  ;;  %v4339_v49 = vld [vmem:[%s13389_s13 + $0x1b8] sm:$0xff]  ;;  %v9054_v53 = vcombine.low %v4354_v29, %v4370_v19 }
 0x645   : > { %v9025_v6 = vcombine.high %v4323_v0, %v4339_v49  ;;  %v9024_v43 = vcombine.low %v4323_v0, %v4339_v49  ;;  %v4610_v49 = vld [vmem:[%s13389_s13 + $0xa30] sm:$0xff] }
 0x646   : > { %7721 = vmatpush2.bf16.msra.mxu1 %v9242_v18  ;;  %v4306_v18 = vld [vmem:[%s13389_s13 + $0xb0] sm:$0xff] }
 0x647   : > { %7762 = vmatpush2.bf16.msra.mxu0 %v9244_v8  ;;  %7772 = vmatprep.subr.bf16.mxu1 %v9215_v9  ;;  %v4291_v8 = vld [vmem:[%s13389_s13 + $0x38] sm:$0xff]  ;;  %v8991_v34 = vcombine.high %v4290_v7, %v4306_v18  ;;  %v8990_v47 = vcombine.low %v4290_v7, %v4306_v18 }
 0x648   : > { %7813 = vmatprep.subr.bf16.mxu0 %v9217_v55  ;;  %v4307_v9 = vld [vmem:[%s13389_s13 + $0xb8] sm:$0xff]  ;;  %v9022_v55 = vcombine.low %v4322_v58, %v4338_v62 }
 0x649   : > { %7723 = vmatmul.mubr.bf16.vlgmr.msra.gmra.mxu1 %v11894_v27  ;;  %v8992_v23 = vcombine.low %v4291_v8, %v4307_v9 }
 0x64a   : > { %7764 = vmatmul.mubr.bf16.vlgmr.msra.gmra.mxu0 %v11894_v27  ;;  %7773 = vmatpush1.bf16.msra.mxu1 %v9214_v45  ;;  %v8993_v45 = vcombine.high %v4291_v8, %v4307_v9  ;;  %v4578_v9 = vld [vmem:[%s13389_s13 + $0x930] sm:$0xff] }
 0x64b   : > { %7804 = vmatprep.mubr.bf16.mxu1 %v11892_v1  ;;  %7814 = vmatpush1.bf16.msra.mxu0 %v9216_v20  ;;  %v4771_v20 = vld [vmem:[%s13389_s13 + $0xf38] sm:$0xff] }
 0x64c   : > { %7845 = vmatprep.mubr.bf16.mxu0 %v11892_v1  ;;  %7774 = vmatprep.subr.bf16.mxu1 %v9183_v50  ;;  %v4787_v50 = vld [vmem:[%s13389_s13 + $0xfb8] sm:$0xff] }
 0x64d   : > { %7815 = vmatprep.subr.bf16.mxu0 %v9185_v41  ;;  %v9471_v41 = vcombine.high %v4770_v48, %v4786_v10  ;;  %v9473_v25 = vcombine.high %v4771_v20, %v4787_v50  ;;  %v9472_v32 = vcombine.low %v4771_v20, %v4787_v50  ;;  %v4546_v50 = vld [vmem:[%s13389_s13 + $0x830] sm:$0xff] }
 0x64e   : > { %7775 = vmatpush1.bf16.msra.mxu1 %v9182_v42  ;;  %v4754_v42 = vld [vmem:[%s13389_s13 + $0xeb0] sm:$0xff] }
 0x64f   : > { %7816 = vmatpush1.bf16.msra.mxu0 %v9184_v26  ;;  %7776 = vmatprep.subr.bf16.mxu1 %v9151_v3  ;;  %v4739_v26 = vld [vmem:[%s13389_s13 + $0xe38] sm:$0xff]  ;;  %v9439_v33 = vcombine.high %v4738_v5, %v4754_v42 }
 0x650   : > { %7817 = vmatprep.subr.bf16.mxu0 %v9153_v28  ;;  %v4755_v3 = vld [vmem:[%s13389_s13 + $0xeb8] sm:$0xff]  ;;  %v9470_v28 = vcombine.low %v4770_v48, %v4786_v10 }
 0x651   : > { %v9441_v37 = vcombine.high %v4739_v26, %v4755_v3  ;;  %v9440_v40 = vcombine.low %v4739_v26, %v4755_v3  ;;  %v4516_v3 = vld [vmem:[%s13389_s13 + $0x740] sm:$0xff] }
 0x652   : > { %7777 = vmatpush1.bf16.msra.mxu1 %v9150_v63  ;;  %v4722_v63 = vld [vmem:[%s13389_s13 + $0xdb0] sm:$0xff] }
 0x653   : > { %7818 = vmatpush1.bf16.msra.mxu0 %v9152_v38  ;;  %7778 = vmatprep.subr.bf16.mxu1 %v9119_v39  ;;  %v4707_v38 = vld [vmem:[%s13389_s13 + $0xd38] sm:$0xff]  ;;  %v9407_v14 = vcombine.high %v4706_v2, %v4722_v63 }
 0x654   : > { %7819 = vmatprep.subr.bf16.mxu0 %v9121_v61  ;;  %v4723_v39 = vld [vmem:[%s13389_s13 + $0xdb8] sm:$0xff]  ;;  %v9438_v61 = vcombine.low %v4738_v5, %v4754_v42 }
 0x655   : > { %v9409_v15 = vcombine.high %v4707_v38, %v4723_v39  ;;  %v9408_v29 = vcombine.low %v4707_v38, %v4723_v39 }
 0x656   : > { %7779 = vmatpush1.bf16.msra.mxu1 %v9118_v21  ;;  %v4690_v21 = vld [vmem:[%s13389_s13 + $0xcb0] sm:$0xff] }
 0x657   : > { %7820 = vmatpush1.bf16.msra.mxu0 %v9120_v30  ;;  %7780 = vmatprep.subr.bf16.mxu1 %v9087_v16  ;;  %v4675_v30 = vld [vmem:[%s13389_s13 + $0xc38] sm:$0xff]  ;;  %v9375_v19 = vcombine.high %v4674_v11, %v4690_v21 }
 0x658   : > { %7821 = vmatprep.subr.bf16.mxu0 %v9089_v36  ;;  %v4691_v16 = vld [vmem:[%s13389_s13 + $0xcb8] sm:$0xff]  ;;  %v9406_v36 = vcombine.low %v4706_v2, %v4722_v63 }
 0x659   : > { %v9377_v56 = vcombine.high %v4675_v30, %v4691_v16  ;;  %v9376_v58 = vcombine.low %v4675_v30, %v4691_v16  ;;  %v4485_v30 = vld [vmem:[%s13389_s13 + $0x648] sm:$0xff] }
 0x65a   : > { %7781 = vmatpush1.bf16.msra.mxu1 %v9086_v22  ;;  %v4658_v22 = vld [vmem:[%s13389_s13 + $0xbb0] sm:$0xff]  ;;  %v4501_v16 = vld [vmem:[%s13389_s13 + $0x6c8] sm:$0xff] }
 0x65b   : > { %7822 = vmatpush1.bf16.msra.mxu0 %v9088_v51  ;;  %7782 = vmatprep.subr.bf16.mxu1 %v9055_v52  ;;  %v4643_v51 = vld [vmem:[%s13389_s13 + $0xb38] sm:$0xff]  ;;  %v9343_v62 = vcombine.high %v4642_v31, %v4658_v22 }
 0x65c   : > { %7823 = vmatprep.subr.bf16.mxu0 %v9057_v57  ;;  %v4659_v52 = vld [vmem:[%s13389_s13 + $0xbb8] sm:$0xff]  ;;  %v9374_v57 = vcombine.low %v4674_v11, %v4690_v21 }
 0x65d   : > { %v9345_v0 = vcombine.high %v4643_v51, %v4659_v52  ;;  %v9344_v7 = vcombine.low %v4643_v51, %v4659_v52  ;;  %v4468_v52 = vld [vmem:[%s13389_s13 + $0x5c0] sm:$0xff] }
 0x65e   : > { %7783 = vmatpush1.bf16.msra.mxu1 %v9054_v53  ;;  %v4626_v53 = vld [vmem:[%s13389_s13 + $0xab0] sm:$0xff] }
 0x65f   : > { %7824 = vmatpush1.bf16.msra.mxu0 %v9056_v54  ;;  %7784 = vmatprep.subr.bf16.mxu1 %v9023_v4  ;;  %v4611_v54 = vld [vmem:[%s13389_s13 + $0xa38] sm:$0xff]  ;;  %v9311_v18 = vcombine.high %v4610_v49, %v4626_v53 }
 0x660   : > { %7825 = vmatprep.subr.bf16.mxu0 %v9025_v6  ;;  %v4627_v4 = vld [vmem:[%s13389_s13 + $0xab8] sm:$0xff]  ;;  %v9342_v6 = vcombine.low %v4642_v31, %v4658_v22 }
 0x661   : > { %v9313_v8 = vcombine.high %v4611_v54, %v4627_v4  ;;  %v9312_v48 = vcombine.low %v4611_v54, %v4627_v4  ;;  %v9188_v4 = vcombine.low %v4485_v30, %v4501_v16 }
 0x662   : > { %7785 = vmatpush1.bf16.msra.mxu1 %v9022_v55  ;;  %v4594_v55 = vld [vmem:[%s13389_s13 + $0x9b0] sm:$0xff] }
 0x663   : > { %7826 = vmatpush1.bf16.msra.mxu0 %v9024_v43  ;;  %7786 = vmatprep.subr.bf16.mxu1 %v8991_v34  ;;  %v4579_v43 = vld [vmem:[%s13389_s13 + $0x938] sm:$0xff]  ;;  %v9279_v10 = vcombine.high %v4578_v9, %v4594_v55 }
 0x664   : > { %7827 = vmatprep.subr.bf16.mxu0 %v8993_v45  ;;  %v4595_v34 = vld [vmem:[%s13389_s13 + $0x9b8] sm:$0xff]  ;;  %v9310_v45 = vcombine.low %v4610_v49, %v4626_v53  ;;  %v9189_v49 = vcombine.high %v4485_v30, %v4501_v16  ;;  %v4357_v30 = vld [vmem:[%s13389_s13 + $0x248] sm:$0xff] }
 0x665   : > { %v9281_v20 = vcombine.high %v4579_v43, %v4595_v34  ;;  %v9280_v5 = vcombine.low %v4579_v43, %v4595_v34  ;;  %v4373_v16 = vld [vmem:[%s13389_s13 + $0x2c8] sm:$0xff] }
 0x666   : > { %7787 = vmatpush1.bf16.msra.mxu1 %v8990_v47  ;;  %v4562_v47 = vld [vmem:[%s13389_s13 + $0x8b0] sm:$0xff] }
 0x667   : > { %7828 = vmatpush1.bf16.msra.mxu0 %v8992_v23  ;;  %7788 = vmatprep.subr.bf16.mxu1 %v9471_v41  ;;  %v4547_v23 = vld [vmem:[%s13389_s13 + $0x838] sm:$0xff]  ;;  %v9247_v42 = vcombine.high %v4546_v50, %v4562_v47  ;;  %v9246_v63 = vcombine.low %v4546_v50, %v4562_v47  ;;  %v4437_v50 = vld [vmem:[%s13389_s13 + $0x4c8] sm:$0xff] }
 0x668   : > { %7829 = vmatprep.subr.bf16.mxu0 %v9473_v25  ;;  %v4563_v41 = vld [vmem:[%s13389_s13 + $0x8b8] sm:$0xff]  ;;  %v9278_v25 = vcombine.low %v4578_v9, %v4594_v55 }
 0x669   : > { %v9249_v26 = vcombine.high %v4547_v23, %v4563_v41  ;;  %v9248_v38 = vcombine.low %v4547_v23, %v4563_v41 }
 0x66a   : > { %7789 = vmatpush2.bf16.msra.mxu1 %v9470_v28  ;;  %v4532_v28 = vld [vmem:[%s13389_s13 + $0x7c0] sm:$0xff] }
 0x66b   : > { %7830 = vmatpush2.bf16.msra.mxu0 %v9472_v32  ;;  %7790 = vmatprep.subr.bf16.mxu1 %v9439_v33  ;;  %v4517_v32 = vld [vmem:[%s13389_s13 + $0x748] sm:$0xff]  ;;  %v9219_v39 = vcombine.high %v4516_v3, %v4532_v28  ;;  %v9218_v21 = vcombine.low %v4516_v3, %v4532_v28 }
 0x66c   : > { %7831 = vmatprep.subr.bf16.mxu0 %v9441_v37  ;;  %v4533_v33 = vld [vmem:[%s13389_s13 + $0x7c8] sm:$0xff]  ;;  %v10110_v37 = vmov 1966171168  }
 0x66d   : > { %v8219_v2 = vunpack.c.l.s4 %v10110_v37  ;;  %v4404_v37 = vld [vmem:[%s13389_s13 + $0x3c0] sm:$0xff] }
 0x66e   : > { %7791 = vmatpush2.bf16.msra.mxu1 %v9438_v61  ;;  %v9221_v61 = vcombine.high %v4517_v32, %v4533_v33 }
 0x66f   : > { %7832 = vmatpush2.bf16.msra.mxu0 %v9440_v40  ;;  %7792 = vmatprep.subr.bf16.mxu1 %v9407_v14  ;;  %v12477_v40 = vld [vmem:[%s13390_s14] sm:$0xff]  ;;  %v8220_v11 = vunpack.c.0.s8 %v8219_v2  ;;  %v4389_v2 = vld [vmem:[%s13389_s13 + $0x348] sm:$0xff] }
 0x670   : > { %7833 = vmatprep.subr.bf16.mxu0 %v9409_v15  ;;  %v4484_v14 = vld [vmem:[%s13389_s13 + $0x640] sm:$0xff]  ;;  %v7373_v31 = vrot.slane %v12477_v40, %v10761_v12  ;;  %v7381_v22 = vrot.slane %v12477_v40, %v10764_v13 }
 0x671   : > { %v4500_v15 = vld [vmem:[%s13389_s13 + $0x6c0] sm:$0xff]  ;;  %v12513_v53 = vsub.s32 %v8220_v11, %v10731_v46 }
 0x672   : > { %7793 = vmatpush2.bf16.msra.mxu1 %v9406_v36  ;;  %v9220_v36 = vcombine.low %v4517_v32, %v4533_v33  ;;  %v9187_v51 = vcombine.high %v4484_v14, %v4500_v15  ;;  %v9186_v54 = vcombine.low %v4484_v14, %v4500_v15  ;;  %v4420_v46 = vld [vmem:[%s13389_s13 + $0x440] sm:$0xff] }
 0x673   : > { %7834 = vmatpush2.bf16.msra.mxu0 %v9408_v29  ;;  %7794 = vmatprep.subr.bf16.mxu1 %v9375_v19  ;;  %v7369_v29 = vrot.slane %v12477_v40, %v10738_v44  ;;  %v4452_v19 = vld [vmem:[%s13389_s13 + $0x540] sm:$0xff] }
 0x674   : > { %7835 = vmatprep.subr.bf16.mxu0 %v9377_v56  ;;  %v7377_v56 = vrot.slane %v12477_v40, %v10741_v59  ;;  %v9154_v41 = vcombine.low %v4452_v19, %v4468_v52  ;;  %v4388_v33 = vld [vmem:[%s13389_s13 + $0x340] sm:$0xff] }
 0x675   : > { %v9091_v14 = vcombine.high %v4388_v33, %v4404_v37  ;;  %v4356_v11 = vld [vmem:[%s13389_s13 + $0x240] sm:$0xff] }
 0x676   : > { %7795 = vmatpush2.bf16.msra.mxu1 %v9374_v57  ;;  %v4453_v57 = vld [vmem:[%s13389_s13 + $0x548] sm:$0xff] }
 0x677   : > { %7836 = vmatpush2.bf16.msra.mxu0 %v9376_v58  ;;  %7796 = vmatprep.subr.bf16.mxu1 %v9343_v62  ;;  %v4469_v58 = vld [vmem:[%s13389_s13 + $0x5c8] sm:$0xff] }
 0x678   : > { %7837 = vmatprep.subr.bf16.mxu0 %v9345_v0  ;;  %v9157_v9 = vcombine.high %v4453_v57, %v4469_v58 }
 0x67a   : > { %7797 = vmatpush2.bf16.msra.mxu1 %v9342_v6 }
 0x67b   : > { %7838 = vmatpush2.bf16.msra.mxu0 %v9344_v7  ;;  %7798 = vmatprep.subr.bf16.mxu1 %v9311_v18 }
 0x67c   : > { %7839 = vmatprep.subr.bf16.mxu0 %v9313_v8  ;;  %v9155_v8 = vcombine.high %v4452_v19, %v4468_v52  ;;  %v4341_v52 = vld [vmem:[%s13389_s13 + $0x1c8] sm:$0xff] }
 0x67e   : > { %7799 = vmatpush2.bf16.msra.mxu1 %v9310_v45  ;;  %v4436_v45 = vld [vmem:[%s13389_s13 + $0x4c0] sm:$0xff] }
 0x67f   : > { %7840 = vmatpush2.bf16.msra.mxu0 %v9312_v48  ;;  %7800 = vmatprep.subr.bf16.mxu1 %v9279_v10 }
 0x680   : > { %7841 = vmatprep.subr.bf16.mxu0 %v9281_v20  ;;  %v4421_v20 = vld [vmem:[%s13389_s13 + $0x448] sm:$0xff] }
 0x681   : > { %v9125_v32 = vcombine.high %v4421_v20, %v4437_v50 }
 0x682   : > { %7801 = vmatpush2.bf16.msra.mxu1 %v9278_v25 }
 0x683   : > { %7842 = vmatpush2.bf16.msra.mxu0 %v9280_v5  ;;  %7802 = vmatprep.subr.bf16.mxu1 %v9247_v42  ;;  %v9156_v42 = vcombine.low %v4453_v57, %v4469_v58  ;;  %v9060_v58 = vcombine.low %v4357_v30, %v4373_v16 }
 0x684   : > { %7843 = vmatprep.subr.bf16.mxu0 %v9249_v26  ;;  %v9123_v26 = vcombine.high %v4420_v46, %v4436_v45 }
 0x686   : > { %7803 = vmatpush2.bf16.msra.mxu1 %v9246_v63  ;;  %v4405_v63 = vld [vmem:[%s13389_s13 + $0x3c8] sm:$0xff] }
 0x687   : > { %7844 = vmatpush2.bf16.msra.mxu0 %v9248_v38  ;;  %7854 = vmatprep.subr.bf16.mxu1 %v9219_v39  ;;  %v9122_v39 = vcombine.low %v4420_v46, %v4436_v45  ;;  %v9093_v15 = vcombine.high %v4389_v2, %v4405_v63  ;;  %v4789_v46 = vld [vmem:[%s13389_s13 + $0xfc8] sm:$0xff] }
 0x688   : > { %7895 = vmatprep.subr.bf16.mxu0 %v9221_v61  ;;  %v9124_v61 = vcombine.low %v4421_v20, %v4437_v50  ;;  %v4740_v50 = vld [vmem:[%s13389_s13 + $0xe40] sm:$0xff] }
 0x689   : > { %7805 = vmatmul.mubr.bf16.vlgmr.msra.gmra.mxu1 %v11894_v27  ;;  %v7560_v62 = vpop.f32.mrf.mxu1  ;;  %v7601_v0 = vpop.f32.mrf.mxu0 }
 0x68a   : > { %7846 = vmatmul.mubr.bf16.vlgmr.msra.gmra.mxu0 %v11894_v27  ;;  %7855 = vmatpush1.bf16.msra.mxu1 %v9218_v21  ;;  %v7561_v6 = vadd.f32 %v7560_v62, %v7369_v29  ;;  %v7602_v55 = vadd.f32 %v7601_v0, %v7377_v56  ;;  %v4372_v21 = vld [vmem:[%s13389_s13 + $0x2c0] sm:$0xff]  ;;  %v9092_v29 = vcombine.low %v4389_v2, %v4405_v63  ;;  %v4725_v2 = vld [vmem:[%s13389_s13 + $0xdc8] sm:$0xff] }
 0x68b   : > { %7886 = vmatprep.mubr.bf16.mxu1 %v11892_v1  ;;  %7896 = vmatpush1.bf16.msra.mxu0 %v9220_v36  ;;  %v7562_v7 = vpop.f32.mrf.mxu1  ;;  %v7603_v18 = vpop.f32.mrf.mxu0  ;;  %v9090_v36 = vcombine.low %v4388_v33, %v4404_v37  ;;  %v9059_v19 = vcombine.high %v4356_v11, %v4372_v21  ;;  %v9061_v56 = vcombine.high %v4357_v30, %v4373_v16  ;;  %v4724_v33 = vld [vmem:[%s13389_s13 + $0xdc0] sm:$0xff]  ;;  %v4709_v37 = vld [vmem:[%s13389_s13 + $0xd48] sm:$0xff] }
 0x68c   : > { %7927 = vmatprep.mubr.bf16.mxu0 %v11892_v1  ;;  %v7563_v43 = vadd.f32 %v7562_v7, %v7373_v31  ;;  %v7604_v34 = vadd.f32 %v7603_v18, %v7381_v22  ;;  %7856 = vmatprep.subr.bf16.mxu1 %v9187_v51  ;;  %v4324_v31 = vld [vmem:[%s13389_s13 + $0x140] sm:$0xff]  ;;  %v4325_v51 = vld [vmem:[%s13389_s13 + $0x148] sm:$0xff]  ;;  %v9058_v57 = vcombine.low %v4356_v11, %v4372_v21 }
 0x68d   : > { %7897 = vmatprep.subr.bf16.mxu0 %v9189_v49  ;;  %v7564_v48 = vpop.f32.mrf.mxu1  ;;  %v7605_v10 = vpop.f32.mrf.mxu0  ;;  %v4340_v22 = vld [vmem:[%s13389_s13 + $0x1c0] sm:$0xff]  ;;  %v9029_v0 = vcombine.high %v4325_v51, %v4341_v52  ;;  %v9028_v18 = vcombine.low %v4325_v51, %v4341_v52  ;;  %v4677_v21 = vld [vmem:[%s13389_s13 + $0xc48] sm:$0xff] }
 0x68e   : > { %v8214_v47 = vcombine.low %v7561_v6, %v7563_v43  ;;  %v8215_v23 = vcombine.low %v7602_v55, %v7604_v34  ;;  %7857 = vmatpush1.bf16.msra.mxu1 %v9186_v54  ;;  %v9027_v62 = vcombine.high %v4324_v31, %v4340_v22  ;;  %v4292_v49 = vld [vmem:[%s13389_s13 + $0x40] sm:$0xff]  ;;  %v4309_v6 = vld [vmem:[%s13389_s13 + $0xc8] sm:$0xff]  ;;  %v9026_v7 = vcombine.low %v4324_v31, %v4340_v22 }
 0x68f   : > { %7898 = vmatpush1.bf16.msra.mxu0 %v9188_v4  ;;  %v7565_v25 = vpop.f32.mrf.mxu1  ;;  %v7606_v5 = vpop.f32.mrf.mxu0  ;;  %7858 = vmatprep.subr.bf16.mxu1 %v9155_v8  ;;  %v4308_v54 = vld [vmem:[%s13389_s13 + $0xc0] sm:$0xff]  ;;  %v4293_v4 = vld [vmem:[%s13389_s13 + $0x48] sm:$0xff] }
 0x690   : > { %v12531_v3 = vrot.slane %v8214_v47, %v12513_v53  ;;  %v12534_v28 = vrot.slane %v8215_v23, %v12513_v53  ;;  %7899 = vmatprep.subr.bf16.mxu0 %v9157_v9  ;;  %v8995_v8 = vcombine.high %v4292_v49, %v4308_v54  ;;  %v8997_v9 = vcombine.high %v4293_v4, %v4309_v6  ;;  %v4772_v55 = vld [vmem:[%s13389_s13 + $0xf40] sm:$0xff]  ;;  %v4773_v34 = vld [vmem:[%s13389_s13 + $0xf48] sm:$0xff] }
 0x691   : > { %v4788_v43 = vld [vmem:[%s13389_s13 + $0xfc0] sm:$0xff]  ;;  %v8994_v45 = vcombine.low %v4292_v49, %v4308_v54  ;;  %v8996_v48 = vcombine.low %v4293_v4, %v4309_v6  ;;  %v9477_v20 = vcombine.high %v4773_v34, %v4789_v46  ;;  %v4741_v23 = vld [vmem:[%s13389_s13 + $0xe48] sm:$0xff]  ;;  %v9476_v5 = vcombine.low %v4773_v34, %v4789_v46 }
 0x692   : > { %v8246_v38 = vcombine.low %v12531_v3, %v12534_v28  ;;  %7859 = vmatpush1.bf16.msra.mxu1 %v9154_v41  ;;  %v9475_v10 = vcombine.high %v4772_v55, %v4788_v43  ;;  %v4756_v47 = vld [vmem:[%s13389_s13 + $0xec0] sm:$0xff]  ;;  %v4757_v41 = vld [vmem:[%s13389_s13 + $0xec8] sm:$0xff]  ;;  %v9474_v25 = vcombine.low %v4772_v55, %v4788_v43  ;;  %v4359_v3 = vld [vmem:[%s13389_s13 + $0x258] sm:$0xff] }
 0x693   : > { %7900 = vmatpush1.bf16.msra.mxu0 %v9156_v42  ;;  %7860 = vmatprep.subr.bf16.mxu1 %v9123_v26  ;;  %v9443_v42 = vcombine.high %v4740_v50, %v4756_v47  ;;  %v9445_v26 = vcombine.high %v4741_v23, %v4757_v41  ;;  %v9442_v63 = vcombine.low %v4740_v50, %v4756_v47  ;;  %v4692_v11 = vld [vmem:[%s13389_s13 + $0xcc0] sm:$0xff]  ;;  %v4693_v30 = vld [vmem:[%s13389_s13 + $0xcc8] sm:$0xff]  ;;  %v4375_v28 = vld [vmem:[%s13389_s13 + $0x2d8] sm:$0xff] }
 0x694   : > { %7901 = vmatprep.subr.bf16.mxu0 %v9125_v32  ;;  %v4708_v32 = vld [vmem:[%s13389_s13 + $0xd40] sm:$0xff]  ;;  %v4645_v22 = vld [vmem:[%s13389_s13 + $0xb48] sm:$0xff] }
 0x695   : > { %v9410_v16 = vcombine.low %v4708_v32, %v4724_v33  ;;  %v4660_v31 = vld [vmem:[%s13389_s13 + $0xbc0] sm:$0xff]  ;;  %v4661_v51 = vld [vmem:[%s13389_s13 + $0xbc8] sm:$0xff] }
 0x696   : > { %7861 = vmatpush1.bf16.msra.mxu1 %v9122_v39  ;;  %v9444_v39 = vcombine.low %v4741_v23, %v4757_v41  ;;  %v4628_v49 = vld [vmem:[%s13389_s13 + $0xac0] sm:$0xff]  ;;  %v4613_v54 = vld [vmem:[%s13389_s13 + $0xa48] sm:$0xff] }
 0x697   : > { %7902 = vmatpush1.bf16.msra.mxu0 %v9124_v61  ;;  %7862 = vmatprep.subr.bf16.mxu1 %v9091_v14  ;;  %v9411_v61 = vcombine.high %v4708_v32, %v4724_v33  ;;  %v9413_v14 = vcombine.high %v4709_v37, %v4725_v2  ;;  %v4629_v4 = vld [vmem:[%s13389_s13 + $0xac8] sm:$0xff]  ;;  %v4596_v55 = vld [vmem:[%s13389_s13 + $0x9c0] sm:$0xff]  ;;  %v4534_v32 = vld [vmem:[%s13389_s13 + $0x7d0] sm:$0xff] }
 0x698   : > { %7903 = vmatprep.subr.bf16.mxu0 %v9093_v15  ;;  %v4676_v15 = vld [vmem:[%s13389_s13 + $0xc40] sm:$0xff]  ;;  %v4581_v43 = vld [vmem:[%s13389_s13 + $0x948] sm:$0xff]  ;;  %v4519_v33 = vld [vmem:[%s13389_s13 + $0x758] sm:$0xff] }
 0x699   : > { %v9378_v52 = vcombine.low %v4676_v15, %v4692_v11  ;;  %v4597_v34 = vld [vmem:[%s13389_s13 + $0x9c8] sm:$0xff]  ;;  %v4564_v50 = vld [vmem:[%s13389_s13 + $0x8c0] sm:$0xff] }
 0x69a   : > { %7863 = vmatpush1.bf16.msra.mxu1 %v9090_v36  ;;  %v9412_v36 = vcombine.low %v4709_v37, %v4725_v2  ;;  %v4549_v47 = vld [vmem:[%s13389_s13 + $0x848] sm:$0xff]  ;;  %v4535_v37 = vld [vmem:[%s13389_s13 + $0x7d8] sm:$0xff] }
 0x69b   : > { %7904 = vmatpush1.bf16.msra.mxu0 %v9092_v29  ;;  %7864 = vmatprep.subr.bf16.mxu1 %v9059_v19  ;;  %v9379_v29 = vcombine.high %v4676_v15, %v4692_v11  ;;  %v9381_v19 = vcombine.high %v4677_v21, %v4693_v30  ;;  %v4565_v23 = vld [vmem:[%s13389_s13 + $0x8c8] sm:$0xff]  ;;  %v4502_v15 = vld [vmem:[%s13389_s13 + $0x6d0] sm:$0xff] }
 0x69c   : > { %7905 = vmatprep.subr.bf16.mxu0 %v9061_v56  ;;  %v4644_v56 = vld [vmem:[%s13389_s13 + $0xb40] sm:$0xff] }
 0x69d   : > { %v9346_v6 = vcombine.low %v4644_v56, %v4660_v31 }
 0x69e   : > { %7865 = vmatpush1.bf16.msra.mxu1 %v9058_v57  ;;  %v9380_v57 = vcombine.low %v4677_v21, %v4693_v30  ;;  %v4487_v21 = vld [vmem:[%s13389_s13 + $0x658] sm:$0xff] }
 0x69f   : > { %7906 = vmatpush1.bf16.msra.mxu0 %v9060_v58  ;;  %7866 = vmatprep.subr.bf16.mxu1 %v9027_v62  ;;  %v9347_v58 = vcombine.high %v4644_v56, %v4660_v31  ;;  %v9349_v62 = vcombine.high %v4645_v22, %v4661_v51  ;;  %v4503_v30 = vld [vmem:[%s13389_s13 + $0x6d8] sm:$0xff]  ;;  %v7389_v56 = vrot.slane %v12477_v40, %v10874_v60 }
 0x6a0   : > { %7907 = vmatprep.subr.bf16.mxu0 %v9029_v0  ;;  %v4612_v0 = vld [vmem:[%s13389_s13 + $0xa40] sm:$0xff]  ;;  %v7397_v31 = vrot.slane %v12477_v40, %v10878_v24 }
 0x6a1   : > { %v9314_v46 = vcombine.low %v4612_v0, %v4628_v49 }
 0x6a2   : > { %7867 = vmatpush1.bf16.msra.mxu1 %v9026_v7  ;;  %v9348_v7 = vcombine.low %v4645_v22, %v4661_v51  ;;  %v4470_v51 = vld [vmem:[%s13389_s13 + $0x5d0] sm:$0xff] }
 0x6a3   : > { %7908 = vmatpush1.bf16.msra.mxu0 %v9028_v18  ;;  %7868 = vmatprep.subr.bf16.mxu1 %v8995_v8  ;;  %v9315_v18 = vcombine.high %v4612_v0, %v4628_v49  ;;  %v9317_v8 = vcombine.high %v4613_v54, %v4629_v4  ;;  %v9193_v0 = vcombine.high %v4487_v21, %v4503_v30 }
 0x6a4   : > { %7909 = vmatprep.subr.bf16.mxu0 %v8997_v9  ;;  %v4580_v9 = vld [vmem:[%s13389_s13 + $0x940] sm:$0xff]  ;;  %v9192_v49 = vcombine.low %v4487_v21, %v4503_v30 }
 0x6a5   : > { %v9282_v41 = vcombine.low %v4580_v9, %v4596_v55 }
 0x6a6   : > { %7869 = vmatpush1.bf16.msra.mxu1 %v8994_v45  ;;  %v9316_v45 = vcombine.low %v4613_v54, %v4629_v4 }
 0x6a7   : > { %7910 = vmatpush1.bf16.msra.mxu0 %v8996_v48  ;;  %7870 = vmatprep.subr.bf16.mxu1 %v9475_v10  ;;  %v9283_v48 = vcombine.high %v4580_v9, %v4596_v55  ;;  %v9285_v10 = vcombine.high %v4581_v43, %v4597_v34 }
 0x6a8   : > { %7911 = vmatprep.subr.bf16.mxu0 %v9477_v20  ;;  %v4548_v20 = vld [vmem:[%s13389_s13 + $0x840] sm:$0xff] }
 0x6a9   : > { %v9250_v2 = vcombine.low %v4548_v20, %v4564_v50 }
 0x6aa   : > { %7871 = vmatpush2.bf16.msra.mxu1 %v9474_v25  ;;  %v9284_v25 = vcombine.low %v4581_v43, %v4597_v34  ;;  %v4422_v43 = vld [vmem:[%s13389_s13 + $0x450] sm:$0xff] }
 0x6ab   : > { %7912 = vmatpush2.bf16.msra.mxu0 %v9476_v5  ;;  %7872 = vmatprep.subr.bf16.mxu1 %v9443_v42  ;;  %v9251_v5 = vcombine.high %v4548_v20, %v4564_v50  ;;  %v9253_v42 = vcombine.high %v4549_v47, %v4565_v23  ;;  %v4438_v34 = vld [vmem:[%s13389_s13 + $0x4d0] sm:$0xff] }
 0x6ac   : > { %7913 = vmatprep.subr.bf16.mxu0 %v9445_v26  ;;  %v4518_v26 = vld [vmem:[%s13389_s13 + $0x750] sm:$0xff] }
 0x6ad   : > { %v9222_v11 = vcombine.low %v4518_v26, %v4534_v32 }
 0x6ae   : > { %7873 = vmatpush2.bf16.msra.mxu1 %v9442_v63  ;;  %v9252_v63 = vcombine.low %v4549_v47, %v4565_v23 }
 0x6af   : > { %7914 = vmatpush2.bf16.msra.mxu0 %v9444_v39  ;;  %7874 = vmatprep.subr.bf16.mxu1 %v9411_v61  ;;  %v9223_v39 = vcombine.high %v4518_v26, %v4534_v32  ;;  %v9225_v61 = vcombine.high %v4519_v33, %v4535_v37 }
 0x6b0   : > { %7915 = vmatprep.subr.bf16.mxu0 %v9413_v14  ;;  %v4486_v14 = vld [vmem:[%s13389_s13 + $0x650] sm:$0xff] }
 0x6b1   : > { %v9191_v22 = vcombine.high %v4486_v14, %v4502_v15 }
 0x6b2   : > { %7875 = vmatpush2.bf16.msra.mxu1 %v9410_v16  ;;  %v7385_v16 = vrot.slane %v12477_v40, %v10991_v17 }
 0x6b3   : > { %7916 = vmatpush2.bf16.msra.mxu0 %v9412_v36  ;;  %7876 = vmatprep.subr.bf16.mxu1 %v9379_v29  ;;  %v9224_v36 = vcombine.low %v4519_v33, %v4535_v37  ;;  %v4454_v29 = vld [vmem:[%s13389_s13 + $0x550] sm:$0xff] }
 0x6b4   : > { %7917 = vmatprep.subr.bf16.mxu0 %v9381_v19  ;;  %v7393_v19 = vrot.slane %v12477_v40, %v10994_v35  ;;  %v9190_v40 = vcombine.low %v4486_v14, %v4502_v15  ;;  %v9158_v47 = vcombine.low %v4454_v29, %v4470_v51  ;;  %v4390_v33 = vld [vmem:[%s13389_s13 + $0x350] sm:$0xff] }
 0x6b5   : > { %v4406_v37 = vld [vmem:[%s13389_s13 + $0x3d0] sm:$0xff] }
 0x6b6   : > { %7877 = vmatpush2.bf16.msra.mxu1 %v9378_v52  ;;  %v4455_v52 = vld [vmem:[%s13389_s13 + $0x558] sm:$0xff]  ;;  %v9095_v15 = vcombine.high %v4390_v33, %v4406_v37 }
 0x6b7   : > { %7918 = vmatpush2.bf16.msra.mxu0 %v9380_v57  ;;  %7878 = vmatprep.subr.bf16.mxu1 %v9347_v58  ;;  %v4471_v57 = vld [vmem:[%s13389_s13 + $0x5d8] sm:$0xff] }
 0x6b8   : > { %7919 = vmatprep.subr.bf16.mxu0 %v9349_v62 }
 0x6ba   : > { %7879 = vmatpush2.bf16.msra.mxu1 %v9346_v6 }
 0x6bb   : > { %7920 = vmatpush2.bf16.msra.mxu0 %v9348_v7  ;;  %7880 = vmatprep.subr.bf16.mxu1 %v9315_v18  ;;  %v9159_v7 = vcombine.high %v4454_v29, %v4470_v51  ;;  %v9161_v18 = vcombine.high %v4455_v52, %v4471_v57  ;;  %v9094_v29 = vcombine.low %v4390_v33, %v4406_v37  ;;  %v4342_v51 = vld [vmem:[%s13389_s13 + $0x1d0] sm:$0xff]  ;;  %v4711_v37 = vld [vmem:[%s13389_s13 + $0xd58] sm:$0xff] }
 0x6bc   : > { %7921 = vmatprep.subr.bf16.mxu0 %v9317_v8  ;;  %v4726_v33 = vld [vmem:[%s13389_s13 + $0xdd0] sm:$0xff] }
 0x6be   : > { %7881 = vmatpush2.bf16.msra.mxu1 %v9314_v46 }
 0x6bf   : > { %7922 = vmatpush2.bf16.msra.mxu0 %v9316_v45  ;;  %7882 = vmatprep.subr.bf16.mxu1 %v9283_v48  ;;  %v4423_v48 = vld [vmem:[%s13389_s13 + $0x458] sm:$0xff] }
 0x6c0   : > { %7923 = vmatprep.subr.bf16.mxu0 %v9285_v10  ;;  %v4439_v10 = vld [vmem:[%s13389_s13 + $0x4d8] sm:$0xff] }
 0x6c1   : > { %v9129_v32 = vcombine.high %v4423_v48, %v4439_v10  ;;  %v9128_v14 = vcombine.low %v4423_v48, %v4439_v10 }
 0x6c2   : > { %7883 = vmatpush2.bf16.msra.mxu1 %v9282_v41 }
 0x6c3   : > { %7924 = vmatpush2.bf16.msra.mxu0 %v9284_v25  ;;  %7884 = vmatprep.subr.bf16.mxu1 %v9251_v5  ;;  %v9160_v25 = vcombine.low %v4455_v52, %v4471_v57  ;;  %v9127_v5 = vcombine.high %v4422_v43, %v4438_v34  ;;  %v4327_v52 = vld [vmem:[%s13389_s13 + $0x158] sm:$0xff] }
 0x6c4   : > { %7925 = vmatprep.subr.bf16.mxu0 %v9253_v42  ;;  %v4343_v57 = vld [vmem:[%s13389_s13 + $0x1d8] sm:$0xff] }
 0x6c6   : > { %7885 = vmatpush2.bf16.msra.mxu1 %v9250_v2  ;;  %v4391_v2 = vld [vmem:[%s13389_s13 + $0x358] sm:$0xff] }
 0x6c7   : > { %7926 = vmatpush2.bf16.msra.mxu0 %v9252_v63  ;;  %7936 = vmatprep.subr.bf16.mxu1 %v9223_v39  ;;  %v4407_v63 = vld [vmem:[%s13389_s13 + $0x3d8] sm:$0xff] }
 0x6c8   : > { %7977 = vmatprep.subr.bf16.mxu0 %v9225_v61  ;;  %v9126_v61 = vcombine.low %v4422_v43, %v4438_v34  ;;  %v9097_v30 = vcombine.high %v4391_v2, %v4407_v63  ;;  %v4790_v43 = vld [vmem:[%s13389_s13 + $0xfd0] sm:$0xff]  ;;  %v4775_v34 = vld [vmem:[%s13389_s13 + $0xf58] sm:$0xff] }
 0x6c9   : > { %v7642_v58 = vpop.f32.mrf.mxu1  ;;  %v7683_v62 = vpop.f32.mrf.mxu0  ;;  %7887 = vmatmul.mubr.bf16.vlgmr.msra.gmra.mxu1 %v11894_v27 }
 0x6ca   : > { %7928 = vmatmul.mubr.bf16.vlgmr.msra.gmra.mxu0 %v11894_v27  ;;  %7937 = vmatpush1.bf16.msra.mxu1 %v9222_v11  ;;  %v7643_v54 = vadd.f32 %v7642_v58, %v7385_v16  ;;  %v7684_v8 = vadd.f32 %v7683_v62, %v7393_v19  ;;  %v8254_v11 = vrot.slane %v8246_v38, %v12513_v53  ;;  %v4358_v16 = vld [vmem:[%s13389_s13 + $0x250] sm:$0xff] }
 0x6cb   : > { %7968 = vmatprep.mubr.bf16.mxu1 %v11892_v1  ;;  %7978 = vmatpush1.bf16.msra.mxu0 %v9224_v36  ;;  %v7644_v4 = vpop.f32.mrf.mxu1  ;;  %v7685_v6 = vpop.f32.mrf.mxu0  ;;  %v4374_v36 = vld [vmem:[%s13389_s13 + $0x2d0] sm:$0xff]  ;;  %v9096_v19 = vcombine.low %v4391_v2, %v4407_v63  ;;  %v9064_v62 = vcombine.low %v4359_v3, %v4375_v28  ;;  %v4727_v2 = vld [vmem:[%s13389_s13 + $0xdd8] sm:$0xff] }
 0x6cc   : > { %8009 = vmatprep.mubr.bf16.mxu0 %v11892_v1  ;;  %v7645_v9 = vadd.f32 %v7644_v4, %v7389_v56  ;;  %v7686_v55 = vadd.f32 %v7685_v6, %v7397_v31  ;;  %7938 = vmatprep.subr.bf16.mxu1 %v9191_v22  ;;  %v9063_v56 = vcombine.high %v4358_v16, %v4374_v36  ;;  %v4326_v22 = vld [vmem:[%s13389_s13 + $0x150] sm:$0xff]  ;;  %v4295_v4 = vld [vmem:[%s13389_s13 + $0x58] sm:$0xff] }
 0x6cd   : > { %v7646_v46 = vpop.f32.mrf.mxu1  ;;  %v7687_v45 = vpop.f32.mrf.mxu0  ;;  %7979 = vmatprep.subr.bf16.mxu0 %v9193_v0  ;;  %v9065_v31 = vcombine.high %v4359_v3, %v4375_v28  ;;  %v9062_v58 = vcombine.low %v4358_v16, %v4374_v36  ;;  %v9031_v0 = vcombine.high %v4326_v22, %v4342_v51  ;;  %v4311_v6 = vld [vmem:[%s13389_s13 + $0xd8] sm:$0xff]  ;;  %v9416_v36 = vcombine.low %v4711_v37, %v4727_v2 }
 0x6ce   : > { %v8216_v20 = vcombine.low %v7643_v54, %v7645_v9  ;;  %v8217_v50 = vcombine.low %v7684_v8, %v7686_v55  ;;  %7939 = vmatpush1.bf16.msra.mxu1 %v9190_v40  ;;  %v9033_v40 = vcombine.high %v4327_v52, %v4343_v57  ;;  %v4310_v54 = vld [vmem:[%s13389_s13 + $0xd0] sm:$0xff]  ;;  %v9001_v9 = vcombine.high %v4295_v4, %v4311_v6  ;;  %v4791_v46 = vld [vmem:[%s13389_s13 + $0xfd8] sm:$0xff] }
 0x6cf   : > { %7980 = vmatpush1.bf16.msra.mxu0 %v9192_v49  ;;  %v7647_v23 = vpop.f32.mrf.mxu1  ;;  %v7688_v41 = vpop.f32.mrf.mxu0  ;;  %7940 = vmatprep.subr.bf16.mxu1 %v9159_v7  ;;  %v4294_v49 = vld [vmem:[%s13389_s13 + $0x50] sm:$0xff]  ;;  %v9030_v7 = vcombine.low %v4326_v22, %v4342_v51  ;;  %v9000_v48 = vcombine.low %v4295_v4, %v4311_v6 }
 0x6d0   : > { %v8238_v42 = vrot.slane %v8216_v20, %v12513_v53  ;;  %v8245_v26 = vrot.slane %v8217_v50, %v12513_v53  ;;  %7981 = vmatprep.subr.bf16.mxu0 %v9161_v18  ;;  %v9032_v18 = vcombine.low %v4327_v52, %v4343_v57  ;;  %v8999_v8 = vcombine.high %v4294_v49, %v4310_v54  ;;  %v4774_v55 = vld [vmem:[%s13389_s13 + $0xf50] sm:$0xff]  ;;  %v4743_v23 = vld [vmem:[%s13389_s13 + $0xe58] sm:$0xff] }
 0x6d1   : > { %v8998_v45 = vcombine.low %v4294_v49, %v4310_v54  ;;  %v9479_v10 = vcombine.high %v4774_v55, %v4790_v43  ;;  %v9481_v20 = vcombine.high %v4775_v34, %v4791_v46  ;;  %v4742_v50 = vld [vmem:[%s13389_s13 + $0xe50] sm:$0xff]  ;;  %v4759_v41 = vld [vmem:[%s13389_s13 + $0xed8] sm:$0xff] }
 0x6d2   : > { %v8247_v39 = vcombine.low %v8238_v42, %v8245_v26  ;;  %7941 = vmatpush1.bf16.msra.mxu1 %v9158_v47  ;;  %v4758_v47 = vld [vmem:[%s13389_s13 + $0xed0] sm:$0xff]  ;;  %v9449_v26 = vcombine.high %v4743_v23, %v4759_v41 }
 0x6d3   : > { %7982 = vmatpush1.bf16.msra.mxu0 %v9160_v25  ;;  %7942 = vmatprep.subr.bf16.mxu1 %v9127_v5  ;;  %v9478_v25 = vcombine.low %v4774_v55, %v4790_v43  ;;  %v9480_v5 = vcombine.low %v4775_v34, %v4791_v46  ;;  %v9447_v42 = vcombine.high %v4742_v50, %v4758_v47  ;;  %v4614_v57 = vld [vmem:[%s13389_s13 + $0xa50] sm:$0xff] }
 0x6d4   : > { %v8261_v21 = vrot.slane %v8247_v39, %v12513_v53  ;;  %7983 = vmatprep.subr.bf16.mxu0 %v9129_v32  ;;  %v4710_v32 = vld [vmem:[%s13389_s13 + $0xd50] sm:$0xff]  ;;  %v9446_v63 = vcombine.low %v4742_v50, %v4758_v47  ;;  %v9448_v39 = vcombine.low %v4743_v23, %v4759_v41  ;;  %v4520_v41 = vld [vmem:[%s13389_s13 + $0x760] sm:$0xff] }
 0x6d5   : > { %v9414_v16 = vcombine.low %v4710_v32, %v4726_v33  ;;  %v4582_v6 = vld [vmem:[%s13389_s13 + $0x950] sm:$0xff] }
 0x6d6   : > { %v8262_v38 = vcombine.low %v8254_v11, %v8261_v21  ;;  %7943 = vmatpush1.bf16.msra.mxu1 %v9126_v61  ;;  %v9415_v61 = vcombine.high %v4710_v32, %v4726_v33  ;;  %v4694_v11 = vld [vmem:[%s13389_s13 + $0xcd0] sm:$0xff]  ;;  %v4679_v21 = vld [vmem:[%s13389_s13 + $0xc58] sm:$0xff] }
 0x6d7   : > { %7984 = vmatpush1.bf16.msra.mxu0 %v9128_v14  ;;  %7944 = vmatprep.subr.bf16.mxu1 %v9095_v15  ;;  %v9417_v14 = vcombine.high %v4711_v37, %v4727_v2  ;;  %v4678_v15 = vld [vmem:[%s13389_s13 + $0xc50] sm:$0xff]  ;;  %v12915_v2 = vld [vmem:[%s13390_s14 + $0x8] sm:$0xff] }
 0x6d8   : > { %8414 = vst [vmem:[%s12771_s21] sm:$0xff] %v8262_v38  ;;  %7985 = vmatprep.subr.bf16.mxu0 %v9097_v30  ;;  %v4695_v30 = vld [vmem:[%s13389_s13 + $0xcd8] sm:$0xff]  ;;  %v9383_v3 = vcombine.high %v4678_v15, %v4694_v11  ;;  %v4646_v38 = vld [vmem:[%s13389_s13 + $0xb50] sm:$0xff] }
 0x6d9   : > { %v9385_v28 = vcombine.high %v4679_v21, %v4695_v30  ;;  %v9384_v22 = vcombine.low %v4679_v21, %v4695_v30  ;;  %v4550_v46 = vld [vmem:[%s13389_s13 + $0x850] sm:$0xff]  ;;  %v7401_v21 = vrot.slane %v12915_v2, %v10738_v44  ;;  %v7405_v30 = vrot.slane %v12915_v2, %v10761_v12 }
 0x6da   : > { %7945 = vmatpush1.bf16.msra.mxu1 %v9094_v29  ;;  %v4662_v29 = vld [vmem:[%s13389_s13 + $0xbd0] sm:$0xff] }
 0x6db   : > { %7986 = vmatpush1.bf16.msra.mxu0 %v9096_v19  ;;  %7946 = vmatprep.subr.bf16.mxu1 %v9063_v56  ;;  %v4647_v19 = vld [vmem:[%s13389_s13 + $0xb58] sm:$0xff]  ;;  %v9351_v51 = vcombine.high %v4646_v38, %v4662_v29 }
 0x6dc   : > { %7987 = vmatprep.subr.bf16.mxu0 %v9065_v31  ;;  %v4663_v56 = vld [vmem:[%s13389_s13 + $0xbd8] sm:$0xff]  ;;  %v9382_v31 = vcombine.low %v4678_v15, %v4694_v11  ;;  %v4505_v15 = vld [vmem:[%s13389_s13 + $0x6e8] sm:$0xff] }
 0x6dd   : > { %v9353_v52 = vcombine.high %v4647_v19, %v4663_v56  ;;  %v9352_v49 = vcombine.low %v4647_v19, %v4663_v56  ;;  %v4457_v56 = vld [vmem:[%s13389_s13 + $0x568] sm:$0xff] }
 0x6de   : > { %7947 = vmatpush1.bf16.msra.mxu1 %v9062_v58  ;;  %v4630_v58 = vld [vmem:[%s13389_s13 + $0xad0] sm:$0xff] }
 0x6df   : > { %7988 = vmatpush1.bf16.msra.mxu0 %v9064_v62  ;;  %7948 = vmatprep.subr.bf16.mxu1 %v9031_v0  ;;  %v4615_v62 = vld [vmem:[%s13389_s13 + $0xa58] sm:$0xff]  ;;  %v9319_v54 = vcombine.high %v4614_v57, %v4630_v58 }
 0x6e0   : > { %7989 = vmatprep.subr.bf16.mxu0 %v9033_v40  ;;  %v4631_v0 = vld [vmem:[%s13389_s13 + $0xad8] sm:$0xff]  ;;  %v9350_v40 = vcombine.low %v4646_v38, %v4662_v29  ;;  %v7409_v38 = vrot.slane %v12915_v2, %v10741_v59  ;;  %v7413_v29 = vrot.slane %v12915_v2, %v10764_v13 }
 0x6e1   : > { %v9321_v4 = vcombine.high %v4615_v62, %v4631_v0  ;;  %v9320_v55 = vcombine.low %v4615_v62, %v4631_v0 }
 0x6e2   : > { %7949 = vmatpush1.bf16.msra.mxu1 %v9030_v7  ;;  %v4598_v7 = vld [vmem:[%s13389_s13 + $0x9d0] sm:$0xff] }
 0x6e3   : > { %7990 = vmatpush1.bf16.msra.mxu0 %v9032_v18  ;;  %7950 = vmatprep.subr.bf16.mxu1 %v8999_v8  ;;  %v4583_v18 = vld [vmem:[%s13389_s13 + $0x958] sm:$0xff]  ;;  %v9287_v43 = vcombine.high %v4582_v6, %v4598_v7 }
 0x6e4   : > { %7991 = vmatprep.subr.bf16.mxu0 %v9001_v9  ;;  %v4599_v8 = vld [vmem:[%s13389_s13 + $0x9d8] sm:$0xff]  ;;  %v9318_v9 = vcombine.low %v4614_v57, %v4630_v58 }
 0x6e5   : > { %v9289_v34 = vcombine.high %v4583_v18, %v4599_v8  ;;  %v9288_v50 = vcombine.low %v4583_v18, %v4599_v8  ;;  %v4425_v8 = vld [vmem:[%s13389_s13 + $0x468] sm:$0xff] }
 0x6e6   : > { %7951 = vmatpush1.bf16.msra.mxu1 %v8998_v45  ;;  %v4566_v45 = vld [vmem:[%s13389_s13 + $0x8d0] sm:$0xff] }
 0x6e7   : > { %7992 = vmatpush1.bf16.msra.mxu0 %v9000_v48  ;;  %7952 = vmatprep.subr.bf16.mxu1 %v9479_v10  ;;  %v4551_v48 = vld [vmem:[%s13389_s13 + $0x858] sm:$0xff]  ;;  %v9255_v47 = vcombine.high %v4550_v46, %v4566_v45 }
 0x6e8   : > { %7993 = vmatprep.subr.bf16.mxu0 %v9481_v20  ;;  %v4567_v10 = vld [vmem:[%s13389_s13 + $0x8d8] sm:$0xff]  ;;  %v9286_v20 = vcombine.low %v4582_v6, %v4598_v7 }
 0x6e9   : > { %v9257_v23 = vcombine.high %v4551_v48, %v4567_v10  ;;  %v9256_v32 = vcombine.low %v4551_v48, %v4567_v10 }
 0x6ea   : > { %7953 = vmatpush2.bf16.msra.mxu1 %v9478_v25  ;;  %v4536_v25 = vld [vmem:[%s13389_s13 + $0x7e0] sm:$0xff] }
 0x6eb   : > { %7994 = vmatpush2.bf16.msra.mxu0 %v9480_v5  ;;  %7954 = vmatprep.subr.bf16.mxu1 %v9447_v42  ;;  %v4521_v5 = vld [vmem:[%s13389_s13 + $0x768] sm:$0xff]  ;;  %v9227_v33 = vcombine.high %v4520_v41, %v4536_v25 }
 0x6ec   : > { %7995 = vmatprep.subr.bf16.mxu0 %v9449_v26  ;;  %v4537_v42 = vld [vmem:[%s13389_s13 + $0x7e8] sm:$0xff]  ;;  %v9254_v26 = vcombine.low %v4550_v46, %v4566_v45 }
 0x6ed   : > { %v9229_v37 = vcombine.high %v4521_v5, %v4537_v42  ;;  %v9228_v11 = vcombine.low %v4521_v5, %v4537_v42  ;;  %v4393_v5 = vld [vmem:[%s13389_s13 + $0x368] sm:$0xff] }
 0x6ee   : > { %7955 = vmatpush2.bf16.msra.mxu1 %v9446_v63  ;;  %v4488_v63 = vld [vmem:[%s13389_s13 + $0x660] sm:$0xff]  ;;  %v4409_v42 = vld [vmem:[%s13389_s13 + $0x3e8] sm:$0xff] }
 0x6ef   : > { %7996 = vmatpush2.bf16.msra.mxu0 %v9448_v39  ;;  %7956 = vmatprep.subr.bf16.mxu1 %v9415_v61  ;;  %v4504_v39 = vld [vmem:[%s13389_s13 + $0x6e0] sm:$0xff]  ;;  %v9226_v61 = vcombine.low %v4520_v41, %v4536_v25 }
 0x6f0   : > { %7997 = vmatprep.subr.bf16.mxu0 %v9417_v14  ;;  %v4489_v14 = vld [vmem:[%s13389_s13 + $0x668] sm:$0xff]  ;;  %v4408_v41 = vld [vmem:[%s13389_s13 + $0x3e0] sm:$0xff] }
 0x6f1   : > { %v9197_v19 = vcombine.high %v4489_v14, %v4505_v15  ;;  %v9196_v57 = vcombine.low %v4489_v14, %v4505_v15  ;;  %v4361_v14 = vld [vmem:[%s13389_s13 + $0x268] sm:$0xff] }
 0x6f2   : > { %7957 = vmatpush2.bf16.msra.mxu1 %v9414_v16  ;;  %v9195_v16 = vcombine.high %v4488_v63, %v4504_v39  ;;  %v4377_v15 = vld [vmem:[%s13389_s13 + $0x2e8] sm:$0xff] }
 0x6f3   : > { %7998 = vmatpush2.bf16.msra.mxu0 %v9416_v36  ;;  %7958 = vmatprep.subr.bf16.mxu1 %v9383_v3  ;;  %v4456_v36 = vld [vmem:[%s13389_s13 + $0x560] sm:$0xff] }
 0x6f4   : > { %7999 = vmatprep.subr.bf16.mxu0 %v9385_v28  ;;  %v4472_v3 = vld [vmem:[%s13389_s13 + $0x5e0] sm:$0xff] }
 0x6f5   : > { %v9163_v58 = vcombine.high %v4456_v36, %v4472_v3 }
 0x6f6   : > { %7959 = vmatpush2.bf16.msra.mxu1 %v9382_v31  ;;  %v4473_v31 = vld [vmem:[%s13389_s13 + $0x5e8] sm:$0xff] }
 0x6f7   : > { %8000 = vmatpush2.bf16.msra.mxu0 %v9384_v22  ;;  %7960 = vmatprep.subr.bf16.mxu1 %v9351_v51  ;;  %v9194_v51 = vcombine.low %v4488_v63, %v4504_v39  ;;  %v9164_v48 = vcombine.low %v4457_v56, %v4473_v31  ;;  %v9101_v63 = vcombine.high %v4393_v5, %v4409_v42  ;;  %v4360_v39 = vld [vmem:[%s13389_s13 + $0x260] sm:$0xff] }
 0x6f8   : > { %8001 = vmatprep.subr.bf16.mxu0 %v9353_v52 }
 0x6fa   : > { %7961 = vmatpush2.bf16.msra.mxu1 %v9350_v40 }
 0x6fb   : > { %8002 = vmatpush2.bf16.msra.mxu0 %v9352_v49  ;;  %7962 = vmatprep.subr.bf16.mxu1 %v9319_v54  ;;  %v9165_v49 = vcombine.high %v4457_v56, %v4473_v31  ;;  %v4424_v54 = vld [vmem:[%s13389_s13 + $0x460] sm:$0xff] }
 0x6fc   : > { %8003 = vmatprep.subr.bf16.mxu0 %v9321_v4  ;;  %v4440_v4 = vld [vmem:[%s13389_s13 + $0x4e0] sm:$0xff] }
 0x6fd   : > { %v9131_v10 = vcombine.high %v4424_v54, %v4440_v4 }
 0x6fe   : > { %7963 = vmatpush2.bf16.msra.mxu1 %v9318_v9  ;;  %v4441_v9 = vld [vmem:[%s13389_s13 + $0x4e8] sm:$0xff] }
 0x6ff   : > { %8004 = vmatpush2.bf16.msra.mxu0 %v9320_v55  ;;  %7964 = vmatprep.subr.bf16.mxu1 %v9287_v43 }
 0x700   : > { %8005 = vmatprep.subr.bf16.mxu0 %v9289_v34  ;;  %v9162_v34 = vcombine.low %v4456_v36, %v4472_v3  ;;  %v4328_v36 = vld [vmem:[%s13389_s13 + $0x160] sm:$0xff] }
 0x701   : > { %v4344_v3 = vld [vmem:[%s13389_s13 + $0x1e0] sm:$0xff] }
 0x702   : > { %7965 = vmatpush2.bf16.msra.mxu1 %v9286_v20  ;;  %v9035_v56 = vcombine.high %v4328_v36, %v4344_v3 }
 0x703   : > { %8006 = vmatpush2.bf16.msra.mxu0 %v9288_v50  ;;  %7966 = vmatprep.subr.bf16.mxu1 %v9255_v47  ;;  %v9133_v47 = vcombine.high %v4425_v8, %v4441_v9 }
 0x704   : > { %8007 = vmatprep.subr.bf16.mxu0 %v9257_v23  ;;  %v4392_v23 = vld [vmem:[%s13389_s13 + $0x360] sm:$0xff] }
 0x706   : > { %7967 = vmatpush2.bf16.msra.mxu1 %v9254_v26  ;;  %v9130_v26 = vcombine.low %v4424_v54, %v4440_v4  ;;  %v4792_v54 = vld [vmem:[%s13389_s13 + $0xfe0] sm:$0xff]  ;;  %v4777_v4 = vld [vmem:[%s13389_s13 + $0xf68] sm:$0xff] }
 0x707   : > { %8008 = vmatpush2.bf16.msra.mxu0 %v9256_v32  ;;  %8018 = vmatprep.subr.bf16.mxu1 %v9227_v33  ;;  %v9132_v33 = vcombine.low %v4425_v8, %v4441_v9 }
 0x708   : > { %8059 = vmatprep.subr.bf16.mxu0 %v9229_v37  ;;  %v9099_v37 = vcombine.high %v4392_v23, %v4408_v41 }
 0x709   : > { %v7724_v28 = vpop.f32.mrf.mxu1  ;;  %7969 = vmatmul.mubr.bf16.vlgmr.msra.gmra.mxu1 %v11894_v27 }
 0x70a   : > { %v7765_v22 = vpop.f32.mrf.mxu0  ;;  %8010 = vmatmul.mubr.bf16.vlgmr.msra.gmra.mxu0 %v11894_v27  ;;  %8019 = vmatpush1.bf16.msra.mxu1 %v9226_v61  ;;  %v7725_v62 = vadd.f32 %v7724_v28, %v7401_v21  ;;  %v4376_v61 = vld [vmem:[%s13389_s13 + $0x2e0] sm:$0xff]  ;;  %v9100_v21 = vcombine.low %v4393_v5, %v4409_v42  ;;  %v4329_v28 = vld [vmem:[%s13389_s13 + $0x168] sm:$0xff] }
 0x70b   : > { %8050 = vmatprep.mubr.bf16.mxu1 %v11892_v1  ;;  %8060 = vmatpush1.bf16.msra.mxu0 %v9228_v11  ;;  %v7726_v52 = vpop.f32.mrf.mxu1  ;;  %v7766_v6 = vadd.f32 %v7765_v22, %v7409_v38  ;;  %v9098_v11 = vcombine.low %v4392_v23, %v4408_v41  ;;  %v4345_v38 = vld [vmem:[%s13389_s13 + $0x1e8] sm:$0xff]  ;;  %v4296_v22 = vld [vmem:[%s13389_s13 + $0x60] sm:$0xff] }
 0x70c   : > { %8091 = vmatprep.mubr.bf16.mxu0 %v11892_v1  ;;  %v7727_v0 = vadd.f32 %v7726_v52, %v7405_v30  ;;  %v7767_v40 = vpop.f32.mrf.mxu0  ;;  %8020 = vmatprep.subr.bf16.mxu1 %v9195_v16  ;;  %v9067_v30 = vcombine.high %v4360_v39, %v4376_v61  ;;  %v9069_v16 = vcombine.high %v4361_v14, %v4377_v15  ;;  %v4297_v52 = vld [vmem:[%s13389_s13 + $0x68] sm:$0xff]  ;;  %v4728_v23 = vld [vmem:[%s13389_s13 + $0xde0] sm:$0xff] }
 0x70d   : > { %v7768_v7 = vadd.f32 %v7767_v40, %v7413_v29  ;;  %v7728_v18 = vpop.f32.mrf.mxu1  ;;  %8061 = vmatprep.subr.bf16.mxu0 %v9197_v19  ;;  %v9066_v29 = vcombine.low %v4360_v39, %v4376_v61  ;;  %v9068_v19 = vcombine.low %v4361_v14, %v4377_v15  ;;  %v9037_v31 = vcombine.high %v4329_v28, %v4345_v38  ;;  %v4713_v41 = vld [vmem:[%s13389_s13 + $0xd68] sm:$0xff]  ;;  %v4696_v39 = vld [vmem:[%s13389_s13 + $0xce0] sm:$0xff] }
 0x70e   : > { %v8263_v55 = vcombine.low %v7725_v62, %v7727_v0  ;;  %v7769_v43 = vpop.f32.mrf.mxu0  ;;  %8021 = vmatpush1.bf16.msra.mxu1 %v9194_v51  ;;  %v4312_v51 = vld [vmem:[%s13389_s13 + $0xe0] sm:$0xff]  ;;  %v9036_v62 = vcombine.low %v4329_v28, %v4345_v38  ;;  %v4729_v5 = vld [vmem:[%s13389_s13 + $0xde8] sm:$0xff] }
 0x70f   : > { %v8264_v46 = vcombine.low %v7766_v6, %v7768_v7  ;;  %8062 = vmatpush1.bf16.msra.mxu0 %v9196_v57  ;;  %v7729_v45 = vpop.f32.mrf.mxu1  ;;  %8022 = vmatprep.subr.bf16.mxu1 %v9163_v58  ;;  %v4313_v57 = vld [vmem:[%s13389_s13 + $0xe8] sm:$0xff]  ;;  %v9034_v58 = vcombine.low %v4328_v36, %v4344_v3  ;;  %v9003_v0 = vcombine.high %v4296_v22, %v4312_v51  ;;  %v4760_v43 = vld [vmem:[%s13389_s13 + $0xee0] sm:$0xff] }
 0x710   : > { %v12966_v20 = vrot.slane %v8263_v55, %v12513_v53  ;;  %v7770_v50 = vpop.f32.mrf.mxu0  ;;  %8063 = vmatprep.subr.bf16.mxu0 %v9165_v49  ;;  %v9005_v40 = vcombine.high %v4297_v52, %v4313_v57  ;;  %v4776_v49 = vld [vmem:[%s13389_s13 + $0xf60] sm:$0xff]  ;;  %v4793_v6 = vld [vmem:[%s13389_s13 + $0xfe8] sm:$0xff]  ;;  %v9002_v7 = vcombine.low %v4296_v22, %v4312_v51  ;;  %v9004_v18 = vcombine.low %v4297_v52, %v4313_v57 }
 0x711   : > { %v12975_v25 = vrot.slane %v8264_v46, %v12513_v53  ;;  %v9483_v8 = vcombine.high %v4776_v49, %v4792_v54  ;;  %v9485_v9 = vcombine.high %v4777_v4, %v4793_v6  ;;  %v4744_v55 = vld [vmem:[%s13389_s13 + $0xe60] sm:$0xff]  ;;  %v4761_v46 = vld [vmem:[%s13389_s13 + $0xee8] sm:$0xff]  ;;  %v9482_v45 = vcombine.low %v4776_v49, %v4792_v54 }
 0x712   : > { %8023 = vmatpush1.bf16.msra.mxu1 %v9162_v34  ;;  %v4745_v34 = vld [vmem:[%s13389_s13 + $0xe68] sm:$0xff]  ;;  %v9450_v42 = vcombine.low %v4744_v55, %v4760_v43  ;;  %v4664_v36 = vld [vmem:[%s13389_s13 + $0xbe0] sm:$0xff] }
 0x713   : > { %v8295_v32 = vcombine.low %v12966_v20, %v12975_v25  ;;  %8064 = vmatpush1.bf16.msra.mxu0 %v9164_v48  ;;  %8024 = vmatprep.subr.bf16.mxu1 %v9131_v10  ;;  %v9484_v48 = vcombine.low %v4777_v4, %v4793_v6  ;;  %v9451_v10 = vcombine.high %v4744_v55, %v4760_v43  ;;  %v4681_v61 = vld [vmem:[%s13389_s13 + $0xc68] sm:$0xff]  ;;  %v4632_v22 = vld [vmem:[%s13389_s13 + $0xae0] sm:$0xff]  ;;  %v4330_v25 = vld [vmem:[%s13389_s13 + $0x170] sm:$0xff] }
 0x714   : > { %8065 = vmatprep.subr.bf16.mxu0 %v9133_v47  ;;  %v9453_v50 = vcombine.high %v4745_v34, %v4761_v46  ;;  %v4712_v47 = vld [vmem:[%s13389_s13 + $0xd60] sm:$0xff]  ;;  %v4697_v14 = vld [vmem:[%s13389_s13 + $0xce8] sm:$0xff] }
 0x715   : > { %v9418_v15 = vcombine.low %v4712_v47, %v4728_v23  ;;  %v4649_v3 = vld [vmem:[%s13389_s13 + $0xb68] sm:$0xff]  ;;  %v4600_v49 = vld [vmem:[%s13389_s13 + $0x9e0] sm:$0xff] }
 0x716   : > { %8025 = vmatpush1.bf16.msra.mxu1 %v9130_v26  ;;  %v9452_v26 = vcombine.low %v4745_v34, %v4761_v46  ;;  %v4665_v28 = vld [vmem:[%s13389_s13 + $0xbe8] sm:$0xff]  ;;  %v4568_v55 = vld [vmem:[%s13389_s13 + $0x8e0] sm:$0xff] }
 0x717   : > { %8066 = vmatpush1.bf16.msra.mxu0 %v9132_v33  ;;  %8026 = vmatprep.subr.bf16.mxu1 %v9099_v37  ;;  %v9419_v33 = vcombine.high %v4712_v47, %v4728_v23  ;;  %v9421_v37 = vcombine.high %v4713_v41, %v4729_v5  ;;  %v4617_v51 = vld [vmem:[%s13389_s13 + $0xa68] sm:$0xff]  ;;  %v4538_v47 = vld [vmem:[%s13389_s13 + $0x7f0] sm:$0xff]  ;;  %v4523_v23 = vld [vmem:[%s13389_s13 + $0x778] sm:$0xff] }
 0x718   : > { %8067 = vmatprep.subr.bf16.mxu0 %v9101_v63  ;;  %v4680_v63 = vld [vmem:[%s13389_s13 + $0xc60] sm:$0xff]  ;;  %v4633_v52 = vld [vmem:[%s13389_s13 + $0xae8] sm:$0xff] }
 0x719   : > { %v9386_v38 = vcombine.low %v4680_v63, %v4696_v39  ;;  %v4585_v54 = vld [vmem:[%s13389_s13 + $0x968] sm:$0xff] }
 0x71a   : > { %8027 = vmatpush1.bf16.msra.mxu1 %v9098_v11  ;;  %v9420_v11 = vcombine.low %v4713_v41, %v4729_v5  ;;  %v4601_v4 = vld [vmem:[%s13389_s13 + $0x9e8] sm:$0xff]  ;;  %v4539_v41 = vld [vmem:[%s13389_s13 + $0x7f8] sm:$0xff] }
 0x71b   : > { %8068 = vmatpush1.bf16.msra.mxu0 %v9100_v21  ;;  %8028 = vmatprep.subr.bf16.mxu1 %v9067_v30  ;;  %v9387_v21 = vcombine.high %v4680_v63, %v4696_v39  ;;  %v9389_v30 = vcombine.high %v4681_v61, %v4697_v14  ;;  %v4553_v43 = vld [vmem:[%s13389_s13 + $0x868] sm:$0xff]  ;;  %v4506_v63 = vld [vmem:[%s13389_s13 + $0x6f0] sm:$0xff] }
 0x71c   : > { %8069 = vmatprep.subr.bf16.mxu0 %v9069_v16  ;;  %v4648_v16 = vld [vmem:[%s13389_s13 + $0xb60] sm:$0xff]  ;;  %v4569_v34 = vld [vmem:[%s13389_s13 + $0x8e8] sm:$0xff] }
 0x71d   : > { %v9354_v57 = vcombine.low %v4648_v16, %v4664_v36 }
 0x71e   : > { %8029 = vmatpush1.bf16.msra.mxu1 %v9066_v29  ;;  %v9388_v29 = vcombine.low %v4681_v61, %v4697_v14  ;;  %v4491_v61 = vld [vmem:[%s13389_s13 + $0x678] sm:$0xff] }
 0x71f   : > { %8070 = vmatpush1.bf16.msra.mxu0 %v9068_v19  ;;  %8030 = vmatprep.subr.bf16.mxu1 %v9035_v56  ;;  %v9355_v19 = vcombine.high %v4648_v16, %v4664_v36  ;;  %v9357_v56 = vcombine.high %v4649_v3, %v4665_v28  ;;  %v4507_v14 = vld [vmem:[%s13389_s13 + $0x6f8] sm:$0xff]  ;;  %v4458_v16 = vld [vmem:[%s13389_s13 + $0x570] sm:$0xff] }
 0x720   : > { %8071 = vmatprep.subr.bf16.mxu0 %v9037_v31  ;;  %v4616_v31 = vld [vmem:[%s13389_s13 + $0xa60] sm:$0xff]  ;;  %v4474_v36 = vld [vmem:[%s13389_s13 + $0x5f0] sm:$0xff] }
 0x721   : > { %v9322_v6 = vcombine.low %v4616_v31, %v4632_v22 }
 0x722   : > { %8031 = vmatpush1.bf16.msra.mxu1 %v9034_v58  ;;  %v9356_v58 = vcombine.low %v4649_v3, %v4665_v28  ;;  %v7425_v28 = vrot.slane %v12915_v2, %v10994_v35 }
 0x723   : > { %8072 = vmatpush1.bf16.msra.mxu0 %v9036_v62  ;;  %8032 = vmatprep.subr.bf16.mxu1 %v9003_v0  ;;  %v9323_v62 = vcombine.high %v4616_v31, %v4632_v22  ;;  %v9325_v0 = vcombine.high %v4617_v51, %v4633_v52 }
 0x724   : > { %8073 = vmatprep.subr.bf16.mxu0 %v9005_v40  ;;  %v4584_v40 = vld [vmem:[%s13389_s13 + $0x960] sm:$0xff] }
 0x725   : > { %v9290_v46 = vcombine.low %v4584_v40, %v4600_v49 }
 0x726   : > { %8033 = vmatpush1.bf16.msra.mxu1 %v9002_v7  ;;  %v9324_v7 = vcombine.low %v4617_v51, %v4633_v52  ;;  %v9200_v52 = vcombine.low %v4491_v61, %v4507_v14 }
 0x727   : > { %8074 = vmatpush1.bf16.msra.mxu0 %v9004_v18  ;;  %8034 = vmatprep.subr.bf16.mxu1 %v9483_v8  ;;  %v9291_v18 = vcombine.high %v4584_v40, %v4600_v49  ;;  %v9293_v8 = vcombine.high %v4585_v54, %v4601_v4  ;;  %v4426_v40 = vld [vmem:[%s13389_s13 + $0x470] sm:$0xff] }
 0x728   : > { %8075 = vmatprep.subr.bf16.mxu0 %v9485_v9  ;;  %v4552_v9 = vld [vmem:[%s13389_s13 + $0x860] sm:$0xff]  ;;  %v4442_v49 = vld [vmem:[%s13389_s13 + $0x4f0] sm:$0xff] }
 0x729   : > { %v9258_v5 = vcombine.low %v4552_v9, %v4568_v55 }
 0x72a   : > { %8035 = vmatpush2.bf16.msra.mxu1 %v9482_v45  ;;  %v9292_v45 = vcombine.low %v4585_v54, %v4601_v4 }
 0x72b   : > { %8076 = vmatpush2.bf16.msra.mxu0 %v9484_v48  ;;  %8036 = vmatprep.subr.bf16.mxu1 %v9451_v10  ;;  %v9259_v48 = vcombine.high %v4552_v9, %v4568_v55  ;;  %v9261_v10 = vcombine.high %v4553_v43, %v4569_v34  ;;  %v9166_v9 = vcombine.low %v4458_v16, %v4474_v36 }
 0x72c   : > { %8077 = vmatprep.subr.bf16.mxu0 %v9453_v50  ;;  %v4522_v50 = vld [vmem:[%s13389_s13 + $0x770] sm:$0xff] }
 0x72d   : > { %v9230_v39 = vcombine.low %v4522_v50, %v4538_v47 }
 0x72e   : > { %8037 = vmatpush2.bf16.msra.mxu1 %v9450_v42  ;;  %v9260_v42 = vcombine.low %v4553_v43, %v4569_v34 }
 0x72f   : > { %8078 = vmatpush2.bf16.msra.mxu0 %v9452_v26  ;;  %8038 = vmatprep.subr.bf16.mxu1 %v9419_v33  ;;  %v9231_v26 = vcombine.high %v4522_v50, %v4538_v47  ;;  %v9233_v33 = vcombine.high %v4523_v23, %v4539_v41  ;;  %v4394_v50 = vld [vmem:[%s13389_s13 + $0x370] sm:$0xff] }
 0x730   : > { %8079 = vmatprep.subr.bf16.mxu0 %v9421_v37  ;;  %v4490_v37 = vld [vmem:[%s13389_s13 + $0x670] sm:$0xff] }
 0x731   : > { %v9198_v22 = vcombine.low %v4490_v37, %v4506_v63  ;;  %v4410_v47 = vld [vmem:[%s13389_s13 + $0x3f0] sm:$0xff] }
 0x732   : > { %8039 = vmatpush2.bf16.msra.mxu1 %v9418_v15  ;;  %v9232_v15 = vcombine.low %v4523_v23, %v4539_v41  ;;  %v4395_v41 = vld [vmem:[%s13389_s13 + $0x378] sm:$0xff] }
 0x733   : > { %8080 = vmatpush2.bf16.msra.mxu0 %v9420_v11  ;;  %8040 = vmatprep.subr.bf16.mxu1 %v9387_v21  ;;  %v7417_v11 = vrot.slane %v12915_v2, %v10991_v17  ;;  %v7421_v21 = vrot.slane %v12915_v2, %v10874_v60 }
 0x734   : > { %8081 = vmatprep.subr.bf16.mxu0 %v9389_v30  ;;  %v9199_v30 = vcombine.high %v4490_v37, %v4506_v63  ;;  %v9103_v37 = vcombine.high %v4394_v50, %v4410_v47 }
 0x736   : > { %8041 = vmatpush2.bf16.msra.mxu1 %v9386_v38  ;;  %v7429_v38 = vrot.slane %v12915_v2, %v10878_v24  ;;  %v9167_v2 = vcombine.high %v4458_v16, %v4474_v36 }
 0x737   : > { %8082 = vmatpush2.bf16.msra.mxu0 %v9388_v29  ;;  %8042 = vmatprep.subr.bf16.mxu1 %v9355_v19  ;;  %v9201_v29 = vcombine.high %v4491_v61, %v4507_v14  ;;  %v4459_v19 = vld [vmem:[%s13389_s13 + $0x578] sm:$0xff]  ;;  %v4378_v61 = vld [vmem:[%s13389_s13 + $0x2f0] sm:$0xff]  ;;  %v8303_v14 = vrot.slane %v8295_v32, %v12513_v53 }
 0x738   : > { %8083 = vmatprep.subr.bf16.mxu0 %v9357_v56  ;;  %v4475_v56 = vld [vmem:[%s13389_s13 + $0x5f8] sm:$0xff]  ;;  %v4346_v32 = vld [vmem:[%s13389_s13 + $0x1f0] sm:$0xff] }
 0x739   : > { %v9168_v34 = vcombine.low %v4459_v19, %v4475_v56 }
 0x73a   : > { %8043 = vmatpush2.bf16.msra.mxu1 %v9354_v57 }
 0x73b   : > { %8084 = vmatpush2.bf16.msra.mxu0 %v9356_v58  ;;  %8044 = vmatprep.subr.bf16.mxu1 %v9323_v62 }
 0x73c   : > { %8085 = vmatprep.subr.bf16.mxu0 %v9325_v0  ;;  %v9169_v0 = vcombine.high %v4459_v19, %v4475_v56  ;;  %v9039_v56 = vcombine.high %v4330_v25, %v4346_v32 }
 0x73e   : > { %8045 = vmatpush2.bf16.msra.mxu1 %v9322_v6 }
 0x73f   : > { %8086 = vmatpush2.bf16.msra.mxu0 %v9324_v7  ;;  %8046 = vmatprep.subr.bf16.mxu1 %v9291_v18  ;;  %v4443_v7 = vld [vmem:[%s13389_s13 + $0x4f8] sm:$0xff] }
 0x740   : > { %8087 = vmatprep.subr.bf16.mxu0 %v9293_v8 }
 0x742   : > { %8047 = vmatpush2.bf16.msra.mxu1 %v9290_v46  ;;  %v9135_v46 = vcombine.high %v4426_v40, %v4442_v49 }
 0x743   : > { %8088 = vmatpush2.bf16.msra.mxu0 %v9292_v45  ;;  %8048 = vmatprep.subr.bf16.mxu1 %v9259_v48 }
 0x744   : > { %8089 = vmatprep.subr.bf16.mxu0 %v9261_v10 }
 0x746   : > { %8049 = vmatpush2.bf16.msra.mxu1 %v9258_v5  ;;  %v4411_v5 = vld [vmem:[%s13389_s13 + $0x3f8] sm:$0xff] }
 0x747   : > { %8090 = vmatpush2.bf16.msra.mxu0 %v9260_v42  ;;  %8100 = vmatprep.subr.bf16.mxu1 %v9231_v26  ;;  %v9134_v42 = vcombine.low %v4426_v40, %v4442_v49  ;;  %v9105_v63 = vcombine.high %v4395_v41, %v4411_v5  ;;  %v9104_v36 = vcombine.low %v4395_v41, %v4411_v5  ;;  %v4778_v40 = vld [vmem:[%s13389_s13 + $0xf70] sm:$0xff] }
 0x748   : > { %8141 = vmatprep.subr.bf16.mxu0 %v9233_v33  ;;  %v4794_v49 = vld [vmem:[%s13389_s13 + $0xff0] sm:$0xff] }
 0x749   : > { %v7806_v3 = vpop.f32.mrf.mxu1  ;;  %8051 = vmatmul.mubr.bf16.vlgmr.msra.gmra.mxu1 %v11894_v27 }
 0x74a   : > { %v7847_v31 = vpop.f32.mrf.mxu0  ;;  %8092 = vmatmul.mubr.bf16.vlgmr.msra.gmra.mxu0 %v11894_v27  ;;  %8101 = vmatpush1.bf16.msra.mxu1 %v9230_v39  ;;  %v7807_v57 = vadd.f32 %v7806_v3, %v7417_v11  ;;  %v4362_v39 = vld [vmem:[%s13389_s13 + $0x270] sm:$0xff]  ;;  %v4363_v11 = vld [vmem:[%s13389_s13 + $0x278] sm:$0xff] }
 0x74b   : > { %8132 = vmatprep.mubr.bf16.mxu1 %v11892_v1  ;;  %8142 = vmatpush1.bf16.msra.mxu0 %v9232_v15  ;;  %v7808_v51 = vpop.f32.mrf.mxu1  ;;  %v7848_v54 = vadd.f32 %v7847_v31, %v7425_v28  ;;  %v9071_v3 = vcombine.high %v4362_v39, %v4378_v61  ;;  %v4331_v28 = vld [vmem:[%s13389_s13 + $0x178] sm:$0xff] }
 0x74c   : > { %8173 = vmatprep.mubr.bf16.mxu0 %v11892_v1  ;;  %v7809_v58 = vadd.f32 %v7808_v51, %v7421_v21  ;;  %v7849_v62 = vpop.f32.mrf.mxu0  ;;  %8102 = vmatprep.subr.bf16.mxu1 %v9199_v30  ;;  %v4427_v1 = vld [vmem:[%s13389_s13 + $0x478] sm:$0xff]  ;;  %v9102_v30 = vcombine.low %v4394_v50, %v4410_v47  ;;  %v4314_v51 = vld [vmem:[%s13389_s13 + $0xf0] sm:$0xff] }
 0x74d   : > { %v7850_v4 = vadd.f32 %v7849_v62, %v7429_v38  ;;  %v7810_v6 = vpop.f32.mrf.mxu1  ;;  %8143 = vmatprep.subr.bf16.mxu0 %v9201_v29  ;;  %v9137_v10 = vcombine.high %v4427_v1, %v4443_v7  ;;  %v9136_v33 = vcombine.low %v4427_v1, %v4443_v7  ;;  %v4379_v21 = vld [vmem:[%s13389_s13 + $0x2f8] sm:$0xff]  ;;  %v9070_v29 = vcombine.low %v4362_v39, %v4378_v61  ;;  %v4730_v50 = vld [vmem:[%s13389_s13 + $0xdf0] sm:$0xff] }
 0x74e   : > { %v8265_v18 = vcombine.low %v7807_v57, %v7809_v58  ;;  %v7851_v8 = vpop.f32.mrf.mxu0  ;;  %8103 = vmatpush1.bf16.msra.mxu1 %v9198_v22  ;;  %v9073_v20 = vcombine.high %v4363_v11, %v4379_v21  ;;  %v4347_v38 = vld [vmem:[%s13389_s13 + $0x1f8] sm:$0xff]  ;;  %v9072_v19 = vcombine.low %v4363_v11, %v4379_v21  ;;  %v4298_v22 = vld [vmem:[%s13389_s13 + $0x70] sm:$0xff]  ;;  %v9038_v57 = vcombine.low %v4330_v25, %v4346_v32 }
 0x74f   : > { %v8266_v55 = vcombine.low %v7848_v54, %v7850_v4  ;;  %8144 = vmatpush1.bf16.msra.mxu0 %v9200_v52  ;;  %v7811_v43 = vpop.f32.mrf.mxu1  ;;  %8104 = vmatprep.subr.bf16.mxu1 %v9167_v2  ;;  %v9041_v31 = vcombine.high %v4331_v28, %v4347_v38  ;;  %v4299_v52 = vld [vmem:[%s13389_s13 + $0x78] sm:$0xff]  ;;  %v9040_v58 = vcombine.low %v4331_v28, %v4347_v38  ;;  %v4746_v8 = vld [vmem:[%s13389_s13 + $0xe70] sm:$0xff] }
 0x750   : > { %v8287_v45 = vrot.slane %v8265_v18, %v12513_v53  ;;  %v7852_v48 = vpop.f32.mrf.mxu0  ;;  %8145 = vmatprep.subr.bf16.mxu0 %v9169_v0  ;;  %v4315_v2 = vld [vmem:[%s13389_s13 + $0xf8] sm:$0xff]  ;;  %v9007_v62 = vcombine.high %v4298_v22, %v4314_v51  ;;  %v9006_v6 = vcombine.low %v4298_v22, %v4314_v51  ;;  %v9487_v7 = vcombine.high %v4778_v40, %v4794_v49  ;;  %v4650_v21 = vld [vmem:[%s13389_s13 + $0xb70] sm:$0xff] }
 0x751   : > { %v8294_v23 = vrot.slane %v8266_v55, %v12513_v53  ;;  %v9009_v0 = vcombine.high %v4299_v52, %v4315_v2  ;;  %v4779_v54 = vld [vmem:[%s13389_s13 + $0xf78] sm:$0xff]  ;;  %v9008_v1 = vcombine.low %v4299_v52, %v4315_v2  ;;  %v4618_v28 = vld [vmem:[%s13389_s13 + $0xa70] sm:$0xff] }
 0x752   : > { %8105 = vmatpush1.bf16.msra.mxu1 %v9166_v9  ;;  %v4795_v4 = vld [vmem:[%s13389_s13 + $0xff8] sm:$0xff]  ;;  %v4762_v9 = vld [vmem:[%s13389_s13 + $0xef0] sm:$0xff] }
 0x753   : > { %v8296_v26 = vcombine.low %v8287_v45, %v8294_v23  ;;  %8146 = vmatpush1.bf16.msra.mxu0 %v9168_v34  ;;  %8106 = vmatprep.subr.bf16.mxu1 %v9135_v46  ;;  %v9489_v18 = vcombine.high %v4779_v54, %v4795_v4  ;;  %v4747_v55 = vld [vmem:[%s13389_s13 + $0xe78] sm:$0xff]  ;;  %v9486_v34 = vcombine.low %v4778_v40, %v4794_v49  ;;  %v4634_v38 = vld [vmem:[%s13389_s13 + $0xaf0] sm:$0xff] }
 0x754   : > { %8147 = vmatprep.subr.bf16.mxu0 %v9137_v10  ;;  %v4763_v43 = vld [vmem:[%s13389_s13 + $0xef8] sm:$0xff]  ;;  %v9488_v46 = vcombine.low %v4779_v54, %v4795_v4  ;;  %v9455_v45 = vcombine.high %v4746_v8, %v4762_v9  ;;  %v4714_v10 = vld [vmem:[%s13389_s13 + $0xd70] sm:$0xff]  ;;  %v9454_v41 = vcombine.low %v4746_v8, %v4762_v9  ;;  %v9327_v22 = vcombine.high %v4618_v28, %v4634_v38 }
 0x755   : > { %v8310_v15 = vrot.slane %v8296_v26, %v12513_v53  ;;  %v9457_v48 = vcombine.high %v4747_v55, %v4763_v43  ;;  %v4715_v47 = vld [vmem:[%s13389_s13 + $0xd78] sm:$0xff]  ;;  %v9456_v5 = vcombine.low %v4747_v55, %v4763_v43  ;;  %v9422_v61 = vcombine.low %v4714_v10, %v4730_v50  ;;  %v4586_v52 = vld [vmem:[%s13389_s13 + $0x970] sm:$0xff] }
 0x756   : > { %8107 = vmatpush1.bf16.msra.mxu1 %v9134_v42  ;;  %v4731_v23 = vld [vmem:[%s13389_s13 + $0xdf8] sm:$0xff]  ;;  %v9423_v42 = vcombine.high %v4714_v10, %v4730_v50  ;;  %v4602_v2 = vld [vmem:[%s13389_s13 + $0x9f0] sm:$0xff] }
 0x757   : > { %v8311_v16 = vcombine.low %v8303_v14, %v8310_v15  ;;  %8148 = vmatpush1.bf16.msra.mxu0 %v9136_v33  ;;  %8108 = vmatprep.subr.bf16.mxu1 %v9103_v37  ;;  %v9425_v26 = vcombine.high %v4715_v47, %v4731_v23  ;;  %v4682_v33 = vld [vmem:[%s13389_s13 + $0xc70] sm:$0xff]  ;;  %v4699_v39 = vld [vmem:[%s13389_s13 + $0xcf8] sm:$0xff]  ;;  %v9424_v14 = vcombine.low %v4715_v47, %v4731_v23 }
 0x758   : > { %8149 = vmatprep.subr.bf16.mxu0 %v9105_v63  ;;  %v4698_v37 = vld [vmem:[%s13389_s13 + $0xcf0] sm:$0xff]  ;;  %v4683_v63 = vld [vmem:[%s13389_s13 + $0xc78] sm:$0xff]  ;;  %v9295_v40 = vcombine.high %v4586_v52, %v4602_v2 }
 0x759   : > { %8415 = vst [vmem:[%s12771_s21 + $0x8] sm:$0xff] %v8311_v16  ;;  %v9391_v15 = vcombine.high %v4682_v33, %v4698_v37  ;;  %v9393_v11 = vcombine.high %v4683_v63, %v4699_v39  ;;  %v4651_v16 = vld [vmem:[%s13389_s13 + $0xb78] sm:$0xff]  ;;  %v4554_v54 = vld [vmem:[%s13389_s13 + $0x870] sm:$0xff] }
 0x75a   : > { %8109 = vmatpush1.bf16.msra.mxu1 %v9102_v30  ;;  %v4666_v30 = vld [vmem:[%s13389_s13 + $0xbf0] sm:$0xff] }
 0x75b   : > { %8150 = vmatpush1.bf16.msra.mxu0 %v9104_v36  ;;  %8110 = vmatprep.subr.bf16.mxu1 %v9071_v3  ;;  %v4667_v36 = vld [vmem:[%s13389_s13 + $0xbf8] sm:$0xff]  ;;  %v9390_v3 = vcombine.low %v4682_v33, %v4698_v37  ;;  %v9359_v25 = vcombine.high %v4650_v21, %v4666_v30  ;;  %v4570_v4 = vld [vmem:[%s13389_s13 + $0x8f0] sm:$0xff] }
 0x75c   : > { %8151 = vmatprep.subr.bf16.mxu0 %v9073_v20  ;;  %v9392_v20 = vcombine.low %v4683_v63, %v4699_v39  ;;  %v9361_v32 = vcombine.high %v4651_v16, %v4667_v36  ;;  %v9263_v8 = vcombine.high %v4554_v54, %v4570_v4  ;;  %v9262_v55 = vcombine.low %v4554_v54, %v4570_v4  ;;  %v4799_v4 = vld [vmem:[%s13390_s14 + $0x18] sm:$0xff] }
 0x75e   : > { %8111 = vmatpush1.bf16.msra.mxu1 %v9070_v29  ;;  %v4619_v29 = vld [vmem:[%s13389_s13 + $0xa78] sm:$0xff] }
 0x75f   : > { %8152 = vmatpush1.bf16.msra.mxu0 %v9072_v19  ;;  %8112 = vmatprep.subr.bf16.mxu1 %v9039_v56  ;;  %v4635_v19 = vld [vmem:[%s13389_s13 + $0xaf8] sm:$0xff]  ;;  %v9358_v56 = vcombine.low %v4650_v21, %v4666_v30 }
 0x760   : > { %8153 = vmatprep.subr.bf16.mxu0 %v9041_v31  ;;  %v9360_v31 = vcombine.low %v4651_v16, %v4667_v36  ;;  %v9329_v51 = vcombine.high %v4619_v29, %v4635_v19 }
 0x762   : > { %8113 = vmatpush1.bf16.msra.mxu1 %v9038_v57  ;;  %v4587_v57 = vld [vmem:[%s13389_s13 + $0x978] sm:$0xff] }
 0x763   : > { %8154 = vmatpush1.bf16.msra.mxu0 %v9040_v58  ;;  %8114 = vmatprep.subr.bf16.mxu1 %v9007_v62  ;;  %v4603_v58 = vld [vmem:[%s13389_s13 + $0x9f8] sm:$0xff]  ;;  %v9326_v62 = vcombine.low %v4618_v28, %v4634_v38 }
 0x764   : > { %8155 = vmatprep.subr.bf16.mxu0 %v9009_v0  ;;  %v9328_v0 = vcombine.low %v4619_v29, %v4635_v19  ;;  %v9297_v49 = vcombine.high %v4587_v57, %v4603_v58 }
 0x766   : > { %8115 = vmatpush1.bf16.msra.mxu1 %v9006_v6  ;;  %v4555_v6 = vld [vmem:[%s13389_s13 + $0x878] sm:$0xff] }
 0x767   : > { %8156 = vmatpush1.bf16.msra.mxu0 %v9008_v1  ;;  %8116 = vmatprep.subr.bf16.mxu1 %v9487_v7  ;;  %v4571_v1 = vld [vmem:[%s13389_s13 + $0x8f8] sm:$0xff]  ;;  %v9294_v7 = vcombine.low %v4586_v52, %v4602_v2 }
 0x768   : > { %8157 = vmatprep.subr.bf16.mxu0 %v9489_v18  ;;  %v9296_v18 = vcombine.low %v4587_v57, %v4603_v58  ;;  %v9265_v9 = vcombine.high %v4555_v6, %v4571_v1  ;;  %v9264_v43 = vcombine.low %v4555_v6, %v4571_v1  ;;  %v7465_v6 = vrot.slane %v4799_v4, %v10738_v44 }
 0x769   : > { %v7469_v1 = vrot.slane %v4799_v4, %v10761_v12 }
 0x76a   : > { %8117 = vmatpush2.bf16.msra.mxu1 %v9486_v34  ;;  %v4798_v34 = vld [vmem:[%s13390_s14 + $0x10] sm:$0xff] }
 0x76b   : > { %8158 = vmatpush2.bf16.msra.mxu0 %v9488_v46  ;;  %8118 = vmatprep.subr.bf16.mxu1 %v9455_v45  ;;  %v7433_v46 = vrot.slane %v4798_v34, %v10738_v44  ;;  %v7437_v45 = vrot.slane %v4798_v34, %v10761_v12  ;;  %v7441_v10 = vrot.slane %v4798_v34, %v10741_v59 }
 0x76c   : > { %8159 = vmatprep.subr.bf16.mxu0 %v9457_v48  ;;  %v7445_v50 = vrot.slane %v4798_v34, %v10764_v13  ;;  %v7449_v16 = vrot.slane %v4798_v34, %v10991_v17 }
 0x76e   : > { %8119 = vmatpush2.bf16.msra.mxu1 %v9454_v41 }
 0x76f   : > { %8160 = vmatpush2.bf16.msra.mxu0 %v9456_v5  ;;  %8120 = vmatprep.subr.bf16.mxu1 %v9423_v42 }
 0x770   : > { %8161 = vmatprep.subr.bf16.mxu0 %v9425_v26 }
 0x772   : > { %8121 = vmatpush2.bf16.msra.mxu1 %v9422_v61 }
 0x773   : > { %8162 = vmatpush2.bf16.msra.mxu0 %v9424_v14  ;;  %8122 = vmatprep.subr.bf16.mxu1 %v9391_v15 }
 0x774   : > { %8163 = vmatprep.subr.bf16.mxu0 %v9393_v11 }
 0x776   : > { %8123 = vmatpush2.bf16.msra.mxu1 %v9390_v3  ;;  %v7457_v3 = vrot.slane %v4798_v34, %v10994_v35 }
 0x777   : > { %8164 = vmatpush2.bf16.msra.mxu0 %v9392_v20  ;;  %8124 = vmatprep.subr.bf16.mxu1 %v9359_v25  ;;  %v7461_v20 = vrot.slane %v4798_v34, %v10878_v24 }
 0x778   : > { %8165 = vmatprep.subr.bf16.mxu0 %v9361_v32 }
 0x77a   : > { %8125 = vmatpush2.bf16.msra.mxu1 %v9358_v56 }
 0x77b   : > { %8166 = vmatpush2.bf16.msra.mxu0 %v9360_v31  ;;  %8126 = vmatprep.subr.bf16.mxu1 %v9327_v22 }
 0x77c   : > { %8167 = vmatprep.subr.bf16.mxu0 %v9329_v51 }
 0x77e   : > { %8127 = vmatpush2.bf16.msra.mxu1 %v9326_v62 }
 0x77f   : > { %8168 = vmatpush2.bf16.msra.mxu0 %v9328_v0  ;;  %8128 = vmatprep.subr.bf16.mxu1 %v9295_v40 }
 0x780   : > { %8169 = vmatprep.subr.bf16.mxu0 %v9297_v49 }
 0x782   : > { %8129 = vmatpush2.bf16.msra.mxu1 %v9294_v7 }
 0x783   : > { %8170 = vmatpush2.bf16.msra.mxu0 %v9296_v18  ;;  %8130 = vmatprep.subr.bf16.mxu1 %v9263_v8  ;;  %v7473_v18 = vrot.slane %v4799_v4, %v10741_v59  ;;  %v7477_v8 = vrot.slane %v4799_v4, %v10764_v13  ;;  %v7481_v13 = vrot.slane %v4799_v4, %v10991_v17 }
 0x784   : > { %8171 = vmatprep.subr.bf16.mxu0 %v9265_v9 }
 0x786   : > { %8131 = vmatpush2.bf16.msra.mxu1 %v9262_v55 }
 0x787   : > { %8172 = vmatpush2.bf16.msra.mxu0 %v9264_v43 }
 0x789   : > { %v7888_v48 = vpop.f32.mrf.mxu1  ;;  %8133 = vmatmul.mubr.bf16.vlgmr.msra.gmra.mxu1 %v11894_v27 }
 0x78a   : > { %v7929_v47 = vpop.f32.mrf.mxu0  ;;  %8174 = vmatmul.mubr.bf16.vlgmr.msra.gmra.mxu0 %v11894_v27  ;;  %v7889_v41 = vadd.f32 %v7888_v48, %v7433_v46  ;;  %v7453_v27 = vrot.slane %v4798_v34, %v10874_v60 }
 0x78b   : > { %v7890_v23 = vpop.f32.mrf.mxu1  ;;  %v7930_v26 = vadd.f32 %v7929_v47, %v7441_v10 }
 0x78c   : > { %v7891_v5 = vadd.f32 %v7890_v23, %v7437_v45  ;;  %v7931_v42 = vpop.f32.mrf.mxu0 }
 0x78d   : > { %v7932_v33 = vadd.f32 %v7931_v42, %v7445_v50  ;;  %v7892_v37 = vpop.f32.mrf.mxu1  ;;  %v7485_v42 = vrot.slane %v4799_v4, %v10874_v60 }
 0x78e   : > { %v8312_v63 = vcombine.low %v7889_v41, %v7891_v5  ;;  %v7933_v39 = vpop.f32.mrf.mxu0  ;;  %v7493_v37 = vrot.slane %v4799_v4, %v10878_v24 }
 0x78f   : > { %v8313_v61 = vcombine.low %v7930_v26, %v7932_v33  ;;  %v7893_v14 = vpop.f32.mrf.mxu1  ;;  %v7489_v33 = vrot.slane %v4799_v4, %v10994_v35 }
 0x790   : > { %v8322_v15 = vrot.slane %v8312_v63, %v12513_v53  ;;  %v7934_v11 = vpop.f32.mrf.mxu0 }
 0x791   : > { %v8329_v21 = vrot.slane %v8313_v61, %v12513_v53 }
 0x793   : > { %v8344_v30 = vcombine.low %v8322_v15, %v8329_v21 }
 0x795   : > { %v8352_v40 = vrot.slane %v8344_v30, %v12513_v53 }
 0x7c9   : > { %v7970_v36 = vpop.f32.mrf.mxu1 }
 0x7ca   : > { %v8011_v25 = vpop.f32.mrf.mxu0  ;;  %v7971_v28 = vadd.f32 %v7970_v36, %v7449_v16 }
 0x7cb   : > { %v7972_v32 = vpop.f32.mrf.mxu1  ;;  %v8012_v19 = vadd.f32 %v8011_v25, %v7457_v3 }
 0x7cc   : > { %v7973_v38 = vadd.f32 %v7972_v32, %v7453_v27  ;;  %v8013_v29 = vpop.f32.mrf.mxu0 }
 0x7cd   : > { %v8014_v56 = vadd.f32 %v8013_v29, %v7461_v20  ;;  %v7974_v31 = vpop.f32.mrf.mxu1 }
 0x7ce   : > { %v8314_v22 = vcombine.low %v7971_v28, %v7973_v38  ;;  %v8015_v51 = vpop.f32.mrf.mxu0 }
 0x7cf   : > { %v8315_v52 = vcombine.low %v8012_v19, %v8014_v56  ;;  %v7975_v2 = vpop.f32.mrf.mxu1 }
 0x7d0   : > { %v8336_v57 = vrot.slane %v8314_v22, %v12513_v53  ;;  %v8016_v58 = vpop.f32.mrf.mxu0 }
 0x7d1   : > { %v8343_v62 = vrot.slane %v8315_v52, %v12513_v53 }
 0x7d3   : > { %v8345_v0 = vcombine.low %v8336_v57, %v8343_v62 }
 0x7d5   : > { %v8359_v49 = vrot.slane %v8345_v0, %v12513_v53 }
 0x7d7   : > { %v8360_v54 = vcombine.low %v8352_v40, %v8359_v49 }
 0x7d9   : > { %8416 = vst [vmem:[%s12771_s21 + $0x10] sm:$0xff] %v8360_v54 }
 0x809   : > { %v8052_v7 = vpop.f32.mrf.mxu1 }
 0x80a   : > { %v8093_v9 = vpop.f32.mrf.mxu0  ;;  %v8053_v43 = vadd.f32 %v8052_v7, %v7465_v6 }
 0x80b   : > { %v8054_v55 = vpop.f32.mrf.mxu1  ;;  %v8094_v45 = vadd.f32 %v8093_v9, %v7473_v18 }
 0x80c   : > { %v8055_v34 = vadd.f32 %v8054_v55, %v7469_v1  ;;  %v8095_v46 = vpop.f32.mrf.mxu0 }
 0x80d   : > { %v8096_v48 = vadd.f32 %v8095_v46, %v7477_v8  ;;  %v8056_v10 = vpop.f32.mrf.mxu1 }
 0x80e   : > { %v8361_v50 = vcombine.low %v8053_v43, %v8055_v34  ;;  %v8097_v47 = vpop.f32.mrf.mxu0 }
 0x80f   : > { %v8362_v23 = vcombine.low %v8094_v45, %v8096_v48  ;;  %v8057_v41 = vpop.f32.mrf.mxu1 }
 0x810   : > { %v8371_v44 = vrot.slane %v8361_v50, %v12513_v53  ;;  %v8098_v12 = vpop.f32.mrf.mxu0 }
 0x811   : > { %v8378_v5 = vrot.slane %v8362_v23, %v12513_v53 }
 0x813   : > { %v8393_v59 = vcombine.low %v8371_v44, %v8378_v5 }
 0x815   : > { %v8401_v24 = vrot.slane %v8393_v59, %v12513_v53 }
 0x849   : > { %v8134_v26 = vpop.f32.mrf.mxu1 }
 0x84a   : > { %v8175_v63 = vpop.f32.mrf.mxu0  ;;  %v8135_v61 = vadd.f32 %v8134_v26, %v7481_v13 }
 0x84b   : > { %v8136_v39 = vpop.f32.mrf.mxu1  ;;  %v8176_v11 = vadd.f32 %v8175_v63, %v7489_v33 }
 0x84c   : > { %v8137_v14 = vadd.f32 %v8136_v39, %v7485_v42  ;;  %v8177_v15 = vpop.f32.mrf.mxu0 }
 0x84d   : > { %v8178_v21 = vadd.f32 %v8177_v15, %v7493_v37  ;;  %v8138_v30 = vpop.f32.mrf.mxu1 }
 0x84e   : > { %v8363_v16 = vcombine.low %v8135_v61, %v8137_v14  ;;  %v8179_v27 = vpop.f32.mrf.mxu0 }
 0x84f   : > { %v8364_v36 = vcombine.low %v8176_v11, %v8178_v21  ;;  %v8139_v17 = vpop.f32.mrf.mxu1 }
 0x850   : > { %v8385_v60 = vrot.slane %v8363_v16, %v12513_v53  ;;  %v8180_v3 = vpop.f32.mrf.mxu0 }
 0x851   : > { %v8392_v35 = vrot.slane %v8364_v36, %v12513_v53 }
 0x853   : > { %v8394_v20 = vcombine.low %v8385_v60, %v8392_v35 }
 0x855   : > { %v8408_v25 = vrot.slane %v8394_v20, %v12513_v53 }
 0x857   : > { %v8409_v32 = vcombine.low %v8401_v24, %v8408_v25 }
 0x859   : > { %8417 = vst [vmem:[%s12771_s21 + $0x18] sm:$0xff] %v8409_v32 }
 0x85a PF: > { %s27_s23 = sadd.s32 1, %s10106_s23   ;;  %s13395_s21 = smov %s10102_s22 }
 0x85b   : > { %p24_p5 = scmp.ge.s32.totalorder %s27_s23, 4   ;;  %s13396_s22 = smov %s13398_s24 }
 0x85d   :  { %26 = sbr.rel (!%p24_p5) target bundleno = 2 (0x2), region = 133 }

</bundles_post_ra>
